<compile_context>
chip_gen: v7x
topology: tpu7x:2x2x1
jax: 0.10.0
libtpu: 0.0.40
codegen_flags: <defaults>
</compile_context>

<pallas_src>
import functools
import math

import jax
import jax.numpy as jnp
from jax.experimental import pallas as pl
from jax.experimental.pallas import tpu as pltpu


def _round_up(x, m):
    return ((x + m - 1) // m) * m


# ---------- fused conv-as-matmul + InstanceNorm (+ residual add) (+ ReLU) ----------

def _conv_in_kernel(a_ref, b_ref, o_ref, *, eps, relu):
    # a_ref: (1, HW, Kp) bf16   b_ref: (Kp, TN) bf16   o_ref: (1, HW, TN) bf16
    acc = jnp.dot(a_ref[0], b_ref[...], preferred_element_type=jnp.float32)
    mean = jnp.mean(acc, axis=0, keepdims=True)                 # per-channel stats
    var = jnp.maximum(jnp.mean(acc * acc, axis=0, keepdims=True) - mean * mean, 0.0)
    y = (acc - mean) * jax.lax.rsqrt(var + eps)
    if relu:
        y = jnp.maximum(y, 0.0)
    o_ref[...] = y[None, :, :].astype(o_ref.dtype)


def _conv_in_add_kernel(a_ref, b_ref, id_ref, o_ref, *, eps):
    # BasicBlock tail: bn2(conv2) + identity + ReLU, identity already normalized.
    acc = jnp.dot(a_ref[0], b_ref[...], preferred_element_type=jnp.float32)
    mean = jnp.mean(acc, axis=0, keepdims=True)
    var = jnp.maximum(jnp.mean(acc * acc, axis=0, keepdims=True) - mean * mean, 0.0)
    y = (acc - mean) * jax.lax.rsqrt(var + eps)
    y = jnp.maximum(y + id_ref[0].astype(jnp.float32), 0.0)
    o_ref[...] = y[None, :, :].astype(o_ref.dtype)


def conv_norm_matmul(a, wp, identity=None, *, relu=True, eps=1e-5,
                     out_dtype=jnp.bfloat16):
    """Fused (per-sample im2col) @ weights -> InstanceNorm [-> +identity] [-> ReLU].

    a:        (N, HW, Kp) bf16, Kp a multiple of 128 (zero-padded K columns).
    wp:       (Kp, Np) bf16, Np a multiple of 128 (zero-padded output channels).
    identity: optional (N, HW, Np) residual in the same "matmul layout"
              (padded channel columns are zero); added after the norm, then ReLU.
    Returns (N, HW, Np) out_dtype; padded channel columns stay exactly zero.
    """
    N, HW, Kp = a.shape
    Kp2, Np = wp.shape
    assert Kp == Kp2 and Kp % 128 == 0 and Np % 128 == 0
    TN = 128
    grid = (N, Np // TN)

    in_specs = [pl.BlockSpec((1, HW, Kp), lambda n, j: (n, 0, 0)),
                pl.BlockSpec((Kp, TN), lambda n, j: (0, j))]
    args = [a, wp]
    if identity is None:
        kernel = functools.partial(_conv_in_kernel, eps=eps, relu=relu)
    else:
        assert identity.shape == (N, HW, Np)
        in_specs.append(pl.BlockSpec((1, HW, TN), lambda n, j: (n, 0, j)))
        args.append(identity)
        kernel = functools.partial(_conv_in_add_kernel, eps=eps)

    return pl.pallas_call(
        kernel,
        out_shape=jax.ShapeDtypeStruct((N, HW, Np), out_dtype),
        grid=grid,
        in_specs=in_specs,
        out_specs=pl.BlockSpec((1, HW, TN), lambda n, j: (n, 0, j)),
        compiler_params=pltpu.CompilerParams(
            dimension_semantics=("parallel", "parallel")),
    )(*args)


def conv2d_in_fused(x_nhwc, wp, *, kh, kw, stride, padding, cout,
                    identity=None, relu=True):
    """bias-free Conv2d + InstanceNorm [+identity] [+ReLU].

    x_nhwc: (N, H, W, Cin) bf16.  wp: (Kp, Np) bf16 pre-packed (see _prep_conv).
    Returns (mat, nhwc): the (N, Ho*Wo, Np) fused output in matmul layout
    (padded channels zero) and its (N, Ho, Wo, cout) NHWC view.
    """
    N, H, W, Cin = x_nhwc.shape
    Ho = (H + 2 * padding - kh) // stride + 1
    Wo = (W + 2 * padding - kw) // stride + 1
    Kp = wp.shape[0]
    xb = x_nhwc
    if padding:
        xb = jnp.pad(xb, ((0, 0), (padding, padding), (padding, padding), (0, 0)))
    # TODO(synk): build these patches inside the matmul kernel (shifted-window
    # accumulation) instead of materializing the im2col matrix in XLA.
    cols = [xb[:, ki:ki + stride * (Ho - 1) + 1:stride,
                  kj:kj + stride * (Wo - 1) + 1:stride, :]
            for ki in range(kh) for kj in range(kw)]
    a = jnp.concatenate(cols, axis=-1).reshape(N, Ho * Wo, kh * kw * Cin)
    if Kp > kh * kw * Cin:                       # zero K-padding (aligned (8,128) tiles)
        a = jnp.pad(a, ((0, 0), (0, 0), (0, Kp - kh * kw * Cin)))
    mat = conv_norm_matmul(a, wp, identity, relu=relu)
    nhwc = mat[:, :, :cout].reshape(N, Ho, Wo, cout)
    return mat, nhwc


# ---------------- max pool 3x3 stride 2 pad 1 ----------------

def _maxpool_kernel(p00_ref, p01_ref, p10_ref, p11_ref, o_ref):
    ho, wo = o_ref.shape[1], o_ref.shape[2]
    p00 = p00_ref[...]
    p01 = p01_ref[...]
    p10 = p10_ref[...]
    p11 = p11_ref[...]
    m = p00[:, :ho, :wo, :]
    m = jnp.maximum(m, p00[:, :ho, 1:wo + 1, :])
    m = jnp.maximum(m, p00[:, 1:ho + 1, :wo, :])
    m = jnp.maximum(m, p00[:, 1:ho + 1, 1:wo + 1, :])
    m = jnp.maximum(m, p01[:, :ho, :wo, :])
    m = jnp.maximum(m, p01[:, 1:ho + 1, :wo, :])
    m = jnp.maximum(m, p10[:, :ho, :wo, :])
    m = jnp.maximum(m, p10[:, :ho, 1:wo + 1, :])
    m = jnp.maximum(m, p11[:, :ho, :wo, :])
    o_ref[...] = m.astype(o_ref.dtype)


def max_pool_3x3_s2_p1(x, out_dtype=jnp.bfloat16):
    """nn.MaxPool2d(kernel_size=3, stride=2, padding=1), NHWC input (even H, W).
    TODO(synk): roll-based in-kernel taps on a lane-dense layout (tiny tensor here)."""
    N, H, W, C = x.shape
    assert H % 2 == 0 and W % 2 == 0
    Ho, Wo = H // 2, W // 2
    xp = jnp.pad(x.astype(jnp.float32), ((0, 0), (1, 1), (1, 1), (0, 0)),
                 constant_values=-jnp.inf)
    p00 = xp[:, 0::2, 0::2, :]
    p01 = xp[:, 0::2, 1::2, :]
    p10 = xp[:, 1::2, 0::2, :]
    p11 = xp[:, 1::2, 1::2, :]
    in_spec = pl.BlockSpec((1, Ho + 1, Wo + 1, C), lambda i: (i, 0, 0, 0))
    return pl.pallas_call(
        _maxpool_kernel,
        out_shape=jax.ShapeDtypeStruct((N, Ho, Wo, C), out_dtype),
        grid=(N,),
        in_specs=[in_spec, in_spec, in_spec, in_spec],
        out_specs=pl.BlockSpec((1, Ho, Wo, C), lambda i: (i, 0, 0, 0)),
        compiler_params=pltpu.CompilerParams(dimension_semantics=("parallel",)),
    )(p00, p01, p10, p11)


# ---------------- fused global average pool + fc (+ bias) ----------------

def _gap_fc_kernel(x_ref, w_ref, b_ref, feat_ref, logits_ref):
    x = x_ref[...].astype(jnp.float32)                 # (N, HW, Cp)
    feat = jnp.mean(x, axis=1)                         # (N, Cp) = avgpool
    feat_ref[...] = feat
    logits_ref[...] = (jnp.dot(feat.astype(jnp.bfloat16), w_ref[...],
                               preferred_element_type=jnp.float32)
                       + b_ref[...])


def gap_fc(x_mat, fc_w, fc_b):
    """AdaptiveAvgPool2d((1,1)) + Linear fused into one kernel.

    x_mat: (N, HW, Cp) bf16 layer4 output in matmul layout (padded channels 0).
    fc_w:  (Cp, Np) bf16 (zero rows for padded channels).  fc_b: (1, Np) f32.
    """
    N, HW, Cp = x_mat.shape
    Np = fc_w.shape[1]
    return pl.pallas_call(
        _gap_fc_kernel,
        out_shape=(jax.ShapeDtypeStruct((N, Cp), jnp.float32),
                   jax.ShapeDtypeStruct((N, Np), jnp.float32)),
        grid=(1,),
        in_specs=[pl.BlockSpec((N, HW, Cp), lambda i: (0, 0, 0)),
                  pl.BlockSpec((Cp, Np), lambda i: (0, 0)),
                  pl.BlockSpec((1, Np), lambda i: (0, 0))],
        out_specs=(pl.BlockSpec((N, Cp), lambda i: (0, 0)),
                   pl.BlockSpec((N, Np), lambda i: (0, 0))),
        compiler_params=pltpu.CompilerParams(dimension_semantics=("arbitrary",)),
    )(x_mat, fc_w, fc_b)


# ---------------- parameters (packed once for the MXU) ----------------

def _prep_conv(w):
    """(Cout,Cin,kh,kw) torch layout -> (round_up(kh*kw*Cin,128), round_up(Cout,128)) bf16."""
    cout, cin, kh, kw = w.shape
    k = kh * kw * cin
    wp = jnp.transpose(w, (2, 3, 1, 0)).reshape(k, cout)
    wp = jnp.pad(wp, ((0, _round_up(k, 128) - k),
                      (0, _round_up(cout, 128) - cout)))
    return wp.astype(jnp.bfloat16)


def _prep_fc(w):
    """(num_classes, K) -> (round_up(K,128), round_up(num_classes,128)) bf16."""
    nc, k = w.shape
    wp = jnp.pad(w.T, ((0, _round_up(k, 128) - k),
                       (0, _round_up(nc, 128) - nc)))
    return wp.astype(jnp.bfloat16)


def init_params(key, c=4, num_classes=8):
    keys = iter(jax.random.split(key, 64))

    def conv_w(cout, cin, kh, kw):
        fan_in = cin * kh * kw
        return (jax.random.normal(next(keys), (cout, cin, kh, kw), jnp.float32)
                / math.sqrt(fan_in))

    params = {'conv1_w': _prep_conv(conv_w(c, 3, 7, 7))}
    layers = []
    inplanes = c
    for li, planes in enumerate([c, c * 2, c * 4, c * 8]):
        stride = 1 if li == 0 else 2
        b0 = {'conv1_w': _prep_conv(conv_w(planes, inplanes, 3, 3)),
              'conv2_w': _prep_conv(conv_w(planes, planes, 3, 3))}
        if stride != 1 or inplanes != planes:
            b0['down_w'] = _prep_conv(conv_w(planes, inplanes, 1, 1))
        inplanes = planes
        b1 = {'conv1_w': _prep_conv(conv_w(planes, planes, 3, 3)),
              'conv2_w': _prep_conv(conv_w(planes, planes, 3, 3))}
        layers.append([b0, b1])
    params['layers'] = layers
    fan_in = c * 8
    fc = (jax.random.normal(next(keys), (num_classes, fan_in), jnp.float32)
          / math.sqrt(fan_in))
    params['fc_w'] = _prep_fc(fc)
    params['fc_b'] = jnp.zeros((1, _round_up(num_classes, 128)), jnp.float32)
    return params


# ---------------- model ----------------

def basic_block(x_nhwc, x_mat, bp, planes, stride):
    # conv1 + bn1 + relu (one fused kernel)
    _, out_nhwc = conv2d_in_fused(x_nhwc, bp['conv1_w'], kh=3, kw=3,
                                  stride=stride, padding=1, cout=planes, relu=True)
    # identity branch: downsample conv1x1 + norm (fused), or raw pass-through
    if 'down_w' in bp:
        id_mat, _ = conv2d_in_fused(x_nhwc, bp['down_w'], kh=1, kw=1,
                                    stride=stride, padding=0, cout=planes,
                                    relu=False)
    else:
        id_mat = x_mat
    # conv2 + bn2 + residual add + relu (one fused kernel)
    out_mat, out_nhwc = conv2d_in_fused(out_nhwc, bp['conv2_w'], kh=3, kw=3,
                                        stride=1, padding=1, cout=planes,
                                        identity=id_mat, relu=True)
    return out_nhwc, out_mat


def make_forward(c, num_classes):
    planes_list = [c, c * 2, c * 4, c * 8]

    def forward(params, x):
        # x arrives NCHW (like PyTorch); convert to NHWC bf16 once.
        x = jnp.transpose(x, (0, 2, 3, 1)).astype(jnp.bfloat16)
        N = x.shape[0]
        # stem: conv7x7/s2 + bn1 + relu (fused), then 3x3/s2 max pool
        _, x_nhwc = conv2d_in_fused(x, params['conv1_w'], kh=7, kw=7,
                                    stride=2, padding=3, cout=c, relu=True)
        x_nhwc = max_pool_3x3_s2_p1(x_nhwc)
        # lane-padded matmul-layout view of the maxpool output (first residual identity)
        _, Hm, Wm, _ = x_nhwc.shape
        cp0 = params['layers'][0][0]['conv2_w'].shape[1]
        x_mat = jnp.pad(x_nhwc.reshape(N, Hm * Wm, c),
                        ((0, 0), (0, 0), (0, cp0 - c)))
        for li, planes in enumerate(planes_list):
            stride = 1 if li == 0 else 2
            x_nhwc, x_mat = basic_block(x_nhwc, x_mat, params['layers'][li][0],
                                        planes, stride)
            x_nhwc, x_mat = basic_block(x_nhwc, x_mat, params['layers'][li][1],
                                        planes, 1)
        feat_p, logits_p = gap_fc(x_mat, params['fc_w'], params['fc_b'])
        logits = logits_p[:, :num_classes]
        feature = feat_p[:, :c * 8].reshape(N, c * 8, 1, 1)   # matches torch (N,C,1,1)
        return logits, feature

    return forward


if __name__ == "__main__":
    c = 4
    num_classes = 8
    key = jax.random.PRNGKey(0)
    pkey, xkey = jax.random.split(key)
    params = init_params(pkey, c=c, num_classes=num_classes)
    x = jax.random.normal(xkey, (2, 3, 64, 64), jnp.float32)   # NCHW, like PyTorch

    forward = jax.jit(make_forward(c, num_classes))
    logits, feature = forward(params, x)
    jax.block_until_ready((logits, feature))
    assert logits.shape == (2, num_classes)
    assert feature.shape == (2, c * 8, 1, 1)
    print("KERNEL_OK")
</pallas_src>

<mosaic_0001>
module attributes {stable_mosaic.version = 11 : i64} {
  func.func @_conv_in_kernel(%arg0: i32, %arg1: i32, %arg2: memref<1x1024x256xbf16, #tpu.memory_space<vmem>>, %arg3: memref<256x128xbf16, #tpu.memory_space<vmem>>, %arg4: memref<1x1024x128xbf16, #tpu.memory_space<vmem>>) attributes {dimension_semantics = [#tpu.dimension_semantics<parallel>, #tpu.dimension_semantics<parallel>], iteration_bounds = array<i64: 2, 1>, scalar_prefetch = 0 : i64, scratch_operands = 0 : i64, tpu.core_type = #tpu.core_type<tc>, window_params = [{transform_indices = @transform_0, window_bounds = array<i64: 1, 1024, 256>}, {transform_indices = @transform_1, window_bounds = array<i64: 256, 128>}, {transform_indices = @transform_2, window_bounds = array<i64: 1, 1024, 128>}]} {
    %c0 = arith.constant 0 : index
    %c0_0 = arith.constant 0 : index
    %c0_1 = arith.constant 0 : index
    %0 = vector.load %arg2[%c0, %c0_0, %c0_1] : memref<1x1024x256xbf16, #tpu.memory_space<vmem>>, vector<1x1024x256xbf16>
    %1 = vector.shape_cast %0 : vector<1x1024x256xbf16> to vector<1024x256xbf16>
    %c0_2 = arith.constant 0 : index
    %c0_3 = arith.constant 0 : index
    %2 = vector.load %arg3[%c0_2, %c0_3] : memref<256x128xbf16, #tpu.memory_space<vmem>>, vector<256x128xbf16>
    %cst = arith.constant dense<0.000000e+00> : vector<1024x128xf32>
    %3 = tpu.matmul %1, %2, %cst {dimension_numbers = #tpu.dot_dimension_numbers<[1], [0], [0], [1], [0, 0, 1, 1], [], []>} : vector<1024x256xbf16>, vector<256x128xbf16>, vector<1024x128xf32> -> vector<1024x128xf32>
    %cst_4 = arith.constant dense<0.000000e+00> : vector<128xf32>
    %4 = vector.multi_reduction <add>, %3, %cst_4 [0] : vector<1024x128xf32> to vector<128xf32>
    %5 = vector.shape_cast %4 : vector<128xf32> to vector<1x128xf32>
    %cst_5 = arith.constant 1.024000e+03 : f32
    %6 = vector.broadcast %cst_5 : f32 to vector<1x128xf32>
    %7 = arith.divf %5, %6 : vector<1x128xf32>
    %8 = arith.mulf %3, %3 : vector<1024x128xf32>
    %cst_6 = arith.constant dense<0.000000e+00> : vector<128xf32>
    %9 = vector.multi_reduction <add>, %8, %cst_6 [0] : vector<1024x128xf32> to vector<128xf32>
    %10 = vector.shape_cast %9 : vector<128xf32> to vector<1x128xf32>
    %cst_7 = arith.constant 1.024000e+03 : f32
    %11 = vector.broadcast %cst_7 : f32 to vector<1x128xf32>
    %12 = arith.divf %10, %11 : vector<1x128xf32>
    %13 = arith.mulf %7, %7 : vector<1x128xf32>
    %14 = arith.subf %12, %13 : vector<1x128xf32>
    %cst_8 = arith.constant 0.000000e+00 : f32
    %15 = vector.broadcast %cst_8 : f32 to vector<1x128xf32>
    %16 = arith.maximumf %14, %15 : vector<1x128xf32>
    %17 = vector.broadcast %7 : vector<1x128xf32> to vector<1024x128xf32>
    %18 = arith.subf %3, %17 : vector<1024x128xf32>
    %cst_9 = arith.constant 9.99999974E-6 : f32
    %19 = vector.broadcast %cst_9 : f32 to vector<1x128xf32>
    %20 = arith.addf %16, %19 : vector<1x128xf32>
    %21 = math.rsqrt %20 : vector<1x128xf32>
    %22 = vector.broadcast %21 : vector<1x128xf32> to vector<1024x128xf32>
    %23 = arith.mulf %18, %22 : vector<1024x128xf32>
    %cst_10 = arith.constant 0.000000e+00 : f32
    %24 = vector.broadcast %cst_10 : f32 to vector<1024x128xf32>
    %25 = arith.maximumf %23, %24 : vector<1024x128xf32>
    %26 = vector.shape_cast %25 : vector<1024x128xf32> to vector<1x1024x128xf32>
    %27 = arith.truncf %26 : vector<1x1024x128xf32> to vector<1x1024x128xbf16>
    %c0_11 = arith.constant 0 : index
    %c0_12 = arith.constant 0 : index
    %c0_13 = arith.constant 0 : index
    %28 = vector.load %arg4[%c0_11, %c0_12, %c0_13] : memref<1x1024x128xbf16, #tpu.memory_space<vmem>>, vector<1x1024x128xbf16>
    tpu.vector_store %arg4[%c0_11, %c0_12, %c0_13], %27 {strides = array<i32>} : memref<1x1024x128xbf16, #tpu.memory_space<vmem>>, vector<1x1024x128xbf16>,
    return
  }
  func.func @transform_0(%arg0: i32, %arg1: i32) -> (i32, i32, i32) {
    %c0_i32 = arith.constant 0 : i32
    %c0_i32_0 = arith.constant 0 : i32
    %c0_i32_1 = arith.constant 0 : i32
    return %arg0, %c0_i32, %c0_i32_0 : i32, i32, i32
  }
  func.func @transform_1(%arg0: i32, %arg1: i32) -> (i32, i32) {
    %c0_i32 = arith.constant 0 : i32
    %c0_i32_0 = arith.constant 0 : i32
    return %c0_i32, %arg1 : i32, i32
  }
  func.func @transform_2(%arg0: i32, %arg1: i32) -> (i32, i32, i32) {
    %c0_i32 = arith.constant 0 : i32
    %c0_i32_0 = arith.constant 0 : i32
    return %arg0, %c0_i32, %arg1 : i32, i32, i32
  }
}

module attributes {stable_mosaic.version = 11 : i64} {
  func.func @_maxpool_kernel(%arg0: i32, %arg1: memref<1x17x17x4xf32, #tpu.memory_space<vmem>>, %arg2: memref<1x17x17x4xf32, #tpu.memory_space<vmem>>, %arg3: memref<1x17x17x4xf32, #tpu.memory_space<vmem>>, %arg4: memref<1x17x17x4xf32, #tpu.memory_space<vmem>>, %arg5: memref<1x16x16x4xbf16, #tpu.memory_space<vmem>>) attributes {dimension_semantics = [#tpu.dimension_semantics<parallel>], iteration_bounds = array<i64: 2>, scalar_prefetch = 0 : i64, scratch_operands = 0 : i64, tpu.core_type = #tpu.core_type<tc>, window_params = [{transform_indices = @transform_0, window_bounds = array<i64: 1, 17, 17, 4>}, {transform_indices = @transform_1, window_bounds = array<i64: 1, 17, 17, 4>}, {transform_indices = @transform_2, window_bounds = array<i64: 1, 17, 17, 4>}, {transform_indices = @transform_3, window_bounds = array<i64: 1, 17, 17, 4>}, {transform_indices = @transform_4, window_bounds = array<i64: 1, 16, 16, 4>}]} {
    %c0 = arith.constant 0 : index
    %c0_0 = arith.constant 0 : index
    %c0_1 = arith.constant 0 : index
    %c0_2 = arith.constant 0 : index
    %0 = vector.load %arg1[%c0, %c0_0, %c0_1, %c0_2] : memref<1x17x17x4xf32, #tpu.memory_space<vmem>>, vector<1x17x17x4xf32>
    %c0_3 = arith.constant 0 : index
    %c0_4 = arith.constant 0 : index
    %c0_5 = arith.constant 0 : index
    %c0_6 = arith.constant 0 : index
    %1 = vector.load %arg2[%c0_3, %c0_4, %c0_5, %c0_6] : memref<1x17x17x4xf32, #tpu.memory_space<vmem>>, vector<1x17x17x4xf32>
    %c0_7 = arith.constant 0 : index
    %c0_8 = arith.constant 0 : index
    %c0_9 = arith.constant 0 : index
    %c0_10 = arith.constant 0 : index
    %2 = vector.load %arg3[%c0_7, %c0_8, %c0_9, %c0_10] : memref<1x17x17x4xf32, #tpu.memory_space<vmem>>, vector<1x17x17x4xf32>
    %c0_11 = arith.constant 0 : index
    %c0_12 = arith.constant 0 : index
    %c0_13 = arith.constant 0 : index
    %c0_14 = arith.constant 0 : index
    %3 = vector.load %arg4[%c0_11, %c0_12, %c0_13, %c0_14] : memref<1x17x17x4xf32, #tpu.memory_space<vmem>>, vector<1x17x17x4xf32>
    %4 = vector.extract_strided_slice %0 {offsets = [0, 0, 0, 0], sizes = [1, 16, 16, 4], strides = [1, 1, 1, 1]} : vector<1x17x17x4xf32> to vector<1x16x16x4xf32>
    %5 = vector.extract_strided_slice %0 {offsets = [0, 0, 1, 0], sizes = [1, 16, 16, 4], strides = [1, 1, 1, 1]} : vector<1x17x17x4xf32> to vector<1x16x16x4xf32>
    %6 = arith.maximumf %4, %5 : vector<1x16x16x4xf32>
    %7 = vector.extract_strided_slice %0 {offsets = [0, 1, 0, 0], sizes = [1, 16, 16, 4], strides = [1, 1, 1, 1]} : vector<1x17x17x4xf32> to vector<1x16x16x4xf32>
    %8 = arith.maximumf %6, %7 : vector<1x16x16x4xf32>
    %9 = vector.extract_strided_slice %0 {offsets = [0, 1, 1, 0], sizes = [1, 16, 16, 4], strides = [1, 1, 1, 1]} : vector<1x17x17x4xf32> to vector<1x16x16x4xf32>
    %10 = arith.maximumf %8, %9 : vector<1x16x16x4xf32>
    %11 = vector.extract_strided_slice %1 {offsets = [0, 0, 0, 0], sizes = [1, 16, 16, 4], strides = [1, 1, 1, 1]} : vector<1x17x17x4xf32> to vector<1x16x16x4xf32>
    %12 = arith.maximumf %10, %11 : vector<1x16x16x4xf32>
    %13 = vector.extract_strided_slice %1 {offsets = [0, 1, 0, 0], sizes = [1, 16, 16, 4], strides = [1, 1, 1, 1]} : vector<1x17x17x4xf32> to vector<1x16x16x4xf32>
    %14 = arith.maximumf %12, %13 : vector<1x16x16x4xf32>
    %15 = vector.extract_strided_slice %2 {offsets = [0, 0, 0, 0], sizes = [1, 16, 16, 4], strides = [1, 1, 1, 1]} : vector<1x17x17x4xf32> to vector<1x16x16x4xf32>
    %16 = arith.maximumf %14, %15 : vector<1x16x16x4xf32>
    %17 = vector.extract_strided_slice %2 {offsets = [0, 0, 1, 0], sizes = [1, 16, 16, 4], strides = [1, 1, 1, 1]} : vector<1x17x17x4xf32> to vector<1x16x16x4xf32>
    %18 = arith.maximumf %16, %17 : vector<1x16x16x4xf32>
    %19 = vector.extract_strided_slice %3 {offsets = [0, 0, 0, 0], sizes = [1, 16, 16, 4], strides = [1, 1, 1, 1]} : vector<1x17x17x4xf32> to vector<1x16x16x4xf32>
    %20 = arith.maximumf %18, %19 : vector<1x16x16x4xf32>
    %21 = arith.truncf %20 : vector<1x16x16x4xf32> to vector<1x16x16x4xbf16>
    %c0_15 = arith.constant 0 : index
    %c0_16 = arith.constant 0 : index
    %c0_17 = arith.constant 0 : index
    %c0_18 = arith.constant 0 : index
    %22 = vector.load %arg5[%c0_15, %c0_16, %c0_17, %c0_18] : memref<1x16x16x4xbf16, #tpu.memory_space<vmem>>, vector<1x16x16x4xbf16>
    tpu.vector_store %arg5[%c0_15, %c0_16, %c0_17, %c0_18], %21 {strides = array<i32>} : memref<1x16x16x4xbf16, #tpu.memory_space<vmem>>, vector<1x16x16x4xbf16>,
    return
  }
  func.func @transform_0(%arg0: i32) -> (i32, i32, i32, i32) {
    %c0_i32 = arith.constant 0 : i32
    %c0_i32_0 = arith.constant 0 : i32
    %c0_i32_1 = arith.constant 0 : i32
    %c0_i32_2 = arith.constant 0 : i32
    return %arg0, %c0_i32, %c0_i32_0, %c0_i32_1 : i32, i32, i32, i32
  }
  func.func @transform_1(%arg0: i32) -> (i32, i32, i32, i32) {
    %c0_i32 = arith.constant 0 : i32
    %c0_i32_0 = arith.constant 0 : i32
    %c0_i32_1 = arith.constant 0 : i32
    %c0_i32_2 = arith.constant 0 : i32
    return %arg0, %c0_i32, %c0_i32_0, %c0_i32_1 : i32, i32, i32, i32
  }
  func.func @transform_2(%arg0: i32) -> (i32, i32, i32, i32) {
    %c0_i32 = arith.constant 0 : i32
    %c0_i32_0 = arith.constant 0 : i32
    %c0_i32_1 = arith.constant 0 : i32
    %c0_i32_2 = arith.constant 0 : i32
    return %arg0, %c0_i32, %c0_i32_0, %c0_i32_1 : i32, i32, i32, i32
  }
  func.func @transform_3(%arg0: i32) -> (i32, i32, i32, i32) {
    %c0_i32 = arith.constant 0 : i32
    %c0_i32_0 = arith.constant 0 : i32
    %c0_i32_1 = arith.constant 0 : i32
    %c0_i32_2 = arith.constant 0 : i32
    return %arg0, %c0_i32, %c0_i32_0, %c0_i32_1 : i32, i32, i32, i32
  }
  func.func @transform_4(%arg0: i32) -> (i32, i32, i32, i32) {
    %c0_i32 = arith.constant 0 : i32
    %c0_i32_0 = arith.constant 0 : i32
    %c0_i32_1 = arith.constant 0 : i32
    %c0_i32_2 = arith.constant 0 : i32
    return %arg0, %c0_i32, %c0_i32_0, %c0_i32_1 : i32, i32, i32, i32
  }
}

module attributes {stable_mosaic.version = 11 : i64} {
  func.func @_conv_in_kernel(%arg0: i32, %arg1: i32, %arg2: memref<1x256x128xbf16, #tpu.memory_space<vmem>>, %arg3: memref<128x128xbf16, #tpu.memory_space<vmem>>, %arg4: memref<1x256x128xbf16, #tpu.memory_space<vmem>>) attributes {dimension_semantics = [#tpu.dimension_semantics<parallel>, #tpu.dimension_semantics<parallel>], iteration_bounds = array<i64: 2, 1>, scalar_prefetch = 0 : i64, scratch_operands = 0 : i64, tpu.core_type = #tpu.core_type<tc>, window_params = [{transform_indices = @transform_0, window_bounds = array<i64: 1, 256, 128>}, {transform_indices = @transform_1, window_bounds = array<i64: 128, 128>}, {transform_indices = @transform_2, window_bounds = array<i64: 1, 256, 128>}]} {
    %c0 = arith.constant 0 : index
    %c0_0 = arith.constant 0 : index
    %c0_1 = arith.constant 0 : index
    %0 = vector.load %arg2[%c0, %c0_0, %c0_1] : memref<1x256x128xbf16, #tpu.memory_space<vmem>>, vector<1x256x128xbf16>
    %1 = vector.shape_cast %0 : vector<1x256x128xbf16> to vector<256x128xbf16>
    %c0_2 = arith.constant 0 : index
    %c0_3 = arith.constant 0 : index
    %2 = vector.load %arg3[%c0_2, %c0_3] : memref<128x128xbf16, #tpu.memory_space<vmem>>, vector<128x128xbf16>
    %cst = arith.constant dense<0.000000e+00> : vector<256x128xf32>
    %3 = tpu.matmul %1, %2, %cst {dimension_numbers = #tpu.dot_dimension_numbers<[1], [0], [0], [1], [0, 0, 1, 1], [], []>} : vector<256x128xbf16>, vector<128x128xbf16>, vector<256x128xf32> -> vector<256x128xf32>
    %cst_4 = arith.constant dense<0.000000e+00> : vector<128xf32>
    %4 = vector.multi_reduction <add>, %3, %cst_4 [0] : vector<256x128xf32> to vector<128xf32>
    %5 = vector.shape_cast %4 : vector<128xf32> to vector<1x128xf32>
    %cst_5 = arith.constant 2.560000e+02 : f32
    %6 = vector.broadcast %cst_5 : f32 to vector<1x128xf32>
    %7 = arith.divf %5, %6 : vector<1x128xf32>
    %8 = arith.mulf %3, %3 : vector<256x128xf32>
    %cst_6 = arith.constant dense<0.000000e+00> : vector<128xf32>
    %9 = vector.multi_reduction <add>, %8, %cst_6 [0] : vector<256x128xf32> to vector<128xf32>
    %10 = vector.shape_cast %9 : vector<128xf32> to vector<1x128xf32>
    %cst_7 = arith.constant 2.560000e+02 : f32
    %11 = vector.broadcast %cst_7 : f32 to vector<1x128xf32>
    %12 = arith.divf %10, %11 : vector<1x128xf32>
    %13 = arith.mulf %7, %7 : vector<1x128xf32>
    %14 = arith.subf %12, %13 : vector<1x128xf32>
    %cst_8 = arith.constant 0.000000e+00 : f32
    %15 = vector.broadcast %cst_8 : f32 to vector<1x128xf32>
    %16 = arith.maximumf %14, %15 : vector<1x128xf32>
    %17 = vector.broadcast %7 : vector<1x128xf32> to vector<256x128xf32>
    %18 = arith.subf %3, %17 : vector<256x128xf32>
    %cst_9 = arith.constant 9.99999974E-6 : f32
    %19 = vector.broadcast %cst_9 : f32 to vector<1x128xf32>
    %20 = arith.addf %16, %19 : vector<1x128xf32>
    %21 = math.rsqrt %20 : vector<1x128xf32>
    %22 = vector.broadcast %21 : vector<1x128xf32> to vector<256x128xf32>
    %23 = arith.mulf %18, %22 : vector<256x128xf32>
    %cst_10 = arith.constant 0.000000e+00 : f32
    %24 = vector.broadcast %cst_10 : f32 to vector<256x128xf32>
    %25 = arith.maximumf %23, %24 : vector<256x128xf32>
    %26 = vector.shape_cast %25 : vector<256x128xf32> to vector<1x256x128xf32>
    %27 = arith.truncf %26 : vector<1x256x128xf32> to vector<1x256x128xbf16>
    %c0_11 = arith.constant 0 : index
    %c0_12 = arith.constant 0 : index
    %c0_13 = arith.constant 0 : index
    %28 = vector.load %arg4[%c0_11, %c0_12, %c0_13] : memref<1x256x128xbf16, #tpu.memory_space<vmem>>, vector<1x256x128xbf16>
    tpu.vector_store %arg4[%c0_11, %c0_12, %c0_13], %27 {strides = array<i32>} : memref<1x256x128xbf16, #tpu.memory_space<vmem>>, vector<1x256x128xbf16>,
    return
  }
  func.func @transform_0(%arg0: i32, %arg1: i32) -> (i32, i32, i32) {
    %c0_i32 = arith.constant 0 : i32
    %c0_i32_0 = arith.constant 0 : i32
    %c0_i32_1 = arith.constant 0 : i32
    return %arg0, %c0_i32, %c0_i32_0 : i32, i32, i32
  }
  func.func @transform_1(%arg0: i32, %arg1: i32) -> (i32, i32) {
    %c0_i32 = arith.constant 0 : i32
    %c0_i32_0 = arith.constant 0 : i32
    return %c0_i32, %arg1 : i32, i32
  }
  func.func @transform_2(%arg0: i32, %arg1: i32) -> (i32, i32, i32) {
    %c0_i32 = arith.constant 0 : i32
    %c0_i32_0 = arith.constant 0 : i32
    return %arg0, %c0_i32, %arg1 : i32, i32, i32
  }
}

module attributes {stable_mosaic.version = 11 : i64} {
  func.func @_conv_in_add_kernel(%arg0: i32, %arg1: i32, %arg2: memref<1x256x128xbf16, #tpu.memory_space<vmem>>, %arg3: memref<128x128xbf16, #tpu.memory_space<vmem>>, %arg4: memref<1x256x128xbf16, #tpu.memory_space<vmem>>, %arg5: memref<1x256x128xbf16, #tpu.memory_space<vmem>>) attributes {dimension_semantics = [#tpu.dimension_semantics<parallel>, #tpu.dimension_semantics<parallel>], iteration_bounds = array<i64: 2, 1>, scalar_prefetch = 0 : i64, scratch_operands = 0 : i64, tpu.core_type = #tpu.core_type<tc>, window_params = [{transform_indices = @transform_0, window_bounds = array<i64: 1, 256, 128>}, {transform_indices = @transform_1, window_bounds = array<i64: 128, 128>}, {transform_indices = @transform_2, window_bounds = array<i64: 1, 256, 128>}, {transform_indices = @transform_3, window_bounds = array<i64: 1, 256, 128>}]} {
    %c0 = arith.constant 0 : index
    %c0_0 = arith.constant 0 : index
    %c0_1 = arith.constant 0 : index
    %0 = vector.load %arg2[%c0, %c0_0, %c0_1] : memref<1x256x128xbf16, #tpu.memory_space<vmem>>, vector<1x256x128xbf16>
    %1 = vector.shape_cast %0 : vector<1x256x128xbf16> to vector<256x128xbf16>
    %c0_2 = arith.constant 0 : index
    %c0_3 = arith.constant 0 : index
    %2 = vector.load %arg3[%c0_2, %c0_3] : memref<128x128xbf16, #tpu.memory_space<vmem>>, vector<128x128xbf16>
    %cst = arith.constant dense<0.000000e+00> : vector<256x128xf32>
    %3 = tpu.matmul %1, %2, %cst {dimension_numbers = #tpu.dot_dimension_numbers<[1], [0], [0], [1], [0, 0, 1, 1], [], []>} : vector<256x128xbf16>, vector<128x128xbf16>, vector<256x128xf32> -> vector<256x128xf32>
    %cst_4 = arith.constant dense<0.000000e+00> : vector<128xf32>
    %4 = vector.multi_reduction <add>, %3, %cst_4 [0] : vector<256x128xf32> to vector<128xf32>
    %5 = vector.shape_cast %4 : vector<128xf32> to vector<1x128xf32>
    %cst_5 = arith.constant 2.560000e+02 : f32
    %6 = vector.broadcast %cst_5 : f32 to vector<1x128xf32>
    %7 = arith.divf %5, %6 : vector<1x128xf32>
    %8 = arith.mulf %3, %3 : vector<256x128xf32>
    %cst_6 = arith.constant dense<0.000000e+00> : vector<128xf32>
    %9 = vector.multi_reduction <add>, %8, %cst_6 [0] : vector<256x128xf32> to vector<128xf32>
    %10 = vector.shape_cast %9 : vector<128xf32> to vector<1x128xf32>
    %cst_7 = arith.constant 2.560000e+02 : f32
    %11 = vector.broadcast %cst_7 : f32 to vector<1x128xf32>
    %12 = arith.divf %10, %11 : vector<1x128xf32>
    %13 = arith.mulf %7, %7 : vector<1x128xf32>
    %14 = arith.subf %12, %13 : vector<1x128xf32>
    %cst_8 = arith.constant 0.000000e+00 : f32
    %15 = vector.broadcast %cst_8 : f32 to vector<1x128xf32>
    %16 = arith.maximumf %14, %15 : vector<1x128xf32>
    %17 = vector.broadcast %7 : vector<1x128xf32> to vector<256x128xf32>
    %18 = arith.subf %3, %17 : vector<256x128xf32>
    %cst_9 = arith.constant 9.99999974E-6 : f32
    %19 = vector.broadcast %cst_9 : f32 to vector<1x128xf32>
    %20 = arith.addf %16, %19 : vector<1x128xf32>
    %21 = math.rsqrt %20 : vector<1x128xf32>
    %22 = vector.broadcast %21 : vector<1x128xf32> to vector<256x128xf32>
    %23 = arith.mulf %18, %22 : vector<256x128xf32>
    %c0_10 = arith.constant 0 : index
    %c0_11 = arith.constant 0 : index
    %c0_12 = arith.constant 0 : index
    %24 = vector.load %arg4[%c0_10, %c0_11, %c0_12] : memref<1x256x128xbf16, #tpu.memory_space<vmem>>, vector<1x256x128xbf16>
    %25 = vector.shape_cast %24 : vector<1x256x128xbf16> to vector<256x128xbf16>
    %26 = arith.extf %25 : vector<256x128xbf16> to vector<256x128xf32>
    %27 = arith.addf %23, %26 : vector<256x128xf32>
    %cst_13 = arith.constant 0.000000e+00 : f32
    %28 = vector.broadcast %cst_13 : f32 to vector<256x128xf32>
    %29 = arith.maximumf %27, %28 : vector<256x128xf32>
    %30 = vector.shape_cast %29 : vector<256x128xf32> to vector<1x256x128xf32>
    %31 = arith.truncf %30 : vector<1x256x128xf32> to vector<1x256x128xbf16>
    %c0_14 = arith.constant 0 : index
    %c0_15 = arith.constant 0 : index
    %c0_16 = arith.constant 0 : index
    %32 = vector.load %arg5[%c0_14, %c0_15, %c0_16] : memref<1x256x128xbf16, #tpu.memory_space<vmem>>, vector<1x256x128xbf16>
    tpu.vector_store %arg5[%c0_14, %c0_15, %c0_16], %31 {strides = array<i32>} : memref<1x256x128xbf16, #tpu.memory_space<vmem>>, vector<1x256x128xbf16>,
    return
  }
  func.func @transform_0(%arg0: i32, %arg1: i32) -> (i32, i32, i32) {
    %c0_i32 = arith.constant 0 : i32
    %c0_i32_0 = arith.constant 0 : i32
    %c0_i32_1 = arith.constant 0 : i32
    return %arg0, %c0_i32, %c0_i32_0 : i32, i32, i32
  }
  func.func @transform_1(%arg0: i32, %arg1: i32) -> (i32, i32) {
    %c0_i32 = arith.constant 0 : i32
    %c0_i32_0 = arith.constant 0 : i32
    return %c0_i32, %arg1 : i32, i32
  }
  func.func @transform_2(%arg0: i32, %arg1: i32) -> (i32, i32, i32) {
    %c0_i32 = arith.constant 0 : i32
    %c0_i32_0 = arith.constant 0 : i32
    return %arg0, %c0_i32, %arg1 : i32, i32, i32
  }
  func.func @transform_3(%arg0: i32, %arg1: i32) -> (i32, i32, i32) {
    %c0_i32 = arith.constant 0 : i32
    %c0_i32_0 = arith.constant 0 : i32
    return %arg0, %c0_i32, %arg1 : i32, i32, i32
  }
}

module attributes {stable_mosaic.version = 11 : i64} {
  func.func @_conv_in_kernel(%arg0: i32, %arg1: i32, %arg2: memref<1x64x128xbf16, #tpu.memory_space<vmem>>, %arg3: memref<128x128xbf16, #tpu.memory_space<vmem>>, %arg4: memref<1x64x128xbf16, #tpu.memory_space<vmem>>) attributes {dimension_semantics = [#tpu.dimension_semantics<parallel>, #tpu.dimension_semantics<parallel>], iteration_bounds = array<i64: 2, 1>, scalar_prefetch = 0 : i64, scratch_operands = 0 : i64, tpu.core_type = #tpu.core_type<tc>, window_params = [{transform_indices = @transform_0, window_bounds = array<i64: 1, 64, 128>}, {transform_indices = @transform_1, window_bounds = array<i64: 128, 128>}, {transform_indices = @transform_2, window_bounds = array<i64: 1, 64, 128>}]} {
    %c0 = arith.constant 0 : index
    %c0_0 = arith.constant 0 : index
    %c0_1 = arith.constant 0 : index
    %0 = vector.load %arg2[%c0, %c0_0, %c0_1] : memref<1x64x128xbf16, #tpu.memory_space<vmem>>, vector<1x64x128xbf16>
    %1 = vector.shape_cast %0 : vector<1x64x128xbf16> to vector<64x128xbf16>
    %c0_2 = arith.constant 0 : index
    %c0_3 = arith.constant 0 : index
    %2 = vector.load %arg3[%c0_2, %c0_3] : memref<128x128xbf16, #tpu.memory_space<vmem>>, vector<128x128xbf16>
    %cst = arith.constant dense<0.000000e+00> : vector<64x128xf32>
    %3 = tpu.matmul %1, %2, %cst {dimension_numbers = #tpu.dot_dimension_numbers<[1], [0], [0], [1], [0, 0, 1, 1], [], []>} : vector<64x128xbf16>, vector<128x128xbf16>, vector<64x128xf32> -> vector<64x128xf32>
    %cst_4 = arith.constant dense<0.000000e+00> : vector<128xf32>
    %4 = vector.multi_reduction <add>, %3, %cst_4 [0] : vector<64x128xf32> to vector<128xf32>
    %5 = vector.shape_cast %4 : vector<128xf32> to vector<1x128xf32>
    %cst_5 = arith.constant 6.400000e+01 : f32
    %6 = vector.broadcast %cst_5 : f32 to vector<1x128xf32>
    %7 = arith.divf %5, %6 : vector<1x128xf32>
    %8 = arith.mulf %3, %3 : vector<64x128xf32>
    %cst_6 = arith.constant dense<0.000000e+00> : vector<128xf32>
    %9 = vector.multi_reduction <add>, %8, %cst_6 [0] : vector<64x128xf32> to vector<128xf32>
    %10 = vector.shape_cast %9 : vector<128xf32> to vector<1x128xf32>
    %cst_7 = arith.constant 6.400000e+01 : f32
    %11 = vector.broadcast %cst_7 : f32 to vector<1x128xf32>
    %12 = arith.divf %10, %11 : vector<1x128xf32>
    %13 = arith.mulf %7, %7 : vector<1x128xf32>
    %14 = arith.subf %12, %13 : vector<1x128xf32>
    %cst_8 = arith.constant 0.000000e+00 : f32
    %15 = vector.broadcast %cst_8 : f32 to vector<1x128xf32>
    %16 = arith.maximumf %14, %15 : vector<1x128xf32>
    %17 = vector.broadcast %7 : vector<1x128xf32> to vector<64x128xf32>
    %18 = arith.subf %3, %17 : vector<64x128xf32>
    %cst_9 = arith.constant 9.99999974E-6 : f32
    %19 = vector.broadcast %cst_9 : f32 to vector<1x128xf32>
    %20 = arith.addf %16, %19 : vector<1x128xf32>
    %21 = math.rsqrt %20 : vector<1x128xf32>
    %22 = vector.broadcast %21 : vector<1x128xf32> to vector<64x128xf32>
    %23 = arith.mulf %18, %22 : vector<64x128xf32>
    %24 = vector.shape_cast %23 : vector<64x128xf32> to vector<1x64x128xf32>
    %25 = arith.truncf %24 : vector<1x64x128xf32> to vector<1x64x128xbf16>
    %c0_10 = arith.constant 0 : index
    %c0_11 = arith.constant 0 : index
    %c0_12 = arith.constant 0 : index
    %26 = vector.load %arg4[%c0_10, %c0_11, %c0_12] : memref<1x64x128xbf16, #tpu.memory_space<vmem>>, vector<1x64x128xbf16>
    tpu.vector_store %arg4[%c0_10, %c0_11, %c0_12], %25 {strides = array<i32>} : memref<1x64x128xbf16, #tpu.memory_space<vmem>>, vector<1x64x128xbf16>,
    return
  }
  func.func @transform_0(%arg0: i32, %arg1: i32) -> (i32, i32, i32) {
    %c0_i32 = arith.constant 0 : i32
    %c0_i32_0 = arith.constant 0 : i32
    %c0_i32_1 = arith.constant 0 : i32
    return %arg0, %c0_i32, %c0_i32_0 : i32, i32, i32
  }
  func.func @transform_1(%arg0: i32, %arg1: i32) -> (i32, i32) {
    %c0_i32 = arith.constant 0 : i32
    %c0_i32_0 = arith.constant 0 : i32
    return %c0_i32, %arg1 : i32, i32
  }
  func.func @transform_2(%arg0: i32, %arg1: i32) -> (i32, i32, i32) {
    %c0_i32 = arith.constant 0 : i32
    %c0_i32_0 = arith.constant 0 : i32
    return %arg0, %c0_i32, %arg1 : i32, i32, i32
  }
}

module attributes {stable_mosaic.version = 11 : i64} {
  func.func @_conv_in_kernel(%arg0: i32, %arg1: i32, %arg2: memref<1x64x128xbf16, #tpu.memory_space<vmem>>, %arg3: memref<128x128xbf16, #tpu.memory_space<vmem>>, %arg4: memref<1x64x128xbf16, #tpu.memory_space<vmem>>) attributes {dimension_semantics = [#tpu.dimension_semantics<parallel>, #tpu.dimension_semantics<parallel>], iteration_bounds = array<i64: 2, 1>, scalar_prefetch = 0 : i64, scratch_operands = 0 : i64, tpu.core_type = #tpu.core_type<tc>, window_params = [{transform_indices = @transform_0, window_bounds = array<i64: 1, 64, 128>}, {transform_indices = @transform_1, window_bounds = array<i64: 128, 128>}, {transform_indices = @transform_2, window_bounds = array<i64: 1, 64, 128>}]} {
    %c0 = arith.constant 0 : index
    %c0_0 = arith.constant 0 : index
    %c0_1 = arith.constant 0 : index
    %0 = vector.load %arg2[%c0, %c0_0, %c0_1] : memref<1x64x128xbf16, #tpu.memory_space<vmem>>, vector<1x64x128xbf16>
    %1 = vector.shape_cast %0 : vector<1x64x128xbf16> to vector<64x128xbf16>
    %c0_2 = arith.constant 0 : index
    %c0_3 = arith.constant 0 : index
    %2 = vector.load %arg3[%c0_2, %c0_3] : memref<128x128xbf16, #tpu.memory_space<vmem>>, vector<128x128xbf16>
    %cst = arith.constant dense<0.000000e+00> : vector<64x128xf32>
    %3 = tpu.matmul %1, %2, %cst {dimension_numbers = #tpu.dot_dimension_numbers<[1], [0], [0], [1], [0, 0, 1, 1], [], []>} : vector<64x128xbf16>, vector<128x128xbf16>, vector<64x128xf32> -> vector<64x128xf32>
    %cst_4 = arith.constant dense<0.000000e+00> : vector<128xf32>
    %4 = vector.multi_reduction <add>, %3, %cst_4 [0] : vector<64x128xf32> to vector<128xf32>
    %5 = vector.shape_cast %4 : vector<128xf32> to vector<1x128xf32>
    %cst_5 = arith.constant 6.400000e+01 : f32
    %6 = vector.broadcast %cst_5 : f32 to vector<1x128xf32>
    %7 = arith.divf %5, %6 : vector<1x128xf32>
    %8 = arith.mulf %3, %3 : vector<64x128xf32>
    %cst_6 = arith.constant dense<0.000000e+00> : vector<128xf32>
    %9 = vector.multi_reduction <add>, %8, %cst_6 [0] : vector<64x128xf32> to vector<128xf32>
    %10 = vector.shape_cast %9 : vector<128xf32> to vector<1x128xf32>
    %cst_7 = arith.constant 6.400000e+01 : f32
    %11 = vector.broadcast %cst_7 : f32 to vector<1x128xf32>
    %12 = arith.divf %10, %11 : vector<1x128xf32>
    %13 = arith.mulf %7, %7 : vector<1x128xf32>
    %14 = arith.subf %12, %13 : vector<1x128xf32>
    %cst_8 = arith.constant 0.000000e+00 : f32
    %15 = vector.broadcast %cst_8 : f32 to vector<1x128xf32>
    %16 = arith.maximumf %14, %15 : vector<1x128xf32>
    %17 = vector.broadcast %7 : vector<1x128xf32> to vector<64x128xf32>
    %18 = arith.subf %3, %17 : vector<64x128xf32>
    %cst_9 = arith.constant 9.99999974E-6 : f32
    %19 = vector.broadcast %cst_9 : f32 to vector<1x128xf32>
    %20 = arith.addf %16, %19 : vector<1x128xf32>
    %21 = math.rsqrt %20 : vector<1x128xf32>
    %22 = vector.broadcast %21 : vector<1x128xf32> to vector<64x128xf32>
    %23 = arith.mulf %18, %22 : vector<64x128xf32>
    %cst_10 = arith.constant 0.000000e+00 : f32
    %24 = vector.broadcast %cst_10 : f32 to vector<64x128xf32>
    %25 = arith.maximumf %23, %24 : vector<64x128xf32>
    %26 = vector.shape_cast %25 : vector<64x128xf32> to vector<1x64x128xf32>
    %27 = arith.truncf %26 : vector<1x64x128xf32> to vector<1x64x128xbf16>
    %c0_11 = arith.constant 0 : index
    %c0_12 = arith.constant 0 : index
    %c0_13 = arith.constant 0 : index
    %28 = vector.load %arg4[%c0_11, %c0_12, %c0_13] : memref<1x64x128xbf16, #tpu.memory_space<vmem>>, vector<1x64x128xbf16>
    tpu.vector_store %arg4[%c0_11, %c0_12, %c0_13], %27 {strides = array<i32>} : memref<1x64x128xbf16, #tpu.memory_space<vmem>>, vector<1x64x128xbf16>,
    return
  }
  func.func @transform_0(%arg0: i32, %arg1: i32) -> (i32, i32, i32) {
    %c0_i32 = arith.constant 0 : i32
    %c0_i32_0 = arith.constant 0 : i32
    %c0_i32_1 = arith.constant 0 : i32
    return %arg0, %c0_i32, %c0_i32_0 : i32, i32, i32
  }
  func.func @transform_1(%arg0: i32, %arg1: i32) -> (i32, i32) {
    %c0_i32 = arith.constant 0 : i32
    %c0_i32_0 = arith.constant 0 : i32
    return %c0_i32, %arg1 : i32, i32
  }
  func.func @transform_2(%arg0: i32, %arg1: i32) -> (i32, i32, i32) {
    %c0_i32 = arith.constant 0 : i32
    %c0_i32_0 = arith.constant 0 : i32
    return %arg0, %c0_i32, %arg1 : i32, i32, i32
  }
}

module attributes {stable_mosaic.version = 11 : i64} {
  func.func @_conv_in_add_kernel(%arg0: i32, %arg1: i32, %arg2: memref<1x64x128xbf16, #tpu.memory_space<vmem>>, %arg3: memref<128x128xbf16, #tpu.memory_space<vmem>>, %arg4: memref<1x64x128xbf16, #tpu.memory_space<vmem>>, %arg5: memref<1x64x128xbf16, #tpu.memory_space<vmem>>) attributes {dimension_semantics = [#tpu.dimension_semantics<parallel>, #tpu.dimension_semantics<parallel>], iteration_bounds = array<i64: 2, 1>, scalar_prefetch = 0 : i64, scratch_operands = 0 : i64, tpu.core_type = #tpu.core_type<tc>, window_params = [{transform_indices = @transform_0, window_bounds = array<i64: 1, 64, 128>}, {transform_indices = @transform_1, window_bounds = array<i64: 128, 128>}, {transform_indices = @transform_2, window_bounds = array<i64: 1, 64, 128>}, {transform_indices = @transform_3, window_bounds = array<i64: 1, 64, 128>}]} {
    %c0 = arith.constant 0 : index
    %c0_0 = arith.constant 0 : index
    %c0_1 = arith.constant 0 : index
    %0 = vector.load %arg2[%c0, %c0_0, %c0_1] : memref<1x64x128xbf16, #tpu.memory_space<vmem>>, vector<1x64x128xbf16>
    %1 = vector.shape_cast %0 : vector<1x64x128xbf16> to vector<64x128xbf16>
    %c0_2 = arith.constant 0 : index
    %c0_3 = arith.constant 0 : index
    %2 = vector.load %arg3[%c0_2, %c0_3] : memref<128x128xbf16, #tpu.memory_space<vmem>>, vector<128x128xbf16>
    %cst = arith.constant dense<0.000000e+00> : vector<64x128xf32>
    %3 = tpu.matmul %1, %2, %cst {dimension_numbers = #tpu.dot_dimension_numbers<[1], [0], [0], [1], [0, 0, 1, 1], [], []>} : vector<64x128xbf16>, vector<128x128xbf16>, vector<64x128xf32> -> vector<64x128xf32>
    %cst_4 = arith.constant dense<0.000000e+00> : vector<128xf32>
    %4 = vector.multi_reduction <add>, %3, %cst_4 [0] : vector<64x128xf32> to vector<128xf32>
    %5 = vector.shape_cast %4 : vector<128xf32> to vector<1x128xf32>
    %cst_5 = arith.constant 6.400000e+01 : f32
    %6 = vector.broadcast %cst_5 : f32 to vector<1x128xf32>
    %7 = arith.divf %5, %6 : vector<1x128xf32>
    %8 = arith.mulf %3, %3 : vector<64x128xf32>
    %cst_6 = arith.constant dense<0.000000e+00> : vector<128xf32>
    %9 = vector.multi_reduction <add>, %8, %cst_6 [0] : vector<64x128xf32> to vector<128xf32>
    %10 = vector.shape_cast %9 : vector<128xf32> to vector<1x128xf32>
    %cst_7 = arith.constant 6.400000e+01 : f32
    %11 = vector.broadcast %cst_7 : f32 to vector<1x128xf32>
    %12 = arith.divf %10, %11 : vector<1x128xf32>
    %13 = arith.mulf %7, %7 : vector<1x128xf32>
    %14 = arith.subf %12, %13 : vector<1x128xf32>
    %cst_8 = arith.constant 0.000000e+00 : f32
    %15 = vector.broadcast %cst_8 : f32 to vector<1x128xf32>
    %16 = arith.maximumf %14, %15 : vector<1x128xf32>
    %17 = vector.broadcast %7 : vector<1x128xf32> to vector<64x128xf32>
    %18 = arith.subf %3, %17 : vector<64x128xf32>
    %cst_9 = arith.constant 9.99999974E-6 : f32
    %19 = vector.broadcast %cst_9 : f32 to vector<1x128xf32>
    %20 = arith.addf %16, %19 : vector<1x128xf32>
    %21 = math.rsqrt %20 : vector<1x128xf32>
    %22 = vector.broadcast %21 : vector<1x128xf32> to vector<64x128xf32>
    %23 = arith.mulf %18, %22 : vector<64x128xf32>
    %c0_10 = arith.constant 0 : index
    %c0_11 = arith.constant 0 : index
    %c0_12 = arith.constant 0 : index
    %24 = vector.load %arg4[%c0_10, %c0_11, %c0_12] : memref<1x64x128xbf16, #tpu.memory_space<vmem>>, vector<1x64x128xbf16>
    %25 = vector.shape_cast %24 : vector<1x64x128xbf16> to vector<64x128xbf16>
    %26 = arith.extf %25 : vector<64x128xbf16> to vector<64x128xf32>
    %27 = arith.addf %23, %26 : vector<64x128xf32>
    %cst_13 = arith.constant 0.000000e+00 : f32
    %28 = vector.broadcast %cst_13 : f32 to vector<64x128xf32>
    %29 = arith.maximumf %27, %28 : vector<64x128xf32>
    %30 = vector.shape_cast %29 : vector<64x128xf32> to vector<1x64x128xf32>
    %31 = arith.truncf %30 : vector<1x64x128xf32> to vector<1x64x128xbf16>
    %c0_14 = arith.constant 0 : index
    %c0_15 = arith.constant 0 : index
    %c0_16 = arith.constant 0 : index
    %32 = vector.load %arg5[%c0_14, %c0_15, %c0_16] : memref<1x64x128xbf16, #tpu.memory_space<vmem>>, vector<1x64x128xbf16>
    tpu.vector_store %arg5[%c0_14, %c0_15, %c0_16], %31 {strides = array<i32>} : memref<1x64x128xbf16, #tpu.memory_space<vmem>>, vector<1x64x128xbf16>,
    return
  }
  func.func @transform_0(%arg0: i32, %arg1: i32) -> (i32, i32, i32) {
    %c0_i32 = arith.constant 0 : i32
    %c0_i32_0 = arith.constant 0 : i32
    %c0_i32_1 = arith.constant 0 : i32
    return %arg0, %c0_i32, %c0_i32_0 : i32, i32, i32
  }
  func.func @transform_1(%arg0: i32, %arg1: i32) -> (i32, i32) {
    %c0_i32 = arith.constant 0 : i32
    %c0_i32_0 = arith.constant 0 : i32
    return %c0_i32, %arg1 : i32, i32
  }
  func.func @transform_2(%arg0: i32, %arg1: i32) -> (i32, i32, i32) {
    %c0_i32 = arith.constant 0 : i32
    %c0_i32_0 = arith.constant 0 : i32
    return %arg0, %c0_i32, %arg1 : i32, i32, i32
  }
  func.func @transform_3(%arg0: i32, %arg1: i32) -> (i32, i32, i32) {
    %c0_i32 = arith.constant 0 : i32
    %c0_i32_0 = arith.constant 0 : i32
    return %arg0, %c0_i32, %arg1 : i32, i32, i32
  }
}

module attributes {stable_mosaic.version = 11 : i64} {
  func.func @_conv_in_kernel(%arg0: i32, %arg1: i32, %arg2: memref<1x16x128xbf16, #tpu.memory_space<vmem>>, %arg3: memref<128x128xbf16, #tpu.memory_space<vmem>>, %arg4: memref<1x16x128xbf16, #tpu.memory_space<vmem>>) attributes {dimension_semantics = [#tpu.dimension_semantics<parallel>, #tpu.dimension_semantics<parallel>], iteration_bounds = array<i64: 2, 1>, scalar_prefetch = 0 : i64, scratch_operands = 0 : i64, tpu.core_type = #tpu.core_type<tc>, window_params = [{transform_indices = @transform_0, window_bounds = array<i64: 1, 16, 128>}, {transform_indices = @transform_1, window_bounds = array<i64: 128, 128>}, {transform_indices = @transform_2, window_bounds = array<i64: 1, 16, 128>}]} {
    %c0 = arith.constant 0 : index
    %c0_0 = arith.constant 0 : index
    %c0_1 = arith.constant 0 : index
    %0 = vector.load %arg2[%c0, %c0_0, %c0_1] : memref<1x16x128xbf16, #tpu.memory_space<vmem>>, vector<1x16x128xbf16>
    %1 = vector.shape_cast %0 : vector<1x16x128xbf16> to vector<16x128xbf16>
    %c0_2 = arith.constant 0 : index
    %c0_3 = arith.constant 0 : index
    %2 = vector.load %arg3[%c0_2, %c0_3] : memref<128x128xbf16, #tpu.memory_space<vmem>>, vector<128x128xbf16>
    %cst = arith.constant dense<0.000000e+00> : vector<16x128xf32>
    %3 = tpu.matmul %1, %2, %cst {dimension_numbers = #tpu.dot_dimension_numbers<[1], [0], [0], [1], [0, 0, 1, 1], [], []>} : vector<16x128xbf16>, vector<128x128xbf16>, vector<16x128xf32> -> vector<16x128xf32>
    %cst_4 = arith.constant dense<0.000000e+00> : vector<128xf32>
    %4 = vector.multi_reduction <add>, %3, %cst_4 [0] : vector<16x128xf32> to vector<128xf32>
    %5 = vector.shape_cast %4 : vector<128xf32> to vector<1x128xf32>
    %cst_5 = arith.constant 1.600000e+01 : f32
    %6 = vector.broadcast %cst_5 : f32 to vector<1x128xf32>
    %7 = arith.divf %5, %6 : vector<1x128xf32>
    %8 = arith.mulf %3, %3 : vector<16x128xf32>
    %cst_6 = arith.constant dense<0.000000e+00> : vector<128xf32>
    %9 = vector.multi_reduction <add>, %8, %cst_6 [0] : vector<16x128xf32> to vector<128xf32>
    %10 = vector.shape_cast %9 : vector<128xf32> to vector<1x128xf32>
    %cst_7 = arith.constant 1.600000e+01 : f32
    %11 = vector.broadcast %cst_7 : f32 to vector<1x128xf32>
    %12 = arith.divf %10, %11 : vector<1x128xf32>
    %13 = arith.mulf %7, %7 : vector<1x128xf32>
    %14 = arith.subf %12, %13 : vector<1x128xf32>
    %cst_8 = arith.constant 0.000000e+00 : f32
    %15 = vector.broadcast %cst_8 : f32 to vector<1x128xf32>
    %16 = arith.maximumf %14, %15 : vector<1x128xf32>
    %17 = vector.broadcast %7 : vector<1x128xf32> to vector<16x128xf32>
    %18 = arith.subf %3, %17 : vector<16x128xf32>
    %cst_9 = arith.constant 9.99999974E-6 : f32
    %19 = vector.broadcast %cst_9 : f32 to vector<1x128xf32>
    %20 = arith.addf %16, %19 : vector<1x128xf32>
    %21 = math.rsqrt %20 : vector<1x128xf32>
    %22 = vector.broadcast %21 : vector<1x128xf32> to vector<16x128xf32>
    %23 = arith.mulf %18, %22 : vector<16x128xf32>
    %24 = vector.shape_cast %23 : vector<16x128xf32> to vector<1x16x128xf32>
    %25 = arith.truncf %24 : vector<1x16x128xf32> to vector<1x16x128xbf16>
    %c0_10 = arith.constant 0 : index
    %c0_11 = arith.constant 0 : index
    %c0_12 = arith.constant 0 : index
    %26 = vector.load %arg4[%c0_10, %c0_11, %c0_12] : memref<1x16x128xbf16, #tpu.memory_space<vmem>>, vector<1x16x128xbf16>
    tpu.vector_store %arg4[%c0_10, %c0_11, %c0_12], %25 {strides = array<i32>} : memref<1x16x128xbf16, #tpu.memory_space<vmem>>, vector<1x16x128xbf16>,
    return
  }
  func.func @transform_0(%arg0: i32, %arg1: i32) -> (i32, i32, i32) {
    %c0_i32 = arith.constant 0 : i32
    %c0_i32_0 = arith.constant 0 : i32
    %c0_i32_1 = arith.constant 0 : i32
    return %arg0, %c0_i32, %c0_i32_0 : i32, i32, i32
  }
  func.func @transform_1(%arg0: i32, %arg1: i32) -> (i32, i32) {
    %c0_i32 = arith.constant 0 : i32
    %c0_i32_0 = arith.constant 0 : i32
    return %c0_i32, %arg1 : i32, i32
  }
  func.func @transform_2(%arg0: i32, %arg1: i32) -> (i32, i32, i32) {
    %c0_i32 = arith.constant 0 : i32
    %c0_i32_0 = arith.constant 0 : i32
    return %arg0, %c0_i32, %arg1 : i32, i32, i32
  }
}

module attributes {stable_mosaic.version = 11 : i64} {
  func.func @_conv_in_kernel(%arg0: i32, %arg1: i32, %arg2: memref<1x16x128xbf16, #tpu.memory_space<vmem>>, %arg3: memref<128x128xbf16, #tpu.memory_space<vmem>>, %arg4: memref<1x16x128xbf16, #tpu.memory_space<vmem>>) attributes {dimension_semantics = [#tpu.dimension_semantics<parallel>, #tpu.dimension_semantics<parallel>], iteration_bounds = array<i64: 2, 1>, scalar_prefetch = 0 : i64, scratch_operands = 0 : i64, tpu.core_type = #tpu.core_type<tc>, window_params = [{transform_indices = @transform_0, window_bounds = array<i64: 1, 16, 128>}, {transform_indices = @transform_1, window_bounds = array<i64: 128, 128>}, {transform_indices = @transform_2, window_bounds = array<i64: 1, 16, 128>}]} {
    %c0 = arith.constant 0 : index
    %c0_0 = arith.constant 0 : index
    %c0_1 = arith.constant 0 : index
    %0 = vector.load %arg2[%c0, %c0_0, %c0_1] : memref<1x16x128xbf16, #tpu.memory_space<vmem>>, vector<1x16x128xbf16>
    %1 = vector.shape_cast %0 : vector<1x16x128xbf16> to vector<16x128xbf16>
    %c0_2 = arith.constant 0 : index
    %c0_3 = arith.constant 0 : index
    %2 = vector.load %arg3[%c0_2, %c0_3] : memref<128x128xbf16, #tpu.memory_space<vmem>>, vector<128x128xbf16>
    %cst = arith.constant dense<0.000000e+00> : vector<16x128xf32>
    %3 = tpu.matmul %1, %2, %cst {dimension_numbers = #tpu.dot_dimension_numbers<[1], [0], [0], [1], [0, 0, 1, 1], [], []>} : vector<16x128xbf16>, vector<128x128xbf16>, vector<16x128xf32> -> vector<16x128xf32>
    %cst_4 = arith.constant dense<0.000000e+00> : vector<128xf32>
    %4 = vector.multi_reduction <add>, %3, %cst_4 [0] : vector<16x128xf32> to vector<128xf32>
    %5 = vector.shape_cast %4 : vector<128xf32> to vector<1x128xf32>
    %cst_5 = arith.constant 1.600000e+01 : f32
    %6 = vector.broadcast %cst_5 : f32 to vector<1x128xf32>
    %7 = arith.divf %5, %6 : vector<1x128xf32>
    %8 = arith.mulf %3, %3 : vector<16x128xf32>
    %cst_6 = arith.constant dense<0.000000e+00> : vector<128xf32>
    %9 = vector.multi_reduction <add>, %8, %cst_6 [0] : vector<16x128xf32> to vector<128xf32>
    %10 = vector.shape_cast %9 : vector<128xf32> to vector<1x128xf32>
    %cst_7 = arith.constant 1.600000e+01 : f32
    %11 = vector.broadcast %cst_7 : f32 to vector<1x128xf32>
    %12 = arith.divf %10, %11 : vector<1x128xf32>
    %13 = arith.mulf %7, %7 : vector<1x128xf32>
    %14 = arith.subf %12, %13 : vector<1x128xf32>
    %cst_8 = arith.constant 0.000000e+00 : f32
    %15 = vector.broadcast %cst_8 : f32 to vector<1x128xf32>
    %16 = arith.maximumf %14, %15 : vector<1x128xf32>
    %17 = vector.broadcast %7 : vector<1x128xf32> to vector<16x128xf32>
    %18 = arith.subf %3, %17 : vector<16x128xf32>
    %cst_9 = arith.constant 9.99999974E-6 : f32
    %19 = vector.broadcast %cst_9 : f32 to vector<1x128xf32>
    %20 = arith.addf %16, %19 : vector<1x128xf32>
    %21 = math.rsqrt %20 : vector<1x128xf32>
    %22 = vector.broadcast %21 : vector<1x128xf32> to vector<16x128xf32>
    %23 = arith.mulf %18, %22 : vector<16x128xf32>
    %cst_10 = arith.constant 0.000000e+00 : f32
    %24 = vector.broadcast %cst_10 : f32 to vector<16x128xf32>
    %25 = arith.maximumf %23, %24 : vector<16x128xf32>
    %26 = vector.shape_cast %25 : vector<16x128xf32> to vector<1x16x128xf32>
    %27 = arith.truncf %26 : vector<1x16x128xf32> to vector<1x16x128xbf16>
    %c0_11 = arith.constant 0 : index
    %c0_12 = arith.constant 0 : index
    %c0_13 = arith.constant 0 : index
    %28 = vector.load %arg4[%c0_11, %c0_12, %c0_13] : memref<1x16x128xbf16, #tpu.memory_space<vmem>>, vector<1x16x128xbf16>
    tpu.vector_store %arg4[%c0_11, %c0_12, %c0_13], %27 {strides = array<i32>} : memref<1x16x128xbf16, #tpu.memory_space<vmem>>, vector<1x16x128xbf16>,
    return
  }
  func.func @transform_0(%arg0: i32, %arg1: i32) -> (i32, i32, i32) {
    %c0_i32 = arith.constant 0 : i32
    %c0_i32_0 = arith.constant 0 : i32
    %c0_i32_1 = arith.constant 0 : i32
    return %arg0, %c0_i32, %c0_i32_0 : i32, i32, i32
  }
  func.func @transform_1(%arg0: i32, %arg1: i32) -> (i32, i32) {
    %c0_i32 = arith.constant 0 : i32
    %c0_i32_0 = arith.constant 0 : i32
    return %c0_i32, %arg1 : i32, i32
  }
  func.func @transform_2(%arg0: i32, %arg1: i32) -> (i32, i32, i32) {
    %c0_i32 = arith.constant 0 : i32
    %c0_i32_0 = arith.constant 0 : i32
    return %arg0, %c0_i32, %arg1 : i32, i32, i32
  }
}

module attributes {stable_mosaic.version = 11 : i64} {
  func.func @_conv_in_add_kernel(%arg0: i32, %arg1: i32, %arg2: memref<1x16x256xbf16, #tpu.memory_space<vmem>>, %arg3: memref<256x128xbf16, #tpu.memory_space<vmem>>, %arg4: memref<1x16x128xbf16, #tpu.memory_space<vmem>>, %arg5: memref<1x16x128xbf16, #tpu.memory_space<vmem>>) attributes {dimension_semantics = [#tpu.dimension_semantics<parallel>, #tpu.dimension_semantics<parallel>], iteration_bounds = array<i64: 2, 1>, scalar_prefetch = 0 : i64, scratch_operands = 0 : i64, tpu.core_type = #tpu.core_type<tc>, window_params = [{transform_indices = @transform_0, window_bounds = array<i64: 1, 16, 256>}, {transform_indices = @transform_1, window_bounds = array<i64: 256, 128>}, {transform_indices = @transform_2, window_bounds = array<i64: 1, 16, 128>}, {transform_indices = @transform_3, window_bounds = array<i64: 1, 16, 128>}]} {
    %c0 = arith.constant 0 : index
    %c0_0 = arith.constant 0 : index
    %c0_1 = arith.constant 0 : index
    %0 = vector.load %arg2[%c0, %c0_0, %c0_1] : memref<1x16x256xbf16, #tpu.memory_space<vmem>>, vector<1x16x256xbf16>
    %1 = vector.shape_cast %0 : vector<1x16x256xbf16> to vector<16x256xbf16>
    %c0_2 = arith.constant 0 : index
    %c0_3 = arith.constant 0 : index
    %2 = vector.load %arg3[%c0_2, %c0_3] : memref<256x128xbf16, #tpu.memory_space<vmem>>, vector<256x128xbf16>
    %cst = arith.constant dense<0.000000e+00> : vector<16x128xf32>
    %3 = tpu.matmul %1, %2, %cst {dimension_numbers = #tpu.dot_dimension_numbers<[1], [0], [0], [1], [0, 0, 1, 1], [], []>} : vector<16x256xbf16>, vector<256x128xbf16>, vector<16x128xf32> -> vector<16x128xf32>
    %cst_4 = arith.constant dense<0.000000e+00> : vector<128xf32>
    %4 = vector.multi_reduction <add>, %3, %cst_4 [0] : vector<16x128xf32> to vector<128xf32>
    %5 = vector.shape_cast %4 : vector<128xf32> to vector<1x128xf32>
    %cst_5 = arith.constant 1.600000e+01 : f32
    %6 = vector.broadcast %cst_5 : f32 to vector<1x128xf32>
    %7 = arith.divf %5, %6 : vector<1x128xf32>
    %8 = arith.mulf %3, %3 : vector<16x128xf32>
    %cst_6 = arith.constant dense<0.000000e+00> : vector<128xf32>
    %9 = vector.multi_reduction <add>, %8, %cst_6 [0] : vector<16x128xf32> to vector<128xf32>
    %10 = vector.shape_cast %9 : vector<128xf32> to vector<1x128xf32>
    %cst_7 = arith.constant 1.600000e+01 : f32
    %11 = vector.broadcast %cst_7 : f32 to vector<1x128xf32>
    %12 = arith.divf %10, %11 : vector<1x128xf32>
    %13 = arith.mulf %7, %7 : vector<1x128xf32>
    %14 = arith.subf %12, %13 : vector<1x128xf32>
    %cst_8 = arith.constant 0.000000e+00 : f32
    %15 = vector.broadcast %cst_8 : f32 to vector<1x128xf32>
    %16 = arith.maximumf %14, %15 : vector<1x128xf32>
    %17 = vector.broadcast %7 : vector<1x128xf32> to vector<16x128xf32>
    %18 = arith.subf %3, %17 : vector<16x128xf32>
    %cst_9 = arith.constant 9.99999974E-6 : f32
    %19 = vector.broadcast %cst_9 : f32 to vector<1x128xf32>
    %20 = arith.addf %16, %19 : vector<1x128xf32>
    %21 = math.rsqrt %20 : vector<1x128xf32>
    %22 = vector.broadcast %21 : vector<1x128xf32> to vector<16x128xf32>
    %23 = arith.mulf %18, %22 : vector<16x128xf32>
    %c0_10 = arith.constant 0 : index
    %c0_11 = arith.constant 0 : index
    %c0_12 = arith.constant 0 : index
    %24 = vector.load %arg4[%c0_10, %c0_11, %c0_12] : memref<1x16x128xbf16, #tpu.memory_space<vmem>>, vector<1x16x128xbf16>
    %25 = vector.shape_cast %24 : vector<1x16x128xbf16> to vector<16x128xbf16>
    %26 = arith.extf %25 : vector<16x128xbf16> to vector<16x128xf32>
    %27 = arith.addf %23, %26 : vector<16x128xf32>
    %cst_13 = arith.constant 0.000000e+00 : f32
    %28 = vector.broadcast %cst_13 : f32 to vector<16x128xf32>
    %29 = arith.maximumf %27, %28 : vector<16x128xf32>
    %30 = vector.shape_cast %29 : vector<16x128xf32> to vector<1x16x128xf32>
    %31 = arith.truncf %30 : vector<1x16x128xf32> to vector<1x16x128xbf16>
    %c0_14 = arith.constant 0 : index
    %c0_15 = arith.constant 0 : index
    %c0_16 = arith.constant 0 : index
    %32 = vector.load %arg5[%c0_14, %c0_15, %c0_16] : memref<1x16x128xbf16, #tpu.memory_space<vmem>>, vector<1x16x128xbf16>
    tpu.vector_store %arg5[%c0_14, %c0_15, %c0_16], %31 {strides = array<i32>} : memref<1x16x128xbf16, #tpu.memory_space<vmem>>, vector<1x16x128xbf16>,
    return
  }
  func.func @transform_0(%arg0: i32, %arg1: i32) -> (i32, i32, i32) {
    %c0_i32 = arith.constant 0 : i32
    %c0_i32_0 = arith.constant 0 : i32
    %c0_i32_1 = arith.constant 0 : i32
    return %arg0, %c0_i32, %c0_i32_0 : i32, i32, i32
  }
  func.func @transform_1(%arg0: i32, %arg1: i32) -> (i32, i32) {
    %c0_i32 = arith.constant 0 : i32
    %c0_i32_0 = arith.constant 0 : i32
    return %c0_i32, %arg1 : i32, i32
  }
  func.func @transform_2(%arg0: i32, %arg1: i32) -> (i32, i32, i32) {
    %c0_i32 = arith.constant 0 : i32
    %c0_i32_0 = arith.constant 0 : i32
    return %arg0, %c0_i32, %arg1 : i32, i32, i32
  }
  func.func @transform_3(%arg0: i32, %arg1: i32) -> (i32, i32, i32) {
    %c0_i32 = arith.constant 0 : i32
    %c0_i32_0 = arith.constant 0 : i32
    return %arg0, %c0_i32, %arg1 : i32, i32, i32
  }
}

module attributes {stable_mosaic.version = 11 : i64} {
  func.func @_conv_in_kernel(%arg0: i32, %arg1: i32, %arg2: memref<1x16x256xbf16, #tpu.memory_space<vmem>>, %arg3: memref<256x128xbf16, #tpu.memory_space<vmem>>, %arg4: memref<1x16x128xbf16, #tpu.memory_space<vmem>>) attributes {dimension_semantics = [#tpu.dimension_semantics<parallel>, #tpu.dimension_semantics<parallel>], iteration_bounds = array<i64: 2, 1>, scalar_prefetch = 0 : i64, scratch_operands = 0 : i64, tpu.core_type = #tpu.core_type<tc>, window_params = [{transform_indices = @transform_0, window_bounds = array<i64: 1, 16, 256>}, {transform_indices = @transform_1, window_bounds = array<i64: 256, 128>}, {transform_indices = @transform_2, window_bounds = array<i64: 1, 16, 128>}]} {
    %c0 = arith.constant 0 : index
    %c0_0 = arith.constant 0 : index
    %c0_1 = arith.constant 0 : index
    %0 = vector.load %arg2[%c0, %c0_0, %c0_1] : memref<1x16x256xbf16, #tpu.memory_space<vmem>>, vector<1x16x256xbf16>
    %1 = vector.shape_cast %0 : vector<1x16x256xbf16> to vector<16x256xbf16>
    %c0_2 = arith.constant 0 : index
    %c0_3 = arith.constant 0 : index
    %2 = vector.load %arg3[%c0_2, %c0_3] : memref<256x128xbf16, #tpu.memory_space<vmem>>, vector<256x128xbf16>
    %cst = arith.constant dense<0.000000e+00> : vector<16x128xf32>
    %3 = tpu.matmul %1, %2, %cst {dimension_numbers = #tpu.dot_dimension_numbers<[1], [0], [0], [1], [0, 0, 1, 1], [], []>} : vector<16x256xbf16>, vector<256x128xbf16>, vector<16x128xf32> -> vector<16x128xf32>
    %cst_4 = arith.constant dense<0.000000e+00> : vector<128xf32>
    %4 = vector.multi_reduction <add>, %3, %cst_4 [0] : vector<16x128xf32> to vector<128xf32>
    %5 = vector.shape_cast %4 : vector<128xf32> to vector<1x128xf32>
    %cst_5 = arith.constant 1.600000e+01 : f32
    %6 = vector.broadcast %cst_5 : f32 to vector<1x128xf32>
    %7 = arith.divf %5, %6 : vector<1x128xf32>
    %8 = arith.mulf %3, %3 : vector<16x128xf32>
    %cst_6 = arith.constant dense<0.000000e+00> : vector<128xf32>
    %9 = vector.multi_reduction <add>, %8, %cst_6 [0] : vector<16x128xf32> to vector<128xf32>
    %10 = vector.shape_cast %9 : vector<128xf32> to vector<1x128xf32>
    %cst_7 = arith.constant 1.600000e+01 : f32
    %11 = vector.broadcast %cst_7 : f32 to vector<1x128xf32>
    %12 = arith.divf %10, %11 : vector<1x128xf32>
    %13 = arith.mulf %7, %7 : vector<1x128xf32>
    %14 = arith.subf %12, %13 : vector<1x128xf32>
    %cst_8 = arith.constant 0.000000e+00 : f32
    %15 = vector.broadcast %cst_8 : f32 to vector<1x128xf32>
    %16 = arith.maximumf %14, %15 : vector<1x128xf32>
    %17 = vector.broadcast %7 : vector<1x128xf32> to vector<16x128xf32>
    %18 = arith.subf %3, %17 : vector<16x128xf32>
    %cst_9 = arith.constant 9.99999974E-6 : f32
    %19 = vector.broadcast %cst_9 : f32 to vector<1x128xf32>
    %20 = arith.addf %16, %19 : vector<1x128xf32>
    %21 = math.rsqrt %20 : vector<1x128xf32>
    %22 = vector.broadcast %21 : vector<1x128xf32> to vector<16x128xf32>
    %23 = arith.mulf %18, %22 : vector<16x128xf32>
    %cst_10 = arith.constant 0.000000e+00 : f32
    %24 = vector.broadcast %cst_10 : f32 to vector<16x128xf32>
    %25 = arith.maximumf %23, %24 : vector<16x128xf32>
    %26 = vector.shape_cast %25 : vector<16x128xf32> to vector<1x16x128xf32>
    %27 = arith.truncf %26 : vector<1x16x128xf32> to vector<1x16x128xbf16>
    %c0_11 = arith.constant 0 : index
    %c0_12 = arith.constant 0 : index
    %c0_13 = arith.constant 0 : index
    %28 = vector.load %arg4[%c0_11, %c0_12, %c0_13] : memref<1x16x128xbf16, #tpu.memory_space<vmem>>, vector<1x16x128xbf16>
    tpu.vector_store %arg4[%c0_11, %c0_12, %c0_13], %27 {strides = array<i32>} : memref<1x16x128xbf16, #tpu.memory_space<vmem>>, vector<1x16x128xbf16>,
    return
  }
  func.func @transform_0(%arg0: i32, %arg1: i32) -> (i32, i32, i32) {
    %c0_i32 = arith.constant 0 : i32
    %c0_i32_0 = arith.constant 0 : i32
    %c0_i32_1 = arith.constant 0 : i32
    return %arg0, %c0_i32, %c0_i32_0 : i32, i32, i32
  }
  func.func @transform_1(%arg0: i32, %arg1: i32) -> (i32, i32) {
    %c0_i32 = arith.constant 0 : i32
    %c0_i32_0 = arith.constant 0 : i32
    return %c0_i32, %arg1 : i32, i32
  }
  func.func @transform_2(%arg0: i32, %arg1: i32) -> (i32, i32, i32) {
    %c0_i32 = arith.constant 0 : i32
    %c0_i32_0 = arith.constant 0 : i32
    return %arg0, %c0_i32, %arg1 : i32, i32, i32
  }
}

module attributes {stable_mosaic.version = 11 : i64} {
  func.func @_conv_in_kernel(%arg0: i32, %arg1: i32, %arg2: memref<1x4x128xbf16, #tpu.memory_space<vmem>>, %arg3: memref<128x128xbf16, #tpu.memory_space<vmem>>, %arg4: memref<1x4x128xbf16, #tpu.memory_space<vmem>>) attributes {dimension_semantics = [#tpu.dimension_semantics<parallel>, #tpu.dimension_semantics<parallel>], iteration_bounds = array<i64: 2, 1>, scalar_prefetch = 0 : i64, scratch_operands = 0 : i64, tpu.core_type = #tpu.core_type<tc>, window_params = [{transform_indices = @transform_0, window_bounds = array<i64: 1, 4, 128>}, {transform_indices = @transform_1, window_bounds = array<i64: 128, 128>}, {transform_indices = @transform_2, window_bounds = array<i64: 1, 4, 128>}]} {
    %c0 = arith.constant 0 : index
    %c0_0 = arith.constant 0 : index
    %c0_1 = arith.constant 0 : index
    %0 = vector.load %arg2[%c0, %c0_0, %c0_1] : memref<1x4x128xbf16, #tpu.memory_space<vmem>>, vector<1x4x128xbf16>
    %1 = vector.shape_cast %0 : vector<1x4x128xbf16> to vector<4x128xbf16>
    %c0_2 = arith.constant 0 : index
    %c0_3 = arith.constant 0 : index
    %2 = vector.load %arg3[%c0_2, %c0_3] : memref<128x128xbf16, #tpu.memory_space<vmem>>, vector<128x128xbf16>
    %cst = arith.constant dense<0.000000e+00> : vector<4x128xf32>
    %3 = tpu.matmul %1, %2, %cst {dimension_numbers = #tpu.dot_dimension_numbers<[1], [0], [0], [1], [0, 0, 1, 1], [], []>} : vector<4x128xbf16>, vector<128x128xbf16>, vector<4x128xf32> -> vector<4x128xf32>
    %cst_4 = arith.constant dense<0.000000e+00> : vector<128xf32>
    %4 = vector.multi_reduction <add>, %3, %cst_4 [0] : vector<4x128xf32> to vector<128xf32>
    %5 = vector.shape_cast %4 : vector<128xf32> to vector<1x128xf32>
    %cst_5 = arith.constant 4.000000e+00 : f32
    %6 = vector.broadcast %cst_5 : f32 to vector<1x128xf32>
    %7 = arith.divf %5, %6 : vector<1x128xf32>
    %8 = arith.mulf %3, %3 : vector<4x128xf32>
    %cst_6 = arith.constant dense<0.000000e+00> : vector<128xf32>
    %9 = vector.multi_reduction <add>, %8, %cst_6 [0] : vector<4x128xf32> to vector<128xf32>
    %10 = vector.shape_cast %9 : vector<128xf32> to vector<1x128xf32>
    %cst_7 = arith.constant 4.000000e+00 : f32
    %11 = vector.broadcast %cst_7 : f32 to vector<1x128xf32>
    %12 = arith.divf %10, %11 : vector<1x128xf32>
    %13 = arith.mulf %7, %7 : vector<1x128xf32>
    %14 = arith.subf %12, %13 : vector<1x128xf32>
    %cst_8 = arith.constant 0.000000e+00 : f32
    %15 = vector.broadcast %cst_8 : f32 to vector<1x128xf32>
    %16 = arith.maximumf %14, %15 : vector<1x128xf32>
    %17 = vector.broadcast %7 : vector<1x128xf32> to vector<4x128xf32>
    %18 = arith.subf %3, %17 : vector<4x128xf32>
    %cst_9 = arith.constant 9.99999974E-6 : f32
    %19 = vector.broadcast %cst_9 : f32 to vector<1x128xf32>
    %20 = arith.addf %16, %19 : vector<1x128xf32>
    %21 = math.rsqrt %20 : vector<1x128xf32>
    %22 = vector.broadcast %21 : vector<1x128xf32> to vector<4x128xf32>
    %23 = arith.mulf %18, %22 : vector<4x128xf32>
    %24 = vector.shape_cast %23 : vector<4x128xf32> to vector<1x4x128xf32>
    %25 = arith.truncf %24 : vector<1x4x128xf32> to vector<1x4x128xbf16>
    %c0_10 = arith.constant 0 : index
    %c0_11 = arith.constant 0 : index
    %c0_12 = arith.constant 0 : index
    %26 = vector.load %arg4[%c0_10, %c0_11, %c0_12] : memref<1x4x128xbf16, #tpu.memory_space<vmem>>, vector<1x4x128xbf16>
    tpu.vector_store %arg4[%c0_10, %c0_11, %c0_12], %25 {strides = array<i32>} : memref<1x4x128xbf16, #tpu.memory_space<vmem>>, vector<1x4x128xbf16>,
    return
  }
  func.func @transform_0(%arg0: i32, %arg1: i32) -> (i32, i32, i32) {
    %c0_i32 = arith.constant 0 : i32
    %c0_i32_0 = arith.constant 0 : i32
    %c0_i32_1 = arith.constant 0 : i32
    return %arg0, %c0_i32, %c0_i32_0 : i32, i32, i32
  }
  func.func @transform_1(%arg0: i32, %arg1: i32) -> (i32, i32) {
    %c0_i32 = arith.constant 0 : i32
    %c0_i32_0 = arith.constant 0 : i32
    return %c0_i32, %arg1 : i32, i32
  }
  func.func @transform_2(%arg0: i32, %arg1: i32) -> (i32, i32, i32) {
    %c0_i32 = arith.constant 0 : i32
    %c0_i32_0 = arith.constant 0 : i32
    return %arg0, %c0_i32, %arg1 : i32, i32, i32
  }
}

module attributes {stable_mosaic.version = 11 : i64} {
  func.func @_conv_in_kernel(%arg0: i32, %arg1: i32, %arg2: memref<1x4x384xbf16, #tpu.memory_space<vmem>>, %arg3: memref<384x128xbf16, #tpu.memory_space<vmem>>, %arg4: memref<1x4x128xbf16, #tpu.memory_space<vmem>>) attributes {dimension_semantics = [#tpu.dimension_semantics<parallel>, #tpu.dimension_semantics<parallel>], iteration_bounds = array<i64: 2, 1>, scalar_prefetch = 0 : i64, scratch_operands = 0 : i64, tpu.core_type = #tpu.core_type<tc>, window_params = [{transform_indices = @transform_0, window_bounds = array<i64: 1, 4, 384>}, {transform_indices = @transform_1, window_bounds = array<i64: 384, 128>}, {transform_indices = @transform_2, window_bounds = array<i64: 1, 4, 128>}]} {
    %c0 = arith.constant 0 : index
    %c0_0 = arith.constant 0 : index
    %c0_1 = arith.constant 0 : index
    %0 = vector.load %arg2[%c0, %c0_0, %c0_1] : memref<1x4x384xbf16, #tpu.memory_space<vmem>>, vector<1x4x384xbf16>
    %1 = vector.shape_cast %0 : vector<1x4x384xbf16> to vector<4x384xbf16>
    %c0_2 = arith.constant 0 : index
    %c0_3 = arith.constant 0 : index
    %2 = vector.load %arg3[%c0_2, %c0_3] : memref<384x128xbf16, #tpu.memory_space<vmem>>, vector<384x128xbf16>
    %cst = arith.constant dense<0.000000e+00> : vector<4x128xf32>
    %3 = tpu.matmul %1, %2, %cst {dimension_numbers = #tpu.dot_dimension_numbers<[1], [0], [0], [1], [0, 0, 1, 1], [], []>} : vector<4x384xbf16>, vector<384x128xbf16>, vector<4x128xf32> -> vector<4x128xf32>
    %cst_4 = arith.constant dense<0.000000e+00> : vector<128xf32>
    %4 = vector.multi_reduction <add>, %3, %cst_4 [0] : vector<4x128xf32> to vector<128xf32>
    %5 = vector.shape_cast %4 : vector<128xf32> to vector<1x128xf32>
    %cst_5 = arith.constant 4.000000e+00 : f32
    %6 = vector.broadcast %cst_5 : f32 to vector<1x128xf32>
    %7 = arith.divf %5, %6 : vector<1x128xf32>
    %8 = arith.mulf %3, %3 : vector<4x128xf32>
    %cst_6 = arith.constant dense<0.000000e+00> : vector<128xf32>
    %9 = vector.multi_reduction <add>, %8, %cst_6 [0] : vector<4x128xf32> to vector<128xf32>
    %10 = vector.shape_cast %9 : vector<128xf32> to vector<1x128xf32>
    %cst_7 = arith.constant 4.000000e+00 : f32
    %11 = vector.broadcast %cst_7 : f32 to vector<1x128xf32>
    %12 = arith.divf %10, %11 : vector<1x128xf32>
    %13 = arith.mulf %7, %7 : vector<1x128xf32>
    %14 = arith.subf %12, %13 : vector<1x128xf32>
    %cst_8 = arith.constant 0.000000e+00 : f32
    %15 = vector.broadcast %cst_8 : f32 to vector<1x128xf32>
    %16 = arith.maximumf %14, %15 : vector<1x128xf32>
    %17 = vector.broadcast %7 : vector<1x128xf32> to vector<4x128xf32>
    %18 = arith.subf %3, %17 : vector<4x128xf32>
    %cst_9 = arith.constant 9.99999974E-6 : f32
    %19 = vector.broadcast %cst_9 : f32 to vector<1x128xf32>
    %20 = arith.addf %16, %19 : vector<1x128xf32>
    %21 = math.rsqrt %20 : vector<1x128xf32>
    %22 = vector.broadcast %21 : vector<1x128xf32> to vector<4x128xf32>
    %23 = arith.mulf %18, %22 : vector<4x128xf32>
    %cst_10 = arith.constant 0.000000e+00 : f32
    %24 = vector.broadcast %cst_10 : f32 to vector<4x128xf32>
    %25 = arith.maximumf %23, %24 : vector<4x128xf32>
    %26 = vector.shape_cast %25 : vector<4x128xf32> to vector<1x4x128xf32>
    %27 = arith.truncf %26 : vector<1x4x128xf32> to vector<1x4x128xbf16>
    %c0_11 = arith.constant 0 : index
    %c0_12 = arith.constant 0 : index
    %c0_13 = arith.constant 0 : index
    %28 = vector.load %arg4[%c0_11, %c0_12, %c0_13] : memref<1x4x128xbf16, #tpu.memory_space<vmem>>, vector<1x4x128xbf16>
    tpu.vector_store %arg4[%c0_11, %c0_12, %c0_13], %27 {strides = array<i32>} : memref<1x4x128xbf16, #tpu.memory_space<vmem>>, vector<1x4x128xbf16>,
    return
  }
  func.func @transform_0(%arg0: i32, %arg1: i32) -> (i32, i32, i32) {
    %c0_i32 = arith.constant 0 : i32
    %c0_i32_0 = arith.constant 0 : i32
    %c0_i32_1 = arith.constant 0 : i32
    return %arg0, %c0_i32, %c0_i32_0 : i32, i32, i32
  }
  func.func @transform_1(%arg0: i32, %arg1: i32) -> (i32, i32) {
    %c0_i32 = arith.constant 0 : i32
    %c0_i32_0 = arith.constant 0 : i32
    return %c0_i32, %arg1 : i32, i32
  }
  func.func @transform_2(%arg0: i32, %arg1: i32) -> (i32, i32, i32) {
    %c0_i32 = arith.constant 0 : i32
    %c0_i32_0 = arith.constant 0 : i32
    return %arg0, %c0_i32, %arg1 : i32, i32, i32
  }
}

module attributes {stable_mosaic.version = 11 : i64} {
  func.func @_conv_in_kernel(%arg0: i32, %arg1: i32, %arg2: memref<1x4x256xbf16, #tpu.memory_space<vmem>>, %arg3: memref<256x128xbf16, #tpu.memory_space<vmem>>, %arg4: memref<1x4x128xbf16, #tpu.memory_space<vmem>>) attributes {dimension_semantics = [#tpu.dimension_semantics<parallel>, #tpu.dimension_semantics<parallel>], iteration_bounds = array<i64: 2, 1>, scalar_prefetch = 0 : i64, scratch_operands = 0 : i64, tpu.core_type = #tpu.core_type<tc>, window_params = [{transform_indices = @transform_0, window_bounds = array<i64: 1, 4, 256>}, {transform_indices = @transform_1, window_bounds = array<i64: 256, 128>}, {transform_indices = @transform_2, window_bounds = array<i64: 1, 4, 128>}]} {
    %c0 = arith.constant 0 : index
    %c0_0 = arith.constant 0 : index
    %c0_1 = arith.constant 0 : index
    %0 = vector.load %arg2[%c0, %c0_0, %c0_1] : memref<1x4x256xbf16, #tpu.memory_space<vmem>>, vector<1x4x256xbf16>
    %1 = vector.shape_cast %0 : vector<1x4x256xbf16> to vector<4x256xbf16>
    %c0_2 = arith.constant 0 : index
    %c0_3 = arith.constant 0 : index
    %2 = vector.load %arg3[%c0_2, %c0_3] : memref<256x128xbf16, #tpu.memory_space<vmem>>, vector<256x128xbf16>
    %cst = arith.constant dense<0.000000e+00> : vector<4x128xf32>
    %3 = tpu.matmul %1, %2, %cst {dimension_numbers = #tpu.dot_dimension_numbers<[1], [0], [0], [1], [0, 0, 1, 1], [], []>} : vector<4x256xbf16>, vector<256x128xbf16>, vector<4x128xf32> -> vector<4x128xf32>
    %cst_4 = arith.constant dense<0.000000e+00> : vector<128xf32>
    %4 = vector.multi_reduction <add>, %3, %cst_4 [0] : vector<4x128xf32> to vector<128xf32>
    %5 = vector.shape_cast %4 : vector<128xf32> to vector<1x128xf32>
    %cst_5 = arith.constant 4.000000e+00 : f32
    %6 = vector.broadcast %cst_5 : f32 to vector<1x128xf32>
    %7 = arith.divf %5, %6 : vector<1x128xf32>
    %8 = arith.mulf %3, %3 : vector<4x128xf32>
    %cst_6 = arith.constant dense<0.000000e+00> : vector<128xf32>
    %9 = vector.multi_reduction <add>, %8, %cst_6 [0] : vector<4x128xf32> to vector<128xf32>
    %10 = vector.shape_cast %9 : vector<128xf32> to vector<1x128xf32>
    %cst_7 = arith.constant 4.000000e+00 : f32
    %11 = vector.broadcast %cst_7 : f32 to vector<1x128xf32>
    %12 = arith.divf %10, %11 : vector<1x128xf32>
    %13 = arith.mulf %7, %7 : vector<1x128xf32>
    %14 = arith.subf %12, %13 : vector<1x128xf32>
    %cst_8 = arith.constant 0.000000e+00 : f32
    %15 = vector.broadcast %cst_8 : f32 to vector<1x128xf32>
    %16 = arith.maximumf %14, %15 : vector<1x128xf32>
    %17 = vector.broadcast %7 : vector<1x128xf32> to vector<4x128xf32>
    %18 = arith.subf %3, %17 : vector<4x128xf32>
    %cst_9 = arith.constant 9.99999974E-6 : f32
    %19 = vector.broadcast %cst_9 : f32 to vector<1x128xf32>
    %20 = arith.addf %16, %19 : vector<1x128xf32>
    %21 = math.rsqrt %20 : vector<1x128xf32>
    %22 = vector.broadcast %21 : vector<1x128xf32> to vector<4x128xf32>
    %23 = arith.mulf %18, %22 : vector<4x128xf32>
    %cst_10 = arith.constant 0.000000e+00 : f32
    %24 = vector.broadcast %cst_10 : f32 to vector<4x128xf32>
    %25 = arith.maximumf %23, %24 : vector<4x128xf32>
    %26 = vector.shape_cast %25 : vector<4x128xf32> to vector<1x4x128xf32>
    %27 = arith.truncf %26 : vector<1x4x128xf32> to vector<1x4x128xbf16>
    %c0_11 = arith.constant 0 : index
    %c0_12 = arith.constant 0 : index
    %c0_13 = arith.constant 0 : index
    %28 = vector.load %arg4[%c0_11, %c0_12, %c0_13] : memref<1x4x128xbf16, #tpu.memory_space<vmem>>, vector<1x4x128xbf16>
    tpu.vector_store %arg4[%c0_11, %c0_12, %c0_13], %27 {strides = array<i32>} : memref<1x4x128xbf16, #tpu.memory_space<vmem>>, vector<1x4x128xbf16>,
    return
  }
  func.func @transform_0(%arg0: i32, %arg1: i32) -> (i32, i32, i32) {
    %c0_i32 = arith.constant 0 : i32
    %c0_i32_0 = arith.constant 0 : i32
    %c0_i32_1 = arith.constant 0 : i32
    return %arg0, %c0_i32, %c0_i32_0 : i32, i32, i32
  }
  func.func @transform_1(%arg0: i32, %arg1: i32) -> (i32, i32) {
    %c0_i32 = arith.constant 0 : i32
    %c0_i32_0 = arith.constant 0 : i32
    return %c0_i32, %arg1 : i32, i32
  }
  func.func @transform_2(%arg0: i32, %arg1: i32) -> (i32, i32, i32) {
    %c0_i32 = arith.constant 0 : i32
    %c0_i32_0 = arith.constant 0 : i32
    return %arg0, %c0_i32, %arg1 : i32, i32, i32
  }
}

module attributes {stable_mosaic.version = 11 : i64} {
  func.func @_conv_in_add_kernel(%arg0: i32, %arg1: i32, %arg2: memref<1x4x384xbf16, #tpu.memory_space<vmem>>, %arg3: memref<384x128xbf16, #tpu.memory_space<vmem>>, %arg4: memref<1x4x128xbf16, #tpu.memory_space<vmem>>, %arg5: memref<1x4x128xbf16, #tpu.memory_space<vmem>>) attributes {dimension_semantics = [#tpu.dimension_semantics<parallel>, #tpu.dimension_semantics<parallel>], iteration_bounds = array<i64: 2, 1>, scalar_prefetch = 0 : i64, scratch_operands = 0 : i64, tpu.core_type = #tpu.core_type<tc>, window_params = [{transform_indices = @transform_0, window_bounds = array<i64: 1, 4, 384>}, {transform_indices = @transform_1, window_bounds = array<i64: 384, 128>}, {transform_indices = @transform_2, window_bounds = array<i64: 1, 4, 128>}, {transform_indices = @transform_3, window_bounds = array<i64: 1, 4, 128>}]} {
    %c0 = arith.constant 0 : index
    %c0_0 = arith.constant 0 : index
    %c0_1 = arith.constant 0 : index
    %0 = vector.load %arg2[%c0, %c0_0, %c0_1] : memref<1x4x384xbf16, #tpu.memory_space<vmem>>, vector<1x4x384xbf16>
    %1 = vector.shape_cast %0 : vector<1x4x384xbf16> to vector<4x384xbf16>
    %c0_2 = arith.constant 0 : index
    %c0_3 = arith.constant 0 : index
    %2 = vector.load %arg3[%c0_2, %c0_3] : memref<384x128xbf16, #tpu.memory_space<vmem>>, vector<384x128xbf16>
    %cst = arith.constant dense<0.000000e+00> : vector<4x128xf32>
    %3 = tpu.matmul %1, %2, %cst {dimension_numbers = #tpu.dot_dimension_numbers<[1], [0], [0], [1], [0, 0, 1, 1], [], []>} : vector<4x384xbf16>, vector<384x128xbf16>, vector<4x128xf32> -> vector<4x128xf32>
    %cst_4 = arith.constant dense<0.000000e+00> : vector<128xf32>
    %4 = vector.multi_reduction <add>, %3, %cst_4 [0] : vector<4x128xf32> to vector<128xf32>
    %5 = vector.shape_cast %4 : vector<128xf32> to vector<1x128xf32>
    %cst_5 = arith.constant 4.000000e+00 : f32
    %6 = vector.broadcast %cst_5 : f32 to vector<1x128xf32>
    %7 = arith.divf %5, %6 : vector<1x128xf32>
    %8 = arith.mulf %3, %3 : vector<4x128xf32>
    %cst_6 = arith.constant dense<0.000000e+00> : vector<128xf32>
    %9 = vector.multi_reduction <add>, %8, %cst_6 [0] : vector<4x128xf32> to vector<128xf32>
    %10 = vector.shape_cast %9 : vector<128xf32> to vector<1x128xf32>
    %cst_7 = arith.constant 4.000000e+00 : f32
    %11 = vector.broadcast %cst_7 : f32 to vector<1x128xf32>
    %12 = arith.divf %10, %11 : vector<1x128xf32>
    %13 = arith.mulf %7, %7 : vector<1x128xf32>
    %14 = arith.subf %12, %13 : vector<1x128xf32>
    %cst_8 = arith.constant 0.000000e+00 : f32
    %15 = vector.broadcast %cst_8 : f32 to vector<1x128xf32>
    %16 = arith.maximumf %14, %15 : vector<1x128xf32>
    %17 = vector.broadcast %7 : vector<1x128xf32> to vector<4x128xf32>
    %18 = arith.subf %3, %17 : vector<4x128xf32>
    %cst_9 = arith.constant 9.99999974E-6 : f32
    %19 = vector.broadcast %cst_9 : f32 to vector<1x128xf32>
    %20 = arith.addf %16, %19 : vector<1x128xf32>
    %21 = math.rsqrt %20 : vector<1x128xf32>
    %22 = vector.broadcast %21 : vector<1x128xf32> to vector<4x128xf32>
    %23 = arith.mulf %18, %22 : vector<4x128xf32>
    %c0_10 = arith.constant 0 : index
    %c0_11 = arith.constant 0 : index
    %c0_12 = arith.constant 0 : index
    %24 = vector.load %arg4[%c0_10, %c0_11, %c0_12] : memref<1x4x128xbf16, #tpu.memory_space<vmem>>, vector<1x4x128xbf16>
    %25 = vector.shape_cast %24 : vector<1x4x128xbf16> to vector<4x128xbf16>
    %26 = arith.extf %25 : vector<4x128xbf16> to vector<4x128xf32>
    %27 = arith.addf %23, %26 : vector<4x128xf32>
    %cst_13 = arith.constant 0.000000e+00 : f32
    %28 = vector.broadcast %cst_13 : f32 to vector<4x128xf32>
    %29 = arith.maximumf %27, %28 : vector<4x128xf32>
    %30 = vector.shape_cast %29 : vector<4x128xf32> to vector<1x4x128xf32>
    %31 = arith.truncf %30 : vector<1x4x128xf32> to vector<1x4x128xbf16>
    %c0_14 = arith.constant 0 : index
    %c0_15 = arith.constant 0 : index
    %c0_16 = arith.constant 0 : index
    %32 = vector.load %arg5[%c0_14, %c0_15, %c0_16] : memref<1x4x128xbf16, #tpu.memory_space<vmem>>, vector<1x4x128xbf16>
    tpu.vector_store %arg5[%c0_14, %c0_15, %c0_16], %31 {strides = array<i32>} : memref<1x4x128xbf16, #tpu.memory_space<vmem>>, vector<1x4x128xbf16>,
    return
  }
  func.func @transform_0(%arg0: i32, %arg1: i32) -> (i32, i32, i32) {
    %c0_i32 = arith.constant 0 : i32
    %c0_i32_0 = arith.constant 0 : i32
    %c0_i32_1 = arith.constant 0 : i32
    return %arg0, %c0_i32, %c0_i32_0 : i32, i32, i32
  }
  func.func @transform_1(%arg0: i32, %arg1: i32) -> (i32, i32) {
    %c0_i32 = arith.constant 0 : i32
    %c0_i32_0 = arith.constant 0 : i32
    return %c0_i32, %arg1 : i32, i32
  }
  func.func @transform_2(%arg0: i32, %arg1: i32) -> (i32, i32, i32) {
    %c0_i32 = arith.constant 0 : i32
    %c0_i32_0 = arith.constant 0 : i32
    return %arg0, %c0_i32, %arg1 : i32, i32, i32
  }
  func.func @transform_3(%arg0: i32, %arg1: i32) -> (i32, i32, i32) {
    %c0_i32 = arith.constant 0 : i32
    %c0_i32_0 = arith.constant 0 : i32
    return %arg0, %c0_i32, %arg1 : i32, i32, i32
  }
}

module attributes {stable_mosaic.version = 11 : i64} {
  func.func @_gap_fc_kernel(%arg0: i32, %arg1: memref<2x4x128xbf16, #tpu.memory_space<vmem>>, %arg2: memref<128x128xbf16, #tpu.memory_space<vmem>>, %arg3: memref<1x128xf32, #tpu.memory_space<vmem>>, %arg4: memref<2x128xf32, #tpu.memory_space<vmem>>, %arg5: memref<2x128xf32, #tpu.memory_space<vmem>>) attributes {dimension_semantics = [#tpu.dimension_semantics<arbitrary>], iteration_bounds = array<i64: 1>, scalar_prefetch = 0 : i64, scratch_operands = 0 : i64, tpu.core_type = #tpu.core_type<tc>, window_params = [{pipeline_mode = #tpu.pipeline_mode<synchronous>, transform_indices = @transform_0, window_bounds = array<i64: 2, 4, 128>}, {pipeline_mode = #tpu.pipeline_mode<synchronous>, transform_indices = @transform_1, window_bounds = array<i64: 128, 128>}, {pipeline_mode = #tpu.pipeline_mode<synchronous>, transform_indices = @transform_2, window_bounds = array<i64: 1, 128>}, {pipeline_mode = #tpu.pipeline_mode<synchronous>, transform_indices = @transform_3, window_bounds = array<i64: 2, 128>}, {pipeline_mode = #tpu.pipeline_mode<synchronous>, transform_indices = @transform_4, window_bounds = array<i64: 2, 128>}]} {
    %c0 = arith.constant 0 : index
    %c0_0 = arith.constant 0 : index
    %c0_1 = arith.constant 0 : index
    %0 = vector.load %arg1[%c0, %c0_0, %c0_1] : memref<2x4x128xbf16, #tpu.memory_space<vmem>>, vector<2x4x128xbf16>
    %1 = arith.extf %0 : vector<2x4x128xbf16> to vector<2x4x128xf32>
    %cst = arith.constant dense<0.000000e+00> : vector<2x128xf32>
    %2 = vector.multi_reduction <add>, %1, %cst [1] : vector<2x4x128xf32> to vector<2x128xf32>
    %cst_2 = arith.constant 4.000000e+00 : f32
    %3 = vector.broadcast %cst_2 : f32 to vector<2x128xf32>
    %4 = arith.divf %2, %3 : vector<2x128xf32>
    %c0_3 = arith.constant 0 : index
    %c0_4 = arith.constant 0 : index
    %5 = vector.load %arg4[%c0_3, %c0_4] : memref<2x128xf32, #tpu.memory_space<vmem>>, vector<2x128xf32>
    tpu.vector_store %arg4[%c0_3, %c0_4], %4 {strides = array<i32>} : memref<2x128xf32, #tpu.memory_space<vmem>>, vector<2x128xf32>,
    %6 = arith.truncf %4 : vector<2x128xf32> to vector<2x128xbf16>
    %c0_5 = arith.constant 0 : index
    %c0_6 = arith.constant 0 : index
    %7 = vector.load %arg2[%c0_5, %c0_6] : memref<128x128xbf16, #tpu.memory_space<vmem>>, vector<128x128xbf16>
    %cst_7 = arith.constant dense<0.000000e+00> : vector<2x128xf32>
    %8 = tpu.matmul %6, %7, %cst_7 {dimension_numbers = #tpu.dot_dimension_numbers<[1], [0], [0], [1], [0, 0, 1, 1], [], []>} : vector<2x128xbf16>, vector<128x128xbf16>, vector<2x128xf32> -> vector<2x128xf32>
    %c0_8 = arith.constant 0 : index
    %c0_9 = arith.constant 0 : index
    %9 = vector.load %arg3[%c0_8, %c0_9] : memref<1x128xf32, #tpu.memory_space<vmem>>, vector<1x128xf32>
    %10 = vector.broadcast %9 : vector<1x128xf32> to vector<2x128xf32>
    %11 = arith.addf %8, %10 : vector<2x128xf32>
    %c0_10 = arith.constant 0 : index
    %c0_11 = arith.constant 0 : index
    %12 = vector.load %arg5[%c0_10, %c0_11] : memref<2x128xf32, #tpu.memory_space<vmem>>, vector<2x128xf32>
    tpu.vector_store %arg5[%c0_10, %c0_11], %11 {strides = array<i32>} : memref<2x128xf32, #tpu.memory_space<vmem>>, vector<2x128xf32>,
    return
  }
  func.func @transform_0(%arg0: i32) -> (i32, i32, i32) {
    %c0_i32 = arith.constant 0 : i32
    %c0_i32_0 = arith.constant 0 : i32
    %c0_i32_1 = arith.constant 0 : i32
    %c0_i32_2 = arith.constant 0 : i32
    return %c0_i32, %c0_i32_0, %c0_i32_1 : i32, i32, i32
  }
  func.func @transform_1(%arg0: i32) -> (i32, i32) {
    %c0_i32 = arith.constant 0 : i32
    %c0_i32_0 = arith.constant 0 : i32
    %c0_i32_1 = arith.constant 0 : i32
    return %c0_i32, %c0_i32_0 : i32, i32
  }
  func.func @transform_2(%arg0: i32) -> (i32, i32) {
    %c0_i32 = arith.constant 0 : i32
    %c0_i32_0 = arith.constant 0 : i32
    %c0_i32_1 = arith.constant 0 : i32
    return %c0_i32, %c0_i32_0 : i32, i32
  }
  func.func @transform_3(%arg0: i32) -> (i32, i32) {
    %c0_i32 = arith.constant 0 : i32
    %c0_i32_0 = arith.constant 0 : i32
    %c0_i32_1 = arith.constant 0 : i32
    return %c0_i32, %c0_i32_0 : i32, i32
  }
  func.func @transform_4(%arg0: i32) -> (i32, i32) {
    %c0_i32 = arith.constant 0 : i32
    %c0_i32_0 = arith.constant 0 : i32
    %c0_i32_1 = arith.constant 0 : i32
    return %c0_i32, %c0_i32_0 : i32, i32
  }
}

</mosaic_0001>

<bundles_post_ra>
// kernel: forward.22
= control target key start
LH: loop header
LB: loop body
LE: loop exit
PB: predicated region body
PF: predicated region fallthrough
CT: control target
= control target key end

     0   :  { %s4246_s9 = smov 0   ;;  %s4248_s10 = smov 0   ;;  %s6616_s0 = inlined_call_operand.vmem [shape: bf16[2,1024,256], index: 0, kind: input, shape index: {}]   ;;  %s6617_s1 = inlined_call_operand.vmem [shape: bf16[256,128], index: 1, kind: input, shape index: {}]   ;;  %s6618_s2 = inlined_call_operand.vmem [shape: bf16[2,1024,128], index: 2, kind: output, shape index: {}]  }
   0x1   :  { %s4250_s11 = smov 0  }
   0x2 LB: > { %s24_s12 = sadd.s32 1, %s4224_s10  ;;  %p3147_p0 = scmp.ge.s32.totalorder %s4228_s11, 1  ;;  %s4228_s11 = sphi %s4250_s11, %s12_s11   ;;  %s4224_s10 = sphi %s4248_s10, %s7688_s10   ;;  %s4220_s9 = sphi %s4246_s9, %s7687_s9  }
   0x3   : > { %p26_p1 = scmp.ge.s32.totalorder %s24_s12, 2  ;;  %p135_p2 = scmp.lt.s32.totalorder %s4228_s11, 3 }
   0x5   : > { %s7690_s12 = smov (%p26_p1, %s24_s12), 0  ;;  %p136_p3 = pnand %p3147_p0, %p135_p2 }
   0x7   : > { %139 = sbr.rel (%p136_p3) target bundleno = 859 (0x35b), region = 28 }
   0xe   : > { %v3996_v0 = vld [vmem:[%s6617_s1] sm:$0xff]   ;;  %v4230_v1 = vmov 0   ;;  %v3997_v2 = vld [vmem:[%s6617_s1 + $0x8] sm:$0xff]   ;;  %p164_p4 = scmp.lt.s32.totalorder %s4220_s9, 1  ;;  %v3998_v3 = vld [vmem:[%s6617_s1 + $0x10] sm:$0xff]  }
   0xf   : > { %1078 = vmatprep.subr.bf16.mxu0 %v4230_v1  ;;  %3939 = vmatprep.subr.bf16.mxu1 %v4230_v1  ;;  %v3999_v4 = vld [vmem:[%s6617_s1 + $0x18] sm:$0xff]   ;;  %v4000_v5 = vld [vmem:[%s6617_s1 + $0x20] sm:$0xff]   ;;  %v4001_v7 = vld [vmem:[%s6617_s1 + $0x28] sm:$0xff]  }
  0x10   : > { %1079 = vmatpush1.bf16.msra.mxu0 %v3996_v0  ;;  %3955 = vmatpush1.bf16.msra.mxu1 %v3996_v0  ;;  %s7692_s9 = smov (!%p164_p4, %s4220_s9), 1  ;;  %v4002_v8 = vld [vmem:[%s6617_s1 + $0x30] sm:$0xff]   ;;  %v4003_v9 = vld [vmem:[%s6617_s1 + $0x38] sm:$0xff]   ;;  %v4004_v10 = vld [vmem:[%s6617_s1 + $0x40] sm:$0xff]  }
  0x11   : > { %1080 = vmatprep.subr.bf16.mxu0 %v4230_v1  ;;  %3940 = vmatprep.subr.bf16.mxu1 %v4230_v1  ;;  %s3426_s21 = sshll.u32 %s7692_s9, 10  ;;  %v4005_v11 = vld [vmem:[%s6617_s1 + $0x48] sm:$0xff]   ;;  %v4006_v12 = vld [vmem:[%s6617_s1 + $0x50] sm:$0xff]   ;;  %v4007_v13 = vld [vmem:[%s6617_s1 + $0x58] sm:$0xff]   ;;  %s3427_s25 = sshll.u32 %s7692_s9, 9 }
  0x12   : > { %s4293_s26 = scalar_lea.vmem %s6616_s0, %s3426_s21  ;;  %v4008_v14 = vld [vmem:[%s6617_s1 + $0x60] sm:$0xff]   ;;  %v4009_v15 = vld [vmem:[%s6617_s1 + $0x68] sm:$0xff]   ;;  %v4010_v16 = vld [vmem:[%s6617_s1 + $0x70] sm:$0xff]   ;;  %s6281_s27 = scalar_lea.vmem %s6618_s2, %s3427_s25 }
  0x13   : > { %v4014_v6 = vld [vmem:[%s4293_s26 + $0x4] ss:$8 sps:$4 sm:$0xff]   ;;  %v4011_v18 = vld [vmem:[%s6617_s1 + $0x78] sm:$0xff]   ;;  %v4012_v19 = vld [vmem:[%s4293_s26] ss:$8 sps:$4 sm:$0xff]  }
  0x14   : > { %1081 = vmatpush1.bf16.msra.mxu0 %v3997_v2  ;;  %3956 = vmatpush1.bf16.msra.mxu1 %v3997_v2  ;;  %v4062_v17 = vld [vmem:[%s4293_s26 + $0x204] ss:$8 sps:$4 sm:$0xff]   ;;  %v4060_v20 = vld [vmem:[%s4293_s26 + $0x200] ss:$8 sps:$4 sm:$0xff]   ;;  %v4015_v21 = vld [vmem:[%s4293_s26 + $0x14] ss:$8 sps:$4 sm:$0xff]  }
  0x15   : > { %1082 = vmatprep.subr.bf16.mxu0 %v4230_v1  ;;  %3941 = vmatprep.subr.bf16.mxu1 %v4230_v1  ;;  %v4066_v22 = vld [vmem:[%s4293_s26 + $0x214] ss:$8 sps:$4 sm:$0xff]   ;;  %v4017_v23 = vld [vmem:[%s4293_s26 + $0x10] ss:$8 sps:$4 sm:$0xff]   ;;  %v4018_v25 = vld [vmem:[%s4293_s26 + $0x24] ss:$8 sps:$4 sm:$0xff]  }
  0x16   : > { %1110 = vmatprep.mubr.bf16.mxu0 %v4014_v6  ;;  %1366 = vmatprep.mubr.bf16.mxu1 %v4062_v17  ;;  %v4068_v24 = vld [vmem:[%s4293_s26 + $0x210] ss:$8 sps:$4 sm:$0xff]   ;;  %v4072_v26 = vld [vmem:[%s4293_s26 + $0x224] ss:$8 sps:$4 sm:$0xff]   ;;  %v4020_v27 = vld [vmem:[%s4293_s26 + $0x20] ss:$8 sps:$4 sm:$0xff]  }
  0x17   : > { %v4074_v28 = vld [vmem:[%s4293_s26 + $0x220] ss:$8 sps:$4 sm:$0xff]   ;;  %v4021_v29 = vld [vmem:[%s4293_s26 + $0x34] ss:$8 sps:$4 sm:$0xff]   ;;  %v4023_v31 = vld [vmem:[%s4293_s26 + $0x30] ss:$8 sps:$4 sm:$0xff]  }
  0x18   : > { %1083 = vmatpush1.bf16.msra.mxu0 %v3998_v3  ;;  %3957 = vmatpush1.bf16.msra.mxu1 %v3998_v3  ;;  %v4078_v30 = vld [vmem:[%s4293_s26 + $0x234] ss:$8 sps:$4 sm:$0xff]   ;;  %v4080_v32 = vld [vmem:[%s4293_s26 + $0x230] ss:$8 sps:$4 sm:$0xff]   ;;  %v4024_v33 = vld [vmem:[%s4293_s26 + $0x44] ss:$8 sps:$4 sm:$0xff]  }
  0x19   : > { %1084 = vmatprep.subr.bf16.mxu0 %v4230_v1  ;;  %3942 = vmatprep.subr.bf16.mxu1 %v4230_v1  ;;  %v4084_v34 = vld [vmem:[%s4293_s26 + $0x244] ss:$8 sps:$4 sm:$0xff]   ;;  %v4026_v35 = vld [vmem:[%s4293_s26 + $0x40] ss:$8 sps:$4 sm:$0xff]   ;;  %v4027_v37 = vld [vmem:[%s4293_s26 + $0x54] ss:$8 sps:$4 sm:$0xff]  }
  0x1a   : > { %v4086_v36 = vld [vmem:[%s4293_s26 + $0x240] ss:$8 sps:$4 sm:$0xff]   ;;  %v4090_v38 = vld [vmem:[%s4293_s26 + $0x254] ss:$8 sps:$4 sm:$0xff]   ;;  %v4029_v39 = vld [vmem:[%s4293_s26 + $0x50] ss:$8 sps:$4 sm:$0xff]  }
  0x1b   : > { %v4092_v40 = vld [vmem:[%s4293_s26 + $0x250] ss:$8 sps:$4 sm:$0xff]   ;;  %v4030_v41 = vld [vmem:[%s4293_s26 + $0x64] ss:$8 sps:$4 sm:$0xff]   ;;  %v4032_v43 = vld [vmem:[%s4293_s26 + $0x60] ss:$8 sps:$4 sm:$0xff]  }
  0x1c   : > { %1085 = vmatpush1.bf16.msra.mxu0 %v3999_v4  ;;  %3958 = vmatpush1.bf16.msra.mxu1 %v3999_v4  ;;  %v4096_v42 = vld [vmem:[%s4293_s26 + $0x264] ss:$8 sps:$4 sm:$0xff]   ;;  %v4098_v44 = vld [vmem:[%s4293_s26 + $0x260] ss:$8 sps:$4 sm:$0xff]   ;;  %v4033_v45 = vld [vmem:[%s4293_s26 + $0x74] ss:$8 sps:$4 sm:$0xff]  }
  0x1d   : > { %1086 = vmatprep.subr.bf16.mxu0 %v4230_v1  ;;  %3943 = vmatprep.subr.bf16.mxu1 %v4230_v1  ;;  %v4102_v46 = vld [vmem:[%s4293_s26 + $0x274] ss:$8 sps:$4 sm:$0xff]   ;;  %v4035_v47 = vld [vmem:[%s4293_s26 + $0x70] ss:$8 sps:$4 sm:$0xff]   ;;  %v4036_v49 = vld [vmem:[%s4293_s26 + $0x84] ss:$8 sps:$4 sm:$0xff]  }
  0x1e   : > { %v4104_v48 = vld [vmem:[%s4293_s26 + $0x270] ss:$8 sps:$4 sm:$0xff]   ;;  %v4108_v50 = vld [vmem:[%s4293_s26 + $0x284] ss:$8 sps:$4 sm:$0xff]   ;;  %v4038_v51 = vld [vmem:[%s4293_s26 + $0x80] ss:$8 sps:$4 sm:$0xff]  }
  0x1f   : > { %v4110_v52 = vld [vmem:[%s4293_s26 + $0x280] ss:$8 sps:$4 sm:$0xff]   ;;  %v4039_v53 = vld [vmem:[%s4293_s26 + $0x94] ss:$8 sps:$4 sm:$0xff]   ;;  %v4041_v55 = vld [vmem:[%s4293_s26 + $0x90] ss:$8 sps:$4 sm:$0xff]  }
  0x20   : > { %1087 = vmatpush1.bf16.msra.mxu0 %v4000_v5  ;;  %3959 = vmatpush1.bf16.msra.mxu1 %v4000_v5  ;;  %v4114_v54 = vld [vmem:[%s4293_s26 + $0x294] ss:$8 sps:$4 sm:$0xff]   ;;  %v4116_v56 = vld [vmem:[%s4293_s26 + $0x290] ss:$8 sps:$4 sm:$0xff]   ;;  %v4042_v57 = vld [vmem:[%s4293_s26 + $0xa4] ss:$8 sps:$4 sm:$0xff]  }
  0x21   : > { %1088 = vmatprep.subr.bf16.mxu0 %v4230_v1  ;;  %3944 = vmatprep.subr.bf16.mxu1 %v4230_v1  ;;  %v4120_v58 = vld [vmem:[%s4293_s26 + $0x2a4] ss:$8 sps:$4 sm:$0xff]   ;;  %v4044_v59 = vld [vmem:[%s4293_s26 + $0xa0] ss:$8 sps:$4 sm:$0xff]   ;;  %v4045_v61 = vld [vmem:[%s4293_s26 + $0xb4] ss:$8 sps:$4 sm:$0xff]  }
  0x22   : > { %v4122_v60 = vld [vmem:[%s4293_s26 + $0x2a0] ss:$8 sps:$4 sm:$0xff]   ;;  %v4126_v62 = vld [vmem:[%s4293_s26 + $0x2b4] ss:$8 sps:$4 sm:$0xff]   ;;  %v4047_v63 = vld [vmem:[%s4293_s26 + $0xb0] ss:$8 sps:$4 sm:$0xff]  }
  0x23   : > { %v4128_v0 = vld [vmem:[%s4293_s26 + $0x2b0] ss:$8 sps:$4 sm:$0xff]   ;;  %v4132_v2 = vld [vmem:[%s4293_s26 + $0x2c4] ss:$8 sps:$4 sm:$0xff]   ;;  %v4050_v3 = vld [vmem:[%s4293_s26 + $0xc0] ss:$8 sps:$4 sm:$0xff]  }
  0x24   : > { %1089 = vmatpush1.bf16.msra.mxu0 %v4001_v7  ;;  %3960 = vmatpush1.bf16.msra.mxu1 %v4001_v7  ;;  %v4134_v4 = vld [vmem:[%s4293_s26 + $0x2c0] ss:$8 sps:$4 sm:$0xff]   ;;  %v4051_v5 = vld [vmem:[%s4293_s26 + $0xd4] ss:$8 sps:$4 sm:$0xff]   ;;  %v4053_v7 = vld [vmem:[%s4293_s26 + $0xd0] ss:$8 sps:$4 sm:$0xff]  }
  0x25   : > { %1090 = vmatprep.subr.bf16.mxu0 %v4230_v1  ;;  %3945 = vmatprep.subr.bf16.mxu1 %v4230_v1  ;;  %v4138_v6 = vld [vmem:[%s4293_s26 + $0x2d4] ss:$8 sps:$4 sm:$0xff]   ;;  %v4063_v17 = vld [vmem:[%s4293_s26 + $0x104] ss:$8 sps:$4 sm:$0xff]  }
  0x28   : > { %1091 = vmatpush1.bf16.msra.mxu0 %v4002_v8  ;;  %3961 = vmatpush1.bf16.msra.mxu1 %v4002_v8  ;;  %v4140_v8 = vld [vmem:[%s4293_s26 + $0x2d0] ss:$8 sps:$4 sm:$0xff]  }
  0x29   : > { %1092 = vmatprep.subr.bf16.mxu0 %v4230_v1  ;;  %3946 = vmatprep.subr.bf16.mxu1 %v4230_v1 }
  0x2c   : > { %1093 = vmatpush1.bf16.msra.mxu0 %v4003_v9  ;;  %3962 = vmatpush1.bf16.msra.mxu1 %v4003_v9  ;;  %v4054_v9 = vld [vmem:[%s4293_s26 + $0xe4] ss:$8 sps:$4 sm:$0xff]  }
  0x2d   : > { %1094 = vmatprep.subr.bf16.mxu0 %v4230_v1  ;;  %3947 = vmatprep.subr.bf16.mxu1 %v4230_v1 }
  0x30   : > { %1095 = vmatpush1.bf16.msra.mxu0 %v4004_v10  ;;  %3963 = vmatpush1.bf16.msra.mxu1 %v4004_v10  ;;  %v4144_v10 = vld [vmem:[%s4293_s26 + $0x2e4] ss:$8 sps:$4 sm:$0xff]  }
  0x31   : > { %1096 = vmatprep.subr.bf16.mxu0 %v4230_v1  ;;  %3948 = vmatprep.subr.bf16.mxu1 %v4230_v1 }
  0x34   : > { %1097 = vmatpush1.bf16.msra.mxu0 %v4005_v11  ;;  %3964 = vmatpush1.bf16.msra.mxu1 %v4005_v11  ;;  %v4056_v11 = vld [vmem:[%s4293_s26 + $0xe0] ss:$8 sps:$4 sm:$0xff]  }
  0x35   : > { %1098 = vmatprep.subr.bf16.mxu0 %v4230_v1  ;;  %3949 = vmatprep.subr.bf16.mxu1 %v4230_v1 }
  0x38   : > { %1099 = vmatpush1.bf16.msra.mxu0 %v4006_v12  ;;  %3965 = vmatpush1.bf16.msra.mxu1 %v4006_v12  ;;  %v4146_v12 = vld [vmem:[%s4293_s26 + $0x2e0] ss:$8 sps:$4 sm:$0xff]  }
  0x39   : > { %1100 = vmatprep.subr.bf16.mxu0 %v4230_v1  ;;  %3950 = vmatprep.subr.bf16.mxu1 %v4230_v1 }
  0x3c   : > { %1101 = vmatpush1.bf16.msra.mxu0 %v4007_v13  ;;  %3966 = vmatpush1.bf16.msra.mxu1 %v4007_v13  ;;  %v4057_v13 = vld [vmem:[%s4293_s26 + $0xf4] ss:$8 sps:$4 sm:$0xff]  }
  0x3d   : > { %1102 = vmatprep.subr.bf16.mxu0 %v4230_v1  ;;  %3951 = vmatprep.subr.bf16.mxu1 %v4230_v1 }
  0x40   : > { %1103 = vmatpush1.bf16.msra.mxu0 %v4008_v14  ;;  %3967 = vmatpush1.bf16.msra.mxu1 %v4008_v14  ;;  %v4150_v14 = vld [vmem:[%s4293_s26 + $0x2f4] ss:$8 sps:$4 sm:$0xff]  }
  0x41   : > { %1104 = vmatprep.subr.bf16.mxu0 %v4230_v1  ;;  %3952 = vmatprep.subr.bf16.mxu1 %v4230_v1 }
  0x44   : > { %1105 = vmatpush1.bf16.msra.mxu0 %v4009_v15  ;;  %3968 = vmatpush1.bf16.msra.mxu1 %v4009_v15  ;;  %v4059_v15 = vld [vmem:[%s4293_s26 + $0xf0] ss:$8 sps:$4 sm:$0xff]  }
  0x45   : > { %1106 = vmatprep.subr.bf16.mxu0 %v4230_v1  ;;  %3953 = vmatprep.subr.bf16.mxu1 %v4230_v1 }
  0x48   : > { %1107 = vmatpush1.bf16.msra.mxu0 %v4010_v16  ;;  %3969 = vmatpush1.bf16.msra.mxu1 %v4010_v16  ;;  %v4152_v16 = vld [vmem:[%s4293_s26 + $0x2f0] ss:$8 sps:$4 sm:$0xff]  }
  0x49   : > { %1108 = vmatprep.subr.bf16.mxu0 %v4230_v1  ;;  %3954 = vmatprep.subr.bf16.mxu1 %v4230_v1  ;;  %v4048_v1 = vld [vmem:[%s4293_s26 + $0xc4] ss:$8 sps:$4 sm:$0xff]  }
  0x4c   : > { %1109 = vmatpush1.bf16.msra.mxu0 %v4011_v18  ;;  %3970 = vmatpush1.bf16.msra.mxu1 %v4011_v18  ;;  %v4156_v18 = vld [vmem:[%s4293_s26 + $0x304] ss:$8 sps:$4 sm:$0xff]  }
  0x4f   : > { %1111 = vmatmul.mubr.bf16.vlgmr.msra.gmra.mrb[0].mxu0 %v4012_v19  ;;  %1367 = vmatmul.mubr.bf16.vlgmr.msra.gmra.mrb[0].mxu1 %v4060_v20  ;;  %v4065_v19 = vld [vmem:[%s4293_s26 + $0x100] ss:$8 sps:$4 sm:$0xff]  }
  0x50   : > { %1118 = vmatprep.mubr.bf16.mxu0 %v4015_v21  ;;  %1374 = vmatprep.mubr.bf16.mxu1 %v4066_v22  ;;  %v4158_v20 = vld [vmem:[%s4293_s26 + $0x300] ss:$8 sps:$4 sm:$0xff]   ;;  %v4069_v21 = vld [vmem:[%s4293_s26 + $0x114] ss:$8 sps:$4 sm:$0xff]  }
  0x51   : > { %v4159_v22 = vld [vmem:[%s4293_s26 + $0x314] ss:$8 sps:$4 sm:$0xff]  }
  0x57   : > { %1119 = vmatmul.mubr.bf16.gmra.mrb[4].mxu0 %v4017_v23  ;;  %1375 = vmatmul.mubr.bf16.gmra.mrb[4].mxu1 %v4068_v24  ;;  %v4071_v23 = vld [vmem:[%s4293_s26 + $0x110] ss:$8 sps:$4 sm:$0xff]  }
  0x58   : > { %1126 = vmatprep.mubr.bf16.mxu0 %v4018_v25  ;;  %1382 = vmatprep.mubr.bf16.mxu1 %v4072_v26  ;;  %v4161_v24 = vld [vmem:[%s4293_s26 + $0x310] ss:$8 sps:$4 sm:$0xff]   ;;  %v4075_v25 = vld [vmem:[%s4293_s26 + $0x124] ss:$8 sps:$4 sm:$0xff]  }
  0x59   : > { %v4162_v26 = vld [vmem:[%s4293_s26 + $0x324] ss:$8 sps:$4 sm:$0xff]  }
  0x5f   : > { %1127 = vmatmul.mubr.bf16.gmra.mrb[8].mxu0 %v4020_v27  ;;  %1383 = vmatmul.mubr.bf16.gmra.mrb[8].mxu1 %v4074_v28  ;;  %v4077_v27 = vld [vmem:[%s4293_s26 + $0x120] ss:$8 sps:$4 sm:$0xff]  }
  0x60   : > { %1134 = vmatprep.mubr.bf16.mxu0 %v4021_v29  ;;  %1390 = vmatprep.mubr.bf16.mxu1 %v4078_v30  ;;  %v4164_v28 = vld [vmem:[%s4293_s26 + $0x320] ss:$8 sps:$4 sm:$0xff]   ;;  %v4081_v29 = vld [vmem:[%s4293_s26 + $0x134] ss:$8 sps:$4 sm:$0xff]  }
  0x61   : > { %v4165_v30 = vld [vmem:[%s4293_s26 + $0x334] ss:$8 sps:$4 sm:$0xff]  }
  0x67   : > { %1135 = vmatmul.mubr.bf16.gmra.mrb[12].mxu0 %v4023_v31  ;;  %1391 = vmatmul.mubr.bf16.gmra.mrb[12].mxu1 %v4080_v32  ;;  %v4083_v31 = vld [vmem:[%s4293_s26 + $0x130] ss:$8 sps:$4 sm:$0xff]  }
  0x68   : > { %1142 = vmatprep.mubr.bf16.mxu0 %v4024_v33  ;;  %1398 = vmatprep.mubr.bf16.mxu1 %v4084_v34  ;;  %v4167_v32 = vld [vmem:[%s4293_s26 + $0x330] ss:$8 sps:$4 sm:$0xff]   ;;  %v4087_v33 = vld [vmem:[%s4293_s26 + $0x144] ss:$8 sps:$4 sm:$0xff]  }
  0x69   : > { %v4168_v34 = vld [vmem:[%s4293_s26 + $0x344] ss:$8 sps:$4 sm:$0xff]  }
  0x6f   : > { %1143 = vmatmul.mubr.bf16.gmra.mrb[16].mxu0 %v4026_v35  ;;  %1399 = vmatmul.mubr.bf16.gmra.mrb[16].mxu1 %v4086_v36  ;;  %v4089_v35 = vld [vmem:[%s4293_s26 + $0x140] ss:$8 sps:$4 sm:$0xff]  }
  0x70   : > { %1150 = vmatprep.mubr.bf16.mxu0 %v4027_v37  ;;  %1406 = vmatprep.mubr.bf16.mxu1 %v4090_v38  ;;  %v4170_v36 = vld [vmem:[%s4293_s26 + $0x340] ss:$8 sps:$4 sm:$0xff]   ;;  %v4093_v37 = vld [vmem:[%s4293_s26 + $0x154] ss:$8 sps:$4 sm:$0xff]  }
  0x71   : > { %v4171_v38 = vld [vmem:[%s4293_s26 + $0x354] ss:$8 sps:$4 sm:$0xff]  }
  0x77   : > { %1151 = vmatmul.mubr.bf16.gmra.mrb[20].mxu0 %v4029_v39  ;;  %1407 = vmatmul.mubr.bf16.gmra.mrb[20].mxu1 %v4092_v40  ;;  %v4095_v39 = vld [vmem:[%s4293_s26 + $0x150] ss:$8 sps:$4 sm:$0xff]  }
  0x78   : > { %1158 = vmatprep.mubr.bf16.mxu0 %v4030_v41  ;;  %1414 = vmatprep.mubr.bf16.mxu1 %v4096_v42  ;;  %v4173_v40 = vld [vmem:[%s4293_s26 + $0x350] ss:$8 sps:$4 sm:$0xff]   ;;  %v4099_v41 = vld [vmem:[%s4293_s26 + $0x164] ss:$8 sps:$4 sm:$0xff]  }
  0x79   : > { %v4174_v42 = vld [vmem:[%s4293_s26 + $0x364] ss:$8 sps:$4 sm:$0xff]  }
  0x7f   : > { %1159 = vmatmul.mubr.bf16.gmra.mrb[24].mxu0 %v4032_v43  ;;  %1415 = vmatmul.mubr.bf16.gmra.mrb[24].mxu1 %v4098_v44  ;;  %v4101_v43 = vld [vmem:[%s4293_s26 + $0x160] ss:$8 sps:$4 sm:$0xff]  }
  0x80   : > { %1166 = vmatprep.mubr.bf16.mxu0 %v4033_v45  ;;  %1422 = vmatprep.mubr.bf16.mxu1 %v4102_v46  ;;  %v4176_v44 = vld [vmem:[%s4293_s26 + $0x360] ss:$8 sps:$4 sm:$0xff]   ;;  %v4105_v45 = vld [vmem:[%s4293_s26 + $0x174] ss:$8 sps:$4 sm:$0xff]  }
  0x81   : > { %v4177_v46 = vld [vmem:[%s4293_s26 + $0x374] ss:$8 sps:$4 sm:$0xff]  }
  0x87   : > { %1167 = vmatmul.mubr.bf16.gmra.mrb[28].mxu0 %v4035_v47  ;;  %1423 = vmatmul.mubr.bf16.gmra.mrb[28].mxu1 %v4104_v48  ;;  %v4107_v47 = vld [vmem:[%s4293_s26 + $0x170] ss:$8 sps:$4 sm:$0xff]  }
  0x88   : > { %1174 = vmatprep.mubr.bf16.mxu0 %v4036_v49  ;;  %1430 = vmatprep.mubr.bf16.mxu1 %v4108_v50  ;;  %v4179_v48 = vld [vmem:[%s4293_s26 + $0x370] ss:$8 sps:$4 sm:$0xff]   ;;  %v4111_v49 = vld [vmem:[%s4293_s26 + $0x184] ss:$8 sps:$4 sm:$0xff]  }
  0x89   : > { %v4180_v50 = vld [vmem:[%s4293_s26 + $0x384] ss:$8 sps:$4 sm:$0xff]  }
  0x8f   : > { %1175 = vmatmul.mubr.bf16.gmra.mrb[32].mxu0 %v4038_v51  ;;  %1431 = vmatmul.mubr.bf16.gmra.mrb[32].mxu1 %v4110_v52  ;;  %v4113_v51 = vld [vmem:[%s4293_s26 + $0x180] ss:$8 sps:$4 sm:$0xff]  }
  0x90   : > { %1182 = vmatprep.mubr.bf16.mxu0 %v4039_v53  ;;  %1438 = vmatprep.mubr.bf16.mxu1 %v4114_v54  ;;  %v4182_v52 = vld [vmem:[%s4293_s26 + $0x380] ss:$8 sps:$4 sm:$0xff]   ;;  %v4117_v53 = vld [vmem:[%s4293_s26 + $0x194] ss:$8 sps:$4 sm:$0xff]  }
  0x91   : > { %v4183_v54 = vld [vmem:[%s4293_s26 + $0x394] ss:$8 sps:$4 sm:$0xff]  }
  0x97   : > { %1183 = vmatmul.mubr.bf16.gmra.mrb[36].mxu0 %v4041_v55  ;;  %1439 = vmatmul.mubr.bf16.gmra.mrb[36].mxu1 %v4116_v56  ;;  %v4119_v55 = vld [vmem:[%s4293_s26 + $0x190] ss:$8 sps:$4 sm:$0xff]  }
  0x98   : > { %1190 = vmatprep.mubr.bf16.mxu0 %v4042_v57  ;;  %1446 = vmatprep.mubr.bf16.mxu1 %v4120_v58  ;;  %v4185_v56 = vld [vmem:[%s4293_s26 + $0x390] ss:$8 sps:$4 sm:$0xff]   ;;  %v4123_v57 = vld [vmem:[%s4293_s26 + $0x1a4] ss:$8 sps:$4 sm:$0xff]  }
  0x99   : > { %v4186_v58 = vld [vmem:[%s4293_s26 + $0x3a4] ss:$8 sps:$4 sm:$0xff]  }
  0x9f   : > { %1191 = vmatmul.mubr.bf16.gmra.mrb[40].mxu0 %v4044_v59  ;;  %1447 = vmatmul.mubr.bf16.gmra.mrb[40].mxu1 %v4122_v60  ;;  %v4125_v59 = vld [vmem:[%s4293_s26 + $0x1a0] ss:$8 sps:$4 sm:$0xff]  }
  0xa0   : > { %1198 = vmatprep.mubr.bf16.mxu0 %v4045_v61  ;;  %1454 = vmatprep.mubr.bf16.mxu1 %v4126_v62  ;;  %v4188_v60 = vld [vmem:[%s4293_s26 + $0x3a0] ss:$8 sps:$4 sm:$0xff]   ;;  %v4129_v61 = vld [vmem:[%s4293_s26 + $0x1b4] ss:$8 sps:$4 sm:$0xff]  }
  0xa1   : > { %v4189_v62 = vld [vmem:[%s4293_s26 + $0x3b4] ss:$8 sps:$4 sm:$0xff]  }
  0xa7   : > { %1199 = vmatmul.mubr.bf16.gmra.mrb[44].mxu0 %v4047_v63  ;;  %1455 = vmatmul.mubr.bf16.gmra.mrb[44].mxu1 %v4128_v0 }
  0xa8   : > { %1206 = vmatprep.mubr.bf16.mxu0 %v4048_v1  ;;  %1462 = vmatprep.mubr.bf16.mxu1 %v4132_v2  ;;  %v4131_v2 = vld [vmem:[%s4293_s26 + $0x1b0] ss:$8 sps:$4 sm:$0xff]  }
  0xaf   : > { %1207 = vmatmul.mubr.bf16.gmra.mrb[48].mxu0 %v4050_v3  ;;  %1463 = vmatmul.mubr.bf16.gmra.mrb[48].mxu1 %v4134_v4  ;;  %v4191_v4 = vld [vmem:[%s4293_s26 + $0x3b0] ss:$8 sps:$4 sm:$0xff]  }
  0xb0   : > { %1214 = vmatprep.mubr.bf16.mxu0 %v4051_v5  ;;  %1470 = vmatprep.mubr.bf16.mxu1 %v4138_v6  ;;  %v4135_v6 = vld [vmem:[%s4293_s26 + $0x1c4] ss:$8 sps:$4 sm:$0xff]  }
  0xb7   : > { %1215 = vmatmul.mubr.bf16.gmra.mrb[52].mxu0 %v4053_v7  ;;  %1471 = vmatmul.mubr.bf16.gmra.mrb[52].mxu1 %v4140_v8 }
  0xb8   : > { %1222 = vmatprep.mubr.bf16.mxu0 %v4054_v9  ;;  %1478 = vmatprep.mubr.bf16.mxu1 %v4144_v10 }
  0xbf   : > { %1223 = vmatmul.mubr.bf16.gmra.mrb[56].mxu0 %v4056_v11  ;;  %1479 = vmatmul.mubr.bf16.gmra.mrb[56].mxu1 %v4146_v12 }
  0xc0   : > { %1230 = vmatprep.mubr.bf16.mxu0 %v4057_v13  ;;  %1486 = vmatprep.mubr.bf16.mxu1 %v4150_v14  ;;  %v4192_v14 = vld [vmem:[%s4293_s26 + $0x3c4] ss:$8 sps:$4 sm:$0xff]  }
  0xc7   : > { %1231 = vmatmul.mubr.bf16.gmra.mrb[60].mxu0 %v4059_v15  ;;  %1487 = vmatmul.mubr.bf16.gmra.mrb[60].mxu1 %v4152_v16 }
  0xc8   : > { %1238 = vmatprep.mubr.bf16.mxu0 %v4063_v17  ;;  %1494 = vmatprep.mubr.bf16.mxu1 %v4156_v18 }
  0xcf   : > { %1239 = vmatmul.mubr.bf16.gmra.mrb[64].mxu0 %v4065_v19  ;;  %1495 = vmatmul.mubr.bf16.gmra.mrb[64].mxu1 %v4158_v20  ;;  %v4137_v20 = vld [vmem:[%s4293_s26 + $0x1c0] ss:$8 sps:$4 sm:$0xff]  }
  0xd0   : > { %1246 = vmatprep.mubr.bf16.mxu0 %v4069_v21  ;;  %1502 = vmatprep.mubr.bf16.mxu1 %v4159_v22  ;;  %v4194_v22 = vld [vmem:[%s4293_s26 + $0x3c0] ss:$8 sps:$4 sm:$0xff]  }
  0xd7   : > { %1247 = vmatmul.mubr.bf16.gmra.mrb[68].mxu0 %v4071_v23  ;;  %1503 = vmatmul.mubr.bf16.gmra.mrb[68].mxu1 %v4161_v24  ;;  %v4141_v24 = vld [vmem:[%s4293_s26 + $0x1d4] ss:$8 sps:$4 sm:$0xff]  }
  0xd8   : > { %1254 = vmatprep.mubr.bf16.mxu0 %v4075_v25  ;;  %1510 = vmatprep.mubr.bf16.mxu1 %v4162_v26 }
  0xdf   : > { %1255 = vmatmul.mubr.bf16.gmra.mrb[72].mxu0 %v4077_v27  ;;  %1511 = vmatmul.mubr.bf16.gmra.mrb[72].mxu1 %v4164_v28 }
  0xe0   : > { %1262 = vmatprep.mubr.bf16.mxu0 %v4081_v29  ;;  %1518 = vmatprep.mubr.bf16.mxu1 %v4165_v30 }
  0xe7   : > { %1263 = vmatmul.mubr.bf16.gmra.mrb[76].mxu0 %v4083_v31  ;;  %1519 = vmatmul.mubr.bf16.gmra.mrb[76].mxu1 %v4167_v32  ;;  %v4195_v32 = vld [vmem:[%s4293_s26 + $0x3d4] ss:$8 sps:$4 sm:$0xff]  }
  0xe8   : > { %1270 = vmatprep.mubr.bf16.mxu0 %v4087_v33  ;;  %1526 = vmatprep.mubr.bf16.mxu1 %v4168_v34 }
  0xef   : > { %1271 = vmatmul.mubr.bf16.gmra.mrb[80].mxu0 %v4089_v35  ;;  %1527 = vmatmul.mubr.bf16.gmra.mrb[80].mxu1 %v4170_v36 }
  0xf0   : > { %1278 = vmatprep.mubr.bf16.mxu0 %v4093_v37  ;;  %1534 = vmatprep.mubr.bf16.mxu1 %v4171_v38  ;;  %v4143_v38 = vld [vmem:[%s4293_s26 + $0x1d0] ss:$8 sps:$4 sm:$0xff]  }
  0xf7   : > { %1279 = vmatmul.mubr.bf16.gmra.mrb[84].mxu0 %v4095_v39  ;;  %1535 = vmatmul.mubr.bf16.gmra.mrb[84].mxu1 %v4173_v40  ;;  %v4197_v40 = vld [vmem:[%s4293_s26 + $0x3d0] ss:$8 sps:$4 sm:$0xff]  }
  0xf8   : > { %1286 = vmatprep.mubr.bf16.mxu0 %v4099_v41  ;;  %1542 = vmatprep.mubr.bf16.mxu1 %v4174_v42  ;;  %v4147_v42 = vld [vmem:[%s4293_s26 + $0x1e4] ss:$8 sps:$4 sm:$0xff]  }
  0xff   : > { %1287 = vmatmul.mubr.bf16.gmra.mrb[88].mxu0 %v4101_v43  ;;  %1543 = vmatmul.mubr.bf16.gmra.mrb[88].mxu1 %v4176_v44 }
 0x100   : > { %1294 = vmatprep.mubr.bf16.mxu0 %v4105_v45  ;;  %1550 = vmatprep.mubr.bf16.mxu1 %v4177_v46 }
 0x107   : > { %1295 = vmatmul.mubr.bf16.gmra.mrb[92].mxu0 %v4107_v47  ;;  %1551 = vmatmul.mubr.bf16.gmra.mrb[92].mxu1 %v4179_v48 }
 0x108   : > { %1302 = vmatprep.mubr.bf16.mxu0 %v4111_v49  ;;  %1558 = vmatprep.mubr.bf16.mxu1 %v4180_v50  ;;  %v4198_v50 = vld [vmem:[%s4293_s26 + $0x3e4] ss:$8 sps:$4 sm:$0xff]  }
 0x10f   : > { %1303 = vmatmul.mubr.bf16.gmra.mrb[96].mxu0 %v4113_v51  ;;  %1559 = vmatmul.mubr.bf16.gmra.mrb[96].mxu1 %v4182_v52 }
 0x110   : > { %1310 = vmatprep.mubr.bf16.mxu0 %v4117_v53  ;;  %1566 = vmatprep.mubr.bf16.mxu1 %v4183_v54 }
 0x117   : > { %1311 = vmatmul.mubr.bf16.gmra.mrb[100].mxu0 %v4119_v55  ;;  %1567 = vmatmul.mubr.bf16.gmra.mrb[100].mxu1 %v4185_v56  ;;  %v4149_v56 = vld [vmem:[%s4293_s26 + $0x1e0] ss:$8 sps:$4 sm:$0xff]  }
 0x118   : > { %1318 = vmatprep.mubr.bf16.mxu0 %v4123_v57  ;;  %1574 = vmatprep.mubr.bf16.mxu1 %v4186_v58  ;;  %v4200_v58 = vld [vmem:[%s4293_s26 + $0x3e0] ss:$8 sps:$4 sm:$0xff]  }
 0x11f   : > { %1319 = vmatmul.mubr.bf16.gmra.mrb[104].mxu0 %v4125_v59  ;;  %1575 = vmatmul.mubr.bf16.gmra.mrb[104].mxu1 %v4188_v60  ;;  %v4153_v60 = vld [vmem:[%s4293_s26 + $0x1f4] ss:$8 sps:$4 sm:$0xff]  }
 0x120   : > { %1326 = vmatprep.mubr.bf16.mxu0 %v4129_v61  ;;  %1582 = vmatprep.mubr.bf16.mxu1 %v4189_v62 }
 0x122   : > { %v4462_v63 = vpop.f32.mrb[0].mxu0  ;;  %v4464_v0 = vpop.f32.mrb[0].mxu1 }
 0x123   : > { %6895 = vst [vmem:[#allocation2_spill] sm:$0xff] %v4462_v63  ;;  %v1114_v1 = vpop.f32.mrb[1].mxu0  ;;  %v1370_v3 = vpop.f32.mrb[1].mxu1  ;;  %v1758_v8 = vmul.f32 %v4462_v63, %v4462_v63 }
 0x124   : > { %v4468_v5 = vpop.f32.mrb[2].mxu0  ;;  %v4471_v7 = vpop.f32.mrb[2].mxu1 }
 0x125   : > { %6896 = vst [vmem:[#allocation3_spill] sm:$0xff] %v4468_v5  ;;  %v1623_v9 = vadd.f32 %v4468_v5, %v4462_v63  ;;  %v1759_v10 = vmul.f32 %v4468_v5, %v4468_v5  ;;  %v1117_v11 = vpop.f32.mrb[3].mxu0  ;;  %v1373_v12 = vpop.f32.mrb[3].mxu1 }
 0x127   : > { %v1886_v13 = vadd.f32 %v1759_v10, %v1758_v8  ;;  %1327 = vmatmul.mubr.bf16.gmra.mrb[108].mxu0 %v4131_v2  ;;  %1583 = vmatmul.mubr.bf16.gmra.mrb[108].mxu1 %v4191_v4  ;;  %v4201_v8 = vld [vmem:[%s4293_s26 + $0x3f4] ss:$8 sps:$4 sm:$0xff]  }
 0x128   : > { %1334 = vmatprep.mubr.bf16.mxu0 %v4135_v6  ;;  %1590 = vmatprep.mubr.bf16.mxu1 %v4192_v14  ;;  %v4155_v14 = vld [vmem:[%s4293_s26 + $0x1f0] ss:$8 sps:$4 sm:$0xff]  }
 0x12a   : > { %v4480_v15 = vpop.f32.mrb[4].mxu0  ;;  %v4482_v16 = vpop.f32.mrb[4].mxu1 }
 0x12b   : > { %6897 = vst [vmem:[#allocation4_spill] sm:$0xff] %v4480_v15  ;;  %v1624_v17 = vadd.f32 %v1623_v9, %v4480_v15  ;;  %v1760_v18 = vmul.f32 %v4480_v15, %v4480_v15  ;;  %v1122_v19 = vpop.f32.mrb[5].mxu0  ;;  %v1378_v21 = vpop.f32.mrb[5].mxu1 }
 0x12c   : > { %v4489_v23 = vpop.f32.mrb[6].mxu0  ;;  %v4492_v25 = vpop.f32.mrb[6].mxu1 }
 0x12d   : > { %6898 = vst [vmem:[#allocation5_spill] sm:$0xff] %v4489_v23  ;;  %v1887_v26 = vadd.f32 %v1886_v13, %v1760_v18  ;;  %v1625_v27 = vadd.f32 %v1624_v17, %v4489_v23  ;;  %v1761_v28 = vmul.f32 %v4489_v23, %v4489_v23  ;;  %v1125_v29 = vpop.f32.mrb[7].mxu0  ;;  %v1381_v30 = vpop.f32.mrb[7].mxu1  ;;  %v4203_v18 = vld [vmem:[%s4293_s26 + $0x3f0] ss:$8 sps:$4 sm:$0xff]  }
 0x12f   : > { %v1888_v31 = vadd.f32 %v1887_v26, %v1761_v28  ;;  %1335 = vmatmul.mubr.bf16.gmra.mrb[112].mxu0 %v4137_v20  ;;  %1591 = vmatmul.mubr.bf16.gmra.mrb[112].mxu1 %v4194_v22 }
 0x130   : > { %1342 = vmatprep.mubr.bf16.mxu0 %v4141_v24  ;;  %1598 = vmatprep.mubr.bf16.mxu1 %v4195_v32 }
 0x132   : > { %v4498_v33 = vpop.f32.mrb[8].mxu0  ;;  %v4500_v34 = vpop.f32.mrb[8].mxu1 }
 0x133   : > { %6899 = vst [vmem:[#allocation6_spill] sm:$0xff] %v4498_v33  ;;  %v1626_v35 = vadd.f32 %v1625_v27, %v4498_v33  ;;  %v1762_v36 = vmul.f32 %v4498_v33, %v4498_v33  ;;  %v1130_v37 = vpop.f32.mrb[9].mxu0  ;;  %v1386_v39 = vpop.f32.mrb[9].mxu1 }
 0x134   : > { %v4507_v41 = vpop.f32.mrb[10].mxu0  ;;  %v4510_v43 = vpop.f32.mrb[10].mxu1 }
 0x135   : > { %6900 = vst [vmem:[#allocation7_spill] sm:$0xff] %v4507_v41  ;;  %v1889_v44 = vadd.f32 %v1888_v31, %v1762_v36  ;;  %v1627_v45 = vadd.f32 %v1626_v35, %v4507_v41  ;;  %v1763_v46 = vmul.f32 %v4507_v41, %v4507_v41  ;;  %v1133_v47 = vpop.f32.mrb[11].mxu0  ;;  %v1389_v48 = vpop.f32.mrb[11].mxu1 }
 0x137   : > { %v1890_v49 = vadd.f32 %v1889_v44, %v1763_v46  ;;  %1343 = vmatmul.mubr.bf16.gmra.mrb[116].mxu0 %v4143_v38  ;;  %1599 = vmatmul.mubr.bf16.gmra.mrb[116].mxu1 %v4197_v40 }
 0x138   : > { %1350 = vmatprep.mubr.bf16.mxu0 %v4147_v42  ;;  %1606 = vmatprep.mubr.bf16.mxu1 %v4198_v50 }
 0x13a   : > { %v4516_v51 = vpop.f32.mrb[12].mxu0  ;;  %v4518_v52 = vpop.f32.mrb[12].mxu1 }
 0x13b   : > { %6901 = vst [vmem:[#allocation8_spill] sm:$0xff] %v4516_v51  ;;  %v1628_v53 = vadd.f32 %v1627_v45, %v4516_v51  ;;  %v1764_v54 = vmul.f32 %v4516_v51, %v4516_v51  ;;  %v1138_v55 = vpop.f32.mrb[13].mxu0  ;;  %v1394_v57 = vpop.f32.mrb[13].mxu1 }
 0x13c   : > { %v4525_v59 = vpop.f32.mrb[14].mxu0  ;;  %v4528_v61 = vpop.f32.mrb[14].mxu1 }
 0x13d   : > { %6902 = vst [vmem:[#allocation9_spill] sm:$0xff] %v4525_v59  ;;  %v1891_v62 = vadd.f32 %v1890_v49, %v1764_v54  ;;  %v1629_v1 = vadd.f32 %v1628_v53, %v4525_v59  ;;  %v1765_v2 = vmul.f32 %v4525_v59, %v4525_v59  ;;  %v1141_v3 = vpop.f32.mrb[15].mxu0  ;;  %v1397_v4 = vpop.f32.mrb[15].mxu1 }
 0x13f   : > { %v1892_v6 = vadd.f32 %v1891_v62, %v1765_v2  ;;  %1351 = vmatmul.mubr.bf16.gmra.mrb[120].mxu0 %v4149_v56  ;;  %1607 = vmatmul.mubr.bf16.gmra.mrb[120].mxu1 %v4200_v58 }
 0x140   : > { %1358 = vmatprep.mubr.bf16.mxu0 %v4153_v60  ;;  %1614 = vmatprep.mubr.bf16.mxu1 %v4201_v8 }
 0x142   : > { %v4534_v9 = vpop.f32.mrb[16].mxu0  ;;  %v4536_v10 = vpop.f32.mrb[16].mxu1 }
 0x143   : > { %6903 = vst [vmem:[#allocation10_spill] sm:$0xff] %v4534_v9  ;;  %v1630_v11 = vadd.f32 %v1629_v1, %v4534_v9  ;;  %v1766_v12 = vmul.f32 %v4534_v9, %v4534_v9  ;;  %v1146_v13 = vpop.f32.mrb[17].mxu0  ;;  %v1402_v17 = vpop.f32.mrb[17].mxu1 }
 0x144   : > { %v4543_v19 = vpop.f32.mrb[18].mxu0  ;;  %v4545_v20 = vpop.f32.mrb[18].mxu1 }
 0x145   : > { %6904 = vst [vmem:[#allocation11_spill] sm:$0xff] %v4543_v19  ;;  %v1893_v21 = vadd.f32 %v1892_v6, %v1766_v12  ;;  %v1631_v22 = vadd.f32 %v1630_v11, %v4543_v19  ;;  %v1767_v24 = vmul.f32 %v4543_v19, %v4543_v19  ;;  %v1149_v26 = vpop.f32.mrb[19].mxu0  ;;  %v1405_v27 = vpop.f32.mrb[19].mxu1 }
 0x147   : > { %v1894_v28 = vadd.f32 %v1893_v21, %v1767_v24  ;;  %1359 = vmatmul.mubr.bf16.gmra.mrb[124].mxu0 %v4155_v14  ;;  %1615 = vmatmul.mubr.bf16.gmra.mrb[124].mxu1 %v4203_v18 }
 0x14a   : > { %v4550_v29 = vpop.f32.mrb[20].mxu0  ;;  %v4552_v30 = vpop.f32.mrb[20].mxu1 }
 0x14b   : > { %6905 = vst [vmem:[#allocation12_spill] sm:$0xff] %v4550_v29  ;;  %v1632_v31 = vadd.f32 %v1631_v22, %v4550_v29  ;;  %v1768_v32 = vmul.f32 %v4550_v29, %v4550_v29  ;;  %v1154_v35 = vpop.f32.mrb[21].mxu0  ;;  %v1410_v36 = vpop.f32.mrb[21].mxu1 }
 0x14c   : > { %v4557_v37 = vpop.f32.mrb[22].mxu0  ;;  %v4559_v38 = vpop.f32.mrb[22].mxu1 }
 0x14d   : > { %6906 = vst [vmem:[#allocation13_spill] sm:$0xff] %v4557_v37  ;;  %v1895_v39 = vadd.f32 %v1894_v28, %v1768_v32  ;;  %v1633_v40 = vadd.f32 %v1632_v31, %v4557_v37  ;;  %v1769_v42 = vmul.f32 %v4557_v37, %v4557_v37  ;;  %v1157_v44 = vpop.f32.mrb[23].mxu0  ;;  %v1413_v45 = vpop.f32.mrb[23].mxu1 }
 0x14f   : > { %v1896_v46 = vadd.f32 %v1895_v39, %v1769_v42 }
 0x152   : > { %v4564_v47 = vpop.f32.mrb[24].mxu0  ;;  %v4566_v48 = vpop.f32.mrb[24].mxu1 }
 0x153   : > { %6907 = vst [vmem:[#allocation14_spill] sm:$0xff] %v4564_v47  ;;  %v1634_v49 = vadd.f32 %v1633_v40, %v4564_v47  ;;  %v1770_v50 = vmul.f32 %v4564_v47, %v4564_v47  ;;  %v1162_v53 = vpop.f32.mrb[25].mxu0  ;;  %v1418_v54 = vpop.f32.mrb[25].mxu1 }
 0x154   : > { %v4571_v55 = vpop.f32.mrb[26].mxu0  ;;  %v4573_v56 = vpop.f32.mrb[26].mxu1 }
 0x155   : > { %6908 = vst [vmem:[#allocation15_spill] sm:$0xff] %v4571_v55  ;;  %v1897_v57 = vadd.f32 %v1896_v46, %v1770_v50  ;;  %v1635_v58 = vadd.f32 %v1634_v49, %v4571_v55  ;;  %v1771_v60 = vmul.f32 %v4571_v55, %v4571_v55  ;;  %v1165_v62 = vpop.f32.mrb[27].mxu0  ;;  %v1421_v1 = vpop.f32.mrb[27].mxu1 }
 0x157   : > { %v1898_v2 = vadd.f32 %v1897_v57, %v1771_v60 }
 0x15a   : > { %v4578_v3 = vpop.f32.mrb[28].mxu0  ;;  %v4580_v4 = vpop.f32.mrb[28].mxu1 }
 0x15b   : > { %6909 = vst [vmem:[#allocation16_spill] sm:$0xff] %v4578_v3  ;;  %v1636_v6 = vadd.f32 %v1635_v58, %v4578_v3  ;;  %v1772_v8 = vmul.f32 %v4578_v3, %v4578_v3  ;;  %v1170_v11 = vpop.f32.mrb[29].mxu0  ;;  %v1426_v12 = vpop.f32.mrb[29].mxu1 }
 0x15c   : > { %v4585_v13 = vpop.f32.mrb[30].mxu0  ;;  %v4587_v14 = vpop.f32.mrb[30].mxu1 }
 0x15d   : > { %6910 = vst [vmem:[#allocation17_spill] sm:$0xff] %v4585_v13  ;;  %v1899_v17 = vadd.f32 %v1898_v2, %v1772_v8  ;;  %v1637_v18 = vadd.f32 %v1636_v6, %v4585_v13  ;;  %v1773_v21 = vmul.f32 %v4585_v13, %v4585_v13  ;;  %v1173_v22 = vpop.f32.mrb[31].mxu0  ;;  %v1429_v24 = vpop.f32.mrb[31].mxu1 }
 0x15f   : > { %v1900_v26 = vadd.f32 %v1899_v17, %v1773_v21 }
 0x162   : > { %v4592_v27 = vpop.f32.mrb[32].mxu0  ;;  %v4594_v28 = vpop.f32.mrb[32].mxu1 }
 0x163   : > { %6911 = vst [vmem:[#allocation18_spill] sm:$0xff] %v4592_v27  ;;  %v1638_v31 = vadd.f32 %v1637_v18, %v4592_v27  ;;  %v1774_v32 = vmul.f32 %v4592_v27, %v4592_v27  ;;  %v1178_v35 = vpop.f32.mrb[33].mxu0  ;;  %v1434_v36 = vpop.f32.mrb[33].mxu1 }
 0x164   : > { %v4599_v39 = vpop.f32.mrb[34].mxu0  ;;  %v4601_v40 = vpop.f32.mrb[34].mxu1 }
 0x165   : > { %6912 = vst [vmem:[#allocation19_spill] sm:$0xff] %v4599_v39  ;;  %v1901_v42 = vadd.f32 %v1900_v26, %v1774_v32  ;;  %v1639_v44 = vadd.f32 %v1638_v31, %v4599_v39  ;;  %v1775_v45 = vmul.f32 %v4599_v39, %v4599_v39  ;;  %v1181_v46 = vpop.f32.mrb[35].mxu0  ;;  %v1437_v49 = vpop.f32.mrb[35].mxu1 }
 0x167   : > { %v1902_v50 = vadd.f32 %v1901_v42, %v1775_v45 }
 0x16a   : > { %v4606_v53 = vpop.f32.mrb[36].mxu0  ;;  %v4608_v54 = vpop.f32.mrb[36].mxu1 }
 0x16b   : > { %6913 = vst [vmem:[#allocation20_spill] sm:$0xff] %v4606_v53  ;;  %v1640_v57 = vadd.f32 %v1639_v44, %v4606_v53  ;;  %v1776_v58 = vmul.f32 %v4606_v53, %v4606_v53  ;;  %v1186_v60 = vpop.f32.mrb[37].mxu0  ;;  %v1442_v62 = vpop.f32.mrb[37].mxu1 }
 0x16c   : > { %v4613_v1 = vpop.f32.mrb[38].mxu0  ;;  %v4615_v2 = vpop.f32.mrb[38].mxu1 }
 0x16d   : > { %6914 = vst [vmem:[#allocation21_spill] sm:$0xff] %v4613_v1  ;;  %v1903_v6 = vadd.f32 %v1902_v50, %v1776_v58  ;;  %v1641_v8 = vadd.f32 %v1640_v57, %v4613_v1  ;;  %v1777_v11 = vmul.f32 %v4613_v1, %v4613_v1  ;;  %v1189_v12 = vpop.f32.mrb[39].mxu0  ;;  %v1445_v17 = vpop.f32.mrb[39].mxu1 }
 0x16f   : > { %v1904_v18 = vadd.f32 %v1903_v6, %v1777_v11 }
 0x172   : > { %v4620_v21 = vpop.f32.mrb[40].mxu0  ;;  %v4622_v22 = vpop.f32.mrb[40].mxu1 }
 0x173   : > { %6915 = vst [vmem:[#allocation22_spill] sm:$0xff] %v4620_v21  ;;  %v1642_v24 = vadd.f32 %v1641_v8, %v4620_v21  ;;  %v1778_v26 = vmul.f32 %v4620_v21, %v4620_v21  ;;  %v1194_v31 = vpop.f32.mrb[41].mxu0  ;;  %v1450_v32 = vpop.f32.mrb[41].mxu1 }
 0x174   : > { %v4627_v35 = vpop.f32.mrb[42].mxu0  ;;  %v4629_v36 = vpop.f32.mrb[42].mxu1 }
 0x175   : > { %6916 = vst [vmem:[#allocation23_spill] sm:$0xff] %v4627_v35  ;;  %v1905_v42 = vadd.f32 %v1904_v18, %v1778_v26  ;;  %v1643_v44 = vadd.f32 %v1642_v24, %v4627_v35  ;;  %v1779_v45 = vmul.f32 %v4627_v35, %v4627_v35  ;;  %v1197_v46 = vpop.f32.mrb[43].mxu0  ;;  %v1453_v49 = vpop.f32.mrb[43].mxu1 }
 0x177   : > { %v1906_v50 = vadd.f32 %v1905_v42, %v1779_v45 }
 0x17a   : > { %v4634_v57 = vpop.f32.mrb[44].mxu0  ;;  %v4636_v58 = vpop.f32.mrb[44].mxu1 }
 0x17b   : > { %6917 = vst [vmem:[#allocation24_spill] sm:$0xff] %v4634_v57  ;;  %v1644_v60 = vadd.f32 %v1643_v44, %v4634_v57  ;;  %v1780_v62 = vmul.f32 %v4634_v57, %v4634_v57  ;;  %v1202_v6 = vpop.f32.mrb[45].mxu0  ;;  %v1458_v8 = vpop.f32.mrb[45].mxu1 }
 0x17c   : > { %v4641_v11 = vpop.f32.mrb[46].mxu0  ;;  %v4643_v12 = vpop.f32.mrb[46].mxu1 }
 0x17d   : > { %6918 = vst [vmem:[#allocation25_spill] sm:$0xff] %v4641_v11  ;;  %v1907_v17 = vadd.f32 %v1906_v50, %v1780_v62  ;;  %v1645_v18 = vadd.f32 %v1644_v60, %v4641_v11  ;;  %v1781_v24 = vmul.f32 %v4641_v11, %v4641_v11  ;;  %v1205_v26 = vpop.f32.mrb[47].mxu0  ;;  %v1461_v31 = vpop.f32.mrb[47].mxu1 }
 0x17f   : > { %v1908_v32 = vadd.f32 %v1907_v17, %v1781_v24 }
 0x182   : > { %v4648_v42 = vpop.f32.mrb[48].mxu0  ;;  %v4650_v44 = vpop.f32.mrb[48].mxu1 }
 0x183   : > { %6919 = vst [vmem:[#allocation26_spill] sm:$0xff] %v4648_v42  ;;  %v1646_v45 = vadd.f32 %v1645_v18, %v4648_v42  ;;  %v1782_v46 = vmul.f32 %v4648_v42, %v4648_v42  ;;  %v1210_v49 = vpop.f32.mrb[49].mxu0  ;;  %v1466_v6 = vpop.f32.mrb[49].mxu1 }
 0x184   : > { %v4655_v50 = vpop.f32.mrb[50].mxu0  ;;  %v4657_v60 = vpop.f32.mrb[50].mxu1 }
 0x185   : > { %6920 = vst [vmem:[#allocation27_spill] sm:$0xff] %v4655_v50  ;;  %v1909_v62 = vadd.f32 %v1908_v32, %v1782_v46  ;;  %v1647_v8 = vadd.f32 %v1646_v45, %v4655_v50  ;;  %v1783_v17 = vmul.f32 %v4655_v50, %v4655_v50  ;;  %v1213_v24 = vpop.f32.mrb[51].mxu0  ;;  %v1469_v26 = vpop.f32.mrb[51].mxu1 }
 0x187   : > { %v1910_v31 = vadd.f32 %v1909_v62, %v1783_v17 }
 0x18a   : > { %v4662_v11 = vpop.f32.mrb[52].mxu0  ;;  %v4664_v18 = vpop.f32.mrb[52].mxu1 }
 0x18b   : > { %6921 = vst [vmem:[#allocation28_spill] sm:$0xff] %v4662_v11  ;;  %v1648_v49 = vadd.f32 %v1647_v8, %v4662_v11  ;;  %v1784_v6 = vmul.f32 %v4662_v11, %v4662_v11  ;;  %v1218_v42 = vpop.f32.mrb[53].mxu0  ;;  %v1474_v57 = vpop.f32.mrb[53].mxu1 }
 0x18c   : > { %v4669_v32 = vpop.f32.mrb[54].mxu0  ;;  %v4671_v45 = vpop.f32.mrb[54].mxu1 }
 0x18d   : > { %6922 = vst [vmem:[#allocation29_spill] sm:$0xff] %v4669_v32  ;;  %v1911_v46 = vadd.f32 %v1910_v31, %v1784_v6  ;;  %v1649_v24 = vadd.f32 %v1648_v49, %v4669_v32  ;;  %v1785_v62 = vmul.f32 %v4669_v32, %v4669_v32  ;;  %v1221_v17 = vpop.f32.mrb[55].mxu0  ;;  %v1477_v26 = vpop.f32.mrb[55].mxu1 }
 0x18f   : > { %v1912_v50 = vadd.f32 %v1911_v46, %v1785_v62 }
 0x192   : > { %v4676_v35 = vpop.f32.mrb[56].mxu0  ;;  %v4678_v8 = vpop.f32.mrb[56].mxu1 }
 0x193   : > { %6923 = vst [vmem:[#allocation30_spill] sm:$0xff] %v4676_v35  ;;  %v1650_v42 = vadd.f32 %v1649_v24, %v4676_v35  ;;  %v1786_v57 = vmul.f32 %v4676_v35, %v4676_v35  ;;  %v1226_v11 = vpop.f32.mrb[57].mxu0  ;;  %v1482_v21 = vpop.f32.mrb[57].mxu1 }
 0x194   : > { %v4683_v31 = vpop.f32.mrb[58].mxu0  ;;  %v4685_v49 = vpop.f32.mrb[58].mxu1 }
 0x195   : > { %6924 = vst [vmem:[#allocation31_spill] sm:$0xff] %v4683_v31  ;;  %v1913_v6 = vadd.f32 %v1912_v50, %v1786_v57  ;;  %v1651_v17 = vadd.f32 %v1650_v42, %v4683_v31  ;;  %v1787_v46 = vmul.f32 %v4683_v31, %v4683_v31  ;;  %v1229_v62 = vpop.f32.mrb[59].mxu0  ;;  %v1485_v26 = vpop.f32.mrb[59].mxu1 }
 0x197   : > { %v1914_v32 = vadd.f32 %v1913_v6, %v1787_v46 }
 0x19a   : > { %v4690_v1 = vpop.f32.mrb[60].mxu0  ;;  %v4692_v24 = vpop.f32.mrb[60].mxu1 }
 0x19b   : > { %6925 = vst [vmem:[#allocation32_spill] sm:$0xff] %v4690_v1  ;;  %v1652_v11 = vadd.f32 %v1651_v17, %v4690_v1  ;;  %v1788_v21 = vmul.f32 %v4690_v1, %v4690_v1  ;;  %v1234_v35 = vpop.f32.mrb[61].mxu0  ;;  %v1490_v53 = vpop.f32.mrb[61].mxu1 }
 0x19c   : > { %v4697_v50 = vpop.f32.mrb[62].mxu0  ;;  %v4699_v42 = vpop.f32.mrb[62].mxu1 }
 0x19d   : > { %6926 = vst [vmem:[#allocation33_spill] sm:$0xff] %v4697_v50  ;;  %v1915_v57 = vadd.f32 %v1914_v32, %v1788_v21  ;;  %v1653_v62 = vadd.f32 %v1652_v11, %v4697_v50  ;;  %v1789_v6 = vmul.f32 %v4697_v50, %v4697_v50  ;;  %v1237_v46 = vpop.f32.mrb[63].mxu0  ;;  %v1493_v26 = vpop.f32.mrb[63].mxu1 }
 0x19f   : > { %v1916_v31 = vadd.f32 %v1915_v57, %v1789_v6 }
 0x1a2   : > { %v4704_v39 = vpop.f32.mrb[64].mxu0  ;;  %v4706_v17 = vpop.f32.mrb[64].mxu1 }
 0x1a3   : > { %6927 = vst [vmem:[#allocation34_spill] sm:$0xff] %v4704_v39  ;;  %v1654_v35 = vadd.f32 %v1653_v62, %v4704_v39  ;;  %v1790_v53 = vmul.f32 %v4704_v39, %v4704_v39  ;;  %v1242_v1 = vpop.f32.mrb[65].mxu0  ;;  %v1498_v27 = vpop.f32.mrb[65].mxu1 }
 0x1a4   : > { %v4711_v32 = vpop.f32.mrb[66].mxu0  ;;  %v4713_v11 = vpop.f32.mrb[66].mxu1 }
 0x1a5   : > { %6928 = vst [vmem:[#allocation35_spill] sm:$0xff] %v4711_v32  ;;  %v1917_v21 = vadd.f32 %v1916_v31, %v1790_v53  ;;  %v1655_v46 = vadd.f32 %v1654_v35, %v4711_v32  ;;  %v1791_v57 = vmul.f32 %v4711_v32, %v4711_v32  ;;  %v1245_v6 = vpop.f32.mrb[67].mxu0  ;;  %v1501_v26 = vpop.f32.mrb[67].mxu1 }
 0x1a7   : > { %v1918_v50 = vadd.f32 %v1917_v21, %v1791_v57 }
 0x1aa   : > { %v4718_v13 = vpop.f32.mrb[68].mxu0  ;;  %v4720_v62 = vpop.f32.mrb[68].mxu1 }
 0x1ab   : > { %6929 = vst [vmem:[#allocation36_spill] sm:$0xff] %v4718_v13  ;;  %v1656_v1 = vadd.f32 %v1655_v46, %v4718_v13  ;;  %v1792_v27 = vmul.f32 %v4718_v13, %v4718_v13  ;;  %v1250_v39 = vpop.f32.mrb[69].mxu0  ;;  %v1506_v3 = vpop.f32.mrb[69].mxu1 }
 0x1ac   : > { %v4725_v31 = vpop.f32.mrb[70].mxu0  ;;  %v4727_v35 = vpop.f32.mrb[70].mxu1 }
 0x1ad   : > { %6930 = vst [vmem:[#allocation37_spill] sm:$0xff] %v4725_v31  ;;  %6931 = vst [vmem:[#allocation38_spill] sm:$0xff] %v4727_v35  ;;  %v1919_v53 = vadd.f32 %v1918_v50, %v1792_v27  ;;  %v1657_v6 = vadd.f32 %v1656_v1, %v4725_v31  ;;  %v1793_v21 = vmul.f32 %v4725_v31, %v4725_v31  ;;  %v1253_v57 = vpop.f32.mrb[71].mxu0  ;;  %v1509_v26 = vpop.f32.mrb[71].mxu1 }
 0x1af   : > { %v1920_v32 = vadd.f32 %v1919_v53, %v1793_v21 }
 0x1b2   : > { %v4732_v55 = vpop.f32.mrb[72].mxu0  ;;  %v4734_v46 = vpop.f32.mrb[72].mxu1 }
 0x1b3   : > { %6932 = vst [vmem:[#allocation39_spill] sm:$0xff] %v4732_v55  ;;  %6933 = vst [vmem:[#allocation40_spill] sm:$0xff] %v4734_v46  ;;  %v1658_v39 = vadd.f32 %v1657_v6, %v4732_v55  ;;  %v1794_v3 = vmul.f32 %v4732_v55, %v4732_v55  ;;  %v1258_v13 = vpop.f32.mrb[73].mxu0  ;;  %v1514_v47 = vpop.f32.mrb[73].mxu1 }
 0x1b4   : > { %v4739_v50 = vpop.f32.mrb[74].mxu0  ;;  %v4741_v1 = vpop.f32.mrb[74].mxu1 }
 0x1b5   : > { %6934 = vst [vmem:[#allocation41_spill] sm:$0xff] %v4739_v50  ;;  %6935 = vst [vmem:[#allocation42_spill] sm:$0xff] %v4741_v1  ;;  %v1921_v27 = vadd.f32 %v1920_v32, %v1794_v3  ;;  %v1659_v57 = vadd.f32 %v1658_v39, %v4739_v50  ;;  %v1795_v53 = vmul.f32 %v4739_v50, %v4739_v50  ;;  %v1261_v21 = vpop.f32.mrb[75].mxu0  ;;  %v1517_v26 = vpop.f32.mrb[75].mxu1 }
 0x1b7   : > { %v1922_v31 = vadd.f32 %v1921_v27, %v1795_v53 }
 0x1ba   : > { %v4746_v37 = vpop.f32.mrb[76].mxu0  ;;  %v4748_v6 = vpop.f32.mrb[76].mxu1 }
 0x1bb   : > { %6936 = vst [vmem:[#allocation43_spill] sm:$0xff] %v4746_v37  ;;  %6937 = vst [vmem:[#allocation44_spill] sm:$0xff] %v4748_v6  ;;  %v1660_v13 = vadd.f32 %v1659_v57, %v4746_v37  ;;  %v1796_v47 = vmul.f32 %v4746_v37, %v4746_v37  ;;  %v1266_v55 = vpop.f32.mrb[77].mxu0  ;;  %v1522_v29 = vpop.f32.mrb[77].mxu1 }
 0x1bc   : > { %v4753_v32 = vpop.f32.mrb[78].mxu0  ;;  %v4755_v39 = vpop.f32.mrb[78].mxu1 }
 0x1bd   : > { %6938 = vst [vmem:[#allocation45_spill] sm:$0xff] %v4753_v32  ;;  %6939 = vst [vmem:[#allocation46_spill] sm:$0xff] %v4755_v39  ;;  %v1923_v3 = vadd.f32 %v1922_v31, %v1796_v47  ;;  %v1661_v21 = vadd.f32 %v1660_v13, %v4753_v32  ;;  %v1797_v27 = vmul.f32 %v4753_v32, %v4753_v32  ;;  %v1269_v53 = vpop.f32.mrb[79].mxu0  ;;  %v1525_v26 = vpop.f32.mrb[79].mxu1 }
 0x1bf   : > { %v1924_v50 = vadd.f32 %v1923_v3, %v1797_v27 }
 0x1c2   : > { %v4760_v19 = vpop.f32.mrb[80].mxu0  ;;  %v4762_v57 = vpop.f32.mrb[80].mxu1 }
 0x1c3   : > { %6940 = vst [vmem:[#allocation47_spill] sm:$0xff] %v4760_v19  ;;  %6941 = vst [vmem:[#allocation48_spill] sm:$0xff] %v4762_v57  ;;  %v1662_v55 = vadd.f32 %v1661_v21, %v4760_v19  ;;  %v1798_v29 = vmul.f32 %v4760_v19, %v4760_v19  ;;  %v1274_v37 = vpop.f32.mrb[81].mxu0  ;;  %v1530_v9 = vpop.f32.mrb[81].mxu1 }
 0x1c4   : > { %v4767_v31 = vpop.f32.mrb[82].mxu0  ;;  %v4769_v13 = vpop.f32.mrb[82].mxu1 }
 0x1c5   : > { %6942 = vst [vmem:[#allocation49_spill] sm:$0xff] %v4767_v31  ;;  %6943 = vst [vmem:[#allocation50_spill] sm:$0xff] %v4769_v13  ;;  %v1925_v47 = vadd.f32 %v1924_v50, %v1798_v29  ;;  %v1663_v53 = vadd.f32 %v1662_v55, %v4767_v31  ;;  %v1799_v3 = vmul.f32 %v4767_v31, %v4767_v31  ;;  %v1277_v27 = vpop.f32.mrb[83].mxu0  ;;  %v1533_v26 = vpop.f32.mrb[83].mxu1 }
 0x1c7   : > { %v1926_v32 = vadd.f32 %v1925_v47, %v1799_v3 }
 0x1ca   : > { %v4774_v59 = vpop.f32.mrb[84].mxu0  ;;  %v4776_v21 = vpop.f32.mrb[84].mxu1 }
 0x1cb   : > { %6944 = vst [vmem:[#allocation51_spill] sm:$0xff] %v4774_v59  ;;  %6945 = vst [vmem:[#allocation52_spill] sm:$0xff] %v4776_v21  ;;  %v1664_v37 = vadd.f32 %v1663_v53, %v4774_v59  ;;  %v1800_v9 = vmul.f32 %v4774_v59, %v4774_v59  ;;  %v1282_v19 = vpop.f32.mrb[85].mxu0  ;;  %v1538_v51 = vpop.f32.mrb[85].mxu1 }
 0x1cc   : > { %v4781_v50 = vpop.f32.mrb[86].mxu0  ;;  %v4783_v55 = vpop.f32.mrb[86].mxu1 }
 0x1cd   : > { %6946 = vst [vmem:[#allocation53_spill] sm:$0xff] %v4781_v50  ;;  %6947 = vst [vmem:[#allocation54_spill] sm:$0xff] %v4783_v55  ;;  %v1927_v29 = vadd.f32 %v1926_v32, %v1800_v9  ;;  %v1665_v27 = vadd.f32 %v1664_v37, %v4781_v50  ;;  %v1801_v47 = vmul.f32 %v4781_v50, %v4781_v50  ;;  %v1285_v3 = vpop.f32.mrb[87].mxu0  ;;  %v1541_v26 = vpop.f32.mrb[87].mxu1 }
 0x1cf   : > { %v1928_v31 = vadd.f32 %v1927_v29, %v1801_v47 }
 0x1d2   : > { %v4788_v41 = vpop.f32.mrb[88].mxu0  ;;  %v4790_v53 = vpop.f32.mrb[88].mxu1 }
 0x1d3   : > { %6948 = vst [vmem:[#allocation55_spill] sm:$0xff] %v4788_v41  ;;  %6949 = vst [vmem:[#allocation56_spill] sm:$0xff] %v4790_v53  ;;  %v1666_v19 = vadd.f32 %v1665_v27, %v4788_v41  ;;  %v1802_v51 = vmul.f32 %v4788_v41, %v4788_v41  ;;  %v1290_v59 = vpop.f32.mrb[89].mxu0  ;;  %v1546_v33 = vpop.f32.mrb[89].mxu1 }
 0x1d4   : > { %v4795_v32 = vpop.f32.mrb[90].mxu0  ;;  %v4797_v37 = vpop.f32.mrb[90].mxu1 }
 0x1d5   : > { %6950 = vst [vmem:[#allocation57_spill] sm:$0xff] %v4795_v32  ;;  %6951 = vst [vmem:[#allocation58_spill] sm:$0xff] %v4797_v37  ;;  %v1929_v9 = vadd.f32 %v1928_v31, %v1802_v51  ;;  %v1667_v3 = vadd.f32 %v1666_v19, %v4795_v32  ;;  %v1803_v29 = vmul.f32 %v4795_v32, %v4795_v32  ;;  %v1293_v47 = vpop.f32.mrb[91].mxu0  ;;  %v1549_v26 = vpop.f32.mrb[91].mxu1 }
 0x1d7   : > { %v1930_v50 = vadd.f32 %v1929_v9, %v1803_v29 }
 0x1da   : > { %v4802_v23 = vpop.f32.mrb[92].mxu0  ;;  %v4804_v27 = vpop.f32.mrb[92].mxu1 }
 0x1db   : > { %6952 = vst [vmem:[#allocation59_spill] sm:$0xff] %v4802_v23  ;;  %6953 = vst [vmem:[#allocation60_spill] sm:$0xff] %v4804_v27  ;;  %v1668_v59 = vadd.f32 %v1667_v3, %v4802_v23  ;;  %v1804_v33 = vmul.f32 %v4802_v23, %v4802_v23  ;;  %v1298_v41 = vpop.f32.mrb[93].mxu0  ;;  %v1554_v15 = vpop.f32.mrb[93].mxu1 }
 0x1dc   : > { %v4809_v31 = vpop.f32.mrb[94].mxu0  ;;  %v4811_v19 = vpop.f32.mrb[94].mxu1 }
 0x1dd   : > { %6954 = vst [vmem:[#allocation61_spill] sm:$0xff] %v4809_v31  ;;  %6955 = vst [vmem:[#allocation62_spill] sm:$0xff] %v4811_v19  ;;  %v1931_v51 = vadd.f32 %v1930_v50, %v1804_v33  ;;  %v1669_v47 = vadd.f32 %v1668_v59, %v4809_v31  ;;  %v1805_v9 = vmul.f32 %v4809_v31, %v4809_v31  ;;  %v1301_v29 = vpop.f32.mrb[95].mxu0  ;;  %v1557_v26 = vpop.f32.mrb[95].mxu1 }
 0x1df   : > { %v1932_v32 = vadd.f32 %v1931_v51, %v1805_v9 }
 0x1e2   : > { %v4816_v5 = vpop.f32.mrb[96].mxu0  ;;  %v4818_v3 = vpop.f32.mrb[96].mxu1 }
 0x1e3   : > { %6956 = vst [vmem:[#allocation63_spill] sm:$0xff] %v4816_v5  ;;  %6957 = vst [vmem:[#allocation64_spill] sm:$0xff] %v4818_v3  ;;  %v1670_v41 = vadd.f32 %v1669_v47, %v4816_v5  ;;  %v1806_v15 = vmul.f32 %v4816_v5, %v4816_v5  ;;  %v1306_v23 = vpop.f32.mrb[97].mxu0  ;;  %v1562_v63 = vpop.f32.mrb[97].mxu1 }
 0x1e4   : > { %v4823_v50 = vpop.f32.mrb[98].mxu0  ;;  %v4825_v59 = vpop.f32.mrb[98].mxu1 }
 0x1e5   : > { %6958 = vst [vmem:[#allocation65_spill] sm:$0xff] %v4823_v50  ;;  %6959 = vst [vmem:[#allocation66_spill] sm:$0xff] %v4825_v59  ;;  %v1933_v33 = vadd.f32 %v1932_v32, %v1806_v15  ;;  %v1671_v29 = vadd.f32 %v1670_v41, %v4823_v50  ;;  %v1807_v51 = vmul.f32 %v4823_v50, %v4823_v50  ;;  %v1309_v9 = vpop.f32.mrb[99].mxu0  ;;  %v1565_v26 = vpop.f32.mrb[99].mxu1 }
 0x1e7   : > { %v1934_v31 = vadd.f32 %v1933_v33, %v1807_v51 }
 0x1ea   : > { %v4830_v3 = vpop.f32.mrb[100].mxu0  ;;  %v4832_v47 = vpop.f32.mrb[100].mxu1 }
 0x1eb   : > { %6960 = vst [vmem:[#allocation67_spill] sm:$0xff] %v4830_v3  ;;  %6961 = vst [vmem:[#allocation68_spill] sm:$0xff] %v4832_v47  ;;  %v1672_v23 = vadd.f32 %v1671_v29, %v4830_v3  ;;  %v1808_v63 = vmul.f32 %v4830_v3, %v4830_v3  ;;  %v1314_v5 = vpop.f32.mrb[101].mxu0  ;;  %v1570_v59 = vpop.f32.mrb[101].mxu1 }
 0x1ec   : > { %v4837_v32 = vpop.f32.mrb[102].mxu0  ;;  %v4839_v41 = vpop.f32.mrb[102].mxu1 }
 0x1ed   : > { %6962 = vst [vmem:[#allocation69_spill] sm:$0xff] %v4837_v32  ;;  %6963 = vst [vmem:[#allocation70_spill] sm:$0xff] %v4839_v41  ;;  %v1935_v15 = vadd.f32 %v1934_v31, %v1808_v63  ;;  %v1673_v9 = vadd.f32 %v1672_v23, %v4837_v32  ;;  %v1809_v33 = vmul.f32 %v4837_v32, %v4837_v32  ;;  %v1317_v51 = vpop.f32.mrb[103].mxu0  ;;  %v1573_v26 = vpop.f32.mrb[103].mxu1 }
 0x1ef   : > { %v1936_v50 = vadd.f32 %v1935_v15, %v1809_v33 }
 0x1f2   : > { %v4844_v47 = vpop.f32.mrb[104].mxu0  ;;  %v4846_v29 = vpop.f32.mrb[104].mxu1 }
 0x1f3   : > { %6964 = vst [vmem:[#allocation71_spill] sm:$0xff] %v4844_v47  ;;  %6965 = vst [vmem:[#allocation72_spill] sm:$0xff] %v4846_v29  ;;  %v1674_v5 = vadd.f32 %v1673_v9, %v4844_v47  ;;  %v1810_v59 = vmul.f32 %v4844_v47, %v4844_v47  ;;  %v1322_v3 = vpop.f32.mrb[105].mxu0  ;;  %v1578_v41 = vpop.f32.mrb[105].mxu1 }
 0x1f4   : > { %v4851_v31 = vpop.f32.mrb[106].mxu0  ;;  %v4853_v23 = vpop.f32.mrb[106].mxu1 }
 0x1f5   : > { %6966 = vst [vmem:[#allocation73_spill] sm:$0xff] %v4851_v31  ;;  %6967 = vst [vmem:[#allocation74_spill] sm:$0xff] %v4853_v23  ;;  %v1937_v63 = vadd.f32 %v1936_v50, %v1810_v59  ;;  %v1675_v51 = vadd.f32 %v1674_v5, %v4851_v31  ;;  %v1811_v15 = vmul.f32 %v4851_v31, %v4851_v31  ;;  %v1325_v33 = vpop.f32.mrb[107].mxu0  ;;  %v1581_v26 = vpop.f32.mrb[107].mxu1 }
 0x1f7   : > { %v1938_v32 = vadd.f32 %v1937_v63, %v1811_v15 }
 0x1fa   : > { %v4858_v29 = vpop.f32.mrb[108].mxu0  ;;  %v4860_v9 = vpop.f32.mrb[108].mxu1 }
 0x1fb   : > { %6968 = vst [vmem:[#allocation75_spill] sm:$0xff] %v4858_v29  ;;  %6969 = vst [vmem:[#allocation76_spill] sm:$0xff] %v4860_v9  ;;  %v1676_v3 = vadd.f32 %v1675_v51, %v4858_v29  ;;  %v1812_v41 = vmul.f32 %v4858_v29, %v4858_v29  ;;  %v1330_v47 = vpop.f32.mrb[109].mxu0  ;;  %v1586_v23 = vpop.f32.mrb[109].mxu1 }
 0x1fc   : > { %v4865_v50 = vpop.f32.mrb[110].mxu0  ;;  %v4867_v5 = vpop.f32.mrb[110].mxu1 }
 0x1fd   : > { %6970 = vst [vmem:[#allocation77_spill] sm:$0xff] %v4865_v50  ;;  %6971 = vst [vmem:[#allocation78_spill] sm:$0xff] %v4867_v5  ;;  %v1939_v59 = vadd.f32 %v1938_v32, %v1812_v41  ;;  %v1677_v33 = vadd.f32 %v1676_v3, %v4865_v50  ;;  %v1813_v63 = vmul.f32 %v4865_v50, %v4865_v50  ;;  %v1333_v15 = vpop.f32.mrb[111].mxu0  ;;  %v1589_v26 = vpop.f32.mrb[111].mxu1 }
 0x1ff   : > { %v1940_v31 = vadd.f32 %v1939_v59, %v1813_v63 }
 0x202   : > { %v4872_v9 = vpop.f32.mrb[112].mxu0  ;;  %v4874_v51 = vpop.f32.mrb[112].mxu1 }
 0x203   : > { %6972 = vst [vmem:[#allocation79_spill] sm:$0xff] %v4872_v9  ;;  %6973 = vst [vmem:[#allocation80_spill] sm:$0xff] %v4874_v51  ;;  %v1678_v47 = vadd.f32 %v1677_v33, %v4872_v9  ;;  %v1814_v23 = vmul.f32 %v4872_v9, %v4872_v9  ;;  %v1338_v29 = vpop.f32.mrb[113].mxu0  ;;  %v1594_v5 = vpop.f32.mrb[113].mxu1 }
 0x204   : > { %v4879_v32 = vpop.f32.mrb[114].mxu0  ;;  %v4881_v3 = vpop.f32.mrb[114].mxu1 }
 0x205   : > { %6974 = vst [vmem:[#allocation81_spill] sm:$0xff] %v4879_v32  ;;  %6975 = vst [vmem:[#allocation82_spill] sm:$0xff] %v4881_v3  ;;  %v1941_v41 = vadd.f32 %v1940_v31, %v1814_v23  ;;  %v1679_v15 = vadd.f32 %v1678_v47, %v4879_v32  ;;  %v1815_v59 = vmul.f32 %v4879_v32, %v4879_v32  ;;  %v1341_v63 = vpop.f32.mrb[115].mxu0  ;;  %v1597_v26 = vpop.f32.mrb[115].mxu1 }
 0x207   : > { %v1942_v50 = vadd.f32 %v1941_v41, %v1815_v59 }
 0x20a   : > { %v4886_v51 = vpop.f32.mrb[116].mxu0  ;;  %v4888_v33 = vpop.f32.mrb[116].mxu1 }
 0x20b   : > { %6976 = vst [vmem:[#allocation83_spill] sm:$0xff] %v4886_v51  ;;  %6977 = vst [vmem:[#allocation84_spill] sm:$0xff] %v4888_v33  ;;  %v1680_v29 = vadd.f32 %v1679_v15, %v4886_v51  ;;  %v1816_v5 = vmul.f32 %v4886_v51, %v4886_v51  ;;  %v1346_v9 = vpop.f32.mrb[117].mxu0  ;;  %v1602_v3 = vpop.f32.mrb[117].mxu1 }
 0x20c   : > { %v4893_v31 = vpop.f32.mrb[118].mxu0  ;;  %v4895_v47 = vpop.f32.mrb[118].mxu1 }
 0x20d   : > { %6978 = vst [vmem:[#allocation85_spill] sm:$0xff] %v4893_v31  ;;  %6979 = vst [vmem:[#allocation86_spill] sm:$0xff] %v4895_v47  ;;  %v1943_v23 = vadd.f32 %v1942_v50, %v1816_v5  ;;  %v1681_v63 = vadd.f32 %v1680_v29, %v4893_v31  ;;  %v1817_v41 = vmul.f32 %v4893_v31, %v4893_v31  ;;  %v1349_v59 = vpop.f32.mrb[119].mxu0  ;;  %v1605_v26 = vpop.f32.mrb[119].mxu1 }
 0x20f   : > { %v1944_v32 = vadd.f32 %v1943_v23, %v1817_v41 }
 0x212   : > { %v4900_v33 = vpop.f32.mrb[120].mxu0  ;;  %v4902_v15 = vpop.f32.mrb[120].mxu1 }
 0x213   : > { %6980 = vst [vmem:[#allocation87_spill] sm:$0xff] %v4900_v33  ;;  %6981 = vst [vmem:[#allocation88_spill] sm:$0xff] %v4902_v15  ;;  %v1682_v9 = vadd.f32 %v1681_v63, %v4900_v33  ;;  %v1818_v3 = vmul.f32 %v4900_v33, %v4900_v33  ;;  %v1354_v51 = vpop.f32.mrb[121].mxu0  ;;  %v1610_v47 = vpop.f32.mrb[121].mxu1 }
 0x214   : > { %v4907_v50 = vpop.f32.mrb[122].mxu0  ;;  %v4909_v29 = vpop.f32.mrb[122].mxu1 }
 0x215   : > { %6982 = vst [vmem:[#allocation89_spill] sm:$0xff] %v4907_v50  ;;  %6983 = vst [vmem:[#allocation90_spill] sm:$0xff] %v4909_v29  ;;  %v1945_v5 = vadd.f32 %v1944_v32, %v1818_v3  ;;  %v1683_v59 = vadd.f32 %v1682_v9, %v4907_v50  ;;  %v1819_v23 = vmul.f32 %v4907_v50, %v4907_v50  ;;  %v1357_v41 = vpop.f32.mrb[123].mxu0  ;;  %v1613_v26 = vpop.f32.mrb[123].mxu1 }
 0x217   : > { %v1946_v31 = vadd.f32 %v1945_v5, %v1819_v23 }
 0x21a   : > { %v4914_v15 = vpop.f32.mrb[124].mxu0  ;;  %v4916_v63 = vpop.f32.mrb[124].mxu1 }
 0x21b   : > { %6984 = vst [vmem:[#allocation91_spill] sm:$0xff] %v4914_v15  ;;  %v1684_v51 = vadd.f32 %v1683_v59, %v4914_v15  ;;  %v1820_v47 = vmul.f32 %v4914_v15, %v4914_v15  ;;  %v1362_v33 = vpop.f32.mrb[125].mxu0  ;;  %v1618_v29 = vpop.f32.mrb[125].mxu1  ;;  %v1822_v59 = vmul.f32 %v4464_v0, %v4464_v0 }
 0x21c   : > { %v4921_v32 = vpop.f32.mrb[126].mxu0  ;;  %v4923_v9 = vpop.f32.mrb[126].mxu1  ;;  %v1823_v33 = vmul.f32 %v4471_v7, %v4471_v7 }
 0x21d   : > { %6985 = vst [vmem:[#allocation92_spill] sm:$0xff] %v4921_v32  ;;  %6986 = vst [vmem:[#allocation93_spill] sm:$0xff] %v4923_v9  ;;  %v1947_v3 = vadd.f32 %v1946_v31, %v1820_v47  ;;  %v1685_v41 = vadd.f32 %v1684_v51, %v4921_v32  ;;  %v1821_v5 = vmul.f32 %v4921_v32, %v4921_v32  ;;  %v1365_v23 = vpop.f32.mrb[127].mxu0  ;;  %v1621_v26 = vpop.f32.mrb[127].mxu1 }
 0x21e   : > { %v1824_v31 = vmul.f32 %v4482_v16, %v4482_v16  ;;  %v1825_v23 = vmul.f32 %v4492_v25, %v4492_v25 }
 0x21f   : > { %v1686_v50 = vadd.f32 %v1685_v41, %v4464_v0  ;;  %v1948_v15 = vadd.f32 %v1947_v3, %v1821_v5  ;;  %v1826_v3 = vmul.f32 %v4500_v34, %v4500_v34 }
 0x221   : > { %v1687_v29 = vadd.f32 %v1686_v50, %v4471_v7  ;;  %v1949_v9 = vadd.f32 %v1948_v15, %v1822_v59  ;;  %v1827_v15 = vmul.f32 %v4510_v43, %v4510_v43 }
 0x223   : > { %v1688_v51 = vadd.f32 %v1687_v29, %v4482_v16  ;;  %v1950_v47 = vadd.f32 %v1949_v9, %v1823_v33  ;;  %v1828_v9 = vmul.f32 %v4518_v52, %v4518_v52 }
 0x225   : > { %v1689_v26 = vadd.f32 %v1688_v51, %v4492_v25  ;;  %v1951_v32 = vadd.f32 %v1950_v47, %v1824_v31  ;;  %v1829_v31 = vmul.f32 %v4528_v61, %v4528_v61 }
 0x227   : > { %v1690_v41 = vadd.f32 %v1689_v26, %v4500_v34  ;;  %v1952_v5 = vadd.f32 %v1951_v32, %v1825_v23  ;;  %v1830_v32 = vmul.f32 %v4536_v10, %v4536_v10 }
 0x229   : > { %v1691_v50 = vadd.f32 %v1690_v41, %v4510_v43  ;;  %v1953_v59 = vadd.f32 %v1952_v5, %v1826_v3  ;;  %v1831_v3 = vmul.f32 %v4545_v20, %v4545_v20 }
 0x22b   : > { %v1692_v33 = vadd.f32 %v1691_v50, %v4518_v52  ;;  %v1954_v29 = vadd.f32 %v1953_v59, %v1827_v15  ;;  %v1832_v15 = vmul.f32 %v4552_v30, %v4552_v30 }
 0x22d   : > { %v1693_v51 = vadd.f32 %v1692_v33, %v4528_v61  ;;  %v1955_v47 = vadd.f32 %v1954_v29, %v1828_v9  ;;  %v1833_v9 = vmul.f32 %v4559_v38, %v4559_v38 }
 0x22f   : > { %v1694_v23 = vadd.f32 %v1693_v51, %v4536_v10  ;;  %v1956_v26 = vadd.f32 %v1955_v47, %v1829_v31  ;;  %v1834_v31 = vmul.f32 %v4566_v48, %v4566_v48 }
 0x231   : > { %v1695_v41 = vadd.f32 %v1694_v23, %v4545_v20  ;;  %v1957_v5 = vadd.f32 %v1956_v26, %v1830_v32  ;;  %v1835_v32 = vmul.f32 %v4573_v56, %v4573_v56 }
 0x233   : > { %v1696_v50 = vadd.f32 %v1695_v41, %v4552_v30  ;;  %v1958_v59 = vadd.f32 %v1957_v5, %v1831_v3  ;;  %v1836_v3 = vmul.f32 %v4580_v4, %v4580_v4 }
 0x235   : > { %v1697_v33 = vadd.f32 %v1696_v50, %v4559_v38  ;;  %v1959_v29 = vadd.f32 %v1958_v59, %v1832_v15  ;;  %v1837_v15 = vmul.f32 %v4587_v14, %v4587_v14 }
 0x237   : > { %v1698_v51 = vadd.f32 %v1697_v33, %v4566_v48  ;;  %v1960_v47 = vadd.f32 %v1959_v29, %v1833_v9  ;;  %v1838_v9 = vmul.f32 %v4594_v28, %v4594_v28 }
 0x239   : > { %v1699_v23 = vadd.f32 %v1698_v51, %v4573_v56  ;;  %v1961_v26 = vadd.f32 %v1960_v47, %v1834_v31  ;;  %v1839_v31 = vmul.f32 %v4601_v40, %v4601_v40 }
 0x23b   : > { %v1700_v41 = vadd.f32 %v1699_v23, %v4580_v4  ;;  %v1962_v5 = vadd.f32 %v1961_v26, %v1835_v32  ;;  %v1840_v32 = vmul.f32 %v4608_v54, %v4608_v54 }
 0x23d   : > { %v1701_v50 = vadd.f32 %v1700_v41, %v4587_v14  ;;  %v1963_v59 = vadd.f32 %v1962_v5, %v1836_v3  ;;  %v1841_v3 = vmul.f32 %v4615_v2, %v4615_v2 }
 0x23f   : > { %v1702_v33 = vadd.f32 %v1701_v50, %v4594_v28  ;;  %v1964_v29 = vadd.f32 %v1963_v59, %v1837_v15  ;;  %v1842_v15 = vmul.f32 %v4622_v22, %v4622_v22 }
 0x241   : > { %v1965_v51 = vadd.f32 %v1964_v29, %v1838_v9  ;;  %v1703_v47 = vadd.f32 %v1702_v33, %v4601_v40  ;;  %v1843_v9 = vmul.f32 %v4629_v36, %v4629_v36 }
 0x243   : > { %v1704_v23 = vadd.f32 %v1703_v47, %v4608_v54  ;;  %v1966_v26 = vadd.f32 %v1965_v51, %v1839_v31  ;;  %v1844_v31 = vmul.f32 %v4636_v58, %v4636_v58 }
 0x245   : > { %v1705_v41 = vadd.f32 %v1704_v23, %v4615_v2  ;;  %v1967_v5 = vadd.f32 %v1966_v26, %v1840_v32  ;;  %v1845_v32 = vmul.f32 %v4643_v12, %v4643_v12 }
 0x247   : > { %v1706_v50 = vadd.f32 %v1705_v41, %v4622_v22  ;;  %v1968_v59 = vadd.f32 %v1967_v5, %v1841_v3  ;;  %v1846_v3 = vmul.f32 %v4650_v44, %v4650_v44 }
 0x249   : > { %v1707_v33 = vadd.f32 %v1706_v50, %v4629_v36  ;;  %v1969_v29 = vadd.f32 %v1968_v59, %v1842_v15  ;;  %v1847_v15 = vmul.f32 %v4657_v60, %v4657_v60 }
 0x24b   : > { %v1708_v51 = vadd.f32 %v1707_v33, %v4636_v58  ;;  %v1970_v47 = vadd.f32 %v1969_v29, %v1843_v9  ;;  %v1848_v9 = vmul.f32 %v4664_v18, %v4664_v18 }
 0x24d   : > { %v1709_v23 = vadd.f32 %v1708_v51, %v4643_v12  ;;  %v1971_v26 = vadd.f32 %v1970_v47, %v1844_v31  ;;  %v1849_v31 = vmul.f32 %v4671_v45, %v4671_v45 }
 0x24f   : > { %v1710_v41 = vadd.f32 %v1709_v23, %v4650_v44  ;;  %v1972_v5 = vadd.f32 %v1971_v26, %v1845_v32  ;;  %v1850_v32 = vmul.f32 %v4678_v8, %v4678_v8 }
 0x251   : > { %v1711_v50 = vadd.f32 %v1710_v41, %v4657_v60  ;;  %v1973_v59 = vadd.f32 %v1972_v5, %v1846_v3  ;;  %v1851_v3 = vmul.f32 %v4685_v49, %v4685_v49 }
 0x253   : > { %v1712_v33 = vadd.f32 %v1711_v50, %v4664_v18  ;;  %v1974_v29 = vadd.f32 %v1973_v59, %v1847_v15  ;;  %v1852_v15 = vmul.f32 %v4692_v24, %v4692_v24 }
 0x255   : > { %v1713_v51 = vadd.f32 %v1712_v33, %v4671_v45  ;;  %v1975_v47 = vadd.f32 %v1974_v29, %v1848_v9  ;;  %v1853_v9 = vmul.f32 %v4699_v42, %v4699_v42 }
 0x257   : > { %v1714_v23 = vadd.f32 %v1713_v51, %v4678_v8  ;;  %v1976_v26 = vadd.f32 %v1975_v47, %v1849_v31  ;;  %v1854_v51 = vmul.f32 %v4706_v17, %v4706_v17 }
 0x259   : > { %v1715_v41 = vadd.f32 %v1714_v23, %v4685_v49  ;;  %v1977_v5 = vadd.f32 %v1976_v26, %v1850_v32  ;;  %v1855_v26 = vmul.f32 %v4713_v11, %v4713_v11 }
 0x25b   : > { %v1716_v50 = vadd.f32 %v1715_v41, %v4692_v24  ;;  %v1978_v59 = vadd.f32 %v1977_v5, %v1851_v3  ;;  %v1856_v5 = vmul.f32 %v4720_v62, %v4720_v62 }
 0x25d   : > { %v1717_v33 = vadd.f32 %v1716_v50, %v4699_v42  ;;  %v1979_v29 = vadd.f32 %v1978_v59, %v1852_v15  ;;  %v1857_v59 = vmul.f32 %v4727_v35, %v4727_v35 }
 0x25f   : > { %v1718_v31 = vadd.f32 %v1717_v33, %v4706_v17  ;;  %v1980_v47 = vadd.f32 %v1979_v29, %v1853_v9  ;;  %v1858_v29 = vmul.f32 %v4734_v46, %v4734_v46 }
 0x261   : > { %v1981_v23 = vadd.f32 %v1980_v47, %v1854_v51  ;;  %v1719_v32 = vadd.f32 %v1718_v31, %v4713_v11  ;;  %v1859_v47 = vmul.f32 %v4741_v1, %v4741_v1 }
 0x263   : > { %v1982_v41 = vadd.f32 %v1981_v23, %v1855_v26  ;;  %v1720_v3 = vadd.f32 %v1719_v32, %v4720_v62  ;;  %v1860_v26 = vmul.f32 %v4748_v6, %v4748_v6 }
 0x265   : > { %v1983_v50 = vadd.f32 %v1982_v41, %v1856_v5  ;;  %v1721_v15 = vadd.f32 %v1720_v3, %v4727_v35  ;;  %v1861_v5 = vmul.f32 %v4755_v39, %v4755_v39 }
 0x267   : > { %v1984_v33 = vadd.f32 %v1983_v50, %v1857_v59  ;;  %v1722_v9 = vadd.f32 %v1721_v15, %v4734_v46  ;;  %v1862_v59 = vmul.f32 %v4762_v57, %v4762_v57 }
 0x269   : > { %v1985_v31 = vadd.f32 %v1984_v33, %v1858_v29  ;;  %v1723_v51 = vadd.f32 %v1722_v9, %v4741_v1  ;;  %v1863_v29 = vmul.f32 %v4769_v13, %v4769_v13 }
 0x26b   : > { %v1986_v23 = vadd.f32 %v1985_v31, %v1859_v47  ;;  %v1724_v32 = vadd.f32 %v1723_v51, %v4748_v6  ;;  %v1864_v47 = vmul.f32 %v4776_v21, %v4776_v21 }
 0x26d   : > { %v1987_v41 = vadd.f32 %v1986_v23, %v1860_v26  ;;  %v1725_v3 = vadd.f32 %v1724_v32, %v4755_v39  ;;  %v1865_v26 = vmul.f32 %v4783_v55, %v4783_v55 }
 0x26f   : > { %v1988_v50 = vadd.f32 %v1987_v41, %v1861_v5  ;;  %v1726_v15 = vadd.f32 %v1725_v3, %v4762_v57  ;;  %v1866_v5 = vmul.f32 %v4790_v53, %v4790_v53 }
 0x271   : > { %v1989_v33 = vadd.f32 %v1988_v50, %v1862_v59  ;;  %v1727_v9 = vadd.f32 %v1726_v15, %v4769_v13  ;;  %v1867_v59 = vmul.f32 %v4797_v37, %v4797_v37  ;;  %v7079_v13 = vld [vmem:[#allocation78_spill] sm:$0xff] }
 0x273   : > { %v1990_v31 = vadd.f32 %v1989_v33, %v1863_v29  ;;  %v1728_v51 = vadd.f32 %v1727_v9, %v4776_v21  ;;  %v1868_v29 = vmul.f32 %v4804_v27, %v4804_v27 }
 0x275   : > { %v1991_v23 = vadd.f32 %v1990_v31, %v1864_v47  ;;  %v1729_v32 = vadd.f32 %v1728_v51, %v4783_v55  ;;  %v1869_v47 = vmul.f32 %v4811_v19, %v4811_v19 }
 0x277   : > { %v1992_v41 = vadd.f32 %v1991_v23, %v1865_v26  ;;  %v1730_v3 = vadd.f32 %v1729_v32, %v4790_v53  ;;  %v6987_v32 = vld [vmem:[#allocation64_spill] sm:$0xff] }
 0x279   : > { %v1993_v50 = vadd.f32 %v1992_v41, %v1866_v5  ;;  %v1731_v15 = vadd.f32 %v1730_v3, %v4797_v37  ;;  %v1870_v41 = vmul.f32 %v6987_v32, %v6987_v32  ;;  %v6988_v5 = vld [vmem:[#allocation66_spill] sm:$0xff] }
 0x27b   : > { %v1994_v33 = vadd.f32 %v1993_v50, %v1867_v59  ;;  %v1732_v9 = vadd.f32 %v1731_v15, %v4804_v27  ;;  %v1871_v15 = vmul.f32 %v6988_v5, %v6988_v5  ;;  %v6989_v27 = vld [vmem:[#allocation68_spill] sm:$0xff] }
 0x27d   : > { %v1995_v31 = vadd.f32 %v1994_v33, %v1868_v29  ;;  %v1733_v51 = vadd.f32 %v1732_v9, %v4811_v19  ;;  %v1872_v9 = vmul.f32 %v6989_v27, %v6989_v27  ;;  %v6990_v19 = vld [vmem:[#allocation70_spill] sm:$0xff] }
 0x27f   : > { %v1996_v23 = vadd.f32 %v1995_v31, %v1869_v47  ;;  %v1734_v26 = vadd.f32 %v1733_v51, %v6987_v32  ;;  %v1873_v51 = vmul.f32 %v6990_v19, %v6990_v19  ;;  %v6991_v32 = vld [vmem:[#allocation72_spill] sm:$0xff] }
 0x281   : > { %v1997_v3 = vadd.f32 %v1996_v23, %v1870_v41  ;;  %v1735_v50 = vadd.f32 %v1734_v26, %v6988_v5  ;;  %v1874_v26 = vmul.f32 %v6991_v32, %v6991_v32  ;;  %v6992_v5 = vld [vmem:[#allocation74_spill] sm:$0xff] }
 0x283   : > { %v1998_v59 = vadd.f32 %v1997_v3, %v1871_v15  ;;  %v1736_v33 = vadd.f32 %v1735_v50, %v6989_v27  ;;  %v1875_v50 = vmul.f32 %v6992_v5, %v6992_v5  ;;  %v6993_v27 = vld [vmem:[#allocation76_spill] sm:$0xff] }
 0x285   : > { %v1999_v29 = vadd.f32 %v1998_v59, %v1872_v9  ;;  %v1737_v31 = vadd.f32 %v1736_v33, %v6990_v19  ;;  %v1876_v33 = vmul.f32 %v6993_v27, %v6993_v27  ;;  %v6994_v19 = vld [vmem:[#allocation78_spill] sm:$0xff] }
 0x287   : > { %v2000_v47 = vadd.f32 %v1999_v29, %v1873_v51  ;;  %v1738_v23 = vadd.f32 %v1737_v31, %v6991_v32  ;;  %v1877_v31 = vmul.f32 %v6994_v19, %v6994_v19  ;;  %v6995_v32 = vld [vmem:[#allocation80_spill] sm:$0xff] }
 0x289   : > { %v2001_v41 = vadd.f32 %v2000_v47, %v1874_v26  ;;  %v1739_v3 = vadd.f32 %v1738_v23, %v6992_v5  ;;  %v1878_v23 = vmul.f32 %v6995_v32, %v6995_v32  ;;  %v6996_v5 = vld [vmem:[#allocation82_spill] sm:$0xff] }
 0x28b   : > { %v2002_v15 = vadd.f32 %v2001_v41, %v1875_v50  ;;  %v1740_v59 = vadd.f32 %v1739_v3, %v6993_v27  ;;  %v1879_v3 = vmul.f32 %v6996_v5, %v6996_v5  ;;  %v6997_v27 = vld [vmem:[#allocation84_spill] sm:$0xff] }
 0x28d   : > { %v2003_v9 = vadd.f32 %v2002_v15, %v1876_v33  ;;  %v1741_v29 = vadd.f32 %v1740_v59, %v6994_v19  ;;  %v1880_v59 = vmul.f32 %v6997_v27, %v6997_v27  ;;  %v6998_v19 = vld [vmem:[#allocation86_spill] sm:$0xff] }
 0x28f   : > { %v2004_v51 = vadd.f32 %v2003_v9, %v1877_v31  ;;  %v1742_v47 = vadd.f32 %v1741_v29, %v6995_v32  ;;  %v1881_v29 = vmul.f32 %v6998_v19, %v6998_v19  ;;  %v6999_v32 = vld [vmem:[#allocation88_spill] sm:$0xff] }
 0x291   : > { %v2005_v26 = vadd.f32 %v2004_v51, %v1878_v23  ;;  %v1743_v41 = vadd.f32 %v1742_v47, %v6996_v5  ;;  %v1882_v47 = vmul.f32 %v6999_v32, %v6999_v32  ;;  %v7000_v5 = vld [vmem:[#allocation90_spill] sm:$0xff] }
 0x293   : > { %v2006_v50 = vadd.f32 %v2005_v26, %v1879_v3  ;;  %v1744_v15 = vadd.f32 %v1743_v41, %v6997_v27  ;;  %v1883_v41 = vmul.f32 %v7000_v5, %v7000_v5  ;;  %v1884_v3 = vmul.f32 %v4916_v63, %v4916_v63 }
 0x295   : > { %v2007_v33 = vadd.f32 %v2006_v50, %v1880_v59  ;;  %v1745_v9 = vadd.f32 %v1744_v15, %v6998_v19  ;;  %v7001_v19 = vld [vmem:[#allocation93_spill] sm:$0xff] }
 0x297   : > { %v2008_v31 = vadd.f32 %v2007_v33, %v1881_v29  ;;  %v1746_v51 = vadd.f32 %v1745_v9, %v6999_v32  ;;  %v1885_v9 = vmul.f32 %v7001_v19, %v7001_v19 }
 0x299   : > { %v2009_v23 = vadd.f32 %v2008_v31, %v1882_v47  ;;  %v1747_v26 = vadd.f32 %v1746_v51, %v7000_v5 }
 0x29b   : > { %v2010_v50 = vadd.f32 %v2009_v23, %v1883_v41  ;;  %v1748_v15 = vadd.f32 %v1747_v26, %v4916_v63 }
 0x29d   : > { %v2011_v59 = vadd.f32 %v2010_v50, %v1884_v3  ;;  %v1749_v33 = vadd.f32 %v1748_v15, %v7001_v19  ;;  %v7002_v15 = vld [vmem:[#allocation2_spill] sm:$0xff] }
 0x29f   : > { %v1750_v29 = vrot.slane %v1749_v33, 4  ;;  %v2012_v32 = vadd.f32 %v2011_v59, %v1885_v9  ;;  %v7059_v9 = vld [vmem:[#allocation81_spill] sm:$0xff]  ;;  %v7065_v59 = vld [vmem:[#allocation92_spill] sm:$0xff] }
 0x2a1   : > { %v1751_v31 = vadd.f32 %v1750_v29, %v1749_v33  ;;  %v2013_v47 = vrot.slane %v2012_v32, 4  ;;  %v7003_v33 = vld [vmem:[#allocation3_spill] sm:$0xff] }
 0x2a2   : > { %v7060_v29 = vld [vmem:[#allocation83_spill] sm:$0xff] }
 0x2a3   : > { %v1752_v51 = vrot.slane %v1751_v31, 2  ;;  %v2014_v27 = vadd.f32 %v2013_v47, %v2012_v32  ;;  %v7008_v47 = vld [vmem:[#allocation8_spill] sm:$0xff] }
 0x2a4   : > { %v7080_v32 = vld [vmem:[#allocation80_spill] sm:$0xff] }
 0x2a5   : > { %v1753_v37 = vadd.f32 %v1752_v51, %v1751_v31  ;;  %v2015_v5 = vrot.slane %v2014_v27, 2  ;;  %v7085_v51 = vld [vmem:[#allocation90_spill] sm:$0xff] }
 0x2a7   : > { %v1754_v53 = vrot.slane %v1753_v37, 1  ;;  %v2016_v55 = vadd.f32 %v2015_v5, %v2014_v27 }
 0x2a9   : > { %v1755_v21 = vadd.f32 %v1754_v53, %v1753_v37  ;;  %v2017_v23 = vrot.slane %v2016_v55, 1  ;;  %v7061_v53 = vld [vmem:[#allocation85_spill] sm:$0xff]  ;;  %v7062_v37 = vld [vmem:[#allocation87_spill] sm:$0xff] }
 0x2ab   : > { %v5120_v41 = vmul.f32 0.0009765625, %v1755_v21  ;;  %v2018_v26 = vadd.f32 %v2017_v23, %v2016_v55  ;;  %v7007_v55 = vld [vmem:[#allocation7_spill] sm:$0xff]  ;;  %v7082_v21 = vld [vmem:[#allocation84_spill] sm:$0xff] }
 0x2ac   : > { %v7090_v23 = vld [vmem:[#allocation4_spill] sm:$0xff] }
 0x2ad   : > { %v2019_v3 = vmul.f32 0.0009765625, %v2018_v26  ;;  %v2020_v50 = vmul.f32 %v5120_v41, %v5120_v41  ;;  %v7064_v26 = vld [vmem:[#allocation91_spill] sm:$0xff]  ;;  %v7086_v6 = vsub.f32 %v7002_v15, %v5120_v41  ;;  %v7088_v57 = vsub.f32 %v7003_v33, %v5120_v41 }
 0x2ae   : > { %v7091_v35 = vsub.f32 %v7090_v23, %v5120_v41 }
 0x2af   : > { %v2021_v31 = vsub.f32 %v2019_v3, %v2020_v50  ;;  %v7083_v50 = vld [vmem:[#allocation86_spill] sm:$0xff]  ;;  %v7084_v3 = vld [vmem:[#allocation88_spill] sm:$0xff] }
 0x2b1   : > { %v5150_v5 = vmax.f32 %v2021_v31, 0.0  ;;  %v7063_v31 = vld [vmem:[#allocation89_spill] sm:$0xff] }
 0x2b3   : > { %v2151_v46 = vadd.f32 1e-05, %v5150_v5 }
 0x2b5   : > { %4204 = vrsqrt.f32 %v2151_v46  ;;  %v7093_v46 = vld [vmem:[#allocation5_spill] sm:$0xff] }
 0x2b6   : > { %v7094_v19 = vsub.f32 %v7093_v46, %v5120_v41 }
 0x2bf   : > { %v5383_v27 = vpop.eup %4204 }
 0x2c0   : > { %v5389_v1 = vmul.f32 %v5383_v27, %v7086_v6  ;;  %v5395_v39 = vmul.f32 %v5383_v27, %v7088_v57  ;;  %v5401_v5 = vmul.f32 %v5383_v27, %v7091_v35  ;;  %v5407_v15 = vmul.f32 %v5383_v27, %v7094_v19  ;;  %v7096_v6 = vld [vmem:[#allocation6_spill] sm:$0xff]  ;;  %v7103_v19 = vld [vmem:[#allocation9_spill] sm:$0xff] }
 0x2c1   : > { %v7099_v57 = vsub.f32 %v7007_v55, %v5120_v41  ;;  %v7101_v35 = vsub.f32 %v7008_v47, %v5120_v41 }
 0x2c2   : > { %7087 = vst [vmem:[#allocation2_spill] sm:$0xff] %v5389_v1  ;;  %7089 = vst [vmem:[#allocation3_spill] sm:$0xff] %v5395_v39  ;;  %v7097_v1 = vsub.f32 %v7096_v6, %v5120_v41 }
 0x2c3   : > { %7092 = vst [vmem:[#allocation7_spill] sm:$0xff] %v5401_v5  ;;  %7095 = vst [vmem:[#allocation8_spill] sm:$0xff] %v5407_v15  ;;  %v5419_v23 = vmul.f32 %v5383_v27, %v7099_v57  ;;  %v5425_v46 = vmul.f32 %v5383_v27, %v7101_v35  ;;  %v7104_v15 = vsub.f32 %v7103_v19, %v5120_v41  ;;  %v7109_v57 = vld [vmem:[#allocation11_spill] sm:$0xff]  ;;  %v7112_v35 = vld [vmem:[#allocation12_spill] sm:$0xff] }
 0x2c4   : > { %v5413_v33 = vmul.f32 %v5383_v27, %v7097_v1  ;;  %v7106_v1 = vld [vmem:[#allocation10_spill] sm:$0xff] }
 0x2c5   : > { %7100 = vst [vmem:[#allocation83_spill] sm:$0xff] %v5419_v23  ;;  %7102 = vst [vmem:[#allocation85_spill] sm:$0xff] %v5425_v46  ;;  %v5431_v6 = vmul.f32 %v5383_v27, %v7104_v15  ;;  %v7110_v23 = vsub.f32 %v7109_v57, %v5120_v41  ;;  %v7113_v46 = vsub.f32 %v7112_v35, %v5120_v41  ;;  %v7115_v15 = vld [vmem:[#allocation13_spill] sm:$0xff] }
 0x2c6   : > { %7098 = vst [vmem:[#allocation81_spill] sm:$0xff] %v5413_v33  ;;  %v7107_v33 = vsub.f32 %v7106_v1, %v5120_v41 }
 0x2c7   : > { %7105 = vst [vmem:[#allocation87_spill] sm:$0xff] %v5431_v6  ;;  %v5443_v47 = vmul.f32 %v5383_v27, %v7110_v23  ;;  %v5449_v19 = vmul.f32 %v5383_v27, %v7113_v46  ;;  %v7116_v6 = vsub.f32 %v7115_v15, %v5120_v41  ;;  %v7121_v23 = vld [vmem:[#allocation15_spill] sm:$0xff]  ;;  %v7124_v46 = vld [vmem:[#allocation16_spill] sm:$0xff] }
 0x2c8   : > { %v5437_v55 = vmul.f32 %v5383_v27, %v7107_v33  ;;  %v7118_v33 = vld [vmem:[#allocation14_spill] sm:$0xff] }
 0x2c9   : > { %7111 = vst [vmem:[#allocation91_spill] sm:$0xff] %v5443_v47  ;;  %7114 = vst [vmem:[#allocation92_spill] sm:$0xff] %v5449_v19  ;;  %v5455_v1 = vmul.f32 %v5383_v27, %v7116_v6  ;;  %v7122_v47 = vsub.f32 %v7121_v23, %v5120_v41  ;;  %v7125_v19 = vsub.f32 %v7124_v46, %v5120_v41  ;;  %v7127_v6 = vld [vmem:[#allocation17_spill] sm:$0xff] }
 0x2ca   : > { %7108 = vst [vmem:[#allocation89_spill] sm:$0xff] %v5437_v55  ;;  %v7119_v55 = vsub.f32 %v7118_v33, %v5120_v41 }
 0x2cb   : > { %7117 = vst [vmem:[#allocation78_spill] sm:$0xff] %v5455_v1  ;;  %v5467_v35 = vmul.f32 %v5383_v27, %v7122_v47  ;;  %v5473_v15 = vmul.f32 %v5383_v27, %v7125_v19  ;;  %v7128_v1 = vsub.f32 %v7127_v6, %v5120_v41  ;;  %v7133_v47 = vld [vmem:[#allocation19_spill] sm:$0xff]  ;;  %v7136_v19 = vld [vmem:[#allocation20_spill] sm:$0xff] }
 0x2cc   : > { %v5461_v57 = vmul.f32 %v5383_v27, %v7119_v55  ;;  %v7130_v55 = vld [vmem:[#allocation18_spill] sm:$0xff] }
 0x2cd   : > { %7123 = vst [vmem:[#allocation84_spill] sm:$0xff] %v5467_v35  ;;  %7126 = vst [vmem:[#allocation86_spill] sm:$0xff] %v5473_v15  ;;  %v5479_v33 = vmul.f32 %v5383_v27, %v7128_v1  ;;  %v7134_v35 = vsub.f32 %v7133_v47, %v5120_v41  ;;  %v7137_v15 = vsub.f32 %v7136_v19, %v5120_v41  ;;  %v7139_v1 = vld [vmem:[#allocation21_spill] sm:$0xff] }
 0x2ce   : > { %7120 = vst [vmem:[#allocation80_spill] sm:$0xff] %v5461_v57  ;;  %v7131_v57 = vsub.f32 %v7130_v55, %v5120_v41 }
 0x2cf   : > { %7129 = vst [vmem:[#allocation88_spill] sm:$0xff] %v5479_v33  ;;  %v5491_v46 = vmul.f32 %v5383_v27, %v7134_v35  ;;  %v5497_v6 = vmul.f32 %v5383_v27, %v7137_v15  ;;  %v7140_v33 = vsub.f32 %v7139_v1, %v5120_v41  ;;  %v7145_v35 = vld [vmem:[#allocation23_spill] sm:$0xff]  ;;  %v7148_v15 = vld [vmem:[#allocation24_spill] sm:$0xff] }
 0x2d0   : > { %v5485_v23 = vmul.f32 %v5383_v27, %v7131_v57  ;;  %v7142_v57 = vld [vmem:[#allocation22_spill] sm:$0xff] }
 0x2d1   : > { %7135 = vst [vmem:[#allocation4_spill] sm:$0xff] %v5491_v46  ;;  %7138 = vst [vmem:[#allocation5_spill] sm:$0xff] %v5497_v6  ;;  %v5503_v55 = vmul.f32 %v5383_v27, %v7140_v33  ;;  %v7146_v46 = vsub.f32 %v7145_v35, %v5120_v41  ;;  %v7149_v6 = vsub.f32 %v7148_v15, %v5120_v41  ;;  %v7151_v33 = vld [vmem:[#allocation25_spill] sm:$0xff] }
 0x2d2   : > { %7132 = vst [vmem:[#allocation90_spill] sm:$0xff] %v5485_v23  ;;  %v7143_v23 = vsub.f32 %v7142_v57, %v5120_v41 }
 0x2d3   : > { %7141 = vst [vmem:[#allocation6_spill] sm:$0xff] %v5503_v55  ;;  %v5515_v19 = vmul.f32 %v5383_v27, %v7146_v46  ;;  %v5521_v1 = vmul.f32 %v5383_v27, %v7149_v6  ;;  %v7152_v55 = vsub.f32 %v7151_v33, %v5120_v41  ;;  %v7157_v46 = vld [vmem:[#allocation27_spill] sm:$0xff]  ;;  %v7160_v6 = vld [vmem:[#allocation28_spill] sm:$0xff] }
 0x2d4   : > { %v5509_v47 = vmul.f32 %v5383_v27, %v7143_v23  ;;  %v7154_v23 = vld [vmem:[#allocation26_spill] sm:$0xff] }
 0x2d5   : > { %7147 = vst [vmem:[#allocation10_spill] sm:$0xff] %v5515_v19  ;;  %7150 = vst [vmem:[#allocation11_spill] sm:$0xff] %v5521_v1  ;;  %v5527_v57 = vmul.f32 %v5383_v27, %v7152_v55  ;;  %v7158_v19 = vsub.f32 %v7157_v46, %v5120_v41  ;;  %v7161_v1 = vsub.f32 %v7160_v6, %v5120_v41  ;;  %v7163_v55 = vld [vmem:[#allocation29_spill] sm:$0xff] }
 0x2d6   : > { %7144 = vst [vmem:[#allocation9_spill] sm:$0xff] %v5509_v47  ;;  %v7155_v47 = vsub.f32 %v7154_v23, %v5120_v41 }
 0x2d7   : > { %7153 = vst [vmem:[#allocation12_spill] sm:$0xff] %v5527_v57  ;;  %v5539_v15 = vmul.f32 %v5383_v27, %v7158_v19  ;;  %v5545_v33 = vmul.f32 %v5383_v27, %v7161_v1  ;;  %v7164_v57 = vsub.f32 %v7163_v55, %v5120_v41  ;;  %v7169_v19 = vld [vmem:[#allocation31_spill] sm:$0xff]  ;;  %v7172_v1 = vld [vmem:[#allocation32_spill] sm:$0xff] }
 0x2d8   : > { %v5533_v35 = vmul.f32 %v5383_v27, %v7155_v47  ;;  %v7166_v47 = vld [vmem:[#allocation30_spill] sm:$0xff] }
 0x2d9   : > { %7159 = vst [vmem:[#allocation14_spill] sm:$0xff] %v5539_v15  ;;  %7162 = vst [vmem:[#allocation15_spill] sm:$0xff] %v5545_v33  ;;  %v5551_v23 = vmul.f32 %v5383_v27, %v7164_v57  ;;  %v7170_v15 = vsub.f32 %v7169_v19, %v5120_v41  ;;  %v7173_v33 = vsub.f32 %v7172_v1, %v5120_v41  ;;  %v7175_v57 = vld [vmem:[#allocation33_spill] sm:$0xff] }
 0x2da   : > { %7156 = vst [vmem:[#allocation13_spill] sm:$0xff] %v5533_v35  ;;  %v7167_v35 = vsub.f32 %v7166_v47, %v5120_v41 }
 0x2db   : > { %7165 = vst [vmem:[#allocation16_spill] sm:$0xff] %v5551_v23  ;;  %v5563_v6 = vmul.f32 %v5383_v27, %v7170_v15  ;;  %v5569_v55 = vmul.f32 %v5383_v27, %v7173_v33  ;;  %v7176_v23 = vsub.f32 %v7175_v57, %v5120_v41  ;;  %v7181_v15 = vld [vmem:[#allocation35_spill] sm:$0xff]  ;;  %v7184_v33 = vld [vmem:[#allocation36_spill] sm:$0xff] }
 0x2dc   : > { %v5557_v46 = vmul.f32 %v5383_v27, %v7167_v35  ;;  %v7178_v35 = vld [vmem:[#allocation34_spill] sm:$0xff] }
 0x2dd   : > { %7171 = vst [vmem:[#allocation18_spill] sm:$0xff] %v5563_v6  ;;  %7174 = vst [vmem:[#allocation19_spill] sm:$0xff] %v5569_v55  ;;  %v5575_v47 = vmul.f32 %v5383_v27, %v7176_v23  ;;  %v7182_v6 = vsub.f32 %v7181_v15, %v5120_v41  ;;  %v7185_v55 = vsub.f32 %v7184_v33, %v5120_v41  ;;  %v7187_v23 = vld [vmem:[#allocation37_spill] sm:$0xff] }
 0x2de   : > { %7168 = vst [vmem:[#allocation17_spill] sm:$0xff] %v5557_v46  ;;  %v7179_v46 = vsub.f32 %v7178_v35, %v5120_v41 }
 0x2df   : > { %7177 = vst [vmem:[#allocation20_spill] sm:$0xff] %v5575_v47  ;;  %v5587_v1 = vmul.f32 %v5383_v27, %v7182_v6  ;;  %v5593_v57 = vmul.f32 %v5383_v27, %v7185_v55  ;;  %v7188_v47 = vsub.f32 %v7187_v23, %v5120_v41  ;;  %v7193_v6 = vld [vmem:[#allocation41_spill] sm:$0xff]  ;;  %v7196_v55 = vld [vmem:[#allocation43_spill] sm:$0xff] }
 0x2e0   : > { %v5581_v19 = vmul.f32 %v5383_v27, %v7179_v46  ;;  %v7190_v46 = vld [vmem:[#allocation39_spill] sm:$0xff] }
 0x2e1   : > { %7183 = vst [vmem:[#allocation22_spill] sm:$0xff] %v5587_v1  ;;  %7186 = vst [vmem:[#allocation23_spill] sm:$0xff] %v5593_v57  ;;  %v5599_v35 = vmul.f32 %v5383_v27, %v7188_v47  ;;  %v7194_v1 = vsub.f32 %v7193_v6, %v5120_v41  ;;  %v7197_v57 = vsub.f32 %v7196_v55, %v5120_v41  ;;  %v7199_v47 = vld [vmem:[#allocation45_spill] sm:$0xff] }
 0x2e2   : > { %7180 = vst [vmem:[#allocation21_spill] sm:$0xff] %v5581_v19  ;;  %v7191_v19 = vsub.f32 %v7190_v46, %v5120_v41 }
 0x2e3   : > { %7189 = vst [vmem:[#allocation24_spill] sm:$0xff] %v5599_v35  ;;  %v5611_v33 = vmul.f32 %v5383_v27, %v7194_v1  ;;  %v5617_v23 = vmul.f32 %v5383_v27, %v7197_v57  ;;  %v7200_v35 = vsub.f32 %v7199_v47, %v5120_v41  ;;  %v7205_v1 = vld [vmem:[#allocation49_spill] sm:$0xff]  ;;  %v7208_v57 = vld [vmem:[#allocation51_spill] sm:$0xff] }
 0x2e4   : > { %v5605_v15 = vmul.f32 %v5383_v27, %v7191_v19  ;;  %v7202_v19 = vld [vmem:[#allocation47_spill] sm:$0xff] }
 0x2e5   : > { %7195 = vst [vmem:[#allocation26_spill] sm:$0xff] %v5611_v33  ;;  %7198 = vst [vmem:[#allocation27_spill] sm:$0xff] %v5617_v23  ;;  %v5623_v46 = vmul.f32 %v5383_v27, %v7200_v35  ;;  %v7206_v33 = vsub.f32 %v7205_v1, %v5120_v41  ;;  %v7209_v23 = vsub.f32 %v7208_v57, %v5120_v41  ;;  %v7211_v35 = vld [vmem:[#allocation53_spill] sm:$0xff] }
 0x2e6   : > { %7192 = vst [vmem:[#allocation25_spill] sm:$0xff] %v5605_v15  ;;  %v7203_v15 = vsub.f32 %v7202_v19, %v5120_v41 }
 0x2e7   : > { %7201 = vst [vmem:[#allocation28_spill] sm:$0xff] %v5623_v46  ;;  %v5635_v55 = vmul.f32 %v5383_v27, %v7206_v33  ;;  %v5641_v47 = vmul.f32 %v5383_v27, %v7209_v23  ;;  %v7212_v46 = vsub.f32 %v7211_v35, %v5120_v41  ;;  %v7217_v33 = vld [vmem:[#allocation57_spill] sm:$0xff]  ;;  %v7220_v23 = vld [vmem:[#allocation59_spill] sm:$0xff] }
 0x2e8   : > { %v5629_v6 = vmul.f32 %v5383_v27, %v7203_v15  ;;  %v7214_v15 = vld [vmem:[#allocation55_spill] sm:$0xff] }
 0x2e9   : > { %7207 = vst [vmem:[#allocation30_spill] sm:$0xff] %v5635_v55  ;;  %7210 = vst [vmem:[#allocation31_spill] sm:$0xff] %v5641_v47  ;;  %v5647_v19 = vmul.f32 %v5383_v27, %v7212_v46  ;;  %v7218_v55 = vsub.f32 %v7217_v33, %v5120_v41  ;;  %v7221_v47 = vsub.f32 %v7220_v23, %v5120_v41  ;;  %v7223_v46 = vld [vmem:[#allocation61_spill] sm:$0xff] }
 0x2ea   : > { %7204 = vst [vmem:[#allocation29_spill] sm:$0xff] %v5629_v6  ;;  %v7215_v6 = vsub.f32 %v7214_v15, %v5120_v41 }
 0x2eb   : > { %7213 = vst [vmem:[#allocation32_spill] sm:$0xff] %v5647_v19  ;;  %v5659_v57 = vmul.f32 %v5383_v27, %v7218_v55  ;;  %v5665_v35 = vmul.f32 %v5383_v27, %v7221_v47  ;;  %v7224_v19 = vsub.f32 %v7223_v46, %v5120_v41  ;;  %v7229_v55 = vld [vmem:[#allocation65_spill] sm:$0xff]  ;;  %v7232_v47 = vld [vmem:[#allocation67_spill] sm:$0xff] }
 0x2ec   : > { %v5653_v1 = vmul.f32 %v5383_v27, %v7215_v6  ;;  %v7226_v6 = vld [vmem:[#allocation63_spill] sm:$0xff] }
 0x2ed   : > { %7219 = vst [vmem:[#allocation34_spill] sm:$0xff] %v5659_v57  ;;  %7222 = vst [vmem:[#allocation35_spill] sm:$0xff] %v5665_v35  ;;  %v5671_v15 = vmul.f32 %v5383_v27, %v7224_v19  ;;  %v7230_v57 = vsub.f32 %v7229_v55, %v5120_v41  ;;  %v7233_v35 = vsub.f32 %v7232_v47, %v5120_v41  ;;  %v7235_v19 = vld [vmem:[#allocation69_spill] sm:$0xff] }
 0x2ee   : > { %7216 = vst [vmem:[#allocation33_spill] sm:$0xff] %v5653_v1  ;;  %v7227_v1 = vsub.f32 %v7226_v6, %v5120_v41 }
 0x2ef   : > { %7225 = vst [vmem:[#allocation36_spill] sm:$0xff] %v5671_v15  ;;  %v5683_v23 = vmul.f32 %v5383_v27, %v7230_v57  ;;  %v5689_v46 = vmul.f32 %v5383_v27, %v7233_v35  ;;  %v7236_v15 = vsub.f32 %v7235_v19, %v5120_v41  ;;  %v7241_v57 = vld [vmem:[#allocation73_spill] sm:$0xff]  ;;  %v7243_v35 = vld [vmem:[#allocation75_spill] sm:$0xff] }
 0x2f0   : > { %v5677_v33 = vmul.f32 %v5383_v27, %v7227_v1  ;;  %v7238_v1 = vld [vmem:[#allocation71_spill] sm:$0xff] }
 0x2f1   : > { %7231 = vst [vmem:[#allocation39_spill] sm:$0xff] %v5683_v23  ;;  %7234 = vst [vmem:[#allocation41_spill] sm:$0xff] %v5689_v46  ;;  %v5695_v6 = vmul.f32 %v5383_v27, %v7236_v15  ;;  %v7242_v23 = vsub.f32 %v7241_v57, %v5120_v41  ;;  %v7244_v46 = vsub.f32 %v7243_v35, %v5120_v41  ;;  %v7245_v15 = vld [vmem:[#allocation77_spill] sm:$0xff] }
 0x2f2   : > { %7228 = vst [vmem:[#allocation37_spill] sm:$0xff] %v5677_v33  ;;  %v7239_v33 = vsub.f32 %v7238_v1, %v5120_v41 }
 0x2f3   : > { %7237 = vst [vmem:[#allocation43_spill] sm:$0xff] %v5695_v6  ;;  %v5707_v47 = vmul.f32 %v5383_v27, %v7242_v23  ;;  %v5713_v19 = vmul.f32 %v5383_v27, %v7244_v46  ;;  %v7246_v6 = vsub.f32 %v7245_v15, %v5120_v41  ;;  %v7249_v23 = vsub.f32 %v7059_v9, %v5120_v41 }
 0x2f4   : > { %v5701_v55 = vmul.f32 %v5383_v27, %v7239_v33  ;;  %v7247_v33 = vld [vmem:[#allocation79_spill] sm:$0xff]  ;;  %v7250_v46 = vsub.f32 %v7060_v29, %v5120_v41  ;;  %v7431_v39 = vld [vmem:[#allocation34_spill] sm:$0xff] }
 0x2f5   : > { %v5719_v1 = vmul.f32 %v5383_v27, %v7246_v6  ;;  %v5731_v35 = vmul.f32 %v5383_v27, %v7249_v23  ;;  %v7251_v6 = vsub.f32 %v7061_v53, %v5120_v41  ;;  %v7253_v23 = vsub.f32 %v7063_v31, %v5120_v41  ;;  %v7432_v5 = vld [vmem:[#allocation35_spill] sm:$0xff] }
 0x2f6   : > { %7240 = vst [vmem:[#allocation45_spill] sm:$0xff] %v5701_v55  ;;  %v7248_v55 = vsub.f32 %v7247_v33, %v5120_v41  ;;  %v5737_v15 = vmul.f32 %v5383_v27, %v7250_v46  ;;  %v7254_v46 = vsub.f32 %v7064_v26, %v5120_v41 }
 0x2f7   : > { %v5743_v33 = vmul.f32 %v5383_v27, %v7251_v6  ;;  %v5755_v29 = vmul.f32 %v5383_v27, %v7253_v23  ;;  %v7255_v6 = vsub.f32 %v7065_v59, %v5120_v41  ;;  %v7257_v23 = vsub.f32 %v4471_v7, %v5120_v41 }
 0x2f8   : > { %v5725_v57 = vmul.f32 %v5383_v27, %v7248_v55  ;;  %v7252_v55 = vsub.f32 %v7062_v37, %v5120_v41  ;;  %v5761_v53 = vmul.f32 %v5383_v27, %v7254_v46  ;;  %v7258_v46 = vsub.f32 %v4482_v16, %v5120_v41 }
 0x2f9   : > { %v5767_v37 = vmul.f32 %v5383_v27, %v7255_v6  ;;  %v5779_v26 = vmul.f32 %v5383_v27, %v7257_v23  ;;  %v7259_v6 = vsub.f32 %v4492_v25, %v5120_v41  ;;  %v7261_v23 = vsub.f32 %v4510_v43, %v5120_v41 }
 0x2fa   : > { %v5749_v9 = vmul.f32 %v5383_v27, %v7252_v55  ;;  %v7256_v55 = vsub.f32 %v4464_v0, %v5120_v41  ;;  %v5785_v59 = vmul.f32 %v5383_v27, %v7258_v46  ;;  %v7262_v46 = vsub.f32 %v4518_v52, %v5120_v41 }
 0x2fb   : > { %v5791_v0 = vmul.f32 %v5383_v27, %v7259_v6  ;;  %v5803_v16 = vmul.f32 %v5383_v27, %v7261_v23  ;;  %v7263_v6 = vsub.f32 %v4528_v61, %v5120_v41  ;;  %v7265_v23 = vsub.f32 %v4545_v20, %v5120_v41 }
 0x2fc   : > { %v5773_v31 = vmul.f32 %v5383_v27, %v7256_v55  ;;  %v7260_v55 = vsub.f32 %v4500_v34, %v5120_v41  ;;  %v5809_v25 = vmul.f32 %v5383_v27, %v7262_v46  ;;  %v7266_v46 = vsub.f32 %v4552_v30, %v5120_v41 }
 0x2fd   : > { %v5815_v34 = vmul.f32 %v5383_v27, %v7263_v6  ;;  %v5827_v52 = vmul.f32 %v5383_v27, %v7265_v23  ;;  %v7267_v6 = vsub.f32 %v4559_v38, %v5120_v41  ;;  %v7269_v23 = vsub.f32 %v4573_v56, %v5120_v41 }
 0x2fe   : > { %v5797_v7 = vmul.f32 %v5383_v27, %v7260_v55  ;;  %v7264_v55 = vsub.f32 %v4536_v10, %v5120_v41  ;;  %v5833_v61 = vmul.f32 %v5383_v27, %v7266_v46  ;;  %v7270_v46 = vsub.f32 %v4580_v4, %v5120_v41 }
 0x2ff   : > { %v5839_v10 = vmul.f32 %v5383_v27, %v7267_v6  ;;  %v5851_v30 = vmul.f32 %v5383_v27, %v7269_v23  ;;  %v7271_v6 = vsub.f32 %v4587_v14, %v5120_v41  ;;  %v7273_v23 = vsub.f32 %v4601_v40, %v5120_v41 }
 0x300   : > { %v5821_v43 = vmul.f32 %v5383_v27, %v7264_v55  ;;  %v7268_v55 = vsub.f32 %v4566_v48, %v5120_v41  ;;  %v5857_v38 = vmul.f32 %v5383_v27, %v7270_v46  ;;  %v7274_v46 = vsub.f32 %v4608_v54, %v5120_v41 }
 0x301   : > { %v5863_v48 = vmul.f32 %v5383_v27, %v7271_v6  ;;  %v5875_v4 = vmul.f32 %v5383_v27, %v7273_v23  ;;  %v7276_v6 = vsub.f32 %v4615_v2, %v5120_v41  ;;  %v7280_v23 = vsub.f32 %v4629_v36, %v5120_v41 }
 0x302   : > { %v5845_v20 = vmul.f32 %v5383_v27, %v7268_v55  ;;  %v7272_v55 = vsub.f32 %v4594_v28, %v5120_v41  ;;  %v5881_v14 = vmul.f32 %v5383_v27, %v7274_v46  ;;  %v7282_v46 = vsub.f32 %v4636_v58, %v5120_v41 }
 0x303   : > { %v5887_v28 = vmul.f32 %v5383_v27, %v7276_v6  ;;  %v5899_v54 = vmul.f32 %v5383_v27, %v7280_v23  ;;  %v7284_v6 = vsub.f32 %v4643_v12, %v5120_v41  ;;  %v7288_v23 = vsub.f32 %v4657_v60, %v5120_v41 }
 0x304   : > { %v5869_v56 = vmul.f32 %v5383_v27, %v7272_v55  ;;  %7275 = vst [vmem:[#allocation47_spill] sm:$0xff] %v5881_v14  ;;  %v7278_v55 = vsub.f32 %v4622_v22, %v5120_v41  ;;  %v5905_v2 = vmul.f32 %v5383_v27, %v7282_v46  ;;  %v7290_v46 = vsub.f32 %v4664_v18, %v5120_v41  ;;  %v7501_v14 = vld [vmem:[#allocation88_spill] sm:$0xff] }
 0x305   : > { %7277 = vst [vmem:[#allocation49_spill] sm:$0xff] %v5887_v28  ;;  %7281 = vst [vmem:[#allocation53_spill] sm:$0xff] %v5899_v54  ;;  %v5911_v22 = vmul.f32 %v5383_v27, %v7284_v6  ;;  %v5923_v58 = vmul.f32 %v5383_v27, %v7288_v23  ;;  %v7292_v6 = vsub.f32 %v4671_v45, %v5120_v41  ;;  %v7499_v28 = vld [vmem:[#allocation86_spill] sm:$0xff] }
 0x306   : > { %v5893_v40 = vmul.f32 %v5383_v27, %v7278_v55  ;;  %7283 = vst [vmem:[#allocation55_spill] sm:$0xff] %v5905_v2  ;;  %v7286_v55 = vsub.f32 %v4650_v44, %v5120_v41  ;;  %v5929_v12 = vmul.f32 %v5383_v27, %v7290_v46  ;;  %v7296_v23 = vsub.f32 %v4685_v49, %v5120_v41  ;;  %v7481_v2 = vld [vmem:[#allocation83_spill] sm:$0xff] }
 0x307   : > { %7285 = vst [vmem:[#allocation57_spill] sm:$0xff] %v5911_v22  ;;  %7289 = vst [vmem:[#allocation61_spill] sm:$0xff] %v5923_v58  ;;  %v5935_v44 = vmul.f32 %v5383_v27, %v7292_v6  ;;  %v7298_v46 = vsub.f32 %v4692_v24, %v5120_v41  ;;  %v7300_v6 = vsub.f32 %v4699_v42, %v5120_v41 }
 0x308   : > { %7279 = vst [vmem:[#allocation51_spill] sm:$0xff] %v5893_v40  ;;  %v5917_v36 = vmul.f32 %v5383_v27, %v7286_v55  ;;  %7291 = vst [vmem:[#allocation63_spill] sm:$0xff] %v5929_v12  ;;  %v7294_v55 = vsub.f32 %v4678_v8, %v5120_v41  ;;  %v5947_v18 = vmul.f32 %v5383_v27, %v7296_v23  ;;  %v7475_v12 = vld [vmem:[#allocation7_spill] sm:$0xff]  ;;  %v7483_v40 = vld [vmem:[#allocation85_spill] sm:$0xff] }
 0x309   : > { %7293 = vst [vmem:[#allocation65_spill] sm:$0xff] %v5935_v44  ;;  %v5953_v45 = vmul.f32 %v5383_v27, %v7298_v46  ;;  %v5959_v8 = vmul.f32 %v5383_v27, %v7300_v6  ;;  %v7304_v23 = vsub.f32 %v4713_v11, %v5120_v41  ;;  %v7306_v46 = vsub.f32 %v4720_v62, %v5120_v41  ;;  %v7308_v6 = vld [vmem:[#allocation38_spill] sm:$0xff] }
 0x30a   : > { %7287 = vst [vmem:[#allocation59_spill] sm:$0xff] %v5917_v36  ;;  %v5941_v60 = vmul.f32 %v5383_v27, %v7294_v55  ;;  %7297 = vst [vmem:[#allocation69_spill] sm:$0xff] %v5947_v18  ;;  %v7302_v55 = vsub.f32 %v4706_v17, %v5120_v41  ;;  %v7476_v58 = vmax.f32 %v7475_v12, 0.0  ;;  %v7477_v36 = vld [vmem:[#allocation8_spill] sm:$0xff] }
 0x30b   : > { %7299 = vst [vmem:[#allocation71_spill] sm:$0xff] %v5953_v45  ;;  %7301 = vst [vmem:[#allocation73_spill] sm:$0xff] %v5959_v8  ;;  %v5971_v24 = vmul.f32 %v5383_v27, %v7304_v23  ;;  %v5977_v42 = vmul.f32 %v5383_v27, %v7306_v46  ;;  %v7309_v8 = vsub.f32 %v7308_v6, %v5120_v41  ;;  %v7314_v23 = vld [vmem:[#allocation42_spill] sm:$0xff]  ;;  %v7317_v46 = vld [vmem:[#allocation44_spill] sm:$0xff] }
 0x30c   : > { %7295 = vst [vmem:[#allocation67_spill] sm:$0xff] %v5941_v60  ;;  %v5965_v49 = vmul.f32 %v5383_v27, %v7302_v55  ;;  %v7311_v55 = vld [vmem:[#allocation40_spill] sm:$0xff] }
 0x30d   : > { %7305 = vst [vmem:[#allocation77_spill] sm:$0xff] %v5971_v24  ;;  %7307 = vst [vmem:[#allocation79_spill] sm:$0xff] %v5977_v42  ;;  %v5983_v17 = vmul.f32 %v5383_v27, %v7309_v8  ;;  %v7315_v24 = vsub.f32 %v7314_v23, %v5120_v41  ;;  %v7318_v42 = vsub.f32 %v7317_v46, %v5120_v41  ;;  %v7320_v8 = vld [vmem:[#allocation46_spill] sm:$0xff] }
 0x30e   : > { %7303 = vst [vmem:[#allocation75_spill] sm:$0xff] %v5965_v49  ;;  %v7312_v49 = vsub.f32 %v7311_v55, %v5120_v41 }
 0x30f   : > { %7310 = vst [vmem:[#allocation38_spill] sm:$0xff] %v5983_v17  ;;  %v5995_v62 = vmul.f32 %v5383_v27, %v7315_v24  ;;  %v6001_v6 = vmul.f32 %v5383_v27, %v7318_v42  ;;  %v7321_v17 = vsub.f32 %v7320_v8, %v5120_v41  ;;  %v7326_v24 = vld [vmem:[#allocation50_spill] sm:$0xff]  ;;  %v7329_v42 = vld [vmem:[#allocation52_spill] sm:$0xff] }
 0x310   : > { %v5989_v11 = vmul.f32 %v5383_v27, %v7312_v49  ;;  %v7323_v49 = vld [vmem:[#allocation48_spill] sm:$0xff] }
 0x311   : > { %7316 = vst [vmem:[#allocation42_spill] sm:$0xff] %v5995_v62  ;;  %7319 = vst [vmem:[#allocation44_spill] sm:$0xff] %v6001_v6  ;;  %v6007_v55 = vmul.f32 %v5383_v27, %v7321_v17  ;;  %v7327_v62 = vsub.f32 %v7326_v24, %v5120_v41  ;;  %v7330_v6 = vsub.f32 %v7329_v42, %v5120_v41  ;;  %v7332_v17 = vld [vmem:[#allocation54_spill] sm:$0xff] }
 0x312   : > { %7313 = vst [vmem:[#allocation40_spill] sm:$0xff] %v5989_v11  ;;  %v7324_v11 = vsub.f32 %v7323_v49, %v5120_v41 }
 0x313   : > { %7322 = vst [vmem:[#allocation46_spill] sm:$0xff] %v6007_v55  ;;  %v6019_v46 = vmul.f32 %v5383_v27, %v7327_v62  ;;  %v6025_v8 = vmul.f32 %v5383_v27, %v7330_v6  ;;  %v7333_v55 = vsub.f32 %v7332_v17, %v5120_v41  ;;  %v7338_v62 = vld [vmem:[#allocation58_spill] sm:$0xff]  ;;  %v7341_v6 = vld [vmem:[#allocation60_spill] sm:$0xff] }
 0x314   : > { %v6013_v23 = vmul.f32 %v5383_v27, %v7324_v11  ;;  %v7335_v11 = vld [vmem:[#allocation56_spill] sm:$0xff] }
 0x315   : > { %7328 = vst [vmem:[#allocation50_spill] sm:$0xff] %v6019_v46  ;;  %7331 = vst [vmem:[#allocation52_spill] sm:$0xff] %v6025_v8  ;;  %v6031_v49 = vmul.f32 %v5383_v27, %v7333_v55  ;;  %v7339_v46 = vsub.f32 %v7338_v62, %v5120_v41  ;;  %v7342_v8 = vsub.f32 %v7341_v6, %v5120_v41  ;;  %v7344_v55 = vld [vmem:[#allocation62_spill] sm:$0xff] }
 0x316   : > { %7325 = vst [vmem:[#allocation48_spill] sm:$0xff] %v6013_v23  ;;  %v7336_v23 = vsub.f32 %v7335_v11, %v5120_v41 }
 0x317   : > { %7334 = vst [vmem:[#allocation54_spill] sm:$0xff] %v6031_v49  ;;  %v6043_v42 = vmul.f32 %v5383_v27, %v7339_v46  ;;  %v6049_v17 = vmul.f32 %v5383_v27, %v7342_v8  ;;  %v7345_v49 = vsub.f32 %v7344_v55, %v5120_v41  ;;  %v7350_v46 = vld [vmem:[#allocation66_spill] sm:$0xff]  ;;  %v7353_v8 = vld [vmem:[#allocation68_spill] sm:$0xff] }
 0x318   : > { %v6037_v24 = vmul.f32 %v5383_v27, %v7336_v23  ;;  %v7347_v23 = vld [vmem:[#allocation64_spill] sm:$0xff] }
 0x319   : > { %7340 = vst [vmem:[#allocation58_spill] sm:$0xff] %v6043_v42  ;;  %7343 = vst [vmem:[#allocation60_spill] sm:$0xff] %v6049_v17  ;;  %v6055_v11 = vmul.f32 %v5383_v27, %v7345_v49  ;;  %v7351_v42 = vsub.f32 %v7350_v46, %v5120_v41  ;;  %v7354_v17 = vsub.f32 %v7353_v8, %v5120_v41  ;;  %v7356_v49 = vld [vmem:[#allocation70_spill] sm:$0xff] }
 0x31a   : > { %7337 = vst [vmem:[#allocation56_spill] sm:$0xff] %v6037_v24  ;;  %v7348_v24 = vsub.f32 %v7347_v23, %v5120_v41 }
 0x31b   : > { %7346 = vst [vmem:[#allocation62_spill] sm:$0xff] %v6055_v11  ;;  %v6067_v6 = vmul.f32 %v5383_v27, %v7351_v42  ;;  %v6073_v55 = vmul.f32 %v5383_v27, %v7354_v17  ;;  %v7357_v11 = vsub.f32 %v7356_v49, %v5120_v41  ;;  %v7362_v42 = vld [vmem:[#allocation74_spill] sm:$0xff]  ;;  %v7365_v17 = vld [vmem:[#allocation76_spill] sm:$0xff] }
 0x31c   : > { %v6061_v62 = vmul.f32 %v5383_v27, %v7348_v24  ;;  %v7359_v24 = vld [vmem:[#allocation72_spill] sm:$0xff] }
 0x31d   : > { %7352 = vst [vmem:[#allocation66_spill] sm:$0xff] %v6067_v6  ;;  %7355 = vst [vmem:[#allocation68_spill] sm:$0xff] %v6073_v55  ;;  %v6079_v23 = vmul.f32 %v5383_v27, %v7357_v11  ;;  %v7363_v6 = vsub.f32 %v7362_v42, %v5120_v41  ;;  %v7366_v55 = vsub.f32 %v7365_v17, %v5120_v41 }
 0x31e   : > { %7349 = vst [vmem:[#allocation64_spill] sm:$0xff] %v6061_v62  ;;  %v7360_v62 = vsub.f32 %v7359_v24, %v5120_v41  ;;  %v7368_v11 = vsub.f32 %v7079_v13, %v5120_v41 }
 0x31f   : > { %7358 = vst [vmem:[#allocation70_spill] sm:$0xff] %v6079_v23  ;;  %v6091_v8 = vmul.f32 %v5383_v27, %v7363_v6  ;;  %v6097_v49 = vmul.f32 %v5383_v27, %v7366_v55  ;;  %v7372_v6 = vld [vmem:[#allocation82_spill] sm:$0xff]  ;;  %v7375_v55 = vsub.f32 %v7082_v21, %v5120_v41  ;;  %v7479_v23 = vld [vmem:[#allocation81_spill] sm:$0xff] }
 0x320   : > { %v6085_v46 = vmul.f32 %v5383_v27, %v7360_v62  ;;  %v6103_v24 = vmul.f32 %v5383_v27, %v7368_v11  ;;  %v7370_v62 = vsub.f32 %v7080_v32, %v5120_v41  ;;  %v7377_v11 = vsub.f32 %v7083_v50, %v5120_v41 }
 0x321   : > { %7364 = vst [vmem:[#allocation74_spill] sm:$0xff] %v6091_v8  ;;  %7367 = vst [vmem:[#allocation76_spill] sm:$0xff] %v6097_v49  ;;  %v7373_v8 = vsub.f32 %v7372_v6, %v5120_v41  ;;  %v6121_v13 = vmul.f32 %v5383_v27, %v7375_v55  ;;  %v7383_v55 = vsub.f32 %v4916_v63, %v5120_v41  ;;  %v7435_v63 = vld [vmem:[#allocation39_spill] sm:$0xff]  ;;  %v7480_v45 = vmax.f32 %v7479_v23, 0.0 }
 0x322   : > { %7361 = vst [vmem:[#allocation72_spill] sm:$0xff] %v6085_v46  ;;  %7369 = vst [vmem:[#allocation94_spill] sm:$0xff] %v6103_v24  ;;  %v6109_v42 = vmul.f32 %v5383_v27, %v7370_v62  ;;  %v6127_v32 = vmul.f32 %v5383_v27, %v7377_v11  ;;  %v7379_v62 = vsub.f32 %v7084_v3, %v5120_v41  ;;  %v7385_v11 = vld [vmem:[#allocation93_spill] sm:$0xff]  ;;  %v7437_v49 = vld [vmem:[#allocation43_spill] sm:$0xff]  ;;  %v7478_v46 = vmax.f32 %v7477_v36, 0.0 }
 0x323   : > { %v6115_v17 = vmul.f32 %v5383_v27, %v7373_v8  ;;  %7376 = vst [vmem:[#allocation96_spill] sm:$0xff] %v6121_v13  ;;  %v7381_v8 = vsub.f32 %v7085_v51, %v5120_v41  ;;  %v6145_v50 = vmul.f32 %v5383_v27, %v7383_v55  ;;  %v7436_v55 = vld [vmem:[#allocation41_spill] sm:$0xff]  ;;  %v7471_v51 = vld [vmem:[#allocation2_spill] sm:$0xff] }
 0x324   : > { %7371 = vst [vmem:[#allocation95_spill] sm:$0xff] %v6109_v42  ;;  %7378 = vst [vmem:[#allocation97_spill] sm:$0xff] %v6127_v32  ;;  %v6133_v6 = vmul.f32 %v5383_v27, %v7379_v62  ;;  %v7386_v32 = vsub.f32 %v7385_v11, %v5120_v41  ;;  %v7430_v62 = vld [vmem:[#allocation33_spill] sm:$0xff]  ;;  %v7472_v24 = vmax.f32 %v7471_v51, 0.0  ;;  %v3564_v54 = vpack.c.bf16 %v7478_v46, %v7476_v58  ;;  %v7485_v42 = vld [vmem:[#allocation87_spill] sm:$0xff] }
 0x325   : > { %7374 = vst [vmem:[#allocation82_spill] sm:$0xff] %v6115_v17  ;;  %v6139_v21 = vmul.f32 %v5383_v27, %v7381_v8  ;;  %7384 = vst [vmem:[#allocation100_spill] sm:$0xff] %v6145_v50  ;;  %v7433_v8 = vld [vmem:[#allocation36_spill] sm:$0xff]  ;;  %v7434_v17 = vld [vmem:[#allocation37_spill] sm:$0xff]  ;;  %v7482_v50 = vmax.f32 %v7481_v2, 0.0 }
 0x326   : > { %7380 = vst [vmem:[#allocation98_spill] sm:$0xff] %v6133_v6  ;;  %v6151_v3 = vmul.f32 %v5383_v27, %v7386_v32  ;;  %v7428_v27 = vld [vmem:[#allocation31_spill] sm:$0xff]  ;;  %v7438_v41 = vld [vmem:[#allocation45_spill] sm:$0xff]  ;;  %v7484_v32 = vmax.f32 %v7483_v40, 0.0  ;;  %v7486_v6 = vmax.f32 %v7485_v42, 0.0  ;;  %v7491_v11 = vld [vmem:[#allocation92_spill] sm:$0xff] }
 0x327   : > { %7382 = vst [vmem:[#allocation99_spill] sm:$0xff] %v6139_v21  ;;  %v7473_v21 = vld [vmem:[#allocation3_spill] sm:$0xff]  ;;  %v3569_v22 = vpack.c.bf16 %v7482_v50, %v7480_v45  ;;  %v7492_v58 = vmax.f32 %v7491_v11, 0.0  ;;  %v7493_v46 = vld [vmem:[#allocation78_spill] sm:$0xff]  ;;  %v7495_v2 = vld [vmem:[#allocation80_spill] sm:$0xff]  ;;  %v7500_v42 = vmax.f32 %v7499_v28, 0.0 }
 0x328   : > { %7387 = vst [vmem:[#allocation93_spill] sm:$0xff] %v6151_v3  ;;  %v7429_v3 = vld [vmem:[#allocation32_spill] sm:$0xff]  ;;  %v7474_v60 = vmax.f32 %v7473_v21, 0.0  ;;  %v3574_v51 = vpack.c.bf16 %v7486_v6, %v7484_v32  ;;  %v7487_v21 = vld [vmem:[#allocation89_spill] sm:$0xff]  ;;  %v7494_v23 = vmax.f32 %v7493_v46, 0.0  ;;  %v7496_v13 = vmax.f32 %v7495_v2, 0.0 }
 0x329   : > { %v7497_v45 = vld [vmem:[#allocation84_spill] sm:$0xff]  ;;  %v7502_v6 = vmax.f32 %v7501_v14, 0.0  ;;  %3876 = vst [vmem:[%s6281_s27 + $0x8] sm:$0xff] %v3564_v54   ;;  %3877 = vst [vmem:[%s6281_s27 + $0x10] sm:$0xff] %v3569_v22   ;;  %v7503_v11 = vld [vmem:[#allocation90_spill] sm:$0xff] }
 0x32a   : > { %v3559_v44 = vpack.c.bf16 %v7474_v60, %v7472_v24  ;;  %v7488_v60 = vmax.f32 %v7487_v21, 0.0  ;;  %v7489_v24 = vld [vmem:[#allocation91_spill] sm:$0xff]  ;;  %v3584_v18 = vpack.c.bf16 %v7494_v23, %v7492_v58  ;;  %v7498_v50 = vmax.f32 %v7497_v45, 0.0  ;;  %3878 = vst [vmem:[%s6281_s27 + $0x18] sm:$0xff] %v3574_v51   ;;  %v7507_v58 = vld [vmem:[#allocation5_spill] sm:$0xff]  ;;  %v7509_v46 = vld [vmem:[#allocation6_spill] sm:$0xff] }
 0x32b   : > { %v7490_v12 = vmax.f32 %v7489_v24, 0.0  ;;  %v3594_v32 = vpack.c.bf16 %v7502_v6, %v7500_v42  ;;  %v7504_v21 = vmax.f32 %v7503_v11, 0.0  ;;  %v7510_v28 = vmax.f32 %v7509_v46, 0.0  ;;  %v7511_v14 = vld [vmem:[#allocation9_spill] sm:$0xff]  ;;  %v7517_v42 = vld [vmem:[#allocation12_spill] sm:$0xff] }
 0x32c   : > { %v3589_v40 = vpack.c.bf16 %v7498_v50, %v7496_v13  ;;  %3560 = vst [vmem:[%s6281_s27] sm:$0xff] %v3559_v44   ;;  %v7508_v13 = vmax.f32 %v7507_v58, 0.0  ;;  %v7512_v2 = vmax.f32 %v7511_v14, 0.0  ;;  %v7513_v44 = vld [vmem:[#allocation10_spill] sm:$0xff]  ;;  %v7515_v50 = vld [vmem:[#allocation11_spill] sm:$0xff]  ;;  %v7518_v51 = vmax.f32 %v7517_v42, 0.0  ;;  %3880 = vst [vmem:[%s6281_s27 + $0x28] sm:$0xff] %v3584_v18  }
 0x32d   : > { %v3579_v36 = vpack.c.bf16 %v7490_v12, %v7488_v60  ;;  %v7505_v60 = vld [vmem:[#allocation4_spill] sm:$0xff]  ;;  %v7514_v45 = vmax.f32 %v7513_v44, 0.0  ;;  %v7516_v22 = vmax.f32 %v7515_v50, 0.0  ;;  %3882 = vst [vmem:[%s6281_s27 + $0x38] sm:$0xff] %v3594_v32   ;;  %v7519_v11 = vld [vmem:[#allocation13_spill] sm:$0xff] }
 0x32e   : > { %v7506_v24 = vmax.f32 %v7505_v60, 0.0  ;;  %v3604_v23 = vpack.c.bf16 %v7510_v28, %v7508_v13  ;;  %3881 = vst [vmem:[%s6281_s27 + $0x30] sm:$0xff] %v3589_v40   ;;  %v7521_v60 = vld [vmem:[#allocation14_spill] sm:$0xff]  ;;  %v7523_v13 = vld [vmem:[#allocation15_spill] sm:$0xff]  ;;  %v7525_v28 = vld [vmem:[#allocation16_spill] sm:$0xff] }
 0x32f   : > { %v3609_v54 = vpack.c.bf16 %v7514_v45, %v7512_v2  ;;  %v3614_v6 = vpack.c.bf16 %v7518_v51, %v7516_v22  ;;  %3879 = vst [vmem:[%s6281_s27 + $0x20] sm:$0xff] %v3579_v36   ;;  %v7524_v46 = vmax.f32 %v7523_v13, 0.0  ;;  %v7526_v14 = vmax.f32 %v7525_v28, 0.0  ;;  %v7527_v44 = vld [vmem:[#allocation17_spill] sm:$0xff]  ;;  %v7529_v36 = vld [vmem:[#allocation18_spill] sm:$0xff]  ;;  %v7531_v22 = vld [vmem:[#allocation19_spill] sm:$0xff] }
 0x330   : > { %v3599_v12 = vpack.c.bf16 %v7506_v24, %v7504_v21  ;;  %v7520_v21 = vmax.f32 %v7519_v11, 0.0  ;;  %v7522_v24 = vmax.f32 %v7521_v60, 0.0  ;;  %v7528_v45 = vmax.f32 %v7527_v44, 0.0  ;;  %v7533_v42 = vld [vmem:[#allocation20_spill] sm:$0xff]  ;;  %3884 = vst [vmem:[%s6281_s27 + $0x48] sm:$0xff] %v3604_v23   ;;  %v7535_v11 = vld [vmem:[#allocation21_spill] sm:$0xff] }
 0x331   : > { %v3624_v2 = vpack.c.bf16 %v7526_v14, %v7524_v46  ;;  %v7530_v50 = vmax.f32 %v7529_v36, 0.0  ;;  %v7532_v40 = vmax.f32 %v7531_v22, 0.0  ;;  %v7534_v32 = vmax.f32 %v7533_v42, 0.0  ;;  %3885 = vst [vmem:[%s6281_s27 + $0x50] sm:$0xff] %v3609_v54   ;;  %3886 = vst [vmem:[%s6281_s27 + $0x58] sm:$0xff] %v3614_v6   ;;  %v7537_v60 = vld [vmem:[#allocation22_spill] sm:$0xff] }
 0x332   : > { %v3619_v58 = vpack.c.bf16 %v7522_v24, %v7520_v21  ;;  %3883 = vst [vmem:[%s6281_s27 + $0x40] sm:$0xff] %v3599_v12   ;;  %v7536_v21 = vmax.f32 %v7535_v11, 0.0  ;;  %v7538_v24 = vmax.f32 %v7537_v60, 0.0  ;;  %v7539_v46 = vld [vmem:[#allocation23_spill] sm:$0xff]  ;;  %v7541_v14 = vld [vmem:[#allocation24_spill] sm:$0xff]  ;;  %v7543_v36 = vld [vmem:[#allocation25_spill] sm:$0xff] }
 0x333   : > { %v3629_v18 = vpack.c.bf16 %v7530_v50, %v7528_v45  ;;  %v3634_v51 = vpack.c.bf16 %v7534_v32, %v7532_v40  ;;  %v7540_v28 = vmax.f32 %v7539_v46, 0.0  ;;  %v7542_v44 = vmax.f32 %v7541_v14, 0.0  ;;  %v7545_v12 = vld [vmem:[#allocation26_spill] sm:$0xff]  ;;  %v7547_v40 = vld [vmem:[#allocation27_spill] sm:$0xff]  ;;  %v7549_v42 = vld [vmem:[#allocation28_spill] sm:$0xff]  ;;  %3888 = vst [vmem:[%s6281_s27 + $0x68] sm:$0xff] %v3624_v2  }
 0x334   : > { %v3639_v13 = vpack.c.bf16 %v7538_v24, %v7536_v21  ;;  %v7544_v50 = vmax.f32 %v7543_v36, 0.0  ;;  %v7546_v22 = vmax.f32 %v7545_v12, 0.0  ;;  %v7548_v54 = vmax.f32 %v7547_v40, 0.0  ;;  %3887 = vst [vmem:[%s6281_s27 + $0x60] sm:$0xff] %v3619_v58   ;;  %v7551_v11 = vld [vmem:[#allocation29_spill] sm:$0xff]  ;;  %v7553_v60 = vld [vmem:[#allocation30_spill] sm:$0xff] }
 0x335   : > { %v3644_v45 = vpack.c.bf16 %v7542_v44, %v7540_v28  ;;  %v7550_v6 = vmax.f32 %v7549_v42, 0.0  ;;  %3889 = vst [vmem:[%s6281_s27 + $0x70] sm:$0xff] %v3629_v18   ;;  %3890 = vst [vmem:[%s6281_s27 + $0x78] sm:$0xff] %v3634_v51   ;;  %v7552_v21 = vmax.f32 %v7551_v11, 0.0  ;;  %v7554_v24 = vmax.f32 %v7553_v60, 0.0 }
 0x336   : > { %v3649_v23 = vpack.c.bf16 %v7546_v22, %v7544_v50  ;;  %v7555_v28 = vmax.f32 %v7428_v27, 0.0  ;;  %v7556_v14 = vmax.f32 %v7429_v3, 0.0  ;;  %v7557_v36 = vmax.f32 %v7430_v62, 0.0  ;;  %3891 = vst [vmem:[%s6281_s27 + $0x80] sm:$0xff] %v3639_v13  }
 0x337   : > { %v3654_v32 = vpack.c.bf16 %v7550_v6, %v7548_v54  ;;  %v3659_v46 = vpack.c.bf16 %v7554_v24, %v7552_v21  ;;  %v7558_v58 = vmax.f32 %v7431_v39, 0.0  ;;  %v7559_v18 = vmax.f32 %v7432_v5, 0.0  ;;  %3892 = vst [vmem:[%s6281_s27 + $0x88] sm:$0xff] %v3644_v45  }
 0x338   : > { %v3664_v44 = vpack.c.bf16 %v7556_v14, %v7555_v28  ;;  %v7560_v51 = vmax.f32 %v7433_v8, 0.0  ;;  %3893 = vst [vmem:[%s6281_s27 + $0x90] sm:$0xff] %v3649_v23   ;;  %v7561_v3 = vmax.f32 %v7434_v17, 0.0  ;;  %v7562_v27 = vmax.f32 %v7435_v63, 0.0 }
 0x339   : > { %v3669_v2 = vpack.c.bf16 %v7558_v58, %v7557_v36  ;;  %3894 = vst [vmem:[%s6281_s27 + $0x98] sm:$0xff] %v3654_v32   ;;  %v7563_v39 = vmax.f32 %v7436_v55, 0.0  ;;  %v7564_v5 = vmax.f32 %v7437_v49, 0.0  ;;  %v7565_v8 = vmax.f32 %v7438_v41, 0.0  ;;  %3895 = vst [vmem:[%s6281_s27 + $0xa0] sm:$0xff] %v3659_v46  }
 0x33a   : > { %v3674_v50 = vpack.c.bf16 %v7560_v51, %v7559_v18  ;;  %v3679_v62 = vpack.c.bf16 %v7562_v27, %v7561_v3  ;;  %v7566_v13 = vmax.f32 %v5707_v47, 0.0  ;;  %v7567_v22 = vmax.f32 %v5713_v19, 0.0  ;;  %3896 = vst [vmem:[%s6281_s27 + $0xa8] sm:$0xff] %v3664_v44   ;;  %v7605_v27 = vld [vmem:[#allocation57_spill] sm:$0xff] }
 0x33b   : > { %v3684_v12 = vpack.c.bf16 %v7564_v5, %v7563_v39  ;;  %v7568_v23 = vmax.f32 %v5719_v1, 0.0  ;;  %3897 = vst [vmem:[%s6281_s27 + $0xb0] sm:$0xff] %v3669_v2   ;;  %v7569_v49 = vmax.f32 %v5725_v57, 0.0  ;;  %v7570_v17 = vmax.f32 %v5731_v35, 0.0  ;;  %v7601_v2 = vld [vmem:[#allocation53_spill] sm:$0xff] }
 0x33c   : > { %v3689_v45 = vpack.c.bf16 %v7566_v13, %v7565_v8  ;;  %3898 = vst [vmem:[%s6281_s27 + $0xb8] sm:$0xff] %v3674_v50   ;;  %v7571_v47 = vmax.f32 %v5737_v15, 0.0  ;;  %v7572_v19 = vmax.f32 %v5743_v33, 0.0  ;;  %v7573_v1 = vmax.f32 %v5749_v9, 0.0  ;;  %3899 = vst [vmem:[%s6281_s27 + $0xc0] sm:$0xff] %v3679_v62   ;;  %v7603_v50 = vld [vmem:[#allocation55_spill] sm:$0xff] }
 0x33d   : > { %v3694_v40 = vpack.c.bf16 %v7568_v23, %v7567_v22  ;;  %v3699_v63 = vpack.c.bf16 %v7570_v17, %v7569_v49  ;;  %v7574_v41 = vmax.f32 %v5755_v29, 0.0  ;;  %v7575_v42 = vmax.f32 %v5761_v53, 0.0  ;;  %3900 = vst [vmem:[%s6281_s27 + $0xc8] sm:$0xff] %v3684_v12   ;;  %v7609_v5 = vld [vmem:[#allocation61_spill] sm:$0xff]  ;;  %v7611_v13 = vld [vmem:[#allocation63_spill] sm:$0xff] }
 0x33e   : > { %v3704_v55 = vpack.c.bf16 %v7572_v19, %v7571_v47  ;;  %v7576_v6 = vmax.f32 %v5767_v37, 0.0  ;;  %3901 = vst [vmem:[%s6281_s27 + $0xd0] sm:$0xff] %v3689_v45   ;;  %v7577_v57 = vmax.f32 %v5773_v31, 0.0  ;;  %v7578_v35 = vmax.f32 %v5779_v26, 0.0  ;;  %v7613_v22 = vld [vmem:[#allocation65_spill] sm:$0xff]  ;;  %v7615_v49 = vld [vmem:[#allocation67_spill] sm:$0xff] }
 0x33f   : > { %v3709_v54 = vpack.c.bf16 %v7574_v41, %v7573_v1  ;;  %3902 = vst [vmem:[%s6281_s27 + $0xd8] sm:$0xff] %v3694_v40   ;;  %v7579_v33 = vmax.f32 %v5785_v59, 0.0  ;;  %v7580_v9 = vmax.f32 %v5791_v0, 0.0  ;;  %v7581_v53 = vmax.f32 %v5797_v7, 0.0  ;;  %3903 = vst [vmem:[%s6281_s27 + $0xe0] sm:$0xff] %v3699_v63   ;;  %v7617_v63 = vld [vmem:[#allocation69_spill] sm:$0xff] }
 0x340   : > { %v3714_v32 = vpack.c.bf16 %v7576_v6, %v7575_v42  ;;  %v3719_v15 = vpack.c.bf16 %v7578_v35, %v7577_v57  ;;  %v7582_v37 = vmax.f32 %v5803_v16, 0.0  ;;  %v7583_v21 = vmax.f32 %v5809_v25, 0.0  ;;  %3904 = vst [vmem:[%s6281_s27 + $0xe8] sm:$0xff] %v3704_v55   ;;  %v7619_v55 = vld [vmem:[#allocation71_spill] sm:$0xff]  ;;  %v7621_v41 = vld [vmem:[#allocation73_spill] sm:$0xff] }
 0x341   : > { %v3724_v29 = vpack.c.bf16 %v7580_v9, %v7579_v33  ;;  %v7584_v60 = vmax.f32 %v5815_v34, 0.0  ;;  %3905 = vst [vmem:[%s6281_s27 + $0xf0] sm:$0xff] %v3709_v54   ;;  %v7585_v31 = vmax.f32 %v5821_v43, 0.0  ;;  %v7586_v26 = vmax.f32 %v5827_v52, 0.0  ;;  %v7623_v6 = vld [vmem:[#allocation75_spill] sm:$0xff]  ;;  %v7625_v57 = vld [vmem:[#allocation77_spill] sm:$0xff] }
 0x342   : > { %v3729_v11 = vpack.c.bf16 %v7582_v37, %v7581_v53  ;;  %3906 = vst [vmem:[%s6281_s27 + $0xf8] sm:$0xff] %v3714_v32   ;;  %v7587_v0 = vmax.f32 %v5833_v61, 0.0  ;;  %v7588_v7 = vmax.f32 %v5839_v10, 0.0  ;;  %v7589_v25 = vmax.f32 %v5845_v20, 0.0  ;;  %3907 = vst [vmem:[%s6281_s27 + $0x100] sm:$0xff] %v3719_v15   ;;  %v7595_v10 = vld [vmem:[#allocation47_spill] sm:$0xff] }
 0x343   : > { %v3734_v24 = vpack.c.bf16 %v7584_v60, %v7583_v21  ;;  %v3739_v59 = vpack.c.bf16 %v7586_v26, %v7585_v31  ;;  %v7590_v34 = vmax.f32 %v5851_v30, 0.0  ;;  %v7591_v28 = vmax.f32 %v5857_v38, 0.0  ;;  %3908 = vst [vmem:[%s6281_s27 + $0x108] sm:$0xff] %v3724_v29   ;;  %v7597_v30 = vld [vmem:[#allocation49_spill] sm:$0xff]  ;;  %v7627_v33 = vld [vmem:[#allocation79_spill] sm:$0xff]  ;;  %v7629_v29 = vld [vmem:[#allocation38_spill] sm:$0xff] }
 0x344   : > { %v3744_v16 = vpack.c.bf16 %v7588_v7, %v7587_v0  ;;  %v7592_v14 = vmax.f32 %v5863_v48, 0.0  ;;  %3909 = vst [vmem:[%s6281_s27 + $0x110] sm:$0xff] %v3729_v11   ;;  %v7593_v43 = vmax.f32 %v5869_v56, 0.0  ;;  %v7594_v52 = vmax.f32 %v5875_v4, 0.0  ;;  %v7599_v48 = vld [vmem:[#allocation51_spill] sm:$0xff]  ;;  %v7631_v11 = vld [vmem:[#allocation40_spill] sm:$0xff] }
 0x345   : > { %v3749_v46 = vpack.c.bf16 %v7590_v34, %v7589_v25  ;;  %3910 = vst [vmem:[%s6281_s27 + $0x118] sm:$0xff] %v3734_v24   ;;  %v7596_v20 = vmax.f32 %v7595_v10, 0.0  ;;  %v7598_v38 = vmax.f32 %v7597_v30, 0.0  ;;  %v7600_v58 = vmax.f32 %v7599_v48, 0.0  ;;  %3911 = vst [vmem:[%s6281_s27 + $0x120] sm:$0xff] %v3739_v59   ;;  %v7607_v56 = vld [vmem:[#allocation59_spill] sm:$0xff] }
 0x346   : > { %v3754_v44 = vpack.c.bf16 %v7592_v14, %v7591_v28  ;;  %v3759_v61 = vpack.c.bf16 %v7594_v52, %v7593_v43  ;;  %v7602_v18 = vmax.f32 %v7601_v2, 0.0  ;;  %v7604_v3 = vmax.f32 %v7603_v50, 0.0  ;;  %3912 = vst [vmem:[%s6281_s27 + $0x128] sm:$0xff] %v3744_v16   ;;  %v7633_v60 = vld [vmem:[#allocation42_spill] sm:$0xff]  ;;  %v7635_v26 = vld [vmem:[#allocation44_spill] sm:$0xff] }
 0x347   : > { %v3764_v36 = vpack.c.bf16 %v7598_v38, %v7596_v20  ;;  %v7606_v62 = vmax.f32 %v7605_v27, 0.0  ;;  %3913 = vst [vmem:[%s6281_s27 + $0x130] sm:$0xff] %v3749_v46   ;;  %v7608_v4 = vmax.f32 %v7607_v56, 0.0  ;;  %v7610_v12 = vmax.f32 %v7609_v5, 0.0  ;;  %v7637_v0 = vld [vmem:[#allocation46_spill] sm:$0xff]  ;;  %v7639_v25 = vld [vmem:[#allocation48_spill] sm:$0xff] }
 0x348   : > { %v3769_v51 = vpack.c.bf16 %v7602_v18, %v7600_v58  ;;  %3914 = vst [vmem:[%s6281_s27 + $0x138] sm:$0xff] %v3754_v44   ;;  %v7612_v45 = vmax.f32 %v7611_v13, 0.0  ;;  %v7614_v23 = vmax.f32 %v7613_v22, 0.0  ;;  %v7616_v17 = vmax.f32 %v7615_v49, 0.0  ;;  %3915 = vst [vmem:[%s6281_s27 + $0x140] sm:$0xff] %v3759_v61   ;;  %v7641_v46 = vld [vmem:[#allocation50_spill] sm:$0xff] }
 0x349   : > { %v3774_v39 = vpack.c.bf16 %v7606_v62, %v7604_v3  ;;  %v3779_v8 = vpack.c.bf16 %v7610_v12, %v7608_v4  ;;  %v7618_v47 = vmax.f32 %v7617_v63, 0.0  ;;  %v7620_v1 = vmax.f32 %v7619_v55, 0.0  ;;  %3916 = vst [vmem:[%s6281_s27 + $0x148] sm:$0xff] %v3764_v36   ;;  %v7643_v44 = vld [vmem:[#allocation52_spill] sm:$0xff]  ;;  %v7645_v52 = vld [vmem:[#allocation54_spill] sm:$0xff] }
 0x34a   : > { %v3784_v40 = vpack.c.bf16 %v7614_v23, %v7612_v45  ;;  %v7622_v54 = vmax.f32 %v7621_v41, 0.0  ;;  %3917 = vst [vmem:[%s6281_s27 + $0x150] sm:$0xff] %v3769_v51   ;;  %v7624_v32 = vmax.f32 %v7623_v6, 0.0  ;;  %v7626_v35 = vmax.f32 %v7625_v57, 0.0  ;;  %v7647_v20 = vld [vmem:[#allocation56_spill] sm:$0xff]  ;;  %v7649_v38 = vld [vmem:[#allocation58_spill] sm:$0xff] }
 0x34b   : > { %v3789_v19 = vpack.c.bf16 %v7618_v47, %v7616_v17  ;;  %3918 = vst [vmem:[%s6281_s27 + $0x158] sm:$0xff] %v3774_v39   ;;  %v7628_v9 = vmax.f32 %v7627_v33, 0.0  ;;  %v7630_v53 = vmax.f32 %v7629_v29, 0.0  ;;  %v7632_v21 = vmax.f32 %v7631_v11, 0.0  ;;  %3919 = vst [vmem:[%s6281_s27 + $0x160] sm:$0xff] %v3779_v8   ;;  %v7651_v58 = vld [vmem:[#allocation60_spill] sm:$0xff] }
 0x34c   : > { %v3794_v42 = vpack.c.bf16 %v7622_v54, %v7620_v1  ;;  %v3799_v15 = vpack.c.bf16 %v7626_v35, %v7624_v32  ;;  %v7634_v24 = vmax.f32 %v7633_v60, 0.0  ;;  %v7636_v59 = vmax.f32 %v7635_v26, 0.0  ;;  %3920 = vst [vmem:[%s6281_s27 + $0x168] sm:$0xff] %v3784_v40   ;;  %v7653_v18 = vld [vmem:[#allocation62_spill] sm:$0xff]  ;;  %v7655_v3 = vld [vmem:[#allocation64_spill] sm:$0xff]  ;;  %v7671_v1 = vld [vmem:[#allocation95_spill] sm:$0xff] }
 0x34d   : > { %v3804_v37 = vpack.c.bf16 %v7630_v53, %v7628_v9  ;;  %v7638_v7 = vmax.f32 %v7637_v0, 0.0  ;;  %3921 = vst [vmem:[%s6281_s27 + $0x170] sm:$0xff] %v3789_v19   ;;  %v7640_v34 = vmax.f32 %v7639_v25, 0.0  ;;  %v7642_v28 = vmax.f32 %v7641_v46, 0.0  ;;  %v7657_v62 = vld [vmem:[#allocation66_spill] sm:$0xff]  ;;  %v7659_v4 = vld [vmem:[#allocation68_spill] sm:$0xff] }
 0x34e   : > { %v3809_v31 = vpack.c.bf16 %v7634_v24, %v7632_v21  ;;  %3922 = vst [vmem:[%s6281_s27 + $0x178] sm:$0xff] %v3794_v42   ;;  %v7644_v43 = vmax.f32 %v7643_v44, 0.0  ;;  %v7646_v61 = vmax.f32 %v7645_v52, 0.0  ;;  %v7648_v30 = vmax.f32 %v7647_v20, 0.0  ;;  %3923 = vst [vmem:[%s6281_s27 + $0x180] sm:$0xff] %v3799_v15   ;;  %v7661_v12 = vld [vmem:[#allocation70_spill] sm:$0xff] }
 0x34f   : > { %v3814_v16 = vpack.c.bf16 %v7638_v7, %v7636_v59  ;;  %v3819_v14 = vpack.c.bf16 %v7642_v28, %v7640_v34  ;;  %v7650_v36 = vmax.f32 %v7649_v38, 0.0  ;;  %v7652_v2 = vmax.f32 %v7651_v58, 0.0  ;;  %3924 = vst [vmem:[%s6281_s27 + $0x188] sm:$0xff] %v3804_v37   ;;  %v7663_v45 = vld [vmem:[#allocation72_spill] sm:$0xff]  ;;  %v7665_v23 = vld [vmem:[#allocation74_spill] sm:$0xff]  ;;  %v7677_v35 = vld [vmem:[#allocation97_spill] sm:$0xff] }
 0x350   : > { %v3824_v10 = vpack.c.bf16 %v7646_v61, %v7644_v43  ;;  %v7654_v51 = vmax.f32 %v7653_v18, 0.0  ;;  %3925 = vst [vmem:[%s6281_s27 + $0x190] sm:$0xff] %v3809_v31   ;;  %v7656_v27 = vmax.f32 %v7655_v3, 0.0  ;;  %v7658_v39 = vmax.f32 %v7657_v62, 0.0  ;;  %v7667_v17 = vld [vmem:[#allocation76_spill] sm:$0xff]  ;;  %v7669_v47 = vld [vmem:[#allocation94_spill] sm:$0xff] }
 0x351   : > { %v3829_v48 = vpack.c.bf16 %v7650_v36, %v7648_v30  ;;  %3926 = vst [vmem:[%s6281_s27 + $0x198] sm:$0xff] %v3814_v16   ;;  %v7660_v5 = vmax.f32 %v7659_v4, 0.0  ;;  %v7662_v8 = vmax.f32 %v7661_v12, 0.0  ;;  %v7664_v22 = vmax.f32 %v7663_v45, 0.0  ;;  %3927 = vst [vmem:[%s6281_s27 + $0x1a0] sm:$0xff] %v3819_v14   ;;  %v7673_v54 = vld [vmem:[#allocation82_spill] sm:$0xff] }
 0x352   : > { %v3834_v50 = vpack.c.bf16 %v7654_v51, %v7652_v2  ;;  %v3839_v56 = vpack.c.bf16 %v7658_v39, %v7656_v27  ;;  %v7666_v40 = vmax.f32 %v7665_v23, 0.0  ;;  %v7668_v63 = vmax.f32 %v7667_v17, 0.0  ;;  %3928 = vst [vmem:[%s6281_s27 + $0x1a8] sm:$0xff] %v3824_v10   ;;  %v7675_v32 = vld [vmem:[#allocation96_spill] sm:$0xff]  ;;  %v7679_v9 = vld [vmem:[#allocation98_spill] sm:$0xff]  ;;  %v7681_v53 = vld [vmem:[#allocation99_spill] sm:$0xff] }
 0x353   : > { %v3844_v13 = vpack.c.bf16 %v7662_v8, %v7660_v5  ;;  %v7670_v19 = vmax.f32 %v7669_v47, 0.0  ;;  %3929 = vst [vmem:[%s6281_s27 + $0x1b0] sm:$0xff] %v3829_v48   ;;  %v7672_v41 = vmax.f32 %v7671_v1, 0.0  ;;  %v7674_v42 = vmax.f32 %v7673_v54, 0.0  ;;  %v7683_v21 = vld [vmem:[#allocation100_spill] sm:$0xff]  ;;  %v7685_v24 = vld [vmem:[#allocation93_spill] sm:$0xff] }
 0x354   : > { %v3849_v49 = vpack.c.bf16 %v7666_v40, %v7664_v22  ;;  %3930 = vst [vmem:[%s6281_s27 + $0x1b8] sm:$0xff] %v3834_v50   ;;  %v7676_v57 = vmax.f32 %v7675_v32, 0.0  ;;  %v7678_v15 = vmax.f32 %v7677_v35, 0.0  ;;  %v7680_v29 = vmax.f32 %v7679_v9, 0.0  ;;  %3931 = vst [vmem:[%s6281_s27 + $0x1c0] sm:$0xff] %v3839_v56  }
 0x355   : > { %v3854_v55 = vpack.c.bf16 %v7670_v19, %v7668_v63  ;;  %v3859_v6 = vpack.c.bf16 %v7674_v42, %v7672_v41  ;;  %v7682_v37 = vmax.f32 %v7681_v53, 0.0  ;;  %v7684_v60 = vmax.f32 %v7683_v21, 0.0  ;;  %3932 = vst [vmem:[%s6281_s27 + $0x1c8] sm:$0xff] %v3844_v13  }
 0x356   : > { %v3864_v33 = vpack.c.bf16 %v7678_v15, %v7676_v57  ;;  %v7686_v31 = vmax.f32 %v7685_v24, 0.0  ;;  %3933 = vst [vmem:[%s6281_s27 + $0x1d0] sm:$0xff] %v3849_v49  }
 0x357   : > { %v3869_v11 = vpack.c.bf16 %v7682_v37, %v7680_v29  ;;  %3934 = vst [vmem:[%s6281_s27 + $0x1d8] sm:$0xff] %v3854_v55   ;;  %3935 = vst [vmem:[%s6281_s27 + $0x1e0] sm:$0xff] %v3859_v6  }
 0x358   : > { %v3874_v26 = vpack.c.bf16 %v7686_v31, %v7684_v60  ;;  %3936 = vst [vmem:[%s6281_s27 + $0x1e8] sm:$0xff] %v3864_v33  }
 0x359   : > { %3937 = vst [vmem:[%s6281_s27 + $0x1f0] sm:$0xff] %v3869_v11  }
 0x35a   : > { %3938 = vst [vmem:[%s6281_s27 + $0x1f8] sm:$0xff] %v3874_v26  }
 0x35b PF: > { %s12_s11 = sadd.s32 1, %s4228_s11   ;;  %s7687_s9 = smov %s4224_s10 }
 0x35c   : > { %p9_p5 = scmp.ge.s32.totalorder %s12_s11, 4   ;;  %s7688_s10 = smov %s7690_s12 }
 0x35e   :  { %11 = sbr.rel (!%p9_p5) target bundleno = 2 (0x2), region = 61 }

// kernel: forward.23
= control target key start
LH: loop header
LB: loop body
LE: loop exit
PB: predicated region body
PF: predicated region fallthrough
CT: control target
= control target key end

     0   :  { %s1382_s15 = smov 0   ;;  %s1936_s0 = inlined_call_operand.vmem [shape: f32[2,17,17,4], index: 0, kind: input, shape index: {}]   ;;  %s1937_s1 = inlined_call_operand.vmem [shape: f32[2,17,17,4], index: 1, kind: input, shape index: {}]   ;;  %s1938_s2 = inlined_call_operand.vmem [shape: f32[2,17,17,4], index: 2, kind: input, shape index: {}]   ;;  %s1939_s3 = inlined_call_operand.vmem [shape: f32[2,17,17,4], index: 3, kind: input, shape index: {}]   ;;  %s1940_s4 = inlined_call_operand.vmem [shape: bf16[2,16,16,4], index: 4, kind: output, shape index: {}]  }
   0x1 LB: > { %s1262_s16 = sadd.s32 4294967295, %s1355_s15   ;;  %p1266_p0 = scmp.ge.s32.totalorder %s1355_s15, 1  ;;  %s1355_s15 = sphi %s1382_s15, %s14_s15  }
   0x2   : > { %p192_p1 = scmp.lt.s32.totalorder %s1355_s15, 3 }
   0x4   : > { %p193_p2 = pnand %p1266_p0, %p192_p1 }
   0x5   : > { %p233_p3 = scmp.lt.s32.totalorder (!%p193_p2), %s1262_s16, 1  ;;  %vm471_vm0 = vcmask (!%p193_p2), 1046528   ;;  %vm1138_vm1 = vcmask (!%p193_p2), 27648  }
   0x6   : > { %196 = sbr.rel (%p193_p2) target bundleno = 142 (0x8e), region = 36 }
   0xd   : > { %s1942_s16 = smov (!%p233_p3, %s1262_s16), 1 }
   0xe   : > { %s1393_s17 = smul.u32 408, %s1942_s16  ;;  %s1307_s30 = sshll.u32 %s1942_s16, 7 }
   0xf   : > { %s1507_s7 = scalar_lea.vmem %s1940_s4, %s1307_s30 }
  0x10   : > { %s1399_s20 = scalar_lea.vmem %s1936_s0, %s1393_s17  ;;  %s1405_s23 = scalar_lea.vmem %s1938_s2, %s1393_s17 }
  0x11   : > { %v258_v0 = vld [vmem:[%s1399_s20] sm:$0xff]  ;;  %v259_v1 = vld [vmem:[%s1399_s20 + $0x8] sm:$0xff]  ;;  %v261_v2 = vld [vmem:[%s1399_s20 + $0x18] sm:$0xff]  ;;  %s1426_s26 = scalar_lea.vmem %s1937_s1, %s1393_s17  ;;  %s1472_s29 = scalar_lea.vmem %s1939_s3, %s1393_s17 }
  0x12   : > { %v262_v3 = vld [vmem:[%s1399_s20 + $0x20] sm:$0xff]  ;;  %v472_v4 = vrot.slane %v258_v0, 1  ;;  %v473_v5 = vrot.slane %v259_v1, 1  ;;  %v477_v6 = vrot.slane %v261_v2, 1  ;;  %v1415_v8 = vld [vmem:[%s1405_s23 + $0x8] sm:$0xff]  ;;  %v264_v22 = vld [vmem:[%s1399_s20 + $0x30] sm:$0xff] }
  0x13   : > { %v1412_v7 = vld [vmem:[%s1405_s23] sm:$0xff]  ;;  %v478_v9 = vrot.slane %v262_v3, 1  ;;  %v835_v12 = vrot.slane %v1415_v8, 1  ;;  %v260_v13 = vld [vmem:[%s1399_s20 + $0x10] sm:$0x1]  ;;  %v1432_v23 = vld [vmem:[%s1399_s20 + $0x38] sm:$0xff] }
  0x14   : > { %v474_v10 = vsel %vm471_vm0, %v472_v4, %v473_v5  ;;  %v834_v11 = vrot.slane %v1412_v7, 1  ;;  %v263_v14 = vld [vmem:[%s1399_s20 + $0x28] sm:$0x1]  ;;  %v345_v17 = vld [vmem:[%s1405_s23 + $0x10] sm:$0x1]  ;;  %v475_v18 = vrot.slane %v260_v13, 1 }
  0x15   : > { %v479_v15 = vsel %vm471_vm0, %v477_v6, %v478_v9  ;;  %v584_v16 = vmax.f32 %v258_v0, %v474_v10  ;;  %v480_v19 = vrot.slane %v263_v14, 1  ;;  %v837_v21 = vrot.slane %v345_v17, 1  ;;  %v346_v27 = vld [vmem:[%s1405_s23 + $0x18] sm:$0xff]  ;;  %v1438_v28 = vld [vmem:[%s1405_s23 + $0x20] sm:$0xff]  ;;  %v1448_v40 = vld [vmem:[%s1399_s20 + $0x48] sm:$0xff] }
  0x16   : > { %v586_v20 = vmax.f32 %v261_v2, %v479_v15  ;;  %v476_v25 = vsel %vm471_vm0, %v473_v5, %v475_v18  ;;  %v482_v29 = vrot.slane %v264_v22, 1  ;;  %v309_v30 = vld [vmem:[%s1426_s26] sm:$0xff]  ;;  %v1442_v31 = vsel %vm471_vm0, %v834_v11, %v835_v12  ;;  %v311_v41 = vld [vmem:[%s1426_s26 + $0x18] sm:$0xff]  ;;  %v348_v44 = vld [vmem:[%s1405_s23 + $0x28] sm:$0x1] }
  0x17   : > { %v616_v24 = vmax.f32 %v584_v16, %v261_v2  ;;  %v481_v26 = vsel %vm471_vm0, %v478_v9, %v480_v19  ;;  %v585_v32 = vmax.f32 %v259_v1, %v476_v25  ;;  %v483_v34 = vrot.slane %v1432_v23, 1  ;;  %v266_v35 = vld [vmem:[%s1399_s20 + $0x40] sm:$0x1]  ;;  %v310_v48 = vld [vmem:[%s1426_s26 + $0x8] sm:$0xff]  ;;  %v1459_v52 = vld [vmem:[%s1399_s20 + $0x50] sm:$0xff] }
  0x18   : > { %v587_v33 = vmax.f32 %v262_v3, %v481_v26  ;;  %v618_v37 = vmax.f32 %v586_v20, %v264_v22  ;;  %v839_v38 = vrot.slane %v346_v27, 1  ;;  %v840_v39 = vrot.slane %v1438_v28, 1  ;;  %v312_v53 = vld [vmem:[%s1426_s26 + $0x20] sm:$0xff]  ;;  %v1465_v57 = vld [vmem:[%s1405_s23 + $0x30] sm:$0xff]  ;;  %v1475_v63 = vld [vmem:[%s1405_s23 + $0x38] sm:$0xff] }
  0x19   : > { %v658_v36 = vmax.f32 %v616_v24, %v479_v15  ;;  %v617_v42 = vmax.f32 %v585_v32, %v262_v3  ;;  %v484_v43 = vsel %vm471_vm0, %v482_v29, %v483_v34  ;;  %v485_v45 = vrot.slane %v266_v35, 1  ;;  %v269_v0 = vld [vmem:[%s1399_s20 + $0x58] sm:$0x1]  ;;  %v313_v2 = vld [vmem:[%s1426_s26 + $0x30] sm:$0xff]  ;;  %v351_v32 = vld [vmem:[%s1405_s23 + $0x40] sm:$0x1] }
  0x1a   : > { %v619_v46 = vmax.f32 %v587_v33, %v1432_v23  ;;  %v1456_v49 = vsel %vm471_vm0, %v835_v12, %v837_v21  ;;  %v588_v50 = vmax.f32 %v264_v22, %v484_v43  ;;  %v660_v51 = vmax.f32 %v618_v37, %v484_v43  ;;  %v391_v12 = vld [vmem:[%s1472_s29] sm:$0xff]  ;;  %v314_v14 = vld [vmem:[%s1426_s26 + $0x38] sm:$0xff]  ;;  %v1514_v37 = vld [vmem:[%s1399_s20 + $0x68] sm:$0xff] }
  0x1b   : > { %v690_v47 = vmax.f32 %v658_v36, %v309_v30  ;;  %v659_v54 = vmax.f32 %v617_v42, %v481_v26  ;;  %v841_v55 = vsel %vm471_vm0, %v839_v38, %v840_v39  ;;  %v486_v56 = vsel %vm471_vm0, %v483_v34, %v485_v45  ;;  %v393_v22 = vld [vmem:[%s1472_s29 + $0x18] sm:$0xff]  ;;  %v1496_v26 = vld [vmem:[%s1399_s20 + $0x60] sm:$0xff]  ;;  %v392_v30 = vld [vmem:[%s1472_s29 + $0x8] sm:$0xff] }
  0x1c   : > { %v487_v58 = vrot.slane %v1448_v40, 1  ;;  %v692_v60 = vmax.f32 %v660_v51, %v311_v41  ;;  %v661_v61 = vmax.f32 %v619_v46, %v486_v56  ;;  %v842_v62 = vrot.slane %v348_v44, 1  ;;  %v394_v34 = vld [vmem:[%s1472_s29 + $0x20] sm:$0xff]  ;;  %v352_v42 = vld [vmem:[%s1405_s23 + $0x48] sm:$0xff] }
  0x1d   : > { %v722_v59 = vmax.f32 %v690_v47, %v311_v41  ;;  %v691_v1 = vmax.f32 %v659_v54, %v310_v48  ;;  %v589_v3 = vmax.f32 %v1432_v23, %v486_v56  ;;  %v488_v4 = vrot.slane %v1459_v52, 1  ;;  %v315_v41 = vld [vmem:[%s1426_s26 + $0x48] sm:$0xff]  ;;  %v1520_v48 = vld [vmem:[%s1405_s23 + $0x50] sm:$0xff] }
  0x1e   : > { %v620_v5 = vmax.f32 %v588_v50, %v1448_v40  ;;  %v724_v9 = vmax.f32 %v692_v60, %v313_v2  ;;  %v693_v10 = vmax.f32 %v661_v61, %v312_v53  ;;  %v844_v11 = vrot.slane %v1465_v57, 1  ;;  %v395_v60 = vld [vmem:[%s1472_s29 + $0x30] sm:$0xff] }
  0x1f   : > { %v754_v6 = vmax.f32 %v722_v59, %v1412_v7  ;;  %v723_v13 = vmax.f32 %v691_v1, %v312_v53  ;;  %v489_v15 = vsel %vm471_vm0, %v487_v58, %v488_v4  ;;  %v845_v16 = vrot.slane %v1475_v63, 1  ;;  %v316_v61 = vld [vmem:[%s1426_s26 + $0x50] sm:$0xff]  ;;  %v354_v1 = vld [vmem:[%s1405_s23 + $0x58] sm:$0x1] }
  0x20   : > { %v490_v17 = vrot.slane %v269_v0, 1  ;;  %v756_v7 = vmax.f32 %v724_v9, %v346_v27  ;;  %v725_v19 = vmax.f32 %v693_v10, %v314_v14  ;;  %v843_v20 = vsel %vm471_vm0, %v840_v39, %v842_v62  ;;  %v1542_v9 = vld [vmem:[%s1399_s20 + $0x80] sm:$0xff] }
  0x21   : > { %v946_v18 = vmax.f32 %v754_v6, %v1442_v31  ;;  %v755_v21 = vmax.f32 %v723_v13, %v1415_v8  ;;  %v590_v23 = vmax.f32 %v1448_v40, %v489_v15  ;;  %v662_v24 = vmax.f32 %v620_v5, %v489_v15  ;;  %v1539_v6 = vld [vmem:[%s1399_s20 + $0x78] sm:$0xff] }
  0x22   : > { %v491_v25 = vsel %vm471_vm0, %v488_v4, %v490_v17  ;;  %v948_v27 = vmax.f32 %v756_v7, %v841_v55  ;;  %v757_v31 = vmax.f32 %v725_v19, %v1438_v28  ;;  %v846_v8 = vsel %vm471_vm0, %v844_v11, %v845_v16  ;;  %v355_v7 = vld [vmem:[%s1405_s23 + $0x60] sm:$0xff]  ;;  %v1555_v19 = vld [vmem:[%s1405_s23 + $0x68] sm:$0xff] }
  0x23   : > { %v978_v29 = vmax.f32 %v946_v18, %v391_v12  ;;  %v947_v33 = vmax.f32 %v755_v21, %v1456_v49  ;;  %v694_v35 = vmax.f32 %v662_v24, %v313_v2  ;;  %v591_v36 = vmax.f32 %v1459_v52, %v491_v25  ;;  %v272_v49 = vld [vmem:[%s1399_s20 + $0x70] sm:$0x1]  ;;  %v317_v21 = vld [vmem:[%s1426_s26 + $0x60] sm:$0xff] }
  0x24   : > { %v621_v28 = vmax.f32 %v589_v3, %v1459_v52  ;;  %v980_v39 = vmax.f32 %v948_v27, %v393_v22  ;;  %v949_v40 = vmax.f32 %v757_v31, %v843_v20  ;;  %v492_v43 = vrot.slane %v1496_v26, 1  ;;  %v396_v20 = vld [vmem:[%s1472_s29 + $0x38] sm:$0xff] }
  0x25   : > { %v1308_v38 = vpack.c.bf16 %v978_v29, %v978_v29  ;;  %v979_v44 = vmax.f32 %v947_v33, %v392_v30  ;;  %v726_v45 = vmax.f32 %v694_v35, %v315_v41  ;;  %v847_v47 = vrot.slane %v351_v32, 1  ;;  %v275_v30 = vld [vmem:[%s1399_s20 + $0x88] sm:$0x1] }
  0x26   : > { %v663_v46 = vmax.f32 %v621_v28, %v491_v25  ;;  %v1310_v50 = vpack.c.bf16 %v980_v39, %v980_v39  ;;  %v981_v51 = vmax.f32 %v949_v40, %v394_v34  ;;  %v493_v52 = vrot.slane %v1514_v37, 1  ;;  %v318_v35 = vld [vmem:[%s1426_s26 + $0x68] sm:$0xff] }
  0x27   : > { %1139 = vst.msk [vmem:[%s1507_s7] sm:$0xf] %vm1138_vm1, %v1308_v38  ;;  %v622_v53 = vmax.f32 %v590_v23, %v1496_v26  ;;  %v1309_v54 = vpack.c.bf16 %v979_v44, %v979_v44  ;;  %v758_v55 = vmax.f32 %v726_v45, %v1465_v57  ;;  %v849_v58 = vrot.slane %v352_v42, 1  ;;  %v1574_v38 = vld [vmem:[%s1399_s20 + $0x98] sm:$0xff]  ;;  %v397_v39 = vld [vmem:[%s1472_s29 + $0x48] sm:$0xff] }
  0x28   : > { %v695_v56 = vmax.f32 %v663_v46, %v314_v14  ;;  %1141 = vst.msk [vmem:[%s1507_s7 + $0x8] sm:$0xf] %vm1138_vm1, %v1310_v50  ;;  %v1311_v59 = vpack.c.bf16 %v981_v51, %v981_v51  ;;  %v494_v62 = vsel %vm471_vm0, %v492_v43, %v493_v52  ;;  %v850_v0 = vrot.slane %v1520_v48, 1  ;;  %v319_v51 = vld [vmem:[%s1426_s26 + $0x78] sm:$0xff] }
  0x29   : > { %v495_v2 = vrot.slane %v272_v49, 1  ;;  %1140 = vst.msk [vmem:[%s1507_s7 + $0x4] sm:$0xf] %vm1138_vm1, %v1309_v54  ;;  %v950_v57 = vmax.f32 %v758_v55, %v846_v8  ;;  %v592_v4 = vmax.f32 %v1496_v26, %v494_v62  ;;  %v664_v5 = vmax.f32 %v622_v53, %v494_v62  ;;  %v357_v49 = vld [vmem:[%s1405_s23 + $0x70] sm:$0x1] }
  0x2a   : > { %v727_v3 = vmax.f32 %v695_v56, %v316_v61  ;;  %1142 = vst.msk [vmem:[%s1507_s7 + $0xc] sm:$0xf] %vm1138_vm1, %v1311_v59  ;;  %v848_v10 = vsel %vm471_vm0, %v845_v16, %v847_v47  ;;  %v851_v11 = vsel %vm471_vm0, %v849_v58, %v850_v0  ;;  %v623_v13 = vmax.f32 %v591_v36, %v1514_v37  ;;  %v398_v56 = vld [vmem:[%s1472_s29 + $0x50] sm:$0xff] }
  0x2b   : > { %v496_v12 = vsel %vm471_vm0, %v493_v52, %v495_v2  ;;  %v982_v14 = vmax.f32 %v950_v57, %v395_v60  ;;  %v696_v17 = vmax.f32 %v664_v5, %v315_v41  ;;  %v852_v18 = vrot.slane %v354_v1, 1  ;;  %v278_v57 = vld [vmem:[%s1399_s20 + $0xa0] sm:$0x1] }
  0x2c   : > { %v759_v15 = vmax.f32 %v727_v3, %v1475_v63  ;;  %v593_v16 = vmax.f32 %v1514_v37, %v496_v12  ;;  %v665_v22 = vmax.f32 %v623_v13, %v496_v12  ;;  %v497_v23 = vrot.slane %v1539_v6, 1  ;;  %v1571_v37 = vld [vmem:[%s1399_s20 + $0x90] sm:$0xff] }
  0x2d   : > { %v498_v24 = vrot.slane %v1542_v9, 1  ;;  %v1312_v25 = vpack.c.bf16 %v982_v14, %v982_v14  ;;  %v728_v26 = vmax.f32 %v696_v17, %v317_v21  ;;  %v624_v29 = vmax.f32 %v592_v4, %v1539_v6 }
  0x2e   : > { %v951_v63 = vmax.f32 %v759_v15, %v848_v10  ;;  %v697_v27 = vmax.f32 %v665_v22, %v316_v61  ;;  %v854_v8 = vrot.slane %v355_v7, 1  ;;  %v855_v32 = vrot.slane %v1555_v19, 1  ;;  %v358_v61 = vld [vmem:[%s1405_s23 + $0x78] sm:$0xff]  ;;  %v399_v10 = vld [vmem:[%s1472_s29 + $0x60] sm:$0xff]  ;;  %v1602_v15 = vld [vmem:[%s1399_s20 + $0xa8] sm:$0xff] }
  0x2f   : > { %v499_v31 = vsel %vm471_vm0, %v497_v23, %v498_v24  ;;  %1143 = vst.msk [vmem:[%s1507_s7 + $0x10] sm:$0xf] %vm1138_vm1, %v1312_v25  ;;  %v760_v34 = vmax.f32 %v728_v26, %v352_v42  ;;  %v853_v36 = vsel %vm471_vm0, %v850_v0, %v852_v18  ;;  %v500_v43 = vrot.slane %v275_v30, 1  ;;  %v1611_v25 = vld [vmem:[%s1399_s20 + $0xb0] sm:$0xff] }
  0x30   : > { %v983_v33 = vmax.f32 %v951_v63, %v396_v20  ;;  %v666_v28 = vmax.f32 %v624_v29, %v499_v31  ;;  %v729_v40 = vmax.f32 %v697_v27, %v318_v35  ;;  %v594_v41 = vmax.f32 %v1539_v6, %v499_v31  ;;  %v321_v29 = vld [vmem:[%s1426_s26 + $0x90] sm:$0xff]  ;;  %v1618_v31 = vld [vmem:[%s1405_s23 + $0x98] sm:$0xff] }
  0x31   : > { %v625_v44 = vmax.f32 %v593_v16, %v1542_v9  ;;  %v952_v42 = vmax.f32 %v760_v34, %v851_v11  ;;  %v856_v47 = vsel %vm471_vm0, %v854_v8, %v855_v32  ;;  %v501_v52 = vsel %vm471_vm0, %v498_v24, %v500_v43  ;;  %v320_v11 = vld [vmem:[%s1426_s26 + $0x80] sm:$0xff]  ;;  %v361_v27 = vld [vmem:[%s1405_s23 + $0x90] sm:$0xff] }
  0x32   : > { %v1313_v45 = vpack.c.bf16 %v983_v33, %v983_v33  ;;  %v698_v46 = vmax.f32 %v666_v28, %v317_v21  ;;  %v761_v50 = vmax.f32 %v729_v40, %v1520_v48  ;;  %v502_v53 = vrot.slane %v1571_v37, 1  ;;  %v1592_v48 = vld [vmem:[%s1405_s23 + $0x80] sm:$0xff] }
  0x33   : > { %v503_v54 = vrot.slane %v1574_v38, 1  ;;  %v984_v55 = vmax.f32 %v952_v42, %v397_v39  ;;  %v595_v59 = vmax.f32 %v1542_v9, %v501_v52  ;;  %v667_v60 = vmax.f32 %v625_v44, %v501_v52  ;;  %v401_v42 = vld [vmem:[%s1472_s29 + $0x78] sm:$0xff] }
  0x34   : > { %1144 = vst.msk [vmem:[%s1507_s7 + $0x14] sm:$0xf] %vm1138_vm1, %v1313_v45  ;;  %v730_v58 = vmax.f32 %v698_v46, %v319_v51  ;;  %v953_v62 = vmax.f32 %v761_v50, %v853_v36  ;;  %v857_v0 = vrot.slane %v357_v49, 1  ;;  %v626_v2 = vmax.f32 %v594_v41, %v1571_v37  ;;  %v281_v36 = vld [vmem:[%s1399_s20 + $0xb8] sm:$0x1] }
  0x35   : > { %v504_v1 = vsel %vm471_vm0, %v502_v53, %v503_v54  ;;  %v1314_v3 = vpack.c.bf16 %v984_v55, %v984_v55  ;;  %v699_v5 = vmax.f32 %v667_v60, %v318_v35  ;;  %v859_v13 = vrot.slane %v358_v61, 1  ;;  %v322_v46 = vld [vmem:[%s1426_s26 + $0x98] sm:$0xff]  ;;  %v363_v49 = vld [vmem:[%s1405_s23 + $0xa0] sm:$0x1] }
  0x36   : > { %v762_v4 = vmax.f32 %v730_v58, %v355_v7  ;;  %v596_v6 = vmax.f32 %v1571_v37, %v504_v1  ;;  %v985_v9 = vmax.f32 %v953_v62, %v398_v56  ;;  %v668_v12 = vmax.f32 %v626_v2, %v504_v1  ;;  %v360_v7 = vld [vmem:[%s1405_s23 + $0x88] sm:$0x1]  ;;  %v1638_v56 = vld [vmem:[%s1399_s20 + $0xc0] sm:$0xff] }
  0x37   : > { %v860_v14 = vrot.slane %v1592_v48, 1  ;;  %1145 = vst.msk [vmem:[%s1507_s7 + $0x18] sm:$0xf] %vm1138_vm1, %v1314_v3  ;;  %v731_v18 = vmax.f32 %v699_v5, %v320_v11  ;;  %v505_v20 = vrot.slane %v278_v57, 1  ;;  %v627_v21 = vmax.f32 %v595_v59, %v1574_v38  ;;  %v1641_v58 = vld [vmem:[%s1399_s20 + $0xc8] sm:$0xff]  ;;  %v402_v5 = vld [vmem:[%s1472_s29 + $0x80] sm:$0xff] }
  0x38   : > { %v954_v17 = vmax.f32 %v762_v4, %v856_v47  ;;  %v1315_v16 = vpack.c.bf16 %v985_v9, %v985_v9  ;;  %v858_v22 = vsel %vm471_vm0, %v855_v32, %v857_v0  ;;  %v700_v23 = vmax.f32 %v668_v12, %v319_v51  ;;  %v400_v32 = vld [vmem:[%s1472_s29 + $0x68] sm:$0xff]  ;;  %v1649_v4 = vld [vmem:[%s1405_s23 + $0xb0] sm:$0xff] }
  0x39   : > { %v861_v24 = vsel %vm471_vm0, %v859_v13, %v860_v14  ;;  %v763_v26 = vmax.f32 %v731_v18, %v1555_v19  ;;  %v506_v30 = vsel %vm471_vm0, %v503_v54, %v505_v20  ;;  %v507_v8 = vrot.slane %v1602_v15, 1  ;;  %v364_v3 = vld [vmem:[%s1405_s23 + $0xa8] sm:$0xff] }
  0x3a   : > { %v986_v63 = vmax.f32 %v954_v17, %v399_v10  ;;  %1146 = vst.msk [vmem:[%s1507_s7 + $0x1c] sm:$0xf] %vm1138_vm1, %v1315_v16  ;;  %v732_v33 = vmax.f32 %v700_v23, %v321_v29  ;;  %v597_v34 = vmax.f32 %v1574_v38, %v506_v30  ;;  %v669_v35 = vmax.f32 %v627_v21, %v506_v30  ;;  %v284_v17 = vld [vmem:[%s1399_s20 + $0xd0] sm:$0x1] }
  0x3b   : > { %v862_v19 = vrot.slane %v360_v7, 1  ;;  %v955_v37 = vmax.f32 %v763_v26, %v858_v22  ;;  %v508_v39 = vrot.slane %v1611_v25, 1  ;;  %v628_v40 = vmax.f32 %v596_v6, %v1602_v15  ;;  %v323_v6 = vld [vmem:[%s1426_s26 + $0xa8] sm:$0xff]  ;;  %v324_v23 = vld [vmem:[%s1426_s26 + $0xb0] sm:$0xff]  ;;  %v1670_v26 = vld [vmem:[%s1399_s20 + $0xe0] sm:$0xff] }
  0x3c   : > { %v1316_v28 = vpack.c.bf16 %v986_v63, %v986_v63  ;;  %v764_v41 = vmax.f32 %v732_v33, %v358_v61  ;;  %v701_v43 = vmax.f32 %v669_v35, %v320_v11  ;;  %v864_v44 = vrot.slane %v361_v27, 1  ;;  %v1667_v63 = vld [vmem:[%s1399_s20 + $0xd8] sm:$0xff] }
  0x3d   : > { %v865_v45 = vrot.slane %v1618_v31, 1  ;;  %v987_v38 = vmax.f32 %v955_v37, %v400_v32  ;;  %v509_v47 = vsel %vm471_vm0, %v507_v8, %v508_v39  ;;  %v510_v50 = vrot.slane %v281_v36, 1  ;;  %v366_v36 = vld [vmem:[%s1405_s23 + $0xb8] sm:$0x1]  ;;  %v325_v37 = vld [vmem:[%s1426_s26 + $0xc0] sm:$0xff] }
  0x3e   : > { %1147 = vst.msk [vmem:[%s1507_s7 + $0x20] sm:$0xf] %vm1138_vm1, %v1316_v28  ;;  %v629_v51 = vmax.f32 %v597_v34, %v1611_v25  ;;  %v956_v52 = vmax.f32 %v764_v41, %v861_v24  ;;  %v733_v53 = vmax.f32 %v701_v43, %v322_v46  ;;  %v598_v54 = vmax.f32 %v1602_v15, %v509_v47 }
  0x3f   : > { %v670_v55 = vmax.f32 %v628_v40, %v509_v47  ;;  %v1317_v59 = vpack.c.bf16 %v987_v38, %v987_v38  ;;  %v863_v60 = vsel %vm471_vm0, %v860_v14, %v862_v19  ;;  %v866_v61 = vsel %vm471_vm0, %v864_v44, %v865_v45  ;;  %v404_v44 = vld [vmem:[%s1472_s29 + $0x98] sm:$0xff] }
  0x40   : > { %v511_v62 = vsel %vm471_vm0, %v508_v39, %v510_v50  ;;  %v988_v0 = vmax.f32 %v956_v52, %v401_v42  ;;  %v765_v1 = vmax.f32 %v733_v53, %v1592_v48  ;;  %v867_v57 = vrot.slane %v363_v49, 1  ;;  %v287_v52 = vld [vmem:[%s1399_s20 + $0xe8] sm:$0x1] }
  0x41   : > { %v702_v2 = vmax.f32 %v670_v55, %v321_v29  ;;  %1148 = vst.msk [vmem:[%s1507_s7 + $0x24] sm:$0xf] %vm1138_vm1, %v1317_v59  ;;  %v599_v9 = vmax.f32 %v1611_v25, %v511_v62  ;;  %v671_v10 = vmax.f32 %v629_v51, %v511_v62  ;;  %v512_v11 = vrot.slane %v1638_v56, 1  ;;  %v403_v29 = vld [vmem:[%s1472_s29 + $0x90] sm:$0xff]  ;;  %v405_v59 = vld [vmem:[%s1472_s29 + $0xa8] sm:$0xff] }
  0x42   : > { %v513_v12 = vrot.slane %v1641_v58, 1  ;;  %v1318_v48 = vpack.c.bf16 %v988_v0, %v988_v0  ;;  %v957_v13 = vmax.f32 %v765_v1, %v863_v60  ;;  %v630_v15 = vmax.f32 %v598_v54, %v1638_v56  ;;  %v326_v60 = vld [vmem:[%s1426_s26 + $0xc8] sm:$0xff]  ;;  %v1698_v1 = vld [vmem:[%s1399_s20 + $0xf0] sm:$0xff] }
  0x43   : > { %v734_v14 = vmax.f32 %v702_v2, %v323_v6  ;;  %v703_v18 = vmax.f32 %v671_v10, %v322_v46  ;;  %v869_v20 = vrot.slane %v364_v3, 1  ;;  %v870_v21 = vrot.slane %v1649_v4, 1  ;;  %v367_v46 = vld [vmem:[%s1405_s23 + $0xc0] sm:$0xff] }
  0x44   : > { %v514_v7 = vsel %vm471_vm0, %v512_v11, %v513_v12  ;;  %1149 = vst.msk [vmem:[%s1507_s7 + $0x28] sm:$0xf] %vm1138_vm1, %v1318_v48  ;;  %v989_v16 = vmax.f32 %v957_v13, %v402_v5  ;;  %v868_v24 = vsel %vm471_vm0, %v865_v45, %v867_v57  ;;  %v515_v32 = vrot.slane %v284_v17, 1  ;;  %v1707_v48 = vld [vmem:[%s1399_s20 + $0xf8] sm:$0xff] }
  0x45   : > { %v766_v22 = vmax.f32 %v734_v14, %v361_v27  ;;  %v672_v25 = vmax.f32 %v630_v15, %v514_v7  ;;  %v735_v30 = vmax.f32 %v703_v18, %v324_v23  ;;  %v600_v8 = vmax.f32 %v1638_v56, %v514_v7  ;;  %v327_v15 = vld [vmem:[%s1426_s26 + $0xd8] sm:$0xff]  ;;  %v1714_v7 = vld [vmem:[%s1405_s23 + $0xe0] sm:$0xff] }
  0x46   : > { %v631_v33 = vmax.f32 %v599_v9, %v1641_v58  ;;  %v1319_v34 = vpack.c.bf16 %v989_v16, %v989_v16  ;;  %v871_v19 = vsel %vm471_vm0, %v869_v20, %v870_v21  ;;  %v516_v39 = vsel %vm471_vm0, %v513_v12, %v515_v32  ;;  %v370_v18 = vld [vmem:[%s1405_s23 + $0xd8] sm:$0xff] }
  0x47   : > { %v958_v27 = vmax.f32 %v766_v22, %v866_v61  ;;  %v704_v35 = vmax.f32 %v672_v25, %v323_v6  ;;  %v767_v28 = vmax.f32 %v735_v30, %v1618_v31  ;;  %v517_v40 = vrot.slane %v1667_v63, 1  ;;  %v1688_v31 = vld [vmem:[%s1405_s23 + $0xc8] sm:$0xff] }
  0x48   : > { %v518_v41 = vrot.slane %v1670_v26, 1  ;;  %1150 = vst.msk [vmem:[%s1507_s7 + $0x2c] sm:$0xf] %vm1138_vm1, %v1319_v34  ;;  %v601_v38 = vmax.f32 %v1641_v58, %v516_v39  ;;  %v673_v42 = vmax.f32 %v631_v33, %v516_v39  ;;  %v872_v49 = vrot.slane %v366_v36, 1  ;;  %v372_v36 = vld [vmem:[%s1405_s23 + $0xe8] sm:$0x1] }
  0x49   : > { %v990_v43 = vmax.f32 %v958_v27, %v403_v29  ;;  %v736_v45 = vmax.f32 %v704_v35, %v325_v37  ;;  %v959_v47 = vmax.f32 %v767_v28, %v868_v24  ;;  %v632_v51 = vmax.f32 %v600_v8, %v1667_v63  ;;  %v290_v24 = vld [vmem:[%s1399_s20 + $0x100] sm:$0x1] }
  0x4a   : > { %v519_v50 = vsel %vm471_vm0, %v517_v40, %v518_v41  ;;  %v705_v55 = vmax.f32 %v673_v42, %v324_v23  ;;  %v874_v62 = vrot.slane %v367_v46, 1  ;;  %v875_v0 = vrot.slane %v1688_v31, 1  ;;  %v407_v27 = vld [vmem:[%s1472_s29 + $0xc0] sm:$0xff] }
  0x4b   : > { %v1320_v53 = vpack.c.bf16 %v990_v43, %v990_v43  ;;  %v768_v54 = vmax.f32 %v736_v45, %v364_v3  ;;  %v602_v56 = vmax.f32 %v1667_v63, %v519_v50  ;;  %v991_v58 = vmax.f32 %v959_v47, %v404_v44  ;;  %v369_v3 = vld [vmem:[%s1405_s23 + $0xd0] sm:$0x1]  ;;  %v328_v35 = vld [vmem:[%s1426_s26 + $0xe0] sm:$0xff]  ;;  %v1734_v44 = vld [vmem:[%s1399_s20 + $0x108] sm:$0xff] }
  0x4c   : > { %v674_v61 = vmax.f32 %v632_v51, %v519_v50  ;;  %v737_v57 = vmax.f32 %v705_v55, %v326_v60  ;;  %v520_v5 = vrot.slane %v287_v52, 1  ;;  %v633_v6 = vmax.f32 %v601_v38, %v1670_v26  ;;  %v1737_v45 = vld [vmem:[%s1399_s20 + $0x110] sm:$0xff]  ;;  %v408_v55 = vld [vmem:[%s1472_s29 + $0xc8] sm:$0xff] }
  0x4d   : > { %1151 = vst.msk [vmem:[%s1507_s7 + $0x30] sm:$0xf] %vm1138_vm1, %v1320_v53  ;;  %v960_v2 = vmax.f32 %v768_v54, %v871_v19  ;;  %v1321_v9 = vpack.c.bf16 %v991_v58, %v991_v58  ;;  %v873_v10 = vsel %vm471_vm0, %v870_v21, %v872_v49  ;;  %v876_v12 = vsel %vm471_vm0, %v874_v62, %v875_v0  ;;  %v406_v21 = vld [vmem:[%s1472_s29 + $0xb0] sm:$0xff]  ;;  %v1745_v54 = vld [vmem:[%s1405_s23 + $0xf8] sm:$0xff] }
  0x4e   : > { %v706_v11 = vmax.f32 %v674_v61, %v325_v37  ;;  %v769_v14 = vmax.f32 %v737_v57, %v1649_v4  ;;  %v521_v17 = vsel %vm471_vm0, %v518_v41, %v520_v5  ;;  %v522_v20 = vrot.slane %v1698_v1, 1  ;;  %v373_v53 = vld [vmem:[%s1405_s23 + $0xf0] sm:$0xff] }
  0x4f   : > { %v992_v13 = vmax.f32 %v960_v2, %v405_v59  ;;  %1152 = vst.msk [vmem:[%s1507_s7 + $0x34] sm:$0xf] %vm1138_vm1, %v1321_v9  ;;  %v603_v22 = vmax.f32 %v1670_v26, %v521_v17  ;;  %v675_v23 = vmax.f32 %v633_v6, %v521_v17  ;;  %v877_v4 = vrot.slane %v369_v3, 1  ;;  %v293_v2 = vld [vmem:[%s1399_s20 + $0x118] sm:$0x1] }
  0x50   : > { %v738_v16 = vmax.f32 %v706_v11, %v327_v15  ;;  %v961_v63 = vmax.f32 %v769_v14, %v873_v10  ;;  %v523_v29 = vrot.slane %v1707_v48, 1  ;;  %v634_v30 = vmax.f32 %v602_v56, %v1698_v1  ;;  %v329_v56 = vld [vmem:[%s1426_s26 + $0xf0] sm:$0xff]  ;;  %v330_v11 = vld [vmem:[%s1426_s26 + $0xf8] sm:$0xff]  ;;  %v1766_v14 = vld [vmem:[%s1399_s20 + $0x128] sm:$0xff] }
  0x51   : > { %v1322_v25 = vpack.c.bf16 %v992_v13, %v992_v13  ;;  %v707_v32 = vmax.f32 %v675_v23, %v326_v60  ;;  %v879_v33 = vrot.slane %v370_v18, 1  ;;  %v880_v34 = vrot.slane %v1714_v7, 1  ;;  %v1763_v13 = vld [vmem:[%s1399_s20 + $0x120] sm:$0xff] }
  0x52   : > { %v770_v8 = vmax.f32 %v738_v16, %v367_v46  ;;  %v993_v26 = vmax.f32 %v961_v63, %v406_v21  ;;  %v524_v19 = vsel %vm471_vm0, %v522_v20, %v523_v29  ;;  %v525_v28 = vrot.slane %v290_v24, 1  ;;  %v375_v24 = vld [vmem:[%s1405_s23 + $0x100] sm:$0x1]  ;;  %v331_v63 = vld [vmem:[%s1426_s26 + $0x108] sm:$0xff] }
  0x53   : > { %1153 = vst.msk [vmem:[%s1507_s7 + $0x38] sm:$0xf] %vm1138_vm1, %v1322_v25  ;;  %v635_v37 = vmax.f32 %v603_v22, %v1707_v48  ;;  %v739_v40 = vmax.f32 %v707_v32, %v328_v35  ;;  %v604_v41 = vmax.f32 %v1698_v1, %v524_v19  ;;  %v676_v43 = vmax.f32 %v634_v30, %v524_v19 }
  0x54   : > { %v962_v39 = vmax.f32 %v770_v8, %v876_v12  ;;  %v1323_v38 = vpack.c.bf16 %v993_v26, %v993_v26  ;;  %v878_v42 = vsel %vm471_vm0, %v875_v0, %v877_v4  ;;  %v881_v46 = vsel %vm471_vm0, %v879_v33, %v880_v34  ;;  %v410_v33 = vld [vmem:[%s1472_s29 + $0xe0] sm:$0xff] }
  0x55   : > { %v526_v47 = vsel %vm471_vm0, %v523_v29, %v525_v28  ;;  %v771_v50 = vmax.f32 %v739_v40, %v1688_v31  ;;  %v708_v51 = vmax.f32 %v676_v43, %v327_v15  ;;  %v882_v52 = vrot.slane %v372_v36, 1  ;;  %v409_v15 = vld [vmem:[%s1472_s29 + $0xd8] sm:$0xff] }
  0x56   : > { %v994_v49 = vmax.f32 %v962_v39, %v407_v27  ;;  %1154 = vst.msk [vmem:[%s1507_s7 + $0x3c] sm:$0xf] %vm1138_vm1, %v1323_v38  ;;  %v605_v58 = vmax.f32 %v1707_v48, %v526_v47  ;;  %v677_v59 = vmax.f32 %v635_v37, %v526_v47  ;;  %v527_v60 = vrot.slane %v1734_v44, 1  ;;  %v296_v39 = vld [vmem:[%s1399_s20 + $0x130] sm:$0x1] }
  0x57   : > { %v528_v61 = vrot.slane %v1737_v45, 1  ;;  %v963_v62 = vmax.f32 %v771_v50, %v878_v42  ;;  %v740_v0 = vmax.f32 %v708_v51, %v329_v56  ;;  %v636_v1 = vmax.f32 %v604_v41, %v1734_v44  ;;  %v411_v38 = vld [vmem:[%s1472_s29 + $0xf0] sm:$0xff]  ;;  %v1794_v50 = vld [vmem:[%s1399_s20 + $0x138] sm:$0xff] }
  0x58   : > { %v1324_v31 = vpack.c.bf16 %v994_v49, %v994_v49  ;;  %v709_v57 = vmax.f32 %v677_v59, %v328_v35  ;;  %v884_v5 = vrot.slane %v373_v53, 1  ;;  %v885_v6 = vrot.slane %v1745_v54, 1  ;;  %v376_v35 = vld [vmem:[%s1405_s23 + $0x108] sm:$0xff]  ;;  %v332_v42 = vld [vmem:[%s1426_s26 + $0x110] sm:$0xff] }
  0x59   : > { %v529_v3 = vsel %vm471_vm0, %v527_v60, %v528_v61  ;;  %v995_v9 = vmax.f32 %v963_v62, %v408_v55  ;;  %v772_v10 = vmax.f32 %v740_v0, %v370_v18  ;;  %v883_v12 = vsel %vm471_vm0, %v880_v34, %v882_v52 }
  0x5a   : > { %1155 = vst.msk [vmem:[%s1507_s7 + $0x40] sm:$0xf] %vm1138_vm1, %v1324_v31  ;;  %v678_v48 = vmax.f32 %v636_v1, %v529_v3  ;;  %v741_v17 = vmax.f32 %v709_v57, %v330_v11  ;;  %v606_v20 = vmax.f32 %v1734_v44, %v529_v3  ;;  %v530_v21 = vrot.slane %v293_v2, 1  ;;  %v1803_v31 = vld [vmem:[%s1399_s20 + $0x140] sm:$0xff]  ;;  %v1810_v3 = vld [vmem:[%s1405_s23 + $0x128] sm:$0xff] }
  0x5b   : > { %v637_v16 = vmax.f32 %v605_v58, %v1737_v45  ;;  %v1325_v22 = vpack.c.bf16 %v995_v9, %v995_v9  ;;  %v964_v18 = vmax.f32 %v772_v10, %v881_v46  ;;  %v886_v4 = vsel %vm471_vm0, %v884_v5, %v885_v6  ;;  %v333_v1 = vld [vmem:[%s1426_s26 + $0x120] sm:$0xff] }
  0x5c   : > { %v710_v23 = vmax.f32 %v678_v48, %v329_v56  ;;  %v773_v25 = vmax.f32 %v741_v17, %v1714_v7  ;;  %v531_v29 = vsel %vm471_vm0, %v528_v61, %v530_v21  ;;  %v532_v30 = vrot.slane %v1763_v13, 1  ;;  %v1784_v7 = vld [vmem:[%s1405_s23 + $0x110] sm:$0xff]  ;;  %v379_v57 = vld [vmem:[%s1405_s23 + $0x120] sm:$0xff] }
  0x5d   : > { %v533_v8 = vrot.slane %v1766_v14, 1  ;;  %1156 = vst.msk [vmem:[%s1507_s7 + $0x44] sm:$0xf] %vm1138_vm1, %v1325_v22  ;;  %v996_v32 = vmax.f32 %v964_v18, %v409_v15  ;;  %v607_v26 = vmax.f32 %v1737_v45, %v531_v29  ;;  %v679_v27 = vmax.f32 %v637_v16, %v531_v29  ;;  %v413_v18 = vld [vmem:[%s1472_s29 + $0x108] sm:$0xff] }
  0x5e   : > { %v742_v34 = vmax.f32 %v710_v23, %v331_v63  ;;  %v965_v19 = vmax.f32 %v773_v25, %v883_v12  ;;  %v887_v36 = vrot.slane %v375_v24, 1  ;;  %v638_v37 = vmax.f32 %v606_v20, %v1763_v13  ;;  %v299_v12 = vld [vmem:[%s1399_s20 + $0x148] sm:$0x1]  ;;  %v381_v24 = vld [vmem:[%s1405_s23 + $0x130] sm:$0x1] }
  0x5f   : > { %v534_v28 = vsel %vm471_vm0, %v532_v30, %v533_v8  ;;  %v1326_v40 = vpack.c.bf16 %v996_v32, %v996_v32  ;;  %v711_v43 = vmax.f32 %v679_v27, %v330_v11  ;;  %v889_v47 = vrot.slane %v376_v35, 1  ;;  %v334_v23 = vld [vmem:[%s1426_s26 + $0x128] sm:$0xff] }
  0x60   : > { %v774_v41 = vmax.f32 %v742_v34, %v373_v53  ;;  %v608_v44 = vmax.f32 %v1763_v13, %v534_v28  ;;  %v997_v45 = vmax.f32 %v965_v19, %v410_v33  ;;  %v680_v46 = vmax.f32 %v638_v37, %v534_v28  ;;  %v378_v53 = vld [vmem:[%s1405_s23 + $0x118] sm:$0x1]  ;;  %v1830_v33 = vld [vmem:[%s1399_s20 + $0x150] sm:$0xff] }
  0x61   : > { %v890_v49 = vrot.slane %v1784_v7, 1  ;;  %1157 = vst.msk [vmem:[%s1507_s7 + $0x48] sm:$0xf] %vm1138_vm1, %v1326_v40  ;;  %v743_v52 = vmax.f32 %v711_v43, %v332_v42  ;;  %v535_v55 = vrot.slane %v296_v39, 1  ;;  %v639_v56 = vmax.f32 %v607_v26, %v1766_v14  ;;  %v1833_v34 = vld [vmem:[%s1399_s20 + $0x158] sm:$0xff]  ;;  %v414_v43 = vld [vmem:[%s1472_s29 + $0x110] sm:$0xff] }
  0x62   : > { %v966_v51 = vmax.f32 %v774_v41, %v886_v4  ;;  %v1327_v58 = vpack.c.bf16 %v997_v45, %v997_v45  ;;  %v888_v59 = vsel %vm471_vm0, %v885_v6, %v887_v36  ;;  %v712_v60 = vmax.f32 %v680_v46, %v331_v63  ;;  %v412_v6 = vld [vmem:[%s1472_s29 + $0xf8] sm:$0xff]  ;;  %v1841_v41 = vld [vmem:[%s1405_s23 + $0x140] sm:$0xff] }
  0x63   : > { %v891_v61 = vsel %vm471_vm0, %v889_v47, %v890_v49  ;;  %v775_v0 = vmax.f32 %v743_v52, %v1745_v54  ;;  %v536_v2 = vsel %vm471_vm0, %v533_v8, %v535_v55  ;;  %v537_v5 = vrot.slane %v1794_v50, 1  ;;  %v382_v40 = vld [vmem:[%s1405_s23 + $0x138] sm:$0xff] }
  0x64   : > { %v998_v62 = vmax.f32 %v966_v51, %v411_v38  ;;  %1158 = vst.msk [vmem:[%s1507_s7 + $0x4c] sm:$0xf] %vm1138_vm1, %v1327_v58  ;;  %v744_v9 = vmax.f32 %v712_v60, %v333_v1  ;;  %v609_v10 = vmax.f32 %v1766_v14, %v536_v2  ;;  %v681_v11 = vmax.f32 %v639_v56, %v536_v2  ;;  %v302_v51 = vld [vmem:[%s1399_s20 + $0x160] sm:$0x1] }
  0x65   : > { %v892_v54 = vrot.slane %v378_v53, 1  ;;  %v967_v13 = vmax.f32 %v775_v0, %v888_v59  ;;  %v538_v15 = vrot.slane %v1803_v31, 1  ;;  %v640_v17 = vmax.f32 %v608_v44, %v1794_v50  ;;  %v335_v44 = vld [vmem:[%s1426_s26 + $0x138] sm:$0xff]  ;;  %v336_v60 = vld [vmem:[%s1426_s26 + $0x140] sm:$0xff]  ;;  %v1862_v0 = vld [vmem:[%s1399_s20 + $0x170] sm:$0xff] }
  0x66   : > { %v1328_v48 = vpack.c.bf16 %v998_v62, %v998_v62  ;;  %v776_v20 = vmax.f32 %v744_v9, %v376_v35  ;;  %v713_v21 = vmax.f32 %v681_v11, %v332_v42  ;;  %v894_v16 = vrot.slane %v379_v57, 1  ;;  %v1859_v62 = vld [vmem:[%s1399_s20 + $0x168] sm:$0xff] }
  0x67   : > { %v895_v22 = vrot.slane %v1810_v3, 1  ;;  %v999_v14 = vmax.f32 %v967_v13, %v412_v6  ;;  %v539_v4 = vsel %vm471_vm0, %v537_v5, %v538_v15  ;;  %v540_v25 = vrot.slane %v299_v12, 1  ;;  %v384_v12 = vld [vmem:[%s1405_s23 + $0x148] sm:$0x1]  ;;  %v337_v13 = vld [vmem:[%s1426_s26 + $0x150] sm:$0xff] }
  0x68   : > { %1159 = vst.msk [vmem:[%s1507_s7 + $0x50] sm:$0xf] %vm1138_vm1, %v1328_v48  ;;  %v641_v63 = vmax.f32 %v609_v10, %v1803_v31  ;;  %v968_v29 = vmax.f32 %v776_v20, %v891_v61  ;;  %v745_v30 = vmax.f32 %v713_v21, %v334_v23  ;;  %v610_v8 = vmax.f32 %v1794_v50, %v539_v4 }
  0x69   : > { %v682_v32 = vmax.f32 %v640_v17, %v539_v4  ;;  %v1329_v26 = vpack.c.bf16 %v999_v14, %v999_v14  ;;  %v893_v27 = vsel %vm471_vm0, %v890_v49, %v892_v54  ;;  %v896_v35 = vsel %vm471_vm0, %v894_v16, %v895_v22  ;;  %v416_v16 = vld [vmem:[%s1472_s29 + $0x128] sm:$0xff] }
  0x6a   : > { %v541_v19 = vsel %vm471_vm0, %v538_v15, %v540_v25  ;;  %v1000_v36 = vmax.f32 %v968_v29, %v413_v18  ;;  %v777_v28 = vmax.f32 %v745_v30, %v1784_v7  ;;  %v897_v39 = vrot.slane %v381_v24, 1  ;;  %v305_v29 = vld [vmem:[%s1399_s20 + $0x178] sm:$0x1] }
  0x6b   : > { %v714_v37 = vmax.f32 %v682_v32, %v333_v1  ;;  %1160 = vst.msk [vmem:[%s1507_s7 + $0x54] sm:$0xf] %vm1138_vm1, %v1329_v26  ;;  %v611_v45 = vmax.f32 %v1803_v31, %v541_v19  ;;  %v683_v38 = vmax.f32 %v641_v63, %v541_v19  ;;  %v542_v42 = vrot.slane %v1830_v33, 1  ;;  %v415_v1 = vld [vmem:[%s1472_s29 + $0x120] sm:$0xff]  ;;  %v417_v26 = vld [vmem:[%s1472_s29 + $0x138] sm:$0xff] }
  0x6c   : > { %v543_v46 = vrot.slane %v1833_v34, 1  ;;  %v1330_v7 = vpack.c.bf16 %v1000_v36, %v1000_v36  ;;  %v969_v47 = vmax.f32 %v777_v28, %v893_v27  ;;  %v642_v50 = vmax.f32 %v610_v8, %v1830_v33  ;;  %v338_v27 = vld [vmem:[%s1426_s26 + $0x158] sm:$0xff]  ;;  %v387_v28 = vld [vmem:[%s1405_s23 + $0x160] sm:$0x1] }
  0x6d   : > { %v746_v49 = vmax.f32 %v714_v37, %v335_v44  ;;  %v715_v52 = vmax.f32 %v683_v38, %v334_v23  ;;  %v899_v55 = vrot.slane %v382_v40, 1  ;;  %v900_v56 = vrot.slane %v1841_v41, 1  ;;  %v385_v23 = vld [vmem:[%s1405_s23 + $0x150] sm:$0xff] }
  0x6e   : > { %v544_v53 = vsel %vm471_vm0, %v542_v42, %v543_v46  ;;  %1161 = vst.msk [vmem:[%s1507_s7 + $0x58] sm:$0xf] %vm1138_vm1, %v1330_v7  ;;  %v1001_v58 = vmax.f32 %v969_v47, %v414_v43  ;;  %v898_v61 = vsel %vm471_vm0, %v895_v22, %v897_v39  ;;  %v545_v6 = vrot.slane %v302_v51, 1  ;;  %v307_v7 = vld [vmem:[%s1399_s20 + $0x188] sm:$0xff] }
  0x6f   : > { %v778_v59 = vmax.f32 %v746_v49, %v379_v57  ;;  %v684_v31 = vmax.f32 %v642_v50, %v544_v53  ;;  %v747_v2 = vmax.f32 %v715_v52, %v336_v60  ;;  %v612_v5 = vmax.f32 %v1830_v33, %v544_v53  ;;  %v339_v50 = vld [vmem:[%s1426_s26 + $0x168] sm:$0xff]  ;;  %v418_v53 = vld [vmem:[%s1472_s29 + $0x140] sm:$0xff] }
  0x70   : > { %v643_v9 = vmax.f32 %v611_v45, %v1833_v34  ;;  %v1331_v10 = vpack.c.bf16 %v1001_v58, %v1001_v58  ;;  %v901_v54 = vsel %vm471_vm0, %v899_v55, %v900_v56  ;;  %v546_v15 = vsel %vm471_vm0, %v543_v46, %v545_v6  ;;  %v389_v6 = vld [vmem:[%s1405_s23 + $0x170] sm:$0xff] }
  0x71   : > { %v970_v57 = vmax.f32 %v778_v59, %v896_v35  ;;  %v716_v11 = vmax.f32 %v684_v31, %v335_v44  ;;  %v779_v48 = vmax.f32 %v747_v2, %v1810_v3  ;;  %v547_v17 = vrot.slane %v1859_v62, 1  ;;  %v1880_v3 = vld [vmem:[%s1405_s23 + $0x158] sm:$0xff]  ;;  %v306_v44 = vld [vmem:[%s1399_s20 + $0x180] sm:$0xff] }
  0x72   : > { %v548_v20 = vrot.slane %v1862_v0, 1  ;;  %1162 = vst.msk [vmem:[%s1507_s7 + $0x5c] sm:$0xf] %vm1138_vm1, %v1331_v10  ;;  %v613_v14 = vmax.f32 %v1833_v34, %v546_v15  ;;  %v685_v18 = vmax.f32 %v643_v9, %v546_v15  ;;  %v902_v24 = vrot.slane %v384_v12, 1  ;;  %v419_v10 = vld [vmem:[%s1472_s29 + $0x150] sm:$0xff] }
  0x73   : > { %v1002_v21 = vmax.f32 %v970_v57, %v415_v1  ;;  %v748_v22 = vmax.f32 %v716_v11, %v337_v13  ;;  %v971_v4 = vmax.f32 %v779_v48, %v898_v61  ;;  %v644_v63 = vmax.f32 %v612_v5, %v1859_v62  ;;  %v388_v5 = vld [vmem:[%s1405_s23 + $0x168] sm:$0xff]  ;;  %v340_v57 = vld [vmem:[%s1426_s26 + $0x170] sm:$0xff] }
  0x74   : > { %v549_v25 = vsel %vm471_vm0, %v547_v17, %v548_v20  ;;  %v717_v32 = vmax.f32 %v685_v18, %v336_v60  ;;  %v904_v19 = vrot.slane %v385_v23, 1  ;;  %v905_v36 = vrot.slane %v1880_v3, 1  ;;  %v308_v60 = vld [vmem:[%s1399_s20 + $0x190] sm:$0x1]  ;;  %v390_v17 = vld [vmem:[%s1405_s23 + $0x178] sm:$0x1] }
  0x75   : > { %v1332_v30 = vpack.c.bf16 %v1002_v21, %v1002_v21  ;;  %v780_v8 = vmax.f32 %v748_v22, %v382_v40  ;;  %v614_v33 = vmax.f32 %v1859_v62, %v549_v25  ;;  %v1003_v34 = vmax.f32 %v971_v4, %v416_v16  ;;  %v341_v21 = vld [vmem:[%s1426_s26 + $0x180] sm:$0xff] }
  0x76   : > { %v686_v35 = vmax.f32 %v644_v63, %v549_v25  ;;  %v749_v39 = vmax.f32 %v717_v32, %v338_v27  ;;  %v550_v40 = vrot.slane %v305_v29, 1  ;;  %v645_v43 = vmax.f32 %v613_v14, %v1862_v0  ;;  %v420_v25 = vld [vmem:[%s1472_s29 + $0x158] sm:$0xff]  ;;  %v342_v63 = vld [vmem:[%s1426_s26 + $0x188] sm:$0xff] }
  0x77   : > { %1163 = vst.msk [vmem:[%s1507_s7 + $0x60] sm:$0xf] %vm1138_vm1, %v1332_v30  ;;  %v972_v37 = vmax.f32 %v780_v8, %v901_v54  ;;  %v1333_v45 = vpack.c.bf16 %v1003_v34, %v1003_v34  ;;  %v903_v38 = vsel %vm471_vm0, %v900_v56, %v902_v24  ;;  %v906_v46 = vsel %vm471_vm0, %v904_v19, %v905_v36 }
  0x78   : > { %v718_v42 = vmax.f32 %v686_v35, %v337_v13  ;;  %v781_v49 = vmax.f32 %v749_v39, %v1841_v41  ;;  %v551_v51 = vsel %vm471_vm0, %v548_v20, %v550_v40  ;;  %v907_v52 = vrot.slane %v387_v28, 1  ;;  %v421_v35 = vld [vmem:[%s1472_s29 + $0x168] sm:$0xff]  ;;  %v422_v39 = vld [vmem:[%s1472_s29 + $0x170] sm:$0xff] }
  0x79   : > { %v1004_v47 = vmax.f32 %v972_v37, %v417_v26  ;;  %1164 = vst.msk [vmem:[%s1507_s7 + $0x64] sm:$0xf] %vm1138_vm1, %v1333_v45  ;;  %v615_v56 = vmax.f32 %v1862_v0, %v551_v51  ;;  %v687_v58 = vmax.f32 %v645_v43, %v551_v51  ;;  %v646_v59 = vmax.f32 %v614_v33, %v306_v44 }
  0x7a   : > { %v750_v55 = vmax.f32 %v718_v42, %v339_v50  ;;  %v973_v41 = vmax.f32 %v781_v49, %v903_v38  ;;  %v651_v31 = vrot.slane %v306_v44, 1  ;;  %v652_v62 = vrot.slane %v307_v7, 1 }
  0x7b   : > { %v1334_v61 = vpack.c.bf16 %v1004_v47, %v1004_v47  ;;  %v719_v2 = vmax.f32 %v687_v58, %v338_v27  ;;  %v647_v11 = vmax.f32 %v615_v56, %v307_v7  ;;  %v654_v54 = vrot.slane %v308_v60, 1 }
  0x7c   : > { %v782_v1 = vmax.f32 %v750_v55, %v385_v23  ;;  %v1005_v9 = vmax.f32 %v973_v41, %v418_v53  ;;  %v653_v0 = vsel %vm471_vm0, %v651_v31, %v652_v62  ;;  %v908_v13 = vsel %vm471_vm0, %v905_v36, %v907_v52 }
  0x7d   : > { %1165 = vst.msk [vmem:[%s1507_s7 + $0x68] sm:$0xf] %vm1138_vm1, %v1334_v61  ;;  %v751_v48 = vmax.f32 %v719_v2, %v340_v57  ;;  %v688_v15 = vmax.f32 %v646_v59, %v653_v0  ;;  %v909_v16 = vrot.slane %v388_v5, 1  ;;  %v910_v22 = vrot.slane %v389_v6, 1 }
  0x7e   : > { %v974_v12 = vmax.f32 %v782_v1, %v906_v46  ;;  %v1335_v20 = vpack.c.bf16 %v1005_v9, %v1005_v9  ;;  %v655_v14 = vsel %vm471_vm0, %v652_v62, %v654_v54  ;;  %v912_v29 = vrot.slane %v390_v17, 1 }
  0x7f   : > { %v783_v23 = vmax.f32 %v751_v48, %v1880_v3  ;;  %v720_v4 = vmax.f32 %v688_v15, %v339_v50  ;;  %v689_v24 = vmax.f32 %v647_v11, %v655_v14  ;;  %v911_v34 = vsel %vm471_vm0, %v909_v16, %v910_v22 }
  0x80   : > { %v1006_v18 = vmax.f32 %v974_v12, %v419_v10  ;;  %1166 = vst.msk [vmem:[%s1507_s7 + $0x6c] sm:$0xf] %vm1138_vm1, %v1335_v20  ;;  %v913_v19 = vsel %vm471_vm0, %v910_v22, %v912_v29 }
  0x81   : > { %v975_v8 = vmax.f32 %v783_v23, %v908_v13  ;;  %v752_v32 = vmax.f32 %v720_v4, %v341_v21  ;;  %v721_v33 = vmax.f32 %v689_v24, %v340_v57 }
  0x82   : > { %v1336_v30 = vpack.c.bf16 %v1006_v18, %v1006_v18 }
  0x83   : > { %v1007_v3 = vmax.f32 %v975_v8, %v420_v25  ;;  %v784_v26 = vmax.f32 %v752_v32, %v388_v5  ;;  %v753_v27 = vmax.f32 %v721_v33, %v342_v63 }
  0x84   : > { %1167 = vst.msk [vmem:[%s1507_s7 + $0x70] sm:$0xf] %vm1138_vm1, %v1336_v30 }
  0x85   : > { %v1337_v36 = vpack.c.bf16 %v1007_v3, %v1007_v3  ;;  %v976_v28 = vmax.f32 %v784_v26, %v911_v34  ;;  %v785_v37 = vmax.f32 %v753_v27, %v389_v6 }
  0x87   : > { %1168 = vst.msk [vmem:[%s1507_s7 + $0x74] sm:$0xf] %vm1138_vm1, %v1337_v36  ;;  %v1008_v40 = vmax.f32 %v976_v28, %v421_v35  ;;  %v977_v43 = vmax.f32 %v785_v37, %v913_v19 }
  0x89   : > { %v1338_v44 = vpack.c.bf16 %v1008_v40, %v1008_v40  ;;  %v1009_v45 = vmax.f32 %v977_v43, %v422_v39 }
  0x8b   : > { %1169 = vst.msk [vmem:[%s1507_s7 + $0x78] sm:$0xf] %vm1138_vm1, %v1338_v44  ;;  %v1339_v38 = vpack.c.bf16 %v1009_v45, %v1009_v45 }
  0x8d   : > { %1170 = vst.msk [vmem:[%s1507_s7 + $0x7c] sm:$0xf] %vm1138_vm1, %v1339_v38 }
  0x8e PF: > { %s14_s15 = sadd.s32 1, %s1355_s15  }
  0x8f   : > { %p11_p4 = scmp.ge.s32.totalorder %s14_s15, 4  }
  0x91   :  { %13 = sbr.rel (!%p11_p4) target bundleno = 1 (0x1), region = 75 }

// kernel: forward.24
= control target key start
LH: loop header
LB: loop body
LE: loop exit
PB: predicated region body
PF: predicated region fallthrough
CT: control target
= control target key end

     0   :  { %s1372_s9 = smov 0   ;;  %s1374_s10 = smov 0   ;;  %s1721_s0 = inlined_call_operand.vmem [shape: bf16[2,256,128], index: 0, kind: input, shape index: {}]   ;;  %s1722_s1 = inlined_call_operand.vmem [shape: bf16[128,128], index: 1, kind: input, shape index: {}]   ;;  %s1723_s2 = inlined_call_operand.vmem [shape: bf16[2,256,128], index: 2, kind: output, shape index: {}]  }
   0x1   :  { %s1376_s11 = smov 0  }
   0x2 LB: > { %s24_s12 = sadd.s32 1, %s1351_s10  ;;  %p1003_p0 = scmp.ge.s32.totalorder %s1355_s11, 1  ;;  %s1355_s11 = sphi %s1376_s11, %s12_s11   ;;  %s1351_s10 = sphi %s1374_s10, %s1725_s10   ;;  %s1347_s9 = sphi %s1372_s9, %s1724_s9  }
   0x3   : > { %p26_p1 = scmp.ge.s32.totalorder %s24_s12, 2  ;;  %p135_p2 = scmp.lt.s32.totalorder %s1355_s11, 3 }
   0x5   : > { %s1727_s12 = smov (%p26_p1, %s24_s12), 0  ;;  %p136_p3 = pnand %p1003_p0, %p135_p2 }
   0x6   : > { %v1307_v0 = vld [vmem:[%s1722_s1] sm:$0xff] (!%p136_p3)   ;;  %p164_p4 = scmp.lt.s32.totalorder (!%p136_p3), %s1347_s9, 1  ;;  %v1308_v1 = vld [vmem:[%s1722_s1 + $0x8] sm:$0xff] (!%p136_p3)   ;;  %v1309_v2 = vld [vmem:[%s1722_s1 + $0x10] sm:$0xff] (!%p136_p3)  }
   0x7   : > { %139 = sbr.rel (%p136_p3) target bundleno = 378 (0x17a), region = 28  ;;  %1219 = vmatprep.subr.bf16.mxu0 (!%p136_p3), %v1307_v0  ;;  %1267 = vmatprep.subr.bf16.mxu1 (!%p136_p3), %v1307_v0  ;;  %v1310_v3 = vld [vmem:[%s1722_s1 + $0x18] sm:$0xff] (!%p136_p3)   ;;  %v1311_v5 = vld [vmem:[%s1722_s1 + $0x20] sm:$0xff] (!%p136_p3)   ;;  %v1312_v6 = vld [vmem:[%s1722_s1 + $0x28] sm:$0xff] (!%p136_p3)  }
   0x8   : > { %1220 = vmatpush3.bf16.msra.mxu0 (!%p136_p3), %v1307_v0  ;;  %1275 = vmatpush3.bf16.msra.mxu1 (!%p136_p3), %v1307_v0  ;;  %v1313_v8 = vld [vmem:[%s1722_s1 + $0x30] sm:$0xff] (!%p136_p3)   ;;  %v1314_v9 = vld [vmem:[%s1722_s1 + $0x38] sm:$0xff] (!%p136_p3)  }
   0x9   : > { %1221 = vmatprep.subr.bf16.mxu0 (!%p136_p3), %v1308_v1  ;;  %1268 = vmatprep.subr.bf16.mxu1 (!%p136_p3), %v1308_v1 }
   0xc   : > { %1222 = vmatpush3.bf16.msra.mxu0 (!%p136_p3), %v1308_v1  ;;  %1276 = vmatpush3.bf16.msra.mxu1 (!%p136_p3), %v1308_v1 }
   0xd   : > { %1223 = vmatprep.subr.bf16.mxu0 (!%p136_p3), %v1309_v2  ;;  %1269 = vmatprep.subr.bf16.mxu1 (!%p136_p3), %v1309_v2 }
   0xe   : > { %s1729_s9 = smov (!%p164_p4, %s1347_s9), 1 }
   0xf   : > { %s1066_s19 = sshll.u32 %s1729_s9, 7 }
  0x10   : > { %s1407_s22 = scalar_lea.vmem %s1721_s0, %s1066_s19  ;;  %1224 = vmatpush3.bf16.msra.mxu0 %v1309_v2  ;;  %1277 = vmatpush3.bf16.msra.mxu1 %v1309_v2  ;;  %s1694_s7 = scalar_lea.vmem %s1723_s2, %s1066_s19 }
  0x11   : > { %v1315_v4 = vld [vmem:[%s1407_s22] sm:$0xff]   ;;  %1225 = vmatprep.subr.bf16.mxu0 %v1310_v3  ;;  %1270 = vmatprep.subr.bf16.mxu1 %v1310_v3  ;;  %v1316_v10 = vld [vmem:[%s1407_s22 + $0x8] sm:$0xff]   ;;  %v1317_v12 = vld [vmem:[%s1407_s22 + $0x10] sm:$0xff]  }
  0x12   : > { %1235 = vmatprep.mubr.bf16.mxu0 %v1315_v4  ;;  %v1323_v7 = vld [vmem:[%s1407_s22 + $0x40] sm:$0xff]   ;;  %v1324_v11 = vld [vmem:[%s1407_s22 + $0x48] sm:$0xff]   ;;  %v1325_v13 = vld [vmem:[%s1407_s22 + $0x50] sm:$0xff]  }
  0x13   : > { %1251 = vmatprep.mubr.bf16.mxu1 %v1323_v7  ;;  %v1318_v14 = vld [vmem:[%s1407_s22 + $0x18] sm:$0xff]   ;;  %v1319_v16 = vld [vmem:[%s1407_s22 + $0x20] sm:$0xff]   ;;  %v1320_v18 = vld [vmem:[%s1407_s22 + $0x28] sm:$0xff]  }
  0x14   : > { %1226 = vmatpush3.bf16.msra.mxu0 %v1310_v3  ;;  %1278 = vmatpush3.bf16.msra.mxu1 %v1310_v3  ;;  %v1326_v15 = vld [vmem:[%s1407_s22 + $0x58] sm:$0xff]   ;;  %v1327_v17 = vld [vmem:[%s1407_s22 + $0x60] sm:$0xff]   ;;  %v1328_v19 = vld [vmem:[%s1407_s22 + $0x68] sm:$0xff]  }
  0x15   : > { %1227 = vmatprep.subr.bf16.mxu0 %v1311_v5  ;;  %1271 = vmatprep.subr.bf16.mxu1 %v1311_v5  ;;  %v1321_v20 = vld [vmem:[%s1407_s22 + $0x30] sm:$0xff]   ;;  %v1322_v22 = vld [vmem:[%s1407_s22 + $0x38] sm:$0xff]  }
  0x16   : > { %v1329_v21 = vld [vmem:[%s1407_s22 + $0x70] sm:$0xff]   ;;  %v1330_v23 = vld [vmem:[%s1407_s22 + $0x78] sm:$0xff]  }
  0x18   : > { %1228 = vmatpush3.bf16.msra.mxu0 %v1311_v5  ;;  %1279 = vmatpush3.bf16.msra.mxu1 %v1311_v5 }
  0x19   : > { %1229 = vmatprep.subr.bf16.mxu0 %v1312_v6  ;;  %1272 = vmatprep.subr.bf16.mxu1 %v1312_v6 }
  0x1c   : > { %1230 = vmatpush3.bf16.msra.mxu0 %v1312_v6  ;;  %1280 = vmatpush3.bf16.msra.mxu1 %v1312_v6 }
  0x1d   : > { %1231 = vmatprep.subr.bf16.mxu0 %v1313_v8  ;;  %1273 = vmatprep.subr.bf16.mxu1 %v1313_v8 }
  0x20   : > { %1232 = vmatpush3.bf16.msra.mxu0 %v1313_v8  ;;  %1281 = vmatpush3.bf16.msra.mxu1 %v1313_v8 }
  0x21   : > { %1233 = vmatprep.subr.bf16.mxu0 %v1314_v9  ;;  %1274 = vmatprep.subr.bf16.mxu1 %v1314_v9 }
  0x24   : > { %1234 = vmatpush3.bf16.msra.mxu0 %v1314_v9  ;;  %1282 = vmatpush3.bf16.msra.mxu1 %v1314_v9 }
  0x27   : > { %1236 = vmatmul.mubr.bf16.vlgmr.msra.gmra.mrb[0].mxu0 %v1316_v10  ;;  %1252 = vmatmul.mubr.bf16.vlgmr.msra.gmra.mrb[0].mxu1 %v1324_v11 }
  0x28   : > { %1239 = vmatprep.mubr.bf16.mxu0 %v1317_v12  ;;  %1255 = vmatprep.mubr.bf16.mxu1 %v1325_v13 }
  0x2f   : > { %1240 = vmatmul.mubr.bf16.gmra.mrb[4].mxu0 %v1318_v14  ;;  %1256 = vmatmul.mubr.bf16.gmra.mrb[4].mxu1 %v1326_v15 }
  0x30   : > { %1243 = vmatprep.mubr.bf16.mxu0 %v1319_v16  ;;  %1259 = vmatprep.mubr.bf16.mxu1 %v1327_v17 }
  0x37   : > { %1244 = vmatmul.mubr.bf16.gmra.mrb[8].mxu0 %v1320_v18  ;;  %1260 = vmatmul.mubr.bf16.gmra.mrb[8].mxu1 %v1328_v19 }
  0x38   : > { %1247 = vmatprep.mubr.bf16.mxu0 %v1321_v20  ;;  %1263 = vmatprep.mubr.bf16.mxu1 %v1329_v21 }
  0x3f   : > { %1248 = vmatmul.mubr.bf16.gmra.mrb[12].mxu0 %v1322_v22  ;;  %1264 = vmatmul.mubr.bf16.gmra.mrb[12].mxu1 %v1330_v23 }
  0xfa   : > { %v1440_v24 = vpop.f32.mrb[0].mxu0  ;;  %v1442_v25 = vpop.f32.mrb[0].mxu1 }
  0xfb   : > { %v1444_v26 = vpop.f32.mrb[1].mxu0  ;;  %v1446_v27 = vpop.f32.mrb[1].mxu1  ;;  %v576_v35 = vmul.f32 %v1440_v24, %v1440_v24 }
  0xfc   : > { %v1448_v28 = vpop.f32.mrb[2].mxu0  ;;  %v1450_v29 = vpop.f32.mrb[2].mxu1  ;;  %v574_v32 = vmul.f32 %v1444_v26, %v1444_v26 }
  0xfd   : > { %v1452_v30 = vpop.f32.mrb[3].mxu0  ;;  %v1454_v31 = vpop.f32.mrb[3].mxu1  ;;  %v577_v38 = vmul.f32 %v1448_v28, %v1448_v28 }
  0xfe   : > { %v535_v33 = vadd.f32 %v1452_v30, %v1444_v26  ;;  %v575_v34 = vmul.f32 %v1452_v30, %v1452_v30 }
 0x100   : > { %v536_v36 = vadd.f32 %v1440_v24, %v535_v33  ;;  %v606_v37 = vadd.f32 %v575_v34, %v574_v32 }
 0x102   : > { %v607_v39 = vadd.f32 %v606_v37, %v576_v35  ;;  %v1467_v40 = vpop.f32.mrb[4].mxu0  ;;  %v537_v41 = vadd.f32 %v1448_v28, %v536_v36  ;;  %v1470_v42 = vpop.f32.mrb[4].mxu1 }
 0x103   : > { %v1472_v43 = vpop.f32.mrb[5].mxu0  ;;  %v1474_v44 = vpop.f32.mrb[5].mxu1  ;;  %v580_v55 = vmul.f32 %v1467_v40, %v1467_v40 }
 0x104   : > { %v538_v45 = vadd.f32 %v537_v41, %v1472_v43  ;;  %v578_v46 = vmul.f32 %v1472_v43, %v1472_v43  ;;  %v608_v47 = vadd.f32 %v607_v39, %v577_v38  ;;  %v1479_v48 = vpop.f32.mrb[6].mxu0  ;;  %v1481_v49 = vpop.f32.mrb[6].mxu1 }
 0x105   : > { %v1483_v50 = vpop.f32.mrb[7].mxu0  ;;  %v1485_v51 = vpop.f32.mrb[7].mxu1  ;;  %v581_v58 = vmul.f32 %v1479_v48, %v1479_v48 }
 0x106   : > { %v609_v52 = vadd.f32 %v608_v47, %v578_v46  ;;  %v539_v53 = vadd.f32 %v538_v45, %v1483_v50  ;;  %v579_v54 = vmul.f32 %v1483_v50, %v1483_v50 }
 0x108   : > { %v540_v56 = vadd.f32 %v1467_v40, %v539_v53  ;;  %v610_v57 = vadd.f32 %v609_v52, %v579_v54  ;;  %v590_v53 = vmul.f32 %v1446_v27, %v1446_v27 }
 0x10a   : > { %v611_v59 = vadd.f32 %v610_v57, %v580_v55  ;;  %v1495_v60 = vpop.f32.mrb[8].mxu0  ;;  %v541_v61 = vadd.f32 %v1479_v48, %v540_v56  ;;  %v1498_v62 = vpop.f32.mrb[8].mxu1 }
 0x10b   : > { %v1500_v63 = vpop.f32.mrb[9].mxu0  ;;  %v1502_v0 = vpop.f32.mrb[9].mxu1  ;;  %v584_v11 = vmul.f32 %v1495_v60, %v1495_v60 }
 0x10c   : > { %v542_v1 = vadd.f32 %v541_v61, %v1500_v63  ;;  %v582_v2 = vmul.f32 %v1500_v63, %v1500_v63  ;;  %v612_v3 = vadd.f32 %v611_v59, %v581_v58  ;;  %v1507_v4 = vpop.f32.mrb[10].mxu0  ;;  %v1509_v5 = vpop.f32.mrb[10].mxu1  ;;  %v591_v58 = vmul.f32 %v1454_v31, %v1454_v31 }
 0x10d   : > { %v1511_v6 = vpop.f32.mrb[11].mxu0  ;;  %v1513_v7 = vpop.f32.mrb[11].mxu1  ;;  %v585_v14 = vmul.f32 %v1507_v4, %v1507_v4  ;;  %v592_v59 = vmul.f32 %v1442_v25, %v1442_v25 }
 0x10e   : > { %v613_v8 = vadd.f32 %v612_v3, %v582_v2  ;;  %v543_v9 = vadd.f32 %v542_v1, %v1511_v6  ;;  %v583_v10 = vmul.f32 %v1511_v6, %v1511_v6  ;;  %v593_v2 = vmul.f32 %v1450_v29, %v1450_v29 }
 0x110   : > { %v544_v12 = vadd.f32 %v1495_v60, %v543_v9  ;;  %v614_v13 = vadd.f32 %v613_v8, %v583_v10  ;;  %v594_v9 = vmul.f32 %v1474_v44, %v1474_v44 }
 0x112   : > { %v615_v15 = vadd.f32 %v614_v13, %v584_v11  ;;  %v1523_v16 = vpop.f32.mrb[12].mxu0  ;;  %v545_v17 = vadd.f32 %v1507_v4, %v544_v12  ;;  %v1526_v18 = vpop.f32.mrb[12].mxu1 }
 0x113   : > { %v1528_v19 = vpop.f32.mrb[13].mxu0  ;;  %v1530_v20 = vpop.f32.mrb[13].mxu1  ;;  %v588_v39 = vmul.f32 %v1523_v16, %v1523_v16 }
 0x114   : > { %v546_v21 = vadd.f32 %v545_v17, %v1528_v19  ;;  %v586_v22 = vmul.f32 %v1528_v19, %v1528_v19  ;;  %v616_v23 = vadd.f32 %v615_v15, %v585_v14  ;;  %v1535_v32 = vpop.f32.mrb[14].mxu0  ;;  %v1537_v33 = vpop.f32.mrb[14].mxu1  ;;  %v595_v14 = vmul.f32 %v1485_v51, %v1485_v51 }
 0x115   : > { %v1539_v34 = vpop.f32.mrb[15].mxu0  ;;  %v1541_v35 = vpop.f32.mrb[15].mxu1  ;;  %v589_v46 = vmul.f32 %v1535_v32, %v1535_v32  ;;  %v596_v15 = vmul.f32 %v1470_v42, %v1470_v42 }
 0x116   : > { %v617_v36 = vadd.f32 %v616_v23, %v586_v22  ;;  %v547_v37 = vadd.f32 %v546_v21, %v1539_v34  ;;  %v587_v38 = vmul.f32 %v1539_v34, %v1539_v34  ;;  %v597_v22 = vmul.f32 %v1481_v49, %v1481_v49 }
 0x118   : > { %v548_v41 = vadd.f32 %v1523_v16, %v547_v37  ;;  %v618_v45 = vadd.f32 %v617_v36, %v587_v38  ;;  %v598_v37 = vmul.f32 %v1502_v0, %v1502_v0 }
 0x11a   : > { %v619_v47 = vadd.f32 %v618_v45, %v588_v39  ;;  %v549_v52 = vadd.f32 %v1535_v32, %v548_v41 }
 0x11c   : > { %v550_v54 = vadd.f32 %v549_v52, %v1446_v27  ;;  %v620_v55 = vadd.f32 %v619_v47, %v589_v46  ;;  %v599_v46 = vmul.f32 %v1513_v7, %v1513_v7  ;;  %v600_v47 = vmul.f32 %v1498_v62, %v1498_v62 }
 0x11e   : > { %v621_v56 = vadd.f32 %v620_v55, %v590_v53  ;;  %v551_v57 = vadd.f32 %v550_v54, %v1454_v31  ;;  %v601_v54 = vmul.f32 %v1509_v5, %v1509_v5 }
 0x120   : > { %v552_v61 = vadd.f32 %v1442_v25, %v551_v57  ;;  %v622_v1 = vadd.f32 %v621_v56, %v591_v58  ;;  %v602_v57 = vmul.f32 %v1530_v20, %v1530_v20 }
 0x122   : > { %v623_v3 = vadd.f32 %v622_v1, %v592_v59  ;;  %v553_v8 = vadd.f32 %v1450_v29, %v552_v61 }
 0x124   : > { %v554_v10 = vadd.f32 %v553_v8, %v1474_v44  ;;  %v624_v11 = vadd.f32 %v623_v3, %v593_v2  ;;  %v603_v2 = vmul.f32 %v1541_v35, %v1541_v35  ;;  %v604_v3 = vmul.f32 %v1526_v18, %v1526_v18 }
 0x126   : > { %v625_v12 = vadd.f32 %v624_v11, %v594_v9  ;;  %v555_v13 = vadd.f32 %v554_v10, %v1485_v51  ;;  %v605_v10 = vmul.f32 %v1537_v33, %v1537_v33 }
 0x128   : > { %v556_v17 = vadd.f32 %v1470_v42, %v555_v13  ;;  %v626_v21 = vadd.f32 %v625_v12, %v595_v14 }
 0x12a   : > { %v627_v23 = vadd.f32 %v626_v21, %v596_v15  ;;  %v557_v36 = vadd.f32 %v1481_v49, %v556_v17 }
 0x12c   : > { %v558_v38 = vadd.f32 %v557_v36, %v1502_v0  ;;  %v628_v39 = vadd.f32 %v627_v23, %v597_v22 }
 0x12e   : > { %v629_v41 = vadd.f32 %v628_v39, %v598_v37  ;;  %v559_v45 = vadd.f32 %v558_v38, %v1513_v7 }
 0x130   : > { %v560_v52 = vadd.f32 %v1498_v62, %v559_v45  ;;  %v630_v53 = vadd.f32 %v629_v41, %v599_v46 }
 0x132   : > { %v631_v55 = vadd.f32 %v630_v53, %v600_v47  ;;  %v561_v56 = vadd.f32 %v1509_v5, %v560_v52 }
 0x134   : > { %v562_v58 = vadd.f32 %v561_v56, %v1530_v20  ;;  %v632_v59 = vadd.f32 %v631_v55, %v601_v54 }
 0x136   : > { %v633_v61 = vadd.f32 %v632_v59, %v602_v57  ;;  %v563_v1 = vadd.f32 %v562_v58, %v1541_v35 }
 0x138   : > { %v564_v8 = vadd.f32 %v1526_v18, %v563_v1  ;;  %v634_v9 = vadd.f32 %v633_v61, %v603_v2 }
 0x13a   : > { %v565_v11 = vadd.f32 %v1537_v33, %v564_v8  ;;  %v635_v12 = vadd.f32 %v634_v9, %v604_v3 }
 0x13c   : > { %v566_v13 = vrot.slane %v565_v11, 4  ;;  %v636_v14 = vadd.f32 %v635_v12, %v605_v10 }
 0x13e   : > { %v567_v15 = vadd.f32 %v566_v13, %v565_v11  ;;  %v637_v17 = vrot.slane %v636_v14, 4 }
 0x140   : > { %v568_v21 = vrot.slane %v567_v15, 2  ;;  %v638_v22 = vadd.f32 %v637_v17, %v636_v14 }
 0x142   : > { %v569_v23 = vadd.f32 %v568_v21, %v567_v15  ;;  %v639_v36 = vrot.slane %v638_v22, 2 }
 0x144   : > { %v570_v37 = vrot.slane %v569_v23, 1  ;;  %v640_v38 = vadd.f32 %v639_v36, %v638_v22 }
 0x146   : > { %v571_v39 = vadd.f32 %v570_v37, %v569_v23  ;;  %v641_v41 = vrot.slane %v640_v38, 1 }
 0x148   : > { %v1600_v45 = vmul.f32 0.00390625, %v571_v39  ;;  %v642_v46 = vadd.f32 %v641_v41, %v640_v38 }
 0x14a   : > { %v643_v47 = vmul.f32 0.00390625, %v642_v46  ;;  %v644_v52 = vmul.f32 %v1600_v45, %v1600_v45  ;;  %v647_v53 = vsub.f32 %v1444_v26, %v1600_v45  ;;  %v648_v54 = vsub.f32 %v1452_v30, %v1600_v45 }
 0x14b   : > { %v649_v55 = vsub.f32 %v1440_v24, %v1600_v45  ;;  %v650_v56 = vsub.f32 %v1448_v28, %v1600_v45  ;;  %v651_v57 = vsub.f32 %v1472_v43, %v1600_v45  ;;  %v652_v58 = vsub.f32 %v1483_v50, %v1600_v45 }
 0x14c   : > { %v645_v59 = vsub.f32 %v643_v47, %v644_v52  ;;  %v653_v61 = vsub.f32 %v1467_v40, %v1600_v45  ;;  %v654_v26 = vsub.f32 %v1479_v48, %v1600_v45  ;;  %v655_v30 = vsub.f32 %v1500_v63, %v1600_v45 }
 0x14d   : > { %v656_v24 = vsub.f32 %v1511_v6, %v1600_v45  ;;  %v657_v28 = vsub.f32 %v1495_v60, %v1600_v45  ;;  %v658_v43 = vsub.f32 %v1507_v4, %v1600_v45  ;;  %v659_v50 = vsub.f32 %v1528_v19, %v1600_v45 }
 0x14e   : > { %v646_v1 = vmax.f32 %v645_v59, 0.0  ;;  %v660_v40 = vsub.f32 %v1539_v34, %v1600_v45  ;;  %v661_v48 = vsub.f32 %v1523_v16, %v1600_v45  ;;  %v662_v63 = vsub.f32 %v1535_v32, %v1600_v45 }
 0x14f   : > { %v663_v6 = vsub.f32 %v1446_v27, %v1600_v45  ;;  %v664_v60 = vsub.f32 %v1454_v31, %v1600_v45  ;;  %v665_v4 = vsub.f32 %v1442_v25, %v1600_v45  ;;  %v666_v19 = vsub.f32 %v1450_v29, %v1600_v45 }
 0x150   : > { %v667_v34 = vsub.f32 %v1474_v44, %v1600_v45  ;;  %v668_v16 = vsub.f32 %v1485_v51, %v1600_v45  ;;  %v669_v32 = vsub.f32 %v1470_v42, %v1600_v45  ;;  %v670_v27 = vsub.f32 %v1481_v49, %v1600_v45 }
 0x151   : > { %v671_v31 = vsub.f32 %v1502_v0, %v1600_v45  ;;  %v672_v25 = vsub.f32 %v1513_v7, %v1600_v45  ;;  %v673_v29 = vsub.f32 %v1498_v62, %v1600_v45  ;;  %v674_v44 = vsub.f32 %v1509_v5, %v1600_v45 }
 0x152   : > { %v675_v51 = vsub.f32 %v1530_v20, %v1600_v45  ;;  %v676_v42 = vsub.f32 %v1541_v35, %v1600_v45  ;;  %v677_v49 = vsub.f32 %v1526_v18, %v1600_v45  ;;  %v678_v0 = vsub.f32 %v1537_v33, %v1600_v45 }
 0x153   : > { %v679_v2 = vadd.f32 1e-05, %v646_v1 }
 0x155   : > { %1331 = vrsqrt.f32 %v679_v2 }
 0x15f   : > { %v1332_v7 = vpop.eup %1331 }
 0x160   : > { %v1668_v3 = vmul.f32 %v1332_v7, %v647_v53  ;;  %v1670_v62 = vmul.f32 %v1332_v7, %v648_v54  ;;  %v1672_v5 = vmul.f32 %v1332_v7, %v649_v55  ;;  %v1674_v8 = vmul.f32 %v1332_v7, %v650_v56 }
 0x161   : > { %v1676_v20 = vmul.f32 %v1332_v7, %v651_v57  ;;  %v1678_v35 = vmul.f32 %v1332_v7, %v652_v58  ;;  %v1680_v9 = vmul.f32 %v1332_v7, %v653_v61  ;;  %v688_v18 = vmul.f32 %v1332_v7, %v654_v26 }
 0x162   : > { %v689_v10 = vmul.f32 %v1332_v7, %v655_v30  ;;  %v690_v33 = vmul.f32 %v1332_v7, %v656_v24  ;;  %v691_v11 = vmul.f32 %v1332_v7, %v657_v28  ;;  %v692_v12 = vmul.f32 %v1332_v7, %v658_v43 }
 0x163   : > { %v693_v13 = vmul.f32 %v1332_v7, %v659_v50  ;;  %v694_v14 = vmul.f32 %v1332_v7, %v660_v40  ;;  %v695_v15 = vmul.f32 %v1332_v7, %v661_v48  ;;  %v696_v17 = vmul.f32 %v1332_v7, %v662_v63 }
 0x164   : > { %v697_v21 = vmul.f32 %v1332_v7, %v663_v6  ;;  %v698_v22 = vmul.f32 %v1332_v7, %v664_v60  ;;  %v699_v23 = vmul.f32 %v1332_v7, %v665_v4  ;;  %v700_v36 = vmul.f32 %v1332_v7, %v666_v19 }
 0x165   : > { %v701_v37 = vmul.f32 %v1332_v7, %v667_v34  ;;  %v702_v38 = vmul.f32 %v1332_v7, %v668_v16  ;;  %v703_v39 = vmul.f32 %v1332_v7, %v669_v32  ;;  %v704_v41 = vmul.f32 %v1332_v7, %v670_v27 }
 0x166   : > { %v705_v45 = vmul.f32 %v1332_v7, %v671_v31  ;;  %v706_v46 = vmul.f32 %v1332_v7, %v672_v25  ;;  %v707_v47 = vmul.f32 %v1332_v7, %v673_v29  ;;  %v708_v52 = vmul.f32 %v1332_v7, %v674_v44 }
 0x167   : > { %v709_v53 = vmul.f32 %v1332_v7, %v675_v51  ;;  %v710_v54 = vmul.f32 %v1332_v7, %v676_v42  ;;  %v711_v55 = vmul.f32 %v1332_v7, %v677_v49  ;;  %v712_v56 = vmul.f32 %v1332_v7, %v678_v0 }
 0x168   : > { %v713_v57 = vmax.f32 %v1668_v3, 0.0  ;;  %v714_v58 = vmax.f32 %v1670_v62, 0.0  ;;  %v715_v59 = vmax.f32 %v1672_v5, 0.0  ;;  %v716_v61 = vmax.f32 %v1674_v8, 0.0 }
 0x169   : > { %v717_v26 = vmax.f32 %v1676_v20, 0.0  ;;  %v718_v30 = vmax.f32 %v1678_v35, 0.0  ;;  %v719_v24 = vmax.f32 %v1680_v9, 0.0  ;;  %v720_v28 = vmax.f32 %v688_v18, 0.0 }
 0x16a   : > { %v721_v43 = vmax.f32 %v689_v10, 0.0  ;;  %v722_v50 = vmax.f32 %v690_v33, 0.0  ;;  %v723_v1 = vmax.f32 %v691_v11, 0.0  ;;  %v724_v40 = vmax.f32 %v692_v12, 0.0 }
 0x16b   : > { %v725_v48 = vmax.f32 %v693_v13, 0.0  ;;  %v726_v63 = vmax.f32 %v694_v14, 0.0  ;;  %v727_v6 = vmax.f32 %v695_v15, 0.0  ;;  %v728_v60 = vmax.f32 %v696_v17, 0.0 }
 0x16c   : > { %v729_v4 = vmax.f32 %v697_v21, 0.0  ;;  %v730_v19 = vmax.f32 %v698_v22, 0.0  ;;  %v731_v34 = vmax.f32 %v699_v23, 0.0  ;;  %v732_v16 = vmax.f32 %v700_v36, 0.0 }
 0x16d   : > { %v733_v32 = vmax.f32 %v701_v37, 0.0  ;;  %v734_v27 = vmax.f32 %v702_v38, 0.0  ;;  %v735_v31 = vmax.f32 %v703_v39, 0.0  ;;  %v736_v25 = vmax.f32 %v704_v41, 0.0 }
 0x16e   : > { %v737_v29 = vmax.f32 %v705_v45, 0.0  ;;  %v738_v44 = vmax.f32 %v706_v46, 0.0  ;;  %v739_v51 = vmax.f32 %v707_v47, 0.0  ;;  %v740_v42 = vmax.f32 %v708_v52, 0.0 }
 0x16f   : > { %v741_v49 = vmax.f32 %v709_v53, 0.0  ;;  %v742_v0 = vmax.f32 %v710_v54, 0.0  ;;  %v743_v2 = vmax.f32 %v711_v55, 0.0  ;;  %v744_v7 = vmax.f32 %v712_v56, 0.0 }
 0x170   : > { %v1103_v3 = vpack.c.bf16 %v714_v58, %v713_v57  ;;  %v1108_v62 = vpack.c.bf16 %v716_v61, %v715_v59  ;;  %v1113_v5 = vpack.c.bf16 %v718_v30, %v717_v26  ;;  %v1118_v8 = vpack.c.bf16 %v720_v28, %v719_v24 }
 0x171   : > { %v1123_v20 = vpack.c.bf16 %v722_v50, %v721_v43  ;;  %v1128_v35 = vpack.c.bf16 %v724_v40, %v723_v1  ;;  %v1133_v9 = vpack.c.bf16 %v726_v63, %v725_v48  ;;  %v1138_v18 = vpack.c.bf16 %v728_v60, %v727_v6 }
 0x172   : > { %1104 = vst [vmem:[%s1694_s7] sm:$0xff] %v1103_v3   ;;  %1180 = vst [vmem:[%s1694_s7 + $0x8] sm:$0xff] %v1108_v62   ;;  %v1143_v10 = vpack.c.bf16 %v730_v19, %v729_v4  ;;  %v1148_v33 = vpack.c.bf16 %v732_v16, %v731_v34  ;;  %v1153_v11 = vpack.c.bf16 %v734_v27, %v733_v32 }
 0x173   : > { %1181 = vst [vmem:[%s1694_s7 + $0x10] sm:$0xff] %v1113_v5   ;;  %1182 = vst [vmem:[%s1694_s7 + $0x18] sm:$0xff] %v1118_v8   ;;  %v1158_v12 = vpack.c.bf16 %v736_v25, %v735_v31  ;;  %v1163_v13 = vpack.c.bf16 %v738_v44, %v737_v29  ;;  %v1168_v14 = vpack.c.bf16 %v740_v42, %v739_v51 }
 0x174   : > { %1183 = vst [vmem:[%s1694_s7 + $0x20] sm:$0xff] %v1123_v20   ;;  %1184 = vst [vmem:[%s1694_s7 + $0x28] sm:$0xff] %v1128_v35   ;;  %v1173_v15 = vpack.c.bf16 %v742_v0, %v741_v49  ;;  %v1178_v17 = vpack.c.bf16 %v744_v7, %v743_v2 }
 0x175   : > { %1185 = vst [vmem:[%s1694_s7 + $0x30] sm:$0xff] %v1133_v9   ;;  %1186 = vst [vmem:[%s1694_s7 + $0x38] sm:$0xff] %v1138_v18  }
 0x176   : > { %1187 = vst [vmem:[%s1694_s7 + $0x40] sm:$0xff] %v1143_v10   ;;  %1188 = vst [vmem:[%s1694_s7 + $0x48] sm:$0xff] %v1148_v33  }
 0x177   : > { %1189 = vst [vmem:[%s1694_s7 + $0x50] sm:$0xff] %v1153_v11   ;;  %1190 = vst [vmem:[%s1694_s7 + $0x58] sm:$0xff] %v1158_v12  }
 0x178   : > { %1191 = vst [vmem:[%s1694_s7 + $0x60] sm:$0xff] %v1163_v13   ;;  %1192 = vst [vmem:[%s1694_s7 + $0x68] sm:$0xff] %v1168_v14  }
 0x179   : > { %1193 = vst [vmem:[%s1694_s7 + $0x70] sm:$0xff] %v1173_v15   ;;  %1194 = vst [vmem:[%s1694_s7 + $0x78] sm:$0xff] %v1178_v17  }
 0x17a PF: > { %s12_s11 = sadd.s32 1, %s1355_s11   ;;  %s1724_s9 = smov %s1351_s10 }
 0x17b   : > { %p9_p5 = scmp.ge.s32.totalorder %s12_s11, 4   ;;  %s1725_s10 = smov %s1727_s12 }
 0x17d   :  { %11 = sbr.rel (!%p9_p5) target bundleno = 2 (0x2), region = 61 }

// kernel: forward.25
= control target key start
LH: loop header
LB: loop body
LE: loop exit
PB: predicated region body
PF: predicated region fallthrough
CT: control target
= control target key end

     0   :  { %s1631_s12 = smov 0   ;;  %s1633_s13 = smov 0   ;;  %s2223_s0 = inlined_call_operand.vmem [shape: bf16[2,256,128], index: 0, kind: input, shape index: {}]   ;;  %s2224_s1 = inlined_call_operand.vmem [shape: bf16[128,128], index: 1, kind: input, shape index: {}]   ;;  %s2225_s2 = inlined_call_operand.vmem [shape: bf16[2,256,128], index: 2, kind: input, shape index: {}]   ;;  %s2226_s3 = inlined_call_operand.vmem [shape: bf16[2,256,128], index: 3, kind: output, shape index: {}]  }
   0x1   :  { %s1635_s14 = smov 0  }
   0x2 LB: > { %s25_s15 = sadd.s32 1, %s1605_s13  ;;  %p1175_p0 = scmp.ge.s32.totalorder %s1609_s14, 1  ;;  %s1609_s14 = sphi %s1635_s14, %s13_s14   ;;  %s1605_s13 = sphi %s1633_s13, %s2285_s13   ;;  %s1601_s12 = sphi %s1631_s12, %s2284_s12  }
   0x3   : > { %p27_p1 = scmp.ge.s32.totalorder %s25_s15, 2  ;;  %p175_p2 = scmp.lt.s32.totalorder %s1609_s14, 3 }
   0x5   : > { %s2287_s15 = smov (%p27_p1, %s25_s15), 0  ;;  %p176_p3 = pnand %p1175_p0, %p175_p2 }
   0x6   : > { %v1561_v0 = vld [vmem:[%s2224_s1] sm:$0xff] (!%p176_p3)   ;;  %p214_p4 = scmp.lt.s32.totalorder (!%p176_p3), %s1601_s12, 1  ;;  %v1562_v1 = vld [vmem:[%s2224_s1 + $0x8] sm:$0xff] (!%p176_p3)   ;;  %v1563_v2 = vld [vmem:[%s2224_s1 + $0x10] sm:$0xff] (!%p176_p3)  }
   0x7   : > { %179 = sbr.rel (%p176_p3) target bundleno = 390 (0x186), region = 32  ;;  %1473 = vmatprep.subr.bf16.mxu0 (!%p176_p3), %v1561_v0  ;;  %1521 = vmatprep.subr.bf16.mxu1 (!%p176_p3), %v1561_v0  ;;  %v1564_v3 = vld [vmem:[%s2224_s1 + $0x18] sm:$0xff] (!%p176_p3)   ;;  %v1565_v5 = vld [vmem:[%s2224_s1 + $0x20] sm:$0xff] (!%p176_p3)   ;;  %v1566_v6 = vld [vmem:[%s2224_s1 + $0x28] sm:$0xff] (!%p176_p3)  }
   0x8   : > { %1474 = vmatpush3.bf16.msra.mxu0 (!%p176_p3), %v1561_v0  ;;  %1529 = vmatpush3.bf16.msra.mxu1 (!%p176_p3), %v1561_v0  ;;  %v1567_v8 = vld [vmem:[%s2224_s1 + $0x30] sm:$0xff] (!%p176_p3)   ;;  %v1568_v9 = vld [vmem:[%s2224_s1 + $0x38] sm:$0xff] (!%p176_p3)  }
   0x9   : > { %1475 = vmatprep.subr.bf16.mxu0 (!%p176_p3), %v1562_v1  ;;  %1522 = vmatprep.subr.bf16.mxu1 (!%p176_p3), %v1562_v1 }
   0xc   : > { %1476 = vmatpush3.bf16.msra.mxu0 (!%p176_p3), %v1562_v1  ;;  %1530 = vmatpush3.bf16.msra.mxu1 (!%p176_p3), %v1562_v1 }
   0xd   : > { %1477 = vmatprep.subr.bf16.mxu0 (!%p176_p3), %v1563_v2  ;;  %1523 = vmatprep.subr.bf16.mxu1 (!%p176_p3), %v1563_v2 }
   0xe   : > { %s2289_s12 = smov (!%p214_p4, %s1601_s12), 1 }
   0xf   : > { %s1658_s22 = sshll.u32 %s2289_s12, 7 }
  0x10   : > { %s1664_s25 = scalar_lea.vmem %s2223_s0, %s1658_s22  ;;  %1478 = vmatpush3.bf16.msra.mxu0 %v1563_v2  ;;  %1531 = vmatpush3.bf16.msra.mxu1 %v1563_v2  ;;  %s1921_s11 = scalar_lea.vmem %s2225_s2, %s1658_s22 }
  0x11   : > { %v1569_v4 = vld [vmem:[%s1664_s25] sm:$0xff]   ;;  %1479 = vmatprep.subr.bf16.mxu0 %v1564_v3  ;;  %1524 = vmatprep.subr.bf16.mxu1 %v1564_v3  ;;  %v1570_v10 = vld [vmem:[%s1664_s25 + $0x8] sm:$0xff]   ;;  %v1571_v12 = vld [vmem:[%s1664_s25 + $0x10] sm:$0xff]   ;;  %s2196_s17 = scalar_lea.vmem %s2226_s3, %s1658_s22 }
  0x12   : > { %1489 = vmatprep.mubr.bf16.mxu0 %v1569_v4  ;;  %v1577_v7 = vld [vmem:[%s1664_s25 + $0x40] sm:$0xff]   ;;  %v1578_v11 = vld [vmem:[%s1664_s25 + $0x48] sm:$0xff]   ;;  %v1579_v13 = vld [vmem:[%s1664_s25 + $0x50] sm:$0xff]  }
  0x13   : > { %1505 = vmatprep.mubr.bf16.mxu1 %v1577_v7  ;;  %v1572_v14 = vld [vmem:[%s1664_s25 + $0x18] sm:$0xff]   ;;  %v1573_v16 = vld [vmem:[%s1664_s25 + $0x20] sm:$0xff]   ;;  %v1574_v18 = vld [vmem:[%s1664_s25 + $0x28] sm:$0xff]  }
  0x14   : > { %1480 = vmatpush3.bf16.msra.mxu0 %v1564_v3  ;;  %1532 = vmatpush3.bf16.msra.mxu1 %v1564_v3  ;;  %v1580_v15 = vld [vmem:[%s1664_s25 + $0x58] sm:$0xff]   ;;  %v1581_v17 = vld [vmem:[%s1664_s25 + $0x60] sm:$0xff]   ;;  %v1582_v19 = vld [vmem:[%s1664_s25 + $0x68] sm:$0xff]  }
  0x15   : > { %1481 = vmatprep.subr.bf16.mxu0 %v1565_v5  ;;  %1525 = vmatprep.subr.bf16.mxu1 %v1565_v5  ;;  %v1575_v20 = vld [vmem:[%s1664_s25 + $0x30] sm:$0xff]   ;;  %v1576_v22 = vld [vmem:[%s1664_s25 + $0x38] sm:$0xff]  }
  0x16   : > { %v1583_v21 = vld [vmem:[%s1664_s25 + $0x70] sm:$0xff]   ;;  %v1584_v23 = vld [vmem:[%s1664_s25 + $0x78] sm:$0xff]  }
  0x18   : > { %1482 = vmatpush3.bf16.msra.mxu0 %v1565_v5  ;;  %1533 = vmatpush3.bf16.msra.mxu1 %v1565_v5 }
  0x19   : > { %1483 = vmatprep.subr.bf16.mxu0 %v1566_v6  ;;  %1526 = vmatprep.subr.bf16.mxu1 %v1566_v6 }
  0x1c   : > { %1484 = vmatpush3.bf16.msra.mxu0 %v1566_v6  ;;  %1534 = vmatpush3.bf16.msra.mxu1 %v1566_v6 }
  0x1d   : > { %1485 = vmatprep.subr.bf16.mxu0 %v1567_v8  ;;  %1527 = vmatprep.subr.bf16.mxu1 %v1567_v8 }
  0x20   : > { %1486 = vmatpush3.bf16.msra.mxu0 %v1567_v8  ;;  %1535 = vmatpush3.bf16.msra.mxu1 %v1567_v8 }
  0x21   : > { %1487 = vmatprep.subr.bf16.mxu0 %v1568_v9  ;;  %1528 = vmatprep.subr.bf16.mxu1 %v1568_v9 }
  0x24   : > { %1488 = vmatpush3.bf16.msra.mxu0 %v1568_v9  ;;  %1536 = vmatpush3.bf16.msra.mxu1 %v1568_v9 }
  0x27   : > { %1490 = vmatmul.mubr.bf16.vlgmr.msra.gmra.mrb[0].mxu0 %v1570_v10  ;;  %1506 = vmatmul.mubr.bf16.vlgmr.msra.gmra.mrb[0].mxu1 %v1578_v11 }
  0x28   : > { %1493 = vmatprep.mubr.bf16.mxu0 %v1571_v12  ;;  %1509 = vmatprep.mubr.bf16.mxu1 %v1579_v13 }
  0x2f   : > { %1494 = vmatmul.mubr.bf16.gmra.mrb[4].mxu0 %v1572_v14  ;;  %1510 = vmatmul.mubr.bf16.gmra.mrb[4].mxu1 %v1580_v15 }
  0x30   : > { %1497 = vmatprep.mubr.bf16.mxu0 %v1573_v16  ;;  %1513 = vmatprep.mubr.bf16.mxu1 %v1581_v17 }
  0x37   : > { %1498 = vmatmul.mubr.bf16.gmra.mrb[8].mxu0 %v1574_v18  ;;  %1514 = vmatmul.mubr.bf16.gmra.mrb[8].mxu1 %v1582_v19 }
  0x38   : > { %1501 = vmatprep.mubr.bf16.mxu0 %v1575_v20  ;;  %1517 = vmatprep.mubr.bf16.mxu1 %v1583_v21 }
  0x3f   : > { %1502 = vmatmul.mubr.bf16.gmra.mrb[12].mxu0 %v1576_v22  ;;  %1518 = vmatmul.mubr.bf16.gmra.mrb[12].mxu1 %v1584_v23 }
  0xfa   : > { %v1697_v24 = vpop.f32.mrb[0].mxu0  ;;  %v1699_v25 = vpop.f32.mrb[0].mxu1 }
  0xfb   : > { %v1701_v26 = vpop.f32.mrb[1].mxu0  ;;  %v1703_v27 = vpop.f32.mrb[1].mxu1  ;;  %v634_v35 = vmul.f32 %v1697_v24, %v1697_v24 }
  0xfc   : > { %v1705_v28 = vpop.f32.mrb[2].mxu0  ;;  %v1707_v29 = vpop.f32.mrb[2].mxu1  ;;  %v632_v32 = vmul.f32 %v1701_v26, %v1701_v26 }
  0xfd   : > { %v1709_v30 = vpop.f32.mrb[3].mxu0  ;;  %v1711_v31 = vpop.f32.mrb[3].mxu1  ;;  %v635_v38 = vmul.f32 %v1705_v28, %v1705_v28 }
  0xfe   : > { %v593_v33 = vadd.f32 %v1709_v30, %v1701_v26  ;;  %v633_v34 = vmul.f32 %v1709_v30, %v1709_v30 }
 0x100   : > { %v594_v36 = vadd.f32 %v1697_v24, %v593_v33  ;;  %v664_v37 = vadd.f32 %v633_v34, %v632_v32 }
 0x102   : > { %v665_v39 = vadd.f32 %v664_v37, %v634_v35  ;;  %v1724_v40 = vpop.f32.mrb[4].mxu0  ;;  %v595_v41 = vadd.f32 %v1705_v28, %v594_v36  ;;  %v1727_v42 = vpop.f32.mrb[4].mxu1 }
 0x103   : > { %v1729_v43 = vpop.f32.mrb[5].mxu0  ;;  %v1731_v44 = vpop.f32.mrb[5].mxu1  ;;  %v638_v55 = vmul.f32 %v1724_v40, %v1724_v40 }
 0x104   : > { %v596_v45 = vadd.f32 %v595_v41, %v1729_v43  ;;  %v636_v46 = vmul.f32 %v1729_v43, %v1729_v43  ;;  %v666_v47 = vadd.f32 %v665_v39, %v635_v38  ;;  %v1736_v48 = vpop.f32.mrb[6].mxu0  ;;  %v1738_v49 = vpop.f32.mrb[6].mxu1 }
 0x105   : > { %v1740_v50 = vpop.f32.mrb[7].mxu0  ;;  %v1742_v51 = vpop.f32.mrb[7].mxu1  ;;  %v639_v58 = vmul.f32 %v1736_v48, %v1736_v48 }
 0x106   : > { %v667_v52 = vadd.f32 %v666_v47, %v636_v46  ;;  %v597_v53 = vadd.f32 %v596_v45, %v1740_v50  ;;  %v637_v54 = vmul.f32 %v1740_v50, %v1740_v50 }
 0x108   : > { %v598_v56 = vadd.f32 %v1724_v40, %v597_v53  ;;  %v668_v57 = vadd.f32 %v667_v52, %v637_v54  ;;  %v648_v53 = vmul.f32 %v1703_v27, %v1703_v27 }
 0x10a   : > { %v669_v59 = vadd.f32 %v668_v57, %v638_v55  ;;  %v1752_v60 = vpop.f32.mrb[8].mxu0  ;;  %v599_v61 = vadd.f32 %v1736_v48, %v598_v56  ;;  %v1755_v62 = vpop.f32.mrb[8].mxu1 }
 0x10b   : > { %v1757_v63 = vpop.f32.mrb[9].mxu0  ;;  %v1759_v0 = vpop.f32.mrb[9].mxu1  ;;  %v642_v11 = vmul.f32 %v1752_v60, %v1752_v60 }
 0x10c   : > { %v600_v1 = vadd.f32 %v599_v61, %v1757_v63  ;;  %v640_v2 = vmul.f32 %v1757_v63, %v1757_v63  ;;  %v670_v3 = vadd.f32 %v669_v59, %v639_v58  ;;  %v1764_v4 = vpop.f32.mrb[10].mxu0  ;;  %v1766_v5 = vpop.f32.mrb[10].mxu1  ;;  %v649_v58 = vmul.f32 %v1711_v31, %v1711_v31 }
 0x10d   : > { %v1768_v6 = vpop.f32.mrb[11].mxu0  ;;  %v1770_v7 = vpop.f32.mrb[11].mxu1  ;;  %v643_v14 = vmul.f32 %v1764_v4, %v1764_v4  ;;  %v650_v59 = vmul.f32 %v1699_v25, %v1699_v25 }
 0x10e   : > { %v671_v8 = vadd.f32 %v670_v3, %v640_v2  ;;  %v601_v9 = vadd.f32 %v600_v1, %v1768_v6  ;;  %v641_v10 = vmul.f32 %v1768_v6, %v1768_v6  ;;  %v651_v2 = vmul.f32 %v1707_v29, %v1707_v29 }
 0x110   : > { %v602_v12 = vadd.f32 %v1752_v60, %v601_v9  ;;  %v672_v13 = vadd.f32 %v671_v8, %v641_v10  ;;  %v652_v9 = vmul.f32 %v1731_v44, %v1731_v44 }
 0x112   : > { %v673_v15 = vadd.f32 %v672_v13, %v642_v11  ;;  %v1780_v16 = vpop.f32.mrb[12].mxu0  ;;  %v603_v17 = vadd.f32 %v1764_v4, %v602_v12  ;;  %v1783_v18 = vpop.f32.mrb[12].mxu1 }
 0x113   : > { %v1785_v19 = vpop.f32.mrb[13].mxu0  ;;  %v1787_v20 = vpop.f32.mrb[13].mxu1  ;;  %v646_v39 = vmul.f32 %v1780_v16, %v1780_v16 }
 0x114   : > { %v604_v21 = vadd.f32 %v603_v17, %v1785_v19  ;;  %v644_v22 = vmul.f32 %v1785_v19, %v1785_v19  ;;  %v674_v23 = vadd.f32 %v673_v15, %v643_v14  ;;  %v1792_v32 = vpop.f32.mrb[14].mxu0  ;;  %v1794_v33 = vpop.f32.mrb[14].mxu1  ;;  %v653_v14 = vmul.f32 %v1742_v51, %v1742_v51 }
 0x115   : > { %v1796_v34 = vpop.f32.mrb[15].mxu0  ;;  %v1798_v35 = vpop.f32.mrb[15].mxu1  ;;  %v647_v46 = vmul.f32 %v1792_v32, %v1792_v32  ;;  %v654_v15 = vmul.f32 %v1727_v42, %v1727_v42 }
 0x116   : > { %v675_v36 = vadd.f32 %v674_v23, %v644_v22  ;;  %v605_v37 = vadd.f32 %v604_v21, %v1796_v34  ;;  %v645_v38 = vmul.f32 %v1796_v34, %v1796_v34  ;;  %v655_v22 = vmul.f32 %v1738_v49, %v1738_v49 }
 0x118   : > { %v606_v41 = vadd.f32 %v1780_v16, %v605_v37  ;;  %v676_v45 = vadd.f32 %v675_v36, %v645_v38  ;;  %v656_v37 = vmul.f32 %v1759_v0, %v1759_v0 }
 0x11a   : > { %v677_v47 = vadd.f32 %v676_v45, %v646_v39  ;;  %v607_v52 = vadd.f32 %v1792_v32, %v606_v41 }
 0x11c   : > { %v608_v54 = vadd.f32 %v607_v52, %v1703_v27  ;;  %v678_v55 = vadd.f32 %v677_v47, %v647_v46  ;;  %v657_v46 = vmul.f32 %v1770_v7, %v1770_v7  ;;  %v658_v47 = vmul.f32 %v1755_v62, %v1755_v62 }
 0x11e   : > { %v679_v56 = vadd.f32 %v678_v55, %v648_v53  ;;  %v609_v57 = vadd.f32 %v608_v54, %v1711_v31  ;;  %v659_v54 = vmul.f32 %v1766_v5, %v1766_v5 }
 0x120   : > { %v610_v61 = vadd.f32 %v1699_v25, %v609_v57  ;;  %v680_v1 = vadd.f32 %v679_v56, %v649_v58  ;;  %v660_v57 = vmul.f32 %v1787_v20, %v1787_v20 }
 0x122   : > { %v681_v3 = vadd.f32 %v680_v1, %v650_v59  ;;  %v611_v8 = vadd.f32 %v1707_v29, %v610_v61 }
 0x124   : > { %v612_v10 = vadd.f32 %v611_v8, %v1731_v44  ;;  %v682_v11 = vadd.f32 %v681_v3, %v651_v2  ;;  %v661_v2 = vmul.f32 %v1798_v35, %v1798_v35  ;;  %v662_v3 = vmul.f32 %v1783_v18, %v1783_v18 }
 0x126   : > { %v683_v12 = vadd.f32 %v682_v11, %v652_v9  ;;  %v613_v13 = vadd.f32 %v612_v10, %v1742_v51  ;;  %v663_v10 = vmul.f32 %v1794_v33, %v1794_v33 }
 0x128   : > { %v614_v17 = vadd.f32 %v1727_v42, %v613_v13  ;;  %v684_v21 = vadd.f32 %v683_v12, %v653_v14 }
 0x12a   : > { %v685_v23 = vadd.f32 %v684_v21, %v654_v15  ;;  %v615_v36 = vadd.f32 %v1738_v49, %v614_v17 }
 0x12c   : > { %v616_v38 = vadd.f32 %v615_v36, %v1759_v0  ;;  %v686_v39 = vadd.f32 %v685_v23, %v655_v22 }
 0x12e   : > { %v687_v41 = vadd.f32 %v686_v39, %v656_v37  ;;  %v617_v45 = vadd.f32 %v616_v38, %v1770_v7 }
 0x130   : > { %v618_v52 = vadd.f32 %v1755_v62, %v617_v45  ;;  %v688_v53 = vadd.f32 %v687_v41, %v657_v46 }
 0x132   : > { %v689_v55 = vadd.f32 %v688_v53, %v658_v47  ;;  %v619_v56 = vadd.f32 %v1766_v5, %v618_v52 }
 0x134   : > { %v620_v58 = vadd.f32 %v619_v56, %v1787_v20  ;;  %v690_v59 = vadd.f32 %v689_v55, %v659_v54 }
 0x136   : > { %v691_v61 = vadd.f32 %v690_v59, %v660_v57  ;;  %v621_v1 = vadd.f32 %v620_v58, %v1798_v35 }
 0x138   : > { %v622_v8 = vadd.f32 %v1783_v18, %v621_v1  ;;  %v692_v9 = vadd.f32 %v691_v61, %v661_v2  ;;  %v1994_v2 = vld [vmem:[%s1921_s11 + $0x70] sm:$0xff]  }
 0x13a   : > { %v623_v11 = vadd.f32 %v1794_v33, %v622_v8  ;;  %v693_v12 = vadd.f32 %v692_v9, %v662_v3  ;;  %v1984_v9 = vld [vmem:[%s1921_s11 + $0x60] sm:$0xff]  }
 0x13c   : > { %v624_v13 = vrot.slane %v623_v11, 4  ;;  %v694_v14 = vadd.f32 %v693_v12, %v663_v10  ;;  %v1977_v12 = vld [vmem:[%s1921_s11 + $0x58] sm:$0xff]  }
 0x13e   : > { %v625_v15 = vadd.f32 %v624_v13, %v623_v11  ;;  %v695_v17 = vrot.slane %v694_v14, 4 }
 0x140   : > { %v626_v21 = vrot.slane %v625_v15, 2  ;;  %v696_v22 = vadd.f32 %v695_v17, %v694_v14  ;;  %v1967_v14 = vld [vmem:[%s1921_s11 + $0x48] sm:$0xff]   ;;  %v1974_v17 = vld [vmem:[%s1921_s11 + $0x50] sm:$0xff]  }
 0x142   : > { %v627_v23 = vadd.f32 %v626_v21, %v625_v15  ;;  %v697_v36 = vrot.slane %v696_v22, 2  ;;  %v1997_v15 = vld [vmem:[%s1921_s11 + $0x78] sm:$0xff]   ;;  %v1325_v21 = vunpack.c.l.bf16 %v1984_v9 }
 0x144   : > { %v628_v37 = vrot.slane %v627_v23, 1  ;;  %v698_v38 = vadd.f32 %v697_v36, %v696_v22  ;;  %v1947_v36 = vld [vmem:[%s1921_s11 + $0x28] sm:$0xff]   ;;  %v1957_v22 = vld [vmem:[%s1921_s11 + $0x38] sm:$0xff]  }
 0x146   : > { %v629_v39 = vadd.f32 %v628_v37, %v627_v23  ;;  %v699_v41 = vrot.slane %v698_v38, 1  ;;  %v1941_v37 = vld [vmem:[%s1921_s11 + $0x18] sm:$0xff]   ;;  %v1954_v23 = vld [vmem:[%s1921_s11 + $0x30] sm:$0xff]  }
 0x148   : > { %v1857_v45 = vmul.f32 0.00390625, %v629_v39  ;;  %v700_v46 = vadd.f32 %v699_v41, %v698_v38  ;;  %v1932_v39 = vld [vmem:[%s1921_s11] sm:$0xff]   ;;  %v1935_v38 = vld [vmem:[%s1921_s11 + $0x8] sm:$0xff]  }
 0x149   : > { %v2255_v58 = vunpack.c.l.bf16 %v1932_v39 }
 0x14a   : > { %v701_v47 = vmul.f32 0.00390625, %v700_v46  ;;  %v702_v52 = vmul.f32 %v1857_v45, %v1857_v45  ;;  %v705_v53 = vsub.f32 %v1701_v26, %v1857_v45  ;;  %v706_v54 = vsub.f32 %v1709_v30, %v1857_v45 }
 0x14b   : > { %v707_v55 = vsub.f32 %v1697_v24, %v1857_v45  ;;  %v708_v56 = vsub.f32 %v1705_v28, %v1857_v45  ;;  %v2227_v10 = vsub.f32 %v1729_v43, %v1857_v45  ;;  %v2228_v26 = vsub.f32 %v1740_v50, %v1857_v45 }
 0x14c   : > { %v703_v59 = vsub.f32 %v701_v47, %v702_v52  ;;  %v1938_v52 = vld [vmem:[%s1921_s11 + $0x10] sm:$0xff]   ;;  %v1321_v47 = vunpack.c.l.bf16 %v1977_v12  ;;  %v2229_v30 = vsub.f32 %v1724_v40, %v1857_v45  ;;  %v2230_v24 = vsub.f32 %v1736_v48, %v1857_v45 }
 0x14d   : > { %v2231_v28 = vsub.f32 %v1757_v63, %v1857_v45  ;;  %v2232_v43 = vsub.f32 %v1768_v6, %v1857_v45  ;;  %v2233_v50 = vsub.f32 %v1752_v60, %v1857_v45  ;;  %v2234_v40 = vsub.f32 %v1764_v4, %v1857_v45 }
 0x14e   : > { %v704_v11 = vmax.f32 %v703_v59, 0.0  ;;  %v1944_v59 = vld [vmem:[%s1921_s11 + $0x20] sm:$0xff]   ;;  %v2235_v48 = vsub.f32 %v1785_v19, %v1857_v45  ;;  %v2236_v63 = vsub.f32 %v1796_v34, %v1857_v45  ;;  %v2237_v6 = vsub.f32 %v1780_v16, %v1857_v45 }
 0x14f   : > { %v2238_v60 = vsub.f32 %v1792_v32, %v1857_v45  ;;  %v2239_v4 = vsub.f32 %v1703_v27, %v1857_v45  ;;  %v2240_v19 = vsub.f32 %v1711_v31, %v1857_v45  ;;  %v2241_v34 = vsub.f32 %v1699_v25, %v1857_v45 }
 0x150   : > { %v737_v41 = vadd.f32 1e-05, %v704_v11  ;;  %v1964_v11 = vld [vmem:[%s1921_s11 + $0x40] sm:$0xff]   ;;  %v2242_v16 = vsub.f32 %v1707_v29, %v1857_v45  ;;  %v2243_v32 = vsub.f32 %v1731_v44, %v1857_v45  ;;  %v2244_v27 = vsub.f32 %v1742_v51, %v1857_v45 }
 0x151   : > { %v2245_v31 = vsub.f32 %v1727_v42, %v1857_v45  ;;  %v2246_v25 = vsub.f32 %v1738_v49, %v1857_v45  ;;  %v2247_v29 = vsub.f32 %v1759_v0, %v1857_v45  ;;  %v2248_v44 = vsub.f32 %v1770_v7, %v1857_v45 }
 0x152   : > { %1585 = vrsqrt.f32 %v737_v41  ;;  %v1987_v41 = vld [vmem:[%s1921_s11 + $0x68] sm:$0xff]   ;;  %v2249_v51 = vsub.f32 %v1755_v62, %v1857_v45  ;;  %v2250_v42 = vsub.f32 %v1766_v5, %v1857_v45  ;;  %v2251_v49 = vsub.f32 %v1787_v20, %v1857_v45 }
 0x153   : > { %v1329_v8 = vunpack.c.l.bf16 %v1987_v41  ;;  %v2252_v0 = vsub.f32 %v1798_v35, %v1857_v45  ;;  %v2253_v7 = vsub.f32 %v1783_v18, %v1857_v45  ;;  %v2254_v62 = vsub.f32 %v1794_v33, %v1857_v45 }
 0x154   : > { %v2260_v45 = vunpack.c.h.bf16 %v1938_v52 }
 0x15c   : > { %v1586_v61 = vpop.eup %1585 }
 0x15d   : > { %v739_v1 = vmul.f32 %v1586_v61, %v705_v53  ;;  %v740_v13 = vmul.f32 %v1586_v61, %v706_v54  ;;  %v741_v3 = vmul.f32 %v1586_v61, %v707_v55  ;;  %v742_v57 = vmul.f32 %v1586_v61, %v708_v56 }
 0x15e   : > { %v743_v46 = vmul.f32 %v1586_v61, %v2227_v10  ;;  %v744_v53 = vmul.f32 %v1586_v61, %v2228_v26  ;;  %v745_v54 = vmul.f32 %v1586_v61, %v2229_v30  ;;  %v746_v55 = vmul.f32 %v1586_v61, %v2230_v24 }
 0x15f   : > { %v747_v56 = vmul.f32 %v1586_v61, %v2231_v28  ;;  %v748_v10 = vmul.f32 %v1586_v61, %v2232_v43  ;;  %v749_v26 = vmul.f32 %v1586_v61, %v2233_v50  ;;  %v750_v30 = vmul.f32 %v1586_v61, %v2234_v40 }
 0x160   : > { %v751_v24 = vmul.f32 %v1586_v61, %v2235_v48  ;;  %v752_v28 = vmul.f32 %v1586_v61, %v2236_v63  ;;  %v753_v43 = vmul.f32 %v1586_v61, %v2237_v6  ;;  %v754_v50 = vmul.f32 %v1586_v61, %v2238_v60 }
 0x161   : > { %v755_v40 = vmul.f32 %v1586_v61, %v2239_v4  ;;  %v756_v48 = vmul.f32 %v1586_v61, %v2240_v19  ;;  %v757_v63 = vmul.f32 %v1586_v61, %v2241_v34  ;;  %v758_v6 = vmul.f32 %v1586_v61, %v2242_v16 }
 0x162   : > { %v759_v60 = vmul.f32 %v1586_v61, %v2243_v32  ;;  %v760_v4 = vmul.f32 %v1586_v61, %v2244_v27  ;;  %v761_v19 = vmul.f32 %v1586_v61, %v2245_v31  ;;  %v762_v34 = vmul.f32 %v1586_v61, %v2246_v25 }
 0x163   : > { %v763_v16 = vmul.f32 %v1586_v61, %v2247_v29  ;;  %v764_v32 = vmul.f32 %v1586_v61, %v2248_v44  ;;  %v765_v27 = vmul.f32 %v1586_v61, %v2249_v51  ;;  %v766_v31 = vmul.f32 %v1586_v61, %v2250_v42 }
 0x164   : > { %v767_v25 = vmul.f32 %v1586_v61, %v2251_v49  ;;  %v768_v29 = vmul.f32 %v1586_v61, %v2252_v0  ;;  %v769_v44 = vmul.f32 %v1586_v61, %v2253_v7  ;;  %v770_v51 = vmul.f32 %v1586_v61, %v2254_v62 }
 0x165   : > { %v2109_v5 = vadd.f32 %v2255_v58, %v739_v1  ;;  %v2256_v42 = vunpack.c.h.bf16 %v1932_v39  ;;  %v2257_v49 = vunpack.c.l.bf16 %v1935_v38  ;;  %v2258_v0 = vunpack.c.h.bf16 %v1935_v38 }
 0x166   : > { %v2259_v7 = vunpack.c.l.bf16 %v1938_v52  ;;  %v2129_v58 = vadd.f32 %v2260_v45, %v744_v53  ;;  %v2261_v61 = vunpack.c.l.bf16 %v1941_v37  ;;  %v2263_v39 = vunpack.c.l.bf16 %v1944_v59 }
 0x167   : > { %v2113_v20 = vadd.f32 %v2256_v42, %v740_v13  ;;  %v2117_v35 = vadd.f32 %v2257_v49, %v741_v3  ;;  %v2121_v18 = vadd.f32 %v2258_v0, %v742_v57  ;;  %v2262_v13 = vunpack.c.h.bf16 %v1941_v37 }
 0x168   : > { %v2125_v33 = vadd.f32 %v2259_v7, %v743_v46  ;;  %v2133_v1 = vadd.f32 %v2261_v61, %v745_v54  ;;  %v843_v38 = vadd.f32 %v2263_v39, %v747_v56  ;;  %v2264_v57 = vunpack.c.h.bf16 %v1944_v59 }
 0x169   : > { %v842_v3 = vadd.f32 %v2262_v13, %v746_v55  ;;  %v2265_v46 = vunpack.c.l.bf16 %v1947_v36  ;;  %v2266_v52 = vunpack.c.h.bf16 %v1947_v36  ;;  %v2267_v49 = vunpack.c.l.bf16 %v1954_v23 }
 0x16a   : > { %v844_v62 = vadd.f32 %v2264_v57, %v748_v10  ;;  %v2268_v54 = vunpack.c.h.bf16 %v1954_v23  ;;  %v2269_v37 = vunpack.c.l.bf16 %v1957_v22  ;;  %v2270_v56 = vunpack.c.h.bf16 %v1957_v22 }
 0x16b   : > { %v845_v42 = vadd.f32 %v2265_v46, %v749_v26  ;;  %v846_v53 = vadd.f32 %v2266_v52, %v750_v30  ;;  %v847_v0 = vadd.f32 %v2267_v49, %v751_v24  ;;  %v2271_v59 = vunpack.c.l.bf16 %v1964_v11 }
 0x16c   : > { %v848_v7 = vadd.f32 %v2268_v54, %v752_v28  ;;  %v849_v55 = vadd.f32 %v2269_v37, %v753_v43  ;;  %v850_v45 = vadd.f32 %v2270_v56, %v754_v50  ;;  %v2272_v26 = vunpack.c.h.bf16 %v1964_v11 }
 0x16d   : > { %v851_v10 = vadd.f32 %v2271_v59, %v755_v40  ;;  %v2273_v36 = vunpack.c.l.bf16 %v1967_v14  ;;  %v2274_v24 = vunpack.c.h.bf16 %v1967_v14  ;;  %v2275_v23 = vunpack.c.l.bf16 %v1974_v17 }
 0x16e   : > { %v852_v61 = vadd.f32 %v2272_v26, %v756_v48  ;;  %v2276_v43 = vunpack.c.h.bf16 %v1974_v17  ;;  %v857_v22 = vadd.f32 %v1321_v47, %v761_v19  ;;  %v2277_v50 = vunpack.c.h.bf16 %v1977_v12 }
 0x16f   : > { %v853_v30 = vadd.f32 %v2273_v36, %v757_v63  ;;  %v854_v13 = vadd.f32 %v2274_v24, %v758_v6  ;;  %v855_v28 = vadd.f32 %v2275_v23, %v759_v60  ;;  %v859_v11 = vadd.f32 %v1325_v21, %v763_v16 }
 0x170   : > { %v856_v39 = vadd.f32 %v2276_v43, %v760_v4  ;;  %v858_v40 = vadd.f32 %v2277_v50, %v762_v34  ;;  %v2278_v48 = vunpack.c.h.bf16 %v1984_v9  ;;  %v861_v14 = vadd.f32 %v1329_v8, %v765_v27 }
 0x171   : > { %v2279_v6 = vunpack.c.h.bf16 %v1987_v41  ;;  %v2280_v17 = vunpack.c.l.bf16 %v1994_v2  ;;  %v2281_v47 = vunpack.c.h.bf16 %v1994_v2  ;;  %v2282_v12 = vunpack.c.l.bf16 %v1997_v15 }
 0x172   : > { %v860_v63 = vadd.f32 %v2278_v48, %v764_v32  ;;  %v2283_v21 = vunpack.c.h.bf16 %v1997_v15  ;;  %v867_v9 = vmax.f32 %v2109_v5, 0.0  ;;  %v868_v32 = vmax.f32 %v2113_v20, 0.0 }
 0x173   : > { %v862_v60 = vadd.f32 %v2279_v6, %v766_v31  ;;  %v863_v4 = vadd.f32 %v2280_v17, %v767_v25  ;;  %v864_v19 = vadd.f32 %v2281_v47, %v768_v29  ;;  %v865_v34 = vadd.f32 %v2282_v12, %v769_v44 }
 0x174   : > { %v866_v16 = vadd.f32 %v2283_v21, %v770_v51  ;;  %v869_v8 = vmax.f32 %v2117_v35, 0.0  ;;  %v870_v41 = vmax.f32 %v2121_v18, 0.0  ;;  %v871_v27 = vmax.f32 %v2125_v33, 0.0 }
 0x175   : > { %v872_v31 = vmax.f32 %v2129_v58, 0.0  ;;  %v873_v2 = vmax.f32 %v2133_v1, 0.0  ;;  %v874_v25 = vmax.f32 %v842_v3, 0.0  ;;  %v875_v29 = vmax.f32 %v843_v38, 0.0 }
 0x176   : > { %v876_v44 = vmax.f32 %v844_v62, 0.0  ;;  %v877_v57 = vmax.f32 %v845_v42, 0.0  ;;  %v878_v15 = vmax.f32 %v846_v53, 0.0  ;;  %v879_v51 = vmax.f32 %v847_v0, 0.0 }
 0x177   : > { %v880_v5 = vmax.f32 %v848_v7, 0.0  ;;  %v881_v46 = vmax.f32 %v849_v55, 0.0  ;;  %v882_v20 = vmax.f32 %v850_v45, 0.0  ;;  %v883_v52 = vmax.f32 %v851_v10, 0.0 }
 0x178   : > { %v884_v35 = vmax.f32 %v852_v61, 0.0  ;;  %v885_v49 = vmax.f32 %v853_v30, 0.0  ;;  %v886_v18 = vmax.f32 %v854_v13, 0.0  ;;  %v887_v54 = vmax.f32 %v855_v28, 0.0 }
 0x179   : > { %v888_v33 = vmax.f32 %v856_v39, 0.0  ;;  %v889_v37 = vmax.f32 %v857_v22, 0.0  ;;  %v890_v58 = vmax.f32 %v858_v40, 0.0  ;;  %v891_v56 = vmax.f32 %v859_v11, 0.0 }
 0x17a   : > { %v892_v1 = vmax.f32 %v860_v63, 0.0  ;;  %v893_v3 = vmax.f32 %v861_v14, 0.0  ;;  %v894_v38 = vmax.f32 %v862_v60, 0.0  ;;  %v895_v62 = vmax.f32 %v863_v4, 0.0 }
 0x17b   : > { %v896_v42 = vmax.f32 %v864_v19, 0.0  ;;  %v897_v53 = vmax.f32 %v865_v34, 0.0  ;;  %v898_v0 = vmax.f32 %v866_v16, 0.0  ;;  %v1342_v7 = vpack.c.bf16 %v868_v32, %v867_v9 }
 0x17c   : > { %v1347_v55 = vpack.c.bf16 %v870_v41, %v869_v8  ;;  %v1352_v45 = vpack.c.bf16 %v872_v31, %v871_v27  ;;  %v1357_v59 = vpack.c.bf16 %v874_v25, %v873_v2  ;;  %v1362_v10 = vpack.c.bf16 %v876_v44, %v875_v29 }
 0x17d   : > { %v1367_v26 = vpack.c.bf16 %v878_v15, %v877_v57  ;;  %v1372_v61 = vpack.c.bf16 %v880_v5, %v879_v51  ;;  %v1377_v36 = vpack.c.bf16 %v882_v20, %v881_v46  ;;  %1343 = vst [vmem:[%s2196_s17] sm:$0xff] %v1342_v7   ;;  %v1382_v30 = vpack.c.bf16 %v884_v35, %v883_v52 }
 0x17e   : > { %1434 = vst [vmem:[%s2196_s17 + $0x8] sm:$0xff] %v1347_v55   ;;  %1435 = vst [vmem:[%s2196_s17 + $0x10] sm:$0xff] %v1352_v45   ;;  %v1387_v24 = vpack.c.bf16 %v886_v18, %v885_v49  ;;  %v1392_v13 = vpack.c.bf16 %v888_v33, %v887_v54  ;;  %v1397_v23 = vpack.c.bf16 %v890_v58, %v889_v37 }
 0x17f   : > { %1436 = vst [vmem:[%s2196_s17 + $0x18] sm:$0xff] %v1357_v59   ;;  %1437 = vst [vmem:[%s2196_s17 + $0x20] sm:$0xff] %v1362_v10   ;;  %v1402_v28 = vpack.c.bf16 %v892_v1, %v891_v56  ;;  %v1407_v43 = vpack.c.bf16 %v894_v38, %v893_v3  ;;  %v1412_v39 = vpack.c.bf16 %v896_v42, %v895_v62 }
 0x180   : > { %1438 = vst [vmem:[%s2196_s17 + $0x28] sm:$0xff] %v1367_v26   ;;  %1439 = vst [vmem:[%s2196_s17 + $0x30] sm:$0xff] %v1372_v61   ;;  %v1417_v22 = vpack.c.bf16 %v898_v0, %v897_v53 }
 0x181   : > { %1440 = vst [vmem:[%s2196_s17 + $0x38] sm:$0xff] %v1377_v36   ;;  %1441 = vst [vmem:[%s2196_s17 + $0x40] sm:$0xff] %v1382_v30  }
 0x182   : > { %1442 = vst [vmem:[%s2196_s17 + $0x48] sm:$0xff] %v1387_v24   ;;  %1443 = vst [vmem:[%s2196_s17 + $0x50] sm:$0xff] %v1392_v13  }
 0x183   : > { %1444 = vst [vmem:[%s2196_s17 + $0x58] sm:$0xff] %v1397_v23   ;;  %1445 = vst [vmem:[%s2196_s17 + $0x60] sm:$0xff] %v1402_v28  }
 0x184   : > { %1446 = vst [vmem:[%s2196_s17 + $0x68] sm:$0xff] %v1407_v43   ;;  %1447 = vst [vmem:[%s2196_s17 + $0x70] sm:$0xff] %v1412_v39  }
 0x185   : > { %1448 = vst [vmem:[%s2196_s17 + $0x78] sm:$0xff] %v1417_v22  }
 0x186 PF: > { %s13_s14 = sadd.s32 1, %s1609_s14   ;;  %s2284_s12 = smov %s1605_s13 }
 0x187   : > { %p10_p5 = scmp.ge.s32.totalorder %s13_s14, 4   ;;  %s2285_s13 = smov %s2287_s15 }
 0x189   :  { %12 = sbr.rel (!%p10_p5) target bundleno = 2 (0x2), region = 68 }

// kernel: forward.29
= control target key start
LH: loop header
LB: loop body
LE: loop exit
PB: predicated region body
PF: predicated region fallthrough
CT: control target
= control target key end

     0   :  { %s728_s9 = smov 0   ;;  %s730_s10 = smov 0   ;;  %s804_s0 = inlined_call_operand.vmem [shape: bf16[2,64,128], index: 0, kind: input, shape index: {}]   ;;  %s805_s1 = inlined_call_operand.vmem [shape: bf16[128,128], index: 1, kind: input, shape index: {}]   ;;  %s806_s2 = inlined_call_operand.vmem [shape: bf16[2,64,128], index: 2, kind: output, shape index: {}]  }
   0x1   :  { %s732_s11 = smov 0  }
   0x2 LB: > { %s24_s12 = sadd.s32 1, %s707_s10  ;;  %p539_p0 = scmp.ge.s32.totalorder %s711_s11, 1  ;;  %s711_s11 = sphi %s732_s11, %s12_s11   ;;  %s707_s10 = sphi %s730_s10, %s808_s10   ;;  %s703_s9 = sphi %s728_s9, %s807_s9  }
   0x3   : > { %p26_p1 = scmp.ge.s32.totalorder %s24_s12, 2  ;;  %p135_p2 = scmp.lt.s32.totalorder %s711_s11, 3 }
   0x5   : > { %s810_s12 = smov (%p26_p1, %s24_s12), 0  ;;  %p136_p3 = pnand %p539_p0, %p135_p2 }
   0x6   : > { %v675_v0 = vld [vmem:[%s805_s1] sm:$0xff] (!%p136_p3)   ;;  %p164_p4 = scmp.lt.s32.totalorder (!%p136_p3), %s703_s9, 1  ;;  %v676_v1 = vld [vmem:[%s805_s1 + $0x8] sm:$0xff] (!%p136_p3)   ;;  %v677_v2 = vld [vmem:[%s805_s1 + $0x10] sm:$0xff] (!%p136_p3)  }
   0x7   : > { %139 = sbr.rel (%p136_p3) target bundleno = 307 (0x133), region = 28  ;;  %611 = vmatprep.subr.bf16.mxu0 (!%p136_p3), %v675_v0  ;;  %635 = vmatprep.subr.bf16.mxu1 (!%p136_p3), %v675_v0  ;;  %v678_v3 = vld [vmem:[%s805_s1 + $0x18] sm:$0xff] (!%p136_p3)   ;;  %v679_v6 = vld [vmem:[%s805_s1 + $0x20] sm:$0xff] (!%p136_p3)   ;;  %v680_v7 = vld [vmem:[%s805_s1 + $0x28] sm:$0xff] (!%p136_p3)  }
   0x8   : > { %612 = vmatpush3.bf16.msra.mxu0 (!%p136_p3), %v675_v0  ;;  %643 = vmatpush3.bf16.msra.mxu1 (!%p136_p3), %v675_v0  ;;  %v681_v8 = vld [vmem:[%s805_s1 + $0x30] sm:$0xff] (!%p136_p3)   ;;  %v682_v9 = vld [vmem:[%s805_s1 + $0x38] sm:$0xff] (!%p136_p3)  }
   0x9   : > { %613 = vmatprep.subr.bf16.mxu0 (!%p136_p3), %v676_v1  ;;  %636 = vmatprep.subr.bf16.mxu1 (!%p136_p3), %v676_v1 }
   0xc   : > { %614 = vmatpush3.bf16.msra.mxu0 (!%p136_p3), %v676_v1  ;;  %644 = vmatpush3.bf16.msra.mxu1 (!%p136_p3), %v676_v1 }
   0xd   : > { %615 = vmatprep.subr.bf16.mxu0 (!%p136_p3), %v677_v2  ;;  %637 = vmatprep.subr.bf16.mxu1 (!%p136_p3), %v677_v2 }
   0xe   : > { %s812_s9 = smov (!%p164_p4, %s703_s9), 1 }
   0xf   : > { %s566_s19 = sshll.u32 %s812_s9, 5 }
  0x10   : > { %s763_s22 = scalar_lea.vmem %s804_s0, %s566_s19  ;;  %616 = vmatpush3.bf16.msra.mxu0 %v677_v2  ;;  %645 = vmatpush3.bf16.msra.mxu1 %v677_v2  ;;  %s180_s7 = scalar_lea.vmem %s806_s2, %s566_s19 }
  0x11   : > { %v683_v4 = vld [vmem:[%s763_s22] sm:$0xff]   ;;  %v685_v5 = vld [vmem:[%s763_s22 + $0x10] sm:$0xff]   ;;  %617 = vmatprep.subr.bf16.mxu0 %v678_v3  ;;  %638 = vmatprep.subr.bf16.mxu1 %v678_v3  ;;  %v684_v10 = vld [vmem:[%s763_s22 + $0x8] sm:$0xff]  }
  0x12   : > { %627 = vmatprep.mubr.bf16.mxu0 %v683_v4  ;;  %631 = vmatprep.mubr.bf16.mxu1 %v685_v5  ;;  %v686_v11 = vld [vmem:[%s763_s22 + $0x18] sm:$0xff]  }
  0x14   : > { %618 = vmatpush3.bf16.msra.mxu0 %v678_v3  ;;  %646 = vmatpush3.bf16.msra.mxu1 %v678_v3 }
  0x15   : > { %619 = vmatprep.subr.bf16.mxu0 %v679_v6  ;;  %639 = vmatprep.subr.bf16.mxu1 %v679_v6 }
  0x18   : > { %620 = vmatpush3.bf16.msra.mxu0 %v679_v6  ;;  %647 = vmatpush3.bf16.msra.mxu1 %v679_v6 }
  0x19   : > { %621 = vmatprep.subr.bf16.mxu0 %v680_v7  ;;  %640 = vmatprep.subr.bf16.mxu1 %v680_v7 }
  0x1c   : > { %622 = vmatpush3.bf16.msra.mxu0 %v680_v7  ;;  %648 = vmatpush3.bf16.msra.mxu1 %v680_v7 }
  0x1d   : > { %623 = vmatprep.subr.bf16.mxu0 %v681_v8  ;;  %641 = vmatprep.subr.bf16.mxu1 %v681_v8 }
  0x20   : > { %624 = vmatpush3.bf16.msra.mxu0 %v681_v8  ;;  %649 = vmatpush3.bf16.msra.mxu1 %v681_v8 }
  0x21   : > { %625 = vmatprep.subr.bf16.mxu0 %v682_v9  ;;  %642 = vmatprep.subr.bf16.mxu1 %v682_v9 }
  0x24   : > { %626 = vmatpush3.bf16.msra.mxu0 %v682_v9  ;;  %650 = vmatpush3.bf16.msra.mxu1 %v682_v9 }
  0x27   : > { %628 = vmatmul.mubr.bf16.vlgmr.msra.gmra.mrb[0].mxu0 %v684_v10  ;;  %632 = vmatmul.mubr.bf16.vlgmr.msra.gmra.mrb[0].mxu1 %v686_v11 }
  0xfa   : > { %v629_v12 = vpop.f32.mrb[0].mxu0  ;;  %v784_v13 = vpop.f32.mrb[0].mxu1 }
  0xfb   : > { %v312_v14 = vpop.f32.mrb[1].mxu0  ;;  %v328_v15 = vpop.f32.mrb[1].mxu1  ;;  %v360_v23 = vmul.f32 %v629_v12, %v629_v12  ;;  %v364_v35 = vmul.f32 %v784_v13, %v784_v13 }
  0xfc   : > { %v630_v16 = vpop.f32.mrb[2].mxu0  ;;  %v634_v17 = vpop.f32.mrb[2].mxu1  ;;  %v358_v20 = vmul.f32 %v312_v14, %v312_v14  ;;  %v362_v29 = vmul.f32 %v328_v15, %v328_v15 }
  0xfd   : > { %v315_v18 = vpop.f32.mrb[3].mxu0  ;;  %v331_v19 = vpop.f32.mrb[3].mxu1  ;;  %v361_v26 = vmul.f32 %v630_v16, %v630_v16  ;;  %v365_v38 = vmul.f32 %v634_v17, %v634_v17 }
  0xfe   : > { %v343_v21 = vadd.f32 %v315_v18, %v312_v14  ;;  %v359_v22 = vmul.f32 %v315_v18, %v315_v18  ;;  %v363_v34 = vmul.f32 %v331_v19, %v331_v19 }
 0x100   : > { %v344_v24 = vadd.f32 %v629_v12, %v343_v21  ;;  %v366_v25 = vadd.f32 %v359_v22, %v358_v20 }
 0x102   : > { %v367_v27 = vadd.f32 %v366_v25, %v360_v23  ;;  %v345_v28 = vadd.f32 %v630_v16, %v344_v24 }
 0x104   : > { %v346_v30 = vadd.f32 %v345_v28, %v328_v15  ;;  %v368_v31 = vadd.f32 %v367_v27, %v361_v26 }
 0x106   : > { %v369_v32 = vadd.f32 %v368_v31, %v362_v29  ;;  %v347_v33 = vadd.f32 %v346_v30, %v331_v19 }
 0x108   : > { %v348_v36 = vadd.f32 %v784_v13, %v347_v33  ;;  %v370_v37 = vadd.f32 %v369_v32, %v363_v34 }
 0x10a   : > { %v349_v39 = vadd.f32 %v634_v17, %v348_v36  ;;  %v371_v40 = vadd.f32 %v370_v37, %v364_v35 }
 0x10c   : > { %v350_v41 = vrot.slane %v349_v39, 4  ;;  %v372_v42 = vadd.f32 %v371_v40, %v365_v38 }
 0x10e   : > { %v351_v43 = vadd.f32 %v350_v41, %v349_v39  ;;  %v373_v44 = vrot.slane %v372_v42, 4 }
 0x110   : > { %v352_v45 = vrot.slane %v351_v43, 2  ;;  %v374_v46 = vadd.f32 %v373_v44, %v372_v42 }
 0x112   : > { %v353_v47 = vadd.f32 %v352_v45, %v351_v43  ;;  %v375_v48 = vrot.slane %v374_v46, 2 }
 0x114   : > { %v354_v49 = vrot.slane %v353_v47, 1  ;;  %v376_v50 = vadd.f32 %v375_v48, %v374_v46 }
 0x116   : > { %v355_v51 = vadd.f32 %v354_v49, %v353_v47  ;;  %v377_v52 = vrot.slane %v376_v50, 1 }
 0x118   : > { %v357_v53 = vmul.f32 0.015625, %v355_v51  ;;  %v378_v54 = vadd.f32 %v377_v52, %v376_v50 }
 0x11a   : > { %v379_v55 = vmul.f32 0.015625, %v378_v54  ;;  %v380_v56 = vmul.f32 %v357_v53, %v357_v53  ;;  %v383_v57 = vsub.f32 %v312_v14, %v357_v53  ;;  %v384_v58 = vsub.f32 %v315_v18, %v357_v53 }
 0x11b   : > { %v385_v59 = vsub.f32 %v629_v12, %v357_v53  ;;  %v386_v60 = vsub.f32 %v630_v16, %v357_v53  ;;  %v387_v61 = vsub.f32 %v328_v15, %v357_v53  ;;  %v388_v62 = vsub.f32 %v331_v19, %v357_v53 }
 0x11c   : > { %v381_v63 = vsub.f32 %v379_v55, %v380_v56  ;;  %v389_v0 = vsub.f32 %v784_v13, %v357_v53  ;;  %v390_v1 = vsub.f32 %v634_v17, %v357_v53 }
 0x11e   : > { %v382_v2 = vmax.f32 %v381_v63, 0.0 }
 0x120   : > { %v391_v3 = vadd.f32 1e-05, %v382_v2 }
 0x122   : > { %687 = vrsqrt.f32 %v391_v3 }
 0x12c   : > { %v688_v4 = vpop.eup %687 }
 0x12d   : > { %v393_v5 = vmul.f32 %v688_v4, %v383_v57  ;;  %v394_v6 = vmul.f32 %v688_v4, %v384_v58  ;;  %v395_v7 = vmul.f32 %v688_v4, %v385_v59  ;;  %v396_v8 = vmul.f32 %v688_v4, %v386_v60 }
 0x12e   : > { %v397_v9 = vmul.f32 %v688_v4, %v387_v61  ;;  %v398_v10 = vmul.f32 %v688_v4, %v388_v62  ;;  %v399_v11 = vmul.f32 %v688_v4, %v389_v0  ;;  %v400_v12 = vmul.f32 %v688_v4, %v390_v1 }
 0x12f   : > { %v579_v14 = vpack.c.bf16 %v394_v6, %v393_v5  ;;  %v584_v13 = vpack.c.bf16 %v396_v8, %v395_v7 }
 0x130   : > { %v589_v15 = vpack.c.bf16 %v398_v10, %v397_v9  ;;  %v594_v16 = vpack.c.bf16 %v400_v12, %v399_v11 }
 0x131   : > { %580 = vst [vmem:[%s180_s7] sm:$0xff] %v579_v14   ;;  %596 = vst [vmem:[%s180_s7 + $0x8] sm:$0xff] %v584_v13  }
 0x132   : > { %597 = vst [vmem:[%s180_s7 + $0x10] sm:$0xff] %v589_v15   ;;  %598 = vst [vmem:[%s180_s7 + $0x18] sm:$0xff] %v594_v16  }
 0x133 PF: > { %s12_s11 = sadd.s32 1, %s711_s11   ;;  %s807_s9 = smov %s707_s10 }
 0x134   : > { %p9_p5 = scmp.ge.s32.totalorder %s12_s11, 4   ;;  %s808_s10 = smov %s810_s12 }
 0x136   :  { %11 = sbr.rel (!%p9_p5) target bundleno = 2 (0x2), region = 61 }

// kernel: forward.28
= control target key start
LH: loop header
LB: loop body
LE: loop exit
PB: predicated region body
PF: predicated region fallthrough
CT: control target
= control target key end

     0   :  { %s736_s9 = smov 0   ;;  %s738_s10 = smov 0   ;;  %s812_s0 = inlined_call_operand.vmem [shape: bf16[2,64,128], index: 0, kind: input, shape index: {}]   ;;  %s813_s1 = inlined_call_operand.vmem [shape: bf16[128,128], index: 1, kind: input, shape index: {}]   ;;  %s814_s2 = inlined_call_operand.vmem [shape: bf16[2,64,128], index: 2, kind: output, shape index: {}]  }
   0x1   :  { %s740_s11 = smov 0  }
   0x2 LB: > { %s24_s12 = sadd.s32 1, %s715_s10  ;;  %p547_p0 = scmp.ge.s32.totalorder %s719_s11, 1  ;;  %s719_s11 = sphi %s740_s11, %s12_s11   ;;  %s715_s10 = sphi %s738_s10, %s816_s10   ;;  %s711_s9 = sphi %s736_s9, %s815_s9  }
   0x3   : > { %p26_p1 = scmp.ge.s32.totalorder %s24_s12, 2  ;;  %p135_p2 = scmp.lt.s32.totalorder %s719_s11, 3 }
   0x5   : > { %s818_s12 = smov (%p26_p1, %s24_s12), 0  ;;  %p136_p3 = pnand %p547_p0, %p135_p2 }
   0x6   : > { %v683_v0 = vld [vmem:[%s813_s1] sm:$0xff] (!%p136_p3)   ;;  %p164_p4 = scmp.lt.s32.totalorder (!%p136_p3), %s711_s9, 1  ;;  %v684_v1 = vld [vmem:[%s813_s1 + $0x8] sm:$0xff] (!%p136_p3)   ;;  %v685_v2 = vld [vmem:[%s813_s1 + $0x10] sm:$0xff] (!%p136_p3)  }
   0x7   : > { %139 = sbr.rel (%p136_p3) target bundleno = 309 (0x135), region = 28  ;;  %619 = vmatprep.subr.bf16.mxu0 (!%p136_p3), %v683_v0  ;;  %643 = vmatprep.subr.bf16.mxu1 (!%p136_p3), %v683_v0  ;;  %v686_v3 = vld [vmem:[%s813_s1 + $0x18] sm:$0xff] (!%p136_p3)   ;;  %v687_v6 = vld [vmem:[%s813_s1 + $0x20] sm:$0xff] (!%p136_p3)   ;;  %v688_v7 = vld [vmem:[%s813_s1 + $0x28] sm:$0xff] (!%p136_p3)  }
   0x8   : > { %620 = vmatpush3.bf16.msra.mxu0 (!%p136_p3), %v683_v0  ;;  %651 = vmatpush3.bf16.msra.mxu1 (!%p136_p3), %v683_v0  ;;  %v689_v8 = vld [vmem:[%s813_s1 + $0x30] sm:$0xff] (!%p136_p3)   ;;  %v690_v9 = vld [vmem:[%s813_s1 + $0x38] sm:$0xff] (!%p136_p3)  }
   0x9   : > { %621 = vmatprep.subr.bf16.mxu0 (!%p136_p3), %v684_v1  ;;  %644 = vmatprep.subr.bf16.mxu1 (!%p136_p3), %v684_v1 }
   0xc   : > { %622 = vmatpush3.bf16.msra.mxu0 (!%p136_p3), %v684_v1  ;;  %652 = vmatpush3.bf16.msra.mxu1 (!%p136_p3), %v684_v1 }
   0xd   : > { %623 = vmatprep.subr.bf16.mxu0 (!%p136_p3), %v685_v2  ;;  %645 = vmatprep.subr.bf16.mxu1 (!%p136_p3), %v685_v2 }
   0xe   : > { %s820_s9 = smov (!%p164_p4, %s711_s9), 1 }
   0xf   : > { %s574_s19 = sshll.u32 %s820_s9, 5 }
  0x10   : > { %s771_s22 = scalar_lea.vmem %s812_s0, %s574_s19  ;;  %624 = vmatpush3.bf16.msra.mxu0 %v685_v2  ;;  %653 = vmatpush3.bf16.msra.mxu1 %v685_v2  ;;  %s180_s7 = scalar_lea.vmem %s814_s2, %s574_s19 }
  0x11   : > { %v691_v4 = vld [vmem:[%s771_s22] sm:$0xff]   ;;  %v693_v5 = vld [vmem:[%s771_s22 + $0x10] sm:$0xff]   ;;  %625 = vmatprep.subr.bf16.mxu0 %v686_v3  ;;  %646 = vmatprep.subr.bf16.mxu1 %v686_v3  ;;  %v692_v10 = vld [vmem:[%s771_s22 + $0x8] sm:$0xff]  }
  0x12   : > { %635 = vmatprep.mubr.bf16.mxu0 %v691_v4  ;;  %639 = vmatprep.mubr.bf16.mxu1 %v693_v5  ;;  %v694_v11 = vld [vmem:[%s771_s22 + $0x18] sm:$0xff]  }
  0x14   : > { %626 = vmatpush3.bf16.msra.mxu0 %v686_v3  ;;  %654 = vmatpush3.bf16.msra.mxu1 %v686_v3 }
  0x15   : > { %627 = vmatprep.subr.bf16.mxu0 %v687_v6  ;;  %647 = vmatprep.subr.bf16.mxu1 %v687_v6 }
  0x18   : > { %628 = vmatpush3.bf16.msra.mxu0 %v687_v6  ;;  %655 = vmatpush3.bf16.msra.mxu1 %v687_v6 }
  0x19   : > { %629 = vmatprep.subr.bf16.mxu0 %v688_v7  ;;  %648 = vmatprep.subr.bf16.mxu1 %v688_v7 }
  0x1c   : > { %630 = vmatpush3.bf16.msra.mxu0 %v688_v7  ;;  %656 = vmatpush3.bf16.msra.mxu1 %v688_v7 }
  0x1d   : > { %631 = vmatprep.subr.bf16.mxu0 %v689_v8  ;;  %649 = vmatprep.subr.bf16.mxu1 %v689_v8 }
  0x20   : > { %632 = vmatpush3.bf16.msra.mxu0 %v689_v8  ;;  %657 = vmatpush3.bf16.msra.mxu1 %v689_v8 }
  0x21   : > { %633 = vmatprep.subr.bf16.mxu0 %v690_v9  ;;  %650 = vmatprep.subr.bf16.mxu1 %v690_v9 }
  0x24   : > { %634 = vmatpush3.bf16.msra.mxu0 %v690_v9  ;;  %658 = vmatpush3.bf16.msra.mxu1 %v690_v9 }
  0x27   : > { %636 = vmatmul.mubr.bf16.vlgmr.msra.gmra.mrb[0].mxu0 %v692_v10  ;;  %640 = vmatmul.mubr.bf16.vlgmr.msra.gmra.mrb[0].mxu1 %v694_v11 }
  0xfa   : > { %v637_v12 = vpop.f32.mrb[0].mxu0  ;;  %v792_v13 = vpop.f32.mrb[0].mxu1 }
  0xfb   : > { %v312_v14 = vpop.f32.mrb[1].mxu0  ;;  %v328_v15 = vpop.f32.mrb[1].mxu1  ;;  %v360_v23 = vmul.f32 %v637_v12, %v637_v12  ;;  %v364_v35 = vmul.f32 %v792_v13, %v792_v13 }
  0xfc   : > { %v638_v16 = vpop.f32.mrb[2].mxu0  ;;  %v642_v17 = vpop.f32.mrb[2].mxu1  ;;  %v358_v20 = vmul.f32 %v312_v14, %v312_v14  ;;  %v362_v29 = vmul.f32 %v328_v15, %v328_v15 }
  0xfd   : > { %v315_v18 = vpop.f32.mrb[3].mxu0  ;;  %v331_v19 = vpop.f32.mrb[3].mxu1  ;;  %v361_v26 = vmul.f32 %v638_v16, %v638_v16  ;;  %v365_v38 = vmul.f32 %v642_v17, %v642_v17 }
  0xfe   : > { %v343_v21 = vadd.f32 %v315_v18, %v312_v14  ;;  %v359_v22 = vmul.f32 %v315_v18, %v315_v18  ;;  %v363_v34 = vmul.f32 %v331_v19, %v331_v19 }
 0x100   : > { %v344_v24 = vadd.f32 %v637_v12, %v343_v21  ;;  %v366_v25 = vadd.f32 %v359_v22, %v358_v20 }
 0x102   : > { %v367_v27 = vadd.f32 %v366_v25, %v360_v23  ;;  %v345_v28 = vadd.f32 %v638_v16, %v344_v24 }
 0x104   : > { %v346_v30 = vadd.f32 %v345_v28, %v328_v15  ;;  %v368_v31 = vadd.f32 %v367_v27, %v361_v26 }
 0x106   : > { %v369_v32 = vadd.f32 %v368_v31, %v362_v29  ;;  %v347_v33 = vadd.f32 %v346_v30, %v331_v19 }
 0x108   : > { %v348_v36 = vadd.f32 %v792_v13, %v347_v33  ;;  %v370_v37 = vadd.f32 %v369_v32, %v363_v34 }
 0x10a   : > { %v349_v39 = vadd.f32 %v642_v17, %v348_v36  ;;  %v371_v40 = vadd.f32 %v370_v37, %v364_v35 }
 0x10c   : > { %v350_v41 = vrot.slane %v349_v39, 4  ;;  %v372_v42 = vadd.f32 %v371_v40, %v365_v38 }
 0x10e   : > { %v351_v43 = vadd.f32 %v350_v41, %v349_v39  ;;  %v373_v44 = vrot.slane %v372_v42, 4 }
 0x110   : > { %v352_v45 = vrot.slane %v351_v43, 2  ;;  %v374_v46 = vadd.f32 %v373_v44, %v372_v42 }
 0x112   : > { %v353_v47 = vadd.f32 %v352_v45, %v351_v43  ;;  %v375_v48 = vrot.slane %v374_v46, 2 }
 0x114   : > { %v354_v49 = vrot.slane %v353_v47, 1  ;;  %v376_v50 = vadd.f32 %v375_v48, %v374_v46 }
 0x116   : > { %v355_v51 = vadd.f32 %v354_v49, %v353_v47  ;;  %v377_v52 = vrot.slane %v376_v50, 1 }
 0x118   : > { %v357_v53 = vmul.f32 0.015625, %v355_v51  ;;  %v378_v54 = vadd.f32 %v377_v52, %v376_v50 }
 0x11a   : > { %v379_v55 = vmul.f32 0.015625, %v378_v54  ;;  %v380_v56 = vmul.f32 %v357_v53, %v357_v53  ;;  %v383_v57 = vsub.f32 %v312_v14, %v357_v53  ;;  %v384_v58 = vsub.f32 %v315_v18, %v357_v53 }
 0x11b   : > { %v385_v59 = vsub.f32 %v637_v12, %v357_v53  ;;  %v386_v60 = vsub.f32 %v638_v16, %v357_v53  ;;  %v387_v61 = vsub.f32 %v328_v15, %v357_v53  ;;  %v388_v62 = vsub.f32 %v331_v19, %v357_v53 }
 0x11c   : > { %v381_v63 = vsub.f32 %v379_v55, %v380_v56  ;;  %v389_v0 = vsub.f32 %v792_v13, %v357_v53  ;;  %v390_v1 = vsub.f32 %v642_v17, %v357_v53 }
 0x11e   : > { %v382_v2 = vmax.f32 %v381_v63, 0.0 }
 0x120   : > { %v391_v3 = vadd.f32 1e-05, %v382_v2 }
 0x122   : > { %695 = vrsqrt.f32 %v391_v3 }
 0x12c   : > { %v696_v4 = vpop.eup %695 }
 0x12d   : > { %v393_v5 = vmul.f32 %v696_v4, %v383_v57  ;;  %v394_v6 = vmul.f32 %v696_v4, %v384_v58  ;;  %v395_v7 = vmul.f32 %v696_v4, %v385_v59  ;;  %v396_v8 = vmul.f32 %v696_v4, %v386_v60 }
 0x12e   : > { %v397_v9 = vmul.f32 %v696_v4, %v387_v61  ;;  %v398_v10 = vmul.f32 %v696_v4, %v388_v62  ;;  %v399_v11 = vmul.f32 %v696_v4, %v389_v0  ;;  %v400_v12 = vmul.f32 %v696_v4, %v390_v1 }
 0x12f   : > { %v401_v14 = vmax.f32 %v393_v5, 0.0  ;;  %v402_v15 = vmax.f32 %v394_v6, 0.0  ;;  %v403_v16 = vmax.f32 %v395_v7, 0.0  ;;  %v404_v18 = vmax.f32 %v396_v8, 0.0 }
 0x130   : > { %v405_v13 = vmax.f32 %v397_v9, 0.0  ;;  %v406_v17 = vmax.f32 %v398_v10, 0.0  ;;  %v407_v19 = vmax.f32 %v399_v11, 0.0  ;;  %v408_v20 = vmax.f32 %v400_v12, 0.0 }
 0x131   : > { %v587_v21 = vpack.c.bf16 %v402_v15, %v401_v14  ;;  %v592_v22 = vpack.c.bf16 %v404_v18, %v403_v16 }
 0x132   : > { %v597_v23 = vpack.c.bf16 %v406_v17, %v405_v13  ;;  %v602_v24 = vpack.c.bf16 %v408_v20, %v407_v19 }
 0x133   : > { %588 = vst [vmem:[%s180_s7] sm:$0xff] %v587_v21   ;;  %604 = vst [vmem:[%s180_s7 + $0x8] sm:$0xff] %v592_v22  }
 0x134   : > { %605 = vst [vmem:[%s180_s7 + $0x10] sm:$0xff] %v597_v23   ;;  %606 = vst [vmem:[%s180_s7 + $0x18] sm:$0xff] %v602_v24  }
 0x135 PF: > { %s12_s11 = sadd.s32 1, %s719_s11   ;;  %s815_s9 = smov %s715_s10 }
 0x136   : > { %p9_p5 = scmp.ge.s32.totalorder %s12_s11, 4   ;;  %s816_s10 = smov %s818_s12 }
 0x138   :  { %11 = sbr.rel (!%p9_p5) target bundleno = 2 (0x2), region = 61 }

// kernel: forward.30
= control target key start
LH: loop header
LB: loop body
LE: loop exit
PB: predicated region body
PF: predicated region fallthrough
CT: control target
= control target key end

     0   :  { %s863_s12 = smov 0   ;;  %s865_s13 = smov 0   ;;  %s982_s0 = inlined_call_operand.vmem [shape: bf16[2,64,128], index: 0, kind: input, shape index: {}]   ;;  %s983_s1 = inlined_call_operand.vmem [shape: bf16[128,128], index: 1, kind: input, shape index: {}]   ;;  %s984_s2 = inlined_call_operand.vmem [shape: bf16[2,64,128], index: 2, kind: input, shape index: {}]   ;;  %s985_s3 = inlined_call_operand.vmem [shape: bf16[2,64,128], index: 3, kind: output, shape index: {}]  }
   0x1   :  { %s867_s14 = smov 0  }
   0x2 LB: > { %s25_s15 = sadd.s32 1, %s837_s13  ;;  %p647_p0 = scmp.ge.s32.totalorder %s841_s14, 1  ;;  %s841_s14 = sphi %s867_s14, %s13_s14   ;;  %s837_s13 = sphi %s865_s13, %s987_s13   ;;  %s833_s12 = sphi %s863_s12, %s986_s12  }
   0x3   : > { %p27_p1 = scmp.ge.s32.totalorder %s25_s15, 2  ;;  %p175_p2 = scmp.lt.s32.totalorder %s841_s14, 3 }
   0x5   : > { %s989_s15 = smov (%p27_p1, %s25_s15), 0  ;;  %p176_p3 = pnand %p647_p0, %p175_p2 }
   0x6   : > { %v805_v0 = vld [vmem:[%s983_s1] sm:$0xff] (!%p176_p3)   ;;  %p214_p4 = scmp.lt.s32.totalorder (!%p176_p3), %s833_s12, 1  ;;  %v806_v1 = vld [vmem:[%s983_s1 + $0x8] sm:$0xff] (!%p176_p3)   ;;  %v807_v2 = vld [vmem:[%s983_s1 + $0x10] sm:$0xff] (!%p176_p3)  }
   0x7   : > { %179 = sbr.rel (%p176_p3) target bundleno = 311 (0x137), region = 32  ;;  %741 = vmatprep.subr.bf16.mxu0 (!%p176_p3), %v805_v0  ;;  %765 = vmatprep.subr.bf16.mxu1 (!%p176_p3), %v805_v0  ;;  %v808_v3 = vld [vmem:[%s983_s1 + $0x18] sm:$0xff] (!%p176_p3)   ;;  %v809_v6 = vld [vmem:[%s983_s1 + $0x20] sm:$0xff] (!%p176_p3)   ;;  %v810_v7 = vld [vmem:[%s983_s1 + $0x28] sm:$0xff] (!%p176_p3)  }
   0x8   : > { %742 = vmatpush3.bf16.msra.mxu0 (!%p176_p3), %v805_v0  ;;  %773 = vmatpush3.bf16.msra.mxu1 (!%p176_p3), %v805_v0  ;;  %v811_v8 = vld [vmem:[%s983_s1 + $0x30] sm:$0xff] (!%p176_p3)   ;;  %v812_v9 = vld [vmem:[%s983_s1 + $0x38] sm:$0xff] (!%p176_p3)  }
   0x9   : > { %743 = vmatprep.subr.bf16.mxu0 (!%p176_p3), %v806_v1  ;;  %766 = vmatprep.subr.bf16.mxu1 (!%p176_p3), %v806_v1 }
   0xc   : > { %744 = vmatpush3.bf16.msra.mxu0 (!%p176_p3), %v806_v1  ;;  %774 = vmatpush3.bf16.msra.mxu1 (!%p176_p3), %v806_v1 }
   0xd   : > { %745 = vmatprep.subr.bf16.mxu0 (!%p176_p3), %v807_v2  ;;  %767 = vmatprep.subr.bf16.mxu1 (!%p176_p3), %v807_v2 }
   0xe   : > { %s991_s12 = smov (!%p214_p4, %s833_s12), 1 }
   0xf   : > { %s890_s22 = sshll.u32 %s991_s12, 5 }
  0x10   : > { %s896_s25 = scalar_lea.vmem %s982_s0, %s890_s22  ;;  %746 = vmatpush3.bf16.msra.mxu0 %v807_v2  ;;  %775 = vmatpush3.bf16.msra.mxu1 %v807_v2  ;;  %s230_s11 = scalar_lea.vmem %s984_s2, %s890_s22 }
  0x11   : > { %v813_v4 = vld [vmem:[%s896_s25] sm:$0xff]   ;;  %v815_v5 = vld [vmem:[%s896_s25 + $0x10] sm:$0xff]   ;;  %747 = vmatprep.subr.bf16.mxu0 %v808_v3  ;;  %768 = vmatprep.subr.bf16.mxu1 %v808_v3  ;;  %v814_v10 = vld [vmem:[%s896_s25 + $0x8] sm:$0xff]   ;;  %s238_s17 = scalar_lea.vmem %s985_s3, %s890_s22 }
  0x12   : > { %757 = vmatprep.mubr.bf16.mxu0 %v813_v4  ;;  %761 = vmatprep.mubr.bf16.mxu1 %v815_v5  ;;  %v816_v11 = vld [vmem:[%s896_s25 + $0x18] sm:$0xff]   ;;  %v688_v4 = vld [vmem:[%s230_s11] sm:$0xff]   ;;  %v723_v5 = vld [vmem:[%s230_s11 + $0x8] sm:$0xff]  }
  0x14   : > { %748 = vmatpush3.bf16.msra.mxu0 %v808_v3  ;;  %776 = vmatpush3.bf16.msra.mxu1 %v808_v3 }
  0x15   : > { %749 = vmatprep.subr.bf16.mxu0 %v809_v6  ;;  %769 = vmatprep.subr.bf16.mxu1 %v809_v6 }
  0x18   : > { %750 = vmatpush3.bf16.msra.mxu0 %v809_v6  ;;  %777 = vmatpush3.bf16.msra.mxu1 %v809_v6  ;;  %v724_v6 = vld [vmem:[%s230_s11 + $0x10] sm:$0xff]  }
  0x19   : > { %751 = vmatprep.subr.bf16.mxu0 %v810_v7  ;;  %770 = vmatprep.subr.bf16.mxu1 %v810_v7 }
  0x1c   : > { %752 = vmatpush3.bf16.msra.mxu0 %v810_v7  ;;  %778 = vmatpush3.bf16.msra.mxu1 %v810_v7  ;;  %v725_v7 = vld [vmem:[%s230_s11 + $0x18] sm:$0xff]  }
  0x1d   : > { %753 = vmatprep.subr.bf16.mxu0 %v811_v8  ;;  %771 = vmatprep.subr.bf16.mxu1 %v811_v8 }
  0x20   : > { %754 = vmatpush3.bf16.msra.mxu0 %v811_v8  ;;  %779 = vmatpush3.bf16.msra.mxu1 %v811_v8  ;;  %v689_v8 = vunpack.c.l.bf16 %v688_v4 }
  0x21   : > { %755 = vmatprep.subr.bf16.mxu0 %v812_v9  ;;  %772 = vmatprep.subr.bf16.mxu1 %v812_v9 }
  0x24   : > { %756 = vmatpush3.bf16.msra.mxu0 %v812_v9  ;;  %780 = vmatpush3.bf16.msra.mxu1 %v812_v9  ;;  %v690_v9 = vunpack.c.h.bf16 %v688_v4 }
  0x27   : > { %758 = vmatmul.mubr.bf16.vlgmr.msra.gmra.mrb[0].mxu0 %v814_v10  ;;  %762 = vmatmul.mubr.bf16.vlgmr.msra.gmra.mrb[0].mxu1 %v816_v11  ;;  %v693_v10 = vunpack.c.l.bf16 %v723_v5  ;;  %v694_v11 = vunpack.c.h.bf16 %v723_v5 }
  0xfa   : > { %v917_v12 = vpop.f32.mrb[0].mxu0  ;;  %v919_v13 = vpop.f32.mrb[0].mxu1 }
  0xfb   : > { %v921_v14 = vpop.f32.mrb[1].mxu0  ;;  %v923_v15 = vpop.f32.mrb[1].mxu1  ;;  %v418_v23 = vmul.f32 %v917_v12, %v917_v12  ;;  %v422_v35 = vmul.f32 %v919_v13, %v919_v13 }
  0xfc   : > { %v925_v16 = vpop.f32.mrb[2].mxu0  ;;  %v927_v17 = vpop.f32.mrb[2].mxu1  ;;  %v416_v20 = vmul.f32 %v921_v14, %v921_v14  ;;  %v420_v29 = vmul.f32 %v923_v15, %v923_v15 }
  0xfd   : > { %v929_v18 = vpop.f32.mrb[3].mxu0  ;;  %v931_v19 = vpop.f32.mrb[3].mxu1  ;;  %v419_v26 = vmul.f32 %v925_v16, %v925_v16  ;;  %v423_v38 = vmul.f32 %v927_v17, %v927_v17 }
  0xfe   : > { %v401_v21 = vadd.f32 %v929_v18, %v921_v14  ;;  %v417_v22 = vmul.f32 %v929_v18, %v929_v18  ;;  %v421_v34 = vmul.f32 %v931_v19, %v931_v19 }
 0x100   : > { %v402_v24 = vadd.f32 %v917_v12, %v401_v21  ;;  %v424_v25 = vadd.f32 %v417_v22, %v416_v20 }
 0x102   : > { %v425_v27 = vadd.f32 %v424_v25, %v418_v23  ;;  %v403_v28 = vadd.f32 %v925_v16, %v402_v24 }
 0x104   : > { %v404_v30 = vadd.f32 %v403_v28, %v923_v15  ;;  %v426_v31 = vadd.f32 %v425_v27, %v419_v26 }
 0x106   : > { %v427_v32 = vadd.f32 %v426_v31, %v420_v29  ;;  %v405_v33 = vadd.f32 %v404_v30, %v931_v19 }
 0x108   : > { %v406_v36 = vadd.f32 %v919_v13, %v405_v33  ;;  %v428_v37 = vadd.f32 %v427_v32, %v421_v34 }
 0x10a   : > { %v407_v39 = vadd.f32 %v927_v17, %v406_v36  ;;  %v429_v40 = vadd.f32 %v428_v37, %v422_v35 }
 0x10c   : > { %v408_v41 = vrot.slane %v407_v39, 4  ;;  %v430_v42 = vadd.f32 %v429_v40, %v423_v38 }
 0x10e   : > { %v409_v43 = vadd.f32 %v408_v41, %v407_v39  ;;  %v431_v44 = vrot.slane %v430_v42, 4 }
 0x110   : > { %v410_v45 = vrot.slane %v409_v43, 2  ;;  %v432_v46 = vadd.f32 %v431_v44, %v430_v42 }
 0x112   : > { %v411_v47 = vadd.f32 %v410_v45, %v409_v43  ;;  %v433_v48 = vrot.slane %v432_v46, 2 }
 0x114   : > { %v412_v49 = vrot.slane %v411_v47, 1  ;;  %v434_v50 = vadd.f32 %v433_v48, %v432_v46 }
 0x116   : > { %v413_v51 = vadd.f32 %v412_v49, %v411_v47  ;;  %v435_v52 = vrot.slane %v434_v50, 1 }
 0x118   : > { %v415_v53 = vmul.f32 0.015625, %v413_v51  ;;  %v436_v54 = vadd.f32 %v435_v52, %v434_v50 }
 0x11a   : > { %v437_v55 = vmul.f32 0.015625, %v436_v54  ;;  %v438_v56 = vmul.f32 %v415_v53, %v415_v53  ;;  %v441_v57 = vsub.f32 %v921_v14, %v415_v53  ;;  %v442_v58 = vsub.f32 %v929_v18, %v415_v53 }
 0x11b   : > { %v443_v59 = vsub.f32 %v917_v12, %v415_v53  ;;  %v444_v60 = vsub.f32 %v925_v16, %v415_v53  ;;  %v445_v61 = vsub.f32 %v923_v15, %v415_v53  ;;  %v446_v62 = vsub.f32 %v931_v19, %v415_v53 }
 0x11c   : > { %v439_v63 = vsub.f32 %v437_v55, %v438_v56  ;;  %v447_v0 = vsub.f32 %v919_v13, %v415_v53  ;;  %v448_v1 = vsub.f32 %v927_v17, %v415_v53  ;;  %v697_v14 = vunpack.c.l.bf16 %v724_v6 }
 0x11d   : > { %v698_v13 = vunpack.c.h.bf16 %v724_v6  ;;  %v701_v15 = vunpack.c.l.bf16 %v725_v7  ;;  %v702_v16 = vunpack.c.h.bf16 %v725_v7 }
 0x11e   : > { %v440_v2 = vmax.f32 %v439_v63, 0.0 }
 0x120   : > { %v449_v3 = vadd.f32 1e-05, %v440_v2 }
 0x122   : > { %817 = vrsqrt.f32 %v449_v3 }
 0x12c   : > { %v818_v12 = vpop.eup %817 }
 0x12d   : > { %v451_v17 = vmul.f32 %v818_v12, %v441_v57  ;;  %v452_v18 = vmul.f32 %v818_v12, %v442_v58  ;;  %v453_v19 = vmul.f32 %v818_v12, %v443_v59  ;;  %v454_v20 = vmul.f32 %v818_v12, %v444_v60 }
 0x12e   : > { %v455_v21 = vmul.f32 %v818_v12, %v445_v61  ;;  %v456_v22 = vmul.f32 %v818_v12, %v446_v62  ;;  %v457_v23 = vmul.f32 %v818_v12, %v447_v0  ;;  %v458_v24 = vmul.f32 %v818_v12, %v448_v1 }
 0x12f   : > { %v475_v25 = vadd.f32 %v689_v8, %v451_v17  ;;  %v476_v26 = vadd.f32 %v690_v9, %v452_v18  ;;  %v477_v27 = vadd.f32 %v693_v10, %v453_v19  ;;  %v478_v28 = vadd.f32 %v694_v11, %v454_v20 }
 0x130   : > { %v479_v29 = vadd.f32 %v697_v14, %v455_v21  ;;  %v480_v30 = vadd.f32 %v698_v13, %v456_v22  ;;  %v481_v31 = vadd.f32 %v701_v15, %v457_v23  ;;  %v482_v32 = vadd.f32 %v702_v16, %v458_v24 }
 0x131   : > { %v483_v33 = vmax.f32 %v475_v25, 0.0  ;;  %v484_v34 = vmax.f32 %v476_v26, 0.0  ;;  %v485_v35 = vmax.f32 %v477_v27, 0.0  ;;  %v486_v36 = vmax.f32 %v478_v28, 0.0 }
 0x132   : > { %v487_v37 = vmax.f32 %v479_v29, 0.0  ;;  %v488_v38 = vmax.f32 %v480_v30, 0.0  ;;  %v489_v39 = vmax.f32 %v481_v31, 0.0  ;;  %v490_v40 = vmax.f32 %v482_v32, 0.0 }
 0x133   : > { %v706_v41 = vpack.c.bf16 %v484_v34, %v483_v33  ;;  %v711_v42 = vpack.c.bf16 %v486_v36, %v485_v35 }
 0x134   : > { %v716_v43 = vpack.c.bf16 %v488_v38, %v487_v37  ;;  %v721_v44 = vpack.c.bf16 %v490_v40, %v489_v39 }
 0x135   : > { %707 = vst [vmem:[%s238_s17] sm:$0xff] %v706_v41   ;;  %726 = vst [vmem:[%s238_s17 + $0x8] sm:$0xff] %v711_v42  }
 0x136   : > { %727 = vst [vmem:[%s238_s17 + $0x10] sm:$0xff] %v716_v43   ;;  %728 = vst [vmem:[%s238_s17 + $0x18] sm:$0xff] %v721_v44  }
 0x137 PF: > { %s13_s14 = sadd.s32 1, %s841_s14   ;;  %s986_s12 = smov %s837_s13 }
 0x138   : > { %p10_p5 = scmp.ge.s32.totalorder %s13_s14, 4   ;;  %s987_s13 = smov %s989_s15 }
 0x13a   :  { %12 = sbr.rel (!%p10_p5) target bundleno = 2 (0x2), region = 68 }

// kernel: forward.34
= control target key start
LH: loop header
LB: loop body
LE: loop exit
PB: predicated region body
PF: predicated region fallthrough
CT: control target
= control target key end

     0   :  { %s565_s9 = smov 0   ;;  %s567_s10 = smov 0   ;;  %s629_s0 = inlined_call_operand.vmem [shape: bf16[2,16,128], index: 0, kind: input, shape index: {}]   ;;  %s630_s1 = inlined_call_operand.vmem [shape: bf16[128,128], index: 1, kind: input, shape index: {}]   ;;  %s631_s2 = inlined_call_operand.vmem [shape: bf16[2,16,128], index: 2, kind: output, shape index: {}]  }
   0x1   :  { %s569_s11 = smov 0  }
   0x2 LB: > { %s24_s12 = sadd.s32 1, %s542_s10  ;;  %p431_p0 = scmp.ge.s32.totalorder %s546_s11, 1  ;;  %s546_s11 = sphi %s569_s11, %s12_s11   ;;  %s542_s10 = sphi %s567_s10, %s633_s10   ;;  %s538_s9 = sphi %s565_s9, %s632_s9  }
   0x3   : > { %p26_p1 = scmp.ge.s32.totalorder %s24_s12, 2  ;;  %p135_p2 = scmp.lt.s32.totalorder %s546_s11, 3 }
   0x5   : > { %s635_s12 = smov (%p26_p1, %s24_s12), 0  ;;  %p136_p3 = pnand %p431_p0, %p135_p2 }
   0x6   : > { %v513_v0 = vld [vmem:[%s630_s1] sm:$0xff] (!%p136_p3)   ;;  %v548_v1 = vmov (!%p136_p3), 0.0   ;;  %v514_v2 = vld [vmem:[%s630_s1 + $0x8] sm:$0xff] (!%p136_p3)   ;;  %vm549_vm0 = vmmov (!%p136_p3), 0   ;;  %p164_p4 = scmp.lt.s32.totalorder (!%p136_p3), %s538_s9, 1  ;;  %v515_v3 = vld [vmem:[%s630_s1 + $0x10] sm:$0xff] (!%p136_p3)  }
   0x7   : > { %139 = sbr.rel (%p136_p3) target bundleno = 293 (0x125), region = 28  ;;  %467 = vmatprep.subr.bf16.mxu0 (!%p136_p3), %v548_v1  ;;  %483 = vmatprep.mubr.msk.bf16.mxu0 (!%p136_p3), %vm549_vm0, %v548_v1  ;;  %v516_v4 = vld [vmem:[%s630_s1 + $0x18] sm:$0xff] (!%p136_p3)   ;;  %v517_v5 = vld [vmem:[%s630_s1 + $0x20] sm:$0xff] (!%p136_p3)   ;;  %v518_v6 = vld [vmem:[%s630_s1 + $0x28] sm:$0xff] (!%p136_p3)  }
   0x8   : > { %468 = vmatpush3.bf16.msra.mxu0 (!%p136_p3), %v513_v0  ;;  %v519_v7 = vld [vmem:[%s630_s1 + $0x30] sm:$0xff] (!%p136_p3)   ;;  %v520_v8 = vld [vmem:[%s630_s1 + $0x38] sm:$0xff] (!%p136_p3)  }
   0x9   : > { %469 = vmatprep.subr.bf16.mxu0 (!%p136_p3), %v548_v1 }
   0xc   : > { %470 = vmatpush3.bf16.msra.mxu0 (!%p136_p3), %v514_v2 }
   0xd   : > { %471 = vmatprep.subr.bf16.mxu0 (!%p136_p3), %v548_v1 }
   0xe   : > { %s637_s9 = smov (!%p164_p4, %s538_s9), 1 }
   0xf   : > { %s449_s19 = sshll.u32 %s637_s9, 3 }
  0x10   : > { %s168_s22 = scalar_lea.vmem %s629_s0, %s449_s19  ;;  %472 = vmatpush3.bf16.msra.mxu0 %v515_v3  ;;  %s180_s7 = scalar_lea.vmem %s631_s2, %s449_s19 }
  0x11   : > { %473 = vmatprep.subr.bf16.mxu0 %v548_v1  ;;  %v521_v9 = vld [vmem:[%s168_s22] sm:$0xff]  }
  0x14   : > { %474 = vmatpush3.bf16.msra.mxu0 %v516_v4 }
  0x15   : > { %475 = vmatprep.subr.bf16.mxu0 %v548_v1 }
  0x18   : > { %476 = vmatpush3.bf16.msra.mxu0 %v517_v5 }
  0x19   : > { %477 = vmatprep.subr.bf16.mxu0 %v548_v1 }
  0x1c   : > { %478 = vmatpush3.bf16.msra.mxu0 %v518_v6 }
  0x1d   : > { %479 = vmatprep.subr.bf16.mxu0 %v548_v1 }
  0x20   : > { %480 = vmatpush3.bf16.msra.mxu0 %v519_v7 }
  0x21   : > { %481 = vmatprep.subr.bf16.mxu0 %v548_v1 }
  0x24   : > { %482 = vmatpush3.bf16.msra.mxu0 %v520_v8 }
  0x27   : > { %484 = vmatmul.mubr.bf16.vlgmr.msra.gmra.mrb[0].mxu0 %v521_v9 }
  0xfa   : > { %v288_v10 = vpop.f32.mrb[0].mxu0 }
  0xfb   : > { %v485_v11 = vpop.f32.mrb[1].mxu0  ;;  %v304_v13 = vmul.f32 %v288_v10, %v288_v10 }
  0xfc   : > { %v291_v12 = vpop.f32.mrb[2].mxu0 }
  0xfd   : > { %v295_v14 = vadd.f32 %v291_v12, %v288_v10  ;;  %v305_v15 = vmul.f32 %v291_v12, %v291_v12  ;;  %v486_v16 = vpop.f32.mrb[3].mxu0 }
  0xff   : > { %v296_v17 = vrot.slane %v295_v14, 4  ;;  %v306_v18 = vadd.f32 %v305_v15, %v304_v13 }
 0x101   : > { %v297_v19 = vadd.f32 %v296_v17, %v295_v14  ;;  %v307_v20 = vrot.slane %v306_v18, 4 }
 0x103   : > { %v298_v21 = vrot.slane %v297_v19, 2  ;;  %v308_v22 = vadd.f32 %v307_v20, %v306_v18 }
 0x105   : > { %v299_v23 = vadd.f32 %v298_v21, %v297_v19  ;;  %v309_v24 = vrot.slane %v308_v22, 2 }
 0x107   : > { %v300_v25 = vrot.slane %v299_v23, 1  ;;  %v310_v26 = vadd.f32 %v309_v24, %v308_v22 }
 0x109   : > { %v301_v27 = vadd.f32 %v300_v25, %v299_v23  ;;  %v311_v28 = vrot.slane %v310_v26, 1 }
 0x10b   : > { %v303_v29 = vmul.f32 0.0625, %v301_v27  ;;  %v312_v30 = vadd.f32 %v311_v28, %v310_v26 }
 0x10d   : > { %v313_v31 = vmul.f32 0.0625, %v312_v30  ;;  %v314_v32 = vmul.f32 %v303_v29, %v303_v29  ;;  %v317_v33 = vsub.f32 %v288_v10, %v303_v29  ;;  %v318_v34 = vsub.f32 %v291_v12, %v303_v29 }
 0x10f   : > { %v315_v35 = vsub.f32 %v313_v31, %v314_v32 }
 0x111   : > { %v316_v36 = vmax.f32 %v315_v35, 0.0 }
 0x113   : > { %v319_v37 = vadd.f32 1e-05, %v316_v36 }
 0x115   : > { %522 = vrsqrt.f32 %v319_v37 }
 0x11f   : > { %v523_v38 = vpop.eup %522 }
 0x120   : > { %v321_v39 = vmul.f32 %v523_v38, %v317_v33  ;;  %v322_v40 = vmul.f32 %v523_v38, %v318_v34 }
 0x122   : > { %v456_v41 = vpack.c.bf16 %v322_v40, %v321_v39 }
 0x124   : > { %457 = vst [vmem:[%s180_s7] sm:$0xff] %v456_v41  }
 0x125 PF: > { %s12_s11 = sadd.s32 1, %s546_s11   ;;  %s632_s9 = smov %s542_s10 }
 0x126   : > { %p9_p5 = scmp.ge.s32.totalorder %s12_s11, 4   ;;  %s633_s10 = smov %s635_s12 }
 0x128   :  { %11 = sbr.rel (!%p9_p5) target bundleno = 2 (0x2), region = 61 }

// kernel: forward.33
= control target key start
LH: loop header
LB: loop body
LE: loop exit
PB: predicated region body
PF: predicated region fallthrough
CT: control target
= control target key end

     0   :  { %s567_s9 = smov 0   ;;  %s569_s10 = smov 0   ;;  %s631_s0 = inlined_call_operand.vmem [shape: bf16[2,16,128], index: 0, kind: input, shape index: {}]   ;;  %s632_s1 = inlined_call_operand.vmem [shape: bf16[128,128], index: 1, kind: input, shape index: {}]   ;;  %s633_s2 = inlined_call_operand.vmem [shape: bf16[2,16,128], index: 2, kind: output, shape index: {}]  }
   0x1   :  { %s571_s11 = smov 0  }
   0x2 LB: > { %s24_s12 = sadd.s32 1, %s544_s10  ;;  %p433_p0 = scmp.ge.s32.totalorder %s548_s11, 1  ;;  %s548_s11 = sphi %s571_s11, %s12_s11   ;;  %s544_s10 = sphi %s569_s10, %s635_s10   ;;  %s540_s9 = sphi %s567_s9, %s634_s9  }
   0x3   : > { %p26_p1 = scmp.ge.s32.totalorder %s24_s12, 2  ;;  %p135_p2 = scmp.lt.s32.totalorder %s548_s11, 3 }
   0x5   : > { %s637_s12 = smov (%p26_p1, %s24_s12), 0  ;;  %p136_p3 = pnand %p433_p0, %p135_p2 }
   0x6   : > { %v515_v0 = vld [vmem:[%s632_s1] sm:$0xff] (!%p136_p3)   ;;  %v550_v1 = vmov (!%p136_p3), 0.0   ;;  %v516_v2 = vld [vmem:[%s632_s1 + $0x8] sm:$0xff] (!%p136_p3)   ;;  %vm551_vm0 = vmmov (!%p136_p3), 0   ;;  %p164_p4 = scmp.lt.s32.totalorder (!%p136_p3), %s540_s9, 1  ;;  %v517_v3 = vld [vmem:[%s632_s1 + $0x10] sm:$0xff] (!%p136_p3)  }
   0x7   : > { %139 = sbr.rel (%p136_p3) target bundleno = 295 (0x127), region = 28  ;;  %469 = vmatprep.subr.bf16.mxu0 (!%p136_p3), %v550_v1  ;;  %485 = vmatprep.mubr.msk.bf16.mxu0 (!%p136_p3), %vm551_vm0, %v550_v1  ;;  %v518_v4 = vld [vmem:[%s632_s1 + $0x18] sm:$0xff] (!%p136_p3)   ;;  %v519_v5 = vld [vmem:[%s632_s1 + $0x20] sm:$0xff] (!%p136_p3)   ;;  %v520_v6 = vld [vmem:[%s632_s1 + $0x28] sm:$0xff] (!%p136_p3)  }
   0x8   : > { %470 = vmatpush3.bf16.msra.mxu0 (!%p136_p3), %v515_v0  ;;  %v521_v7 = vld [vmem:[%s632_s1 + $0x30] sm:$0xff] (!%p136_p3)   ;;  %v522_v8 = vld [vmem:[%s632_s1 + $0x38] sm:$0xff] (!%p136_p3)  }
   0x9   : > { %471 = vmatprep.subr.bf16.mxu0 (!%p136_p3), %v550_v1 }
   0xc   : > { %472 = vmatpush3.bf16.msra.mxu0 (!%p136_p3), %v516_v2 }
   0xd   : > { %473 = vmatprep.subr.bf16.mxu0 (!%p136_p3), %v550_v1 }
   0xe   : > { %s639_s9 = smov (!%p164_p4, %s540_s9), 1 }
   0xf   : > { %s451_s19 = sshll.u32 %s639_s9, 3 }
  0x10   : > { %s168_s22 = scalar_lea.vmem %s631_s0, %s451_s19  ;;  %474 = vmatpush3.bf16.msra.mxu0 %v517_v3  ;;  %s180_s7 = scalar_lea.vmem %s633_s2, %s451_s19 }
  0x11   : > { %475 = vmatprep.subr.bf16.mxu0 %v550_v1  ;;  %v523_v9 = vld [vmem:[%s168_s22] sm:$0xff]  }
  0x14   : > { %476 = vmatpush3.bf16.msra.mxu0 %v518_v4 }
  0x15   : > { %477 = vmatprep.subr.bf16.mxu0 %v550_v1 }
  0x18   : > { %478 = vmatpush3.bf16.msra.mxu0 %v519_v5 }
  0x19   : > { %479 = vmatprep.subr.bf16.mxu0 %v550_v1 }
  0x1c   : > { %480 = vmatpush3.bf16.msra.mxu0 %v520_v6 }
  0x1d   : > { %481 = vmatprep.subr.bf16.mxu0 %v550_v1 }
  0x20   : > { %482 = vmatpush3.bf16.msra.mxu0 %v521_v7 }
  0x21   : > { %483 = vmatprep.subr.bf16.mxu0 %v550_v1 }
  0x24   : > { %484 = vmatpush3.bf16.msra.mxu0 %v522_v8 }
  0x27   : > { %486 = vmatmul.mubr.bf16.vlgmr.msra.gmra.mrb[0].mxu0 %v523_v9 }
  0xfa   : > { %v288_v10 = vpop.f32.mrb[0].mxu0 }
  0xfb   : > { %v487_v11 = vpop.f32.mrb[1].mxu0  ;;  %v304_v13 = vmul.f32 %v288_v10, %v288_v10 }
  0xfc   : > { %v291_v12 = vpop.f32.mrb[2].mxu0 }
  0xfd   : > { %v295_v14 = vadd.f32 %v291_v12, %v288_v10  ;;  %v305_v15 = vmul.f32 %v291_v12, %v291_v12  ;;  %v488_v16 = vpop.f32.mrb[3].mxu0 }
  0xff   : > { %v296_v17 = vrot.slane %v295_v14, 4  ;;  %v306_v18 = vadd.f32 %v305_v15, %v304_v13 }
 0x101   : > { %v297_v19 = vadd.f32 %v296_v17, %v295_v14  ;;  %v307_v20 = vrot.slane %v306_v18, 4 }
 0x103   : > { %v298_v21 = vrot.slane %v297_v19, 2  ;;  %v308_v22 = vadd.f32 %v307_v20, %v306_v18 }
 0x105   : > { %v299_v23 = vadd.f32 %v298_v21, %v297_v19  ;;  %v309_v24 = vrot.slane %v308_v22, 2 }
 0x107   : > { %v300_v25 = vrot.slane %v299_v23, 1  ;;  %v310_v26 = vadd.f32 %v309_v24, %v308_v22 }
 0x109   : > { %v301_v27 = vadd.f32 %v300_v25, %v299_v23  ;;  %v311_v28 = vrot.slane %v310_v26, 1 }
 0x10b   : > { %v303_v29 = vmul.f32 0.0625, %v301_v27  ;;  %v312_v30 = vadd.f32 %v311_v28, %v310_v26 }
 0x10d   : > { %v313_v31 = vmul.f32 0.0625, %v312_v30  ;;  %v314_v32 = vmul.f32 %v303_v29, %v303_v29  ;;  %v317_v33 = vsub.f32 %v288_v10, %v303_v29  ;;  %v318_v34 = vsub.f32 %v291_v12, %v303_v29 }
 0x10f   : > { %v315_v35 = vsub.f32 %v313_v31, %v314_v32 }
 0x111   : > { %v316_v36 = vmax.f32 %v315_v35, 0.0 }
 0x113   : > { %v319_v37 = vadd.f32 1e-05, %v316_v36 }
 0x115   : > { %524 = vrsqrt.f32 %v319_v37 }
 0x11f   : > { %v525_v38 = vpop.eup %524 }
 0x120   : > { %v321_v39 = vmul.f32 %v525_v38, %v317_v33  ;;  %v322_v40 = vmul.f32 %v525_v38, %v318_v34 }
 0x122   : > { %v323_v41 = vmax.f32 %v321_v39, 0.0  ;;  %v324_v42 = vmax.f32 %v322_v40, 0.0 }
 0x124   : > { %v458_v43 = vpack.c.bf16 %v324_v42, %v323_v41 }
 0x126   : > { %459 = vst [vmem:[%s180_s7] sm:$0xff] %v458_v43  }
 0x127 PF: > { %s12_s11 = sadd.s32 1, %s548_s11   ;;  %s634_s9 = smov %s544_s10 }
 0x128   : > { %p9_p5 = scmp.ge.s32.totalorder %s12_s11, 4   ;;  %s635_s10 = smov %s637_s12 }
 0x12a   :  { %11 = sbr.rel (!%p9_p5) target bundleno = 2 (0x2), region = 61 }

// kernel: forward.36
= control target key start
LH: loop header
LB: loop body
LE: loop exit
PB: predicated region body
PF: predicated region fallthrough
CT: control target
= control target key end

     0   :  { %s643_s9 = smov 0   ;;  %s645_s10 = smov 0   ;;  %s728_s0 = inlined_call_operand.vmem [shape: bf16[2,16,256], index: 0, kind: input, shape index: {}]   ;;  %s729_s1 = inlined_call_operand.vmem [shape: bf16[256,128], index: 1, kind: input, shape index: {}]   ;;  %s730_s2 = inlined_call_operand.vmem [shape: bf16[2,16,128], index: 2, kind: output, shape index: {}]  }
   0x1   :  { %s647_s11 = smov 0  }
   0x2 LB: > { %s24_s12 = sadd.s32 1, %s622_s10  ;;  %p501_p0 = scmp.ge.s32.totalorder %s626_s11, 1  ;;  %s626_s11 = sphi %s647_s11, %s12_s11   ;;  %s622_s10 = sphi %s645_s10, %s732_s10   ;;  %s618_s9 = sphi %s643_s9, %s731_s9  }
   0x3   : > { %p26_p1 = scmp.ge.s32.totalorder %s24_s12, 2  ;;  %p135_p2 = scmp.lt.s32.totalorder %s626_s11, 3 }
   0x5   : > { %s734_s12 = smov (%p26_p1, %s24_s12), 0  ;;  %p136_p3 = pnand %p501_p0, %p135_p2 }
   0x6   : > { %v583_v0 = vld [vmem:[%s729_s1 + $0x40] sm:$0xff] (!%p136_p3)   ;;  %v585_v2 = vld [vmem:[%s729_s1 + $0x48] sm:$0xff] (!%p136_p3)   ;;  %p164_p4 = scmp.lt.s32.totalorder (!%p136_p3), %s618_s9, 1  ;;  %v587_v4 = vld [vmem:[%s729_s1 + $0x50] sm:$0xff] (!%p136_p3)  }
   0x7   : > { %139 = sbr.rel (%p136_p3) target bundleno = 298 (0x12a), region = 28  ;;  %v584_v1 = vld [vmem:[%s729_s1] sm:$0xff] (!%p136_p3)   ;;  %537 = vmatprep.subr.bf16.mxu0 (!%p136_p3), %v583_v0  ;;  %v586_v3 = vld [vmem:[%s729_s1 + $0x8] sm:$0xff] (!%p136_p3)   ;;  %v588_v5 = vld [vmem:[%s729_s1 + $0x10] sm:$0xff] (!%p136_p3)  }
   0x8   : > { %538 = vmatpush3.bf16.msra.mxu0 (!%p136_p3), %v584_v1  ;;  %v589_v6 = vld [vmem:[%s729_s1 + $0x58] sm:$0xff] (!%p136_p3)   ;;  %v591_v8 = vld [vmem:[%s729_s1 + $0x60] sm:$0xff] (!%p136_p3)   ;;  %v593_v10 = vld [vmem:[%s729_s1 + $0x68] sm:$0xff] (!%p136_p3)  }
   0x9   : > { %539 = vmatprep.subr.bf16.mxu0 (!%p136_p3), %v585_v2  ;;  %v590_v7 = vld [vmem:[%s729_s1 + $0x18] sm:$0xff] (!%p136_p3)   ;;  %v592_v9 = vld [vmem:[%s729_s1 + $0x20] sm:$0xff] (!%p136_p3)   ;;  %v594_v12 = vld [vmem:[%s729_s1 + $0x28] sm:$0xff] (!%p136_p3)  }
   0xa   : > { %v595_v13 = vld [vmem:[%s729_s1 + $0x70] sm:$0xff] (!%p136_p3)   ;;  %v597_v15 = vld [vmem:[%s729_s1 + $0x78] sm:$0xff] (!%p136_p3)  }
   0xb   : > { %v596_v14 = vld [vmem:[%s729_s1 + $0x30] sm:$0xff] (!%p136_p3)   ;;  %v598_v16 = vld [vmem:[%s729_s1 + $0x38] sm:$0xff] (!%p136_p3)  }
   0xc   : > { %540 = vmatpush3.bf16.msra.mxu0 (!%p136_p3), %v586_v3 }
   0xd   : > { %541 = vmatprep.subr.bf16.mxu0 (!%p136_p3), %v587_v4 }
   0xe   : > { %s736_s9 = smov (!%p164_p4, %s618_s9), 1 }
   0xf   : > { %s528_s29 = sshll.u32 %s736_s9, 4  ;;  %s529_s25 = sshll.u32 %s736_s9, 3 }
  0x10   : > { %542 = vmatpush3.bf16.msra.mxu0 %v588_v5  ;;  %s168_s6 = scalar_lea.vmem %s728_s0, %s528_s29  ;;  %s180_s28 = scalar_lea.vmem %s730_s2, %s529_s25 }
  0x11   : > { %543 = vmatprep.subr.bf16.mxu0 %v589_v6  ;;  %v601_v11 = vld [vmem:[%s168_s6 + $0x4] ss:$8 sps:$4 sm:$0xff]   ;;  %v599_v17 = vld [vmem:[%s168_s6] ss:$8 sps:$4 sm:$0xff]  }
  0x12   : > { %354 = vmatprep.mubr.bf16.mxu0 %v601_v11 }
  0x14   : > { %544 = vmatpush3.bf16.msra.mxu0 %v590_v7 }
  0x15   : > { %545 = vmatprep.subr.bf16.mxu0 %v591_v8 }
  0x18   : > { %546 = vmatpush3.bf16.msra.mxu0 %v592_v9 }
  0x19   : > { %547 = vmatprep.subr.bf16.mxu0 %v593_v10 }
  0x1c   : > { %548 = vmatpush3.bf16.msra.mxu0 %v594_v12 }
  0x1d   : > { %549 = vmatprep.subr.bf16.mxu0 %v595_v13 }
  0x20   : > { %550 = vmatpush3.bf16.msra.mxu0 %v596_v14 }
  0x21   : > { %551 = vmatprep.subr.bf16.mxu0 %v597_v15 }
  0x24   : > { %552 = vmatpush3.bf16.msra.mxu0 %v598_v16 }
  0x27   : > { %355 = vmatmul.mubr.bf16.vlgmr.msra.gmra.mrb[0].mxu0 %v599_v17 }
  0xfa   : > { %v553_v18 = vpop.f32.mrb[0].mxu0 }
  0xfb   : > { %v554_v19 = vpop.f32.mrb[1].mxu0 }
  0xfc   : > { %v555_v20 = vadd.f32 %v554_v19, %v553_v18  ;;  %v556_v21 = vpop.f32.mrb[2].mxu0 }
  0xfd   : > { %v557_v22 = vpop.f32.mrb[3].mxu0 }
  0xfe   : > { %v558_v23 = vadd.f32 %v557_v22, %v556_v21  ;;  %v372_v24 = vmul.f32 %v555_v20, %v555_v20 }
 0x100   : > { %v363_v25 = vadd.f32 %v558_v23, %v555_v20  ;;  %v373_v26 = vmul.f32 %v558_v23, %v558_v23 }
 0x102   : > { %v364_v27 = vrot.slane %v363_v25, 4  ;;  %v374_v28 = vadd.f32 %v373_v26, %v372_v24 }
 0x104   : > { %v365_v29 = vadd.f32 %v364_v27, %v363_v25  ;;  %v375_v30 = vrot.slane %v374_v28, 4 }
 0x106   : > { %v366_v31 = vrot.slane %v365_v29, 2  ;;  %v376_v32 = vadd.f32 %v375_v30, %v374_v28 }
 0x108   : > { %v367_v33 = vadd.f32 %v366_v31, %v365_v29  ;;  %v377_v34 = vrot.slane %v376_v32, 2 }
 0x10a   : > { %v368_v35 = vrot.slane %v367_v33, 1  ;;  %v378_v36 = vadd.f32 %v377_v34, %v376_v32 }
 0x10c   : > { %v369_v37 = vadd.f32 %v368_v35, %v367_v33  ;;  %v379_v38 = vrot.slane %v378_v36, 1 }
 0x10e   : > { %v371_v39 = vmul.f32 0.0625, %v369_v37  ;;  %v380_v40 = vadd.f32 %v379_v38, %v378_v36 }
 0x110   : > { %v381_v41 = vmul.f32 0.0625, %v380_v40  ;;  %v382_v42 = vmul.f32 %v371_v39, %v371_v39  ;;  %v385_v43 = vsub.f32 %v555_v20, %v371_v39  ;;  %v386_v44 = vsub.f32 %v558_v23, %v371_v39 }
 0x112   : > { %v383_v45 = vsub.f32 %v381_v41, %v382_v42 }
 0x114   : > { %v384_v46 = vmax.f32 %v383_v45, 0.0 }
 0x116   : > { %v387_v47 = vadd.f32 1e-05, %v384_v46 }
 0x118   : > { %602 = vrsqrt.f32 %v387_v47 }
 0x122   : > { %v603_v48 = vpop.eup %602 }
 0x123   : > { %v389_v49 = vmul.f32 %v603_v48, %v385_v43  ;;  %v390_v50 = vmul.f32 %v603_v48, %v386_v44 }
 0x125   : > { %v391_v51 = vmax.f32 %v389_v49, 0.0  ;;  %v392_v52 = vmax.f32 %v390_v50, 0.0 }
 0x127   : > { %v535_v53 = vpack.c.bf16 %v392_v52, %v391_v51 }
 0x129   : > { %536 = vst [vmem:[%s180_s28] sm:$0xff] %v535_v53  }
 0x12a PF: > { %s12_s11 = sadd.s32 1, %s626_s11   ;;  %s731_s9 = smov %s622_s10 }
 0x12b   : > { %p9_p5 = scmp.ge.s32.totalorder %s12_s11, 4   ;;  %s732_s10 = smov %s734_s12 }
 0x12d   :  { %11 = sbr.rel (!%p9_p5) target bundleno = 2 (0x2), region = 61 }

// kernel: forward.35
= control target key start
LH: loop header
LB: loop body
LE: loop exit
PB: predicated region body
PF: predicated region fallthrough
CT: control target
= control target key end

     0   :  { %s737_s12 = smov 0   ;;  %s739_s13 = smov 0   ;;  %s825_s0 = inlined_call_operand.vmem [shape: bf16[2,16,256], index: 0, kind: input, shape index: {}]   ;;  %s826_s1 = inlined_call_operand.vmem [shape: bf16[256,128], index: 1, kind: input, shape index: {}]   ;;  %s827_s2 = inlined_call_operand.vmem [shape: bf16[2,16,128], index: 2, kind: input, shape index: {}]   ;;  %s828_s3 = inlined_call_operand.vmem [shape: bf16[2,16,128], index: 3, kind: output, shape index: {}]  }
   0x1   :  { %s741_s14 = smov 0  }
   0x2 LB: > { %s25_s15 = sadd.s32 1, %s711_s13  ;;  %p583_p0 = scmp.ge.s32.totalorder %s715_s14, 1  ;;  %s715_s14 = sphi %s741_s14, %s13_s14   ;;  %s711_s13 = sphi %s739_s13, %s830_s13   ;;  %s707_s12 = sphi %s737_s12, %s829_s12  }
   0x3   : > { %p27_p1 = scmp.ge.s32.totalorder %s25_s15, 2  ;;  %p175_p2 = scmp.lt.s32.totalorder %s715_s14, 3 }
   0x5   : > { %s832_s15 = smov (%p27_p1, %s25_s15), 0  ;;  %p176_p3 = pnand %p583_p0, %p175_p2 }
   0x6   : > { %v672_v0 = vld [vmem:[%s826_s1 + $0x40] sm:$0xff] (!%p176_p3)   ;;  %v674_v2 = vld [vmem:[%s826_s1 + $0x48] sm:$0xff] (!%p176_p3)   ;;  %p214_p4 = scmp.lt.s32.totalorder (!%p176_p3), %s707_s12, 1  ;;  %v676_v4 = vld [vmem:[%s826_s1 + $0x50] sm:$0xff] (!%p176_p3)  }
   0x7   : > { %179 = sbr.rel (%p176_p3) target bundleno = 300 (0x12c), region = 32  ;;  %v673_v1 = vld [vmem:[%s826_s1] sm:$0xff] (!%p176_p3)   ;;  %626 = vmatprep.subr.bf16.mxu0 (!%p176_p3), %v672_v0  ;;  %v675_v3 = vld [vmem:[%s826_s1 + $0x8] sm:$0xff] (!%p176_p3)   ;;  %v677_v5 = vld [vmem:[%s826_s1 + $0x10] sm:$0xff] (!%p176_p3)  }
   0x8   : > { %627 = vmatpush3.bf16.msra.mxu0 (!%p176_p3), %v673_v1  ;;  %v678_v6 = vld [vmem:[%s826_s1 + $0x58] sm:$0xff] (!%p176_p3)   ;;  %v680_v8 = vld [vmem:[%s826_s1 + $0x60] sm:$0xff] (!%p176_p3)   ;;  %v682_v10 = vld [vmem:[%s826_s1 + $0x68] sm:$0xff] (!%p176_p3)  }
   0x9   : > { %628 = vmatprep.subr.bf16.mxu0 (!%p176_p3), %v674_v2  ;;  %v679_v7 = vld [vmem:[%s826_s1 + $0x18] sm:$0xff] (!%p176_p3)   ;;  %v681_v9 = vld [vmem:[%s826_s1 + $0x20] sm:$0xff] (!%p176_p3)   ;;  %v683_v12 = vld [vmem:[%s826_s1 + $0x28] sm:$0xff] (!%p176_p3)  }
   0xa   : > { %v684_v13 = vld [vmem:[%s826_s1 + $0x70] sm:$0xff] (!%p176_p3)   ;;  %v686_v15 = vld [vmem:[%s826_s1 + $0x78] sm:$0xff] (!%p176_p3)  }
   0xb   : > { %v685_v14 = vld [vmem:[%s826_s1 + $0x30] sm:$0xff] (!%p176_p3)   ;;  %v687_v16 = vld [vmem:[%s826_s1 + $0x38] sm:$0xff] (!%p176_p3)  }
   0xc   : > { %629 = vmatpush3.bf16.msra.mxu0 (!%p176_p3), %v675_v3 }
   0xd   : > { %630 = vmatprep.subr.bf16.mxu0 (!%p176_p3), %v676_v4 }
   0xe   : > { %s834_s12 = smov (!%p214_p4, %s707_s12), 1 }
   0xf   : > { %s612_s5 = sshll.u32 %s834_s12, 4  ;;  %s613_s29 = sshll.u32 %s834_s12, 3 }
  0x10   : > { %631 = vmatpush3.bf16.msra.mxu0 %v677_v5  ;;  %s218_s10 = scalar_lea.vmem %s825_s0, %s612_s5  ;;  %s230_s5 = scalar_lea.vmem %s827_s2, %s613_s29 }
  0x11   : > { %632 = vmatprep.subr.bf16.mxu0 %v678_v6  ;;  %v690_v11 = vld [vmem:[%s218_s10 + $0x4] ss:$8 sps:$4 sm:$0xff]   ;;  %v688_v17 = vld [vmem:[%s218_s10] ss:$8 sps:$4 sm:$0xff]   ;;  %s238_s8 = scalar_lea.vmem %s828_s3, %s613_s29 }
  0x12   : > { %412 = vmatprep.mubr.bf16.mxu0 %v690_v11  ;;  %v618_v48 = vld [vmem:[%s230_s5] sm:$0xff]  }
  0x13   : > { %v619_v49 = vunpack.c.l.bf16 %v618_v48  ;;  %v620_v50 = vunpack.c.h.bf16 %v618_v48 }
  0x14   : > { %633 = vmatpush3.bf16.msra.mxu0 %v679_v7 }
  0x15   : > { %634 = vmatprep.subr.bf16.mxu0 %v680_v8 }
  0x18   : > { %635 = vmatpush3.bf16.msra.mxu0 %v681_v9 }
  0x19   : > { %636 = vmatprep.subr.bf16.mxu0 %v682_v10 }
  0x1c   : > { %637 = vmatpush3.bf16.msra.mxu0 %v683_v12 }
  0x1d   : > { %638 = vmatprep.subr.bf16.mxu0 %v684_v13 }
  0x20   : > { %639 = vmatpush3.bf16.msra.mxu0 %v685_v14 }
  0x21   : > { %640 = vmatprep.subr.bf16.mxu0 %v686_v15 }
  0x24   : > { %641 = vmatpush3.bf16.msra.mxu0 %v687_v16 }
  0x27   : > { %413 = vmatmul.mubr.bf16.vlgmr.msra.gmra.mrb[0].mxu0 %v688_v17 }
  0xfa   : > { %v642_v18 = vpop.f32.mrb[0].mxu0 }
  0xfb   : > { %v643_v19 = vpop.f32.mrb[1].mxu0 }
  0xfc   : > { %v644_v20 = vadd.f32 %v643_v19, %v642_v18  ;;  %v645_v21 = vpop.f32.mrb[2].mxu0 }
  0xfd   : > { %v646_v22 = vpop.f32.mrb[3].mxu0 }
  0xfe   : > { %v647_v23 = vadd.f32 %v646_v22, %v645_v21  ;;  %v430_v24 = vmul.f32 %v644_v20, %v644_v20 }
 0x100   : > { %v421_v25 = vadd.f32 %v647_v23, %v644_v20  ;;  %v431_v26 = vmul.f32 %v647_v23, %v647_v23 }
 0x102   : > { %v422_v27 = vrot.slane %v421_v25, 4  ;;  %v432_v28 = vadd.f32 %v431_v26, %v430_v24 }
 0x104   : > { %v423_v29 = vadd.f32 %v422_v27, %v421_v25  ;;  %v433_v30 = vrot.slane %v432_v28, 4 }
 0x106   : > { %v424_v31 = vrot.slane %v423_v29, 2  ;;  %v434_v32 = vadd.f32 %v433_v30, %v432_v28 }
 0x108   : > { %v425_v33 = vadd.f32 %v424_v31, %v423_v29  ;;  %v435_v34 = vrot.slane %v434_v32, 2 }
 0x10a   : > { %v426_v35 = vrot.slane %v425_v33, 1  ;;  %v436_v36 = vadd.f32 %v435_v34, %v434_v32 }
 0x10c   : > { %v427_v37 = vadd.f32 %v426_v35, %v425_v33  ;;  %v437_v38 = vrot.slane %v436_v36, 1 }
 0x10e   : > { %v429_v39 = vmul.f32 0.0625, %v427_v37  ;;  %v438_v40 = vadd.f32 %v437_v38, %v436_v36 }
 0x110   : > { %v439_v41 = vmul.f32 0.0625, %v438_v40  ;;  %v440_v42 = vmul.f32 %v429_v39, %v429_v39  ;;  %v443_v43 = vsub.f32 %v644_v20, %v429_v39  ;;  %v444_v44 = vsub.f32 %v647_v23, %v429_v39 }
 0x112   : > { %v441_v45 = vsub.f32 %v439_v41, %v440_v42 }
 0x114   : > { %v442_v46 = vmax.f32 %v441_v45, 0.0 }
 0x116   : > { %v445_v47 = vadd.f32 1e-05, %v442_v46 }
 0x118   : > { %691 = vrsqrt.f32 %v445_v47 }
 0x122   : > { %v692_v51 = vpop.eup %691 }
 0x123   : > { %v447_v52 = vmul.f32 %v692_v51, %v443_v43  ;;  %v448_v53 = vmul.f32 %v692_v51, %v444_v44 }
 0x125   : > { %v453_v54 = vadd.f32 %v619_v49, %v447_v52  ;;  %v454_v55 = vadd.f32 %v620_v50, %v448_v53 }
 0x127   : > { %v455_v56 = vmax.f32 %v453_v54, 0.0  ;;  %v456_v57 = vmax.f32 %v454_v55, 0.0 }
 0x129   : > { %v624_v58 = vpack.c.bf16 %v456_v57, %v455_v56 }
 0x12b   : > { %625 = vst [vmem:[%s238_s8] sm:$0xff] %v624_v58  }
 0x12c PF: > { %s13_s14 = sadd.s32 1, %s715_s14   ;;  %s829_s12 = smov %s711_s13 }
 0x12d   : > { %p10_p5 = scmp.ge.s32.totalorder %s13_s14, 4   ;;  %s830_s13 = smov %s832_s15 }
 0x12f   :  { %12 = sbr.rel (!%p10_p5) target bundleno = 2 (0x2), region = 68 }

// kernel: forward.39
= control target key start
LH: loop header
LB: loop body
LE: loop exit
PB: predicated region body
PF: predicated region fallthrough
CT: control target
= control target key end

     0   :  { %s521_s9 = smov 0   ;;  %s523_s10 = smov 0   ;;  %s589_s0 = inlined_call_operand.vmem [shape: bf16[2,4,128], index: 0, kind: input, shape index: {}]   ;;  %s590_s1 = inlined_call_operand.vmem [shape: bf16[128,128], index: 1, kind: input, shape index: {}]   ;;  %s591_s2 = inlined_call_operand.vmem [shape: bf16[2,4,128], index: 2, kind: output, shape index: {}]  }
   0x1   :  { %s525_s11 = smov 0  }
   0x2 LB: > { %s24_s12 = sadd.s32 1, %s498_s10  ;;  %p402_p0 = scmp.ge.s32.totalorder %s502_s11, 1  ;;  %s502_s11 = sphi %s525_s11, %s12_s11   ;;  %s498_s10 = sphi %s523_s10, %s593_s10   ;;  %s494_s9 = sphi %s521_s9, %s592_s9  }
   0x3   : > { %p26_p1 = scmp.ge.s32.totalorder %s24_s12, 2  ;;  %p134_p2 = scmp.lt.s32.totalorder %s502_s11, 3 }
   0x5   : > { %s595_s12 = smov (%p26_p1, %s24_s12), 0  ;;  %p135_p3 = pnand %p402_p0, %p134_p2 }
   0x6   : > { %v470_v0 = vld [vmem:[%s590_s1] sm:$0xff] (!%p135_p3)   ;;  %v504_v1 = vmov (!%p135_p3), 0.0   ;;  %v471_v2 = vld [vmem:[%s590_s1 + $0x8] sm:$0xff] (!%p135_p3)   ;;  %vm505_vm0 = vmmov (!%p135_p3), 0   ;;  %v472_v3 = vld [vmem:[%s590_s1 + $0x10] sm:$0xff] (!%p135_p3)   ;;  %p161_p4 = scmp.lt.s32.totalorder (!%p135_p3), %s494_s9, 1 }
   0x7   : > { %138 = sbr.rel (%p135_p3) target bundleno = 290 (0x122), region = 28  ;;  %424 = vmatprep.subr.bf16.mxu0 (!%p135_p3), %v504_v1  ;;  %440 = vmatprep.mubr.msk.bf16.mxu0 (!%p135_p3), %vm505_vm0, %v504_v1  ;;  %v473_v4 = vld [vmem:[%s590_s1 + $0x18] sm:$0xff] (!%p135_p3)   ;;  %v474_v5 = vld [vmem:[%s590_s1 + $0x20] sm:$0xff] (!%p135_p3)   ;;  %v475_v6 = vld [vmem:[%s590_s1 + $0x28] sm:$0xff] (!%p135_p3)   ;;  %vm282_vm1 = vcmask (!%p135_p3), 1043456  }
   0x8   : > { %425 = vmatpush3.bf16.msra.mxu0 (!%p135_p3), %v470_v0  ;;  %v476_v7 = vld [vmem:[%s590_s1 + $0x30] sm:$0xff] (!%p135_p3)   ;;  %v477_v8 = vld [vmem:[%s590_s1 + $0x38] sm:$0xff] (!%p135_p3)  }
   0x9   : > { %426 = vmatprep.subr.bf16.mxu0 (!%p135_p3), %v504_v1 }
   0xc   : > { %427 = vmatpush3.bf16.msra.mxu0 (!%p135_p3), %v471_v2 }
   0xd   : > { %428 = vmatprep.subr.bf16.mxu0 (!%p135_p3), %v504_v1 }
   0xe   : > { %s597_s9 = smov (!%p161_p4, %s494_s9), 1 }
   0xf   : > { %s403_s27 = sshll.u32 %s597_s9, 1 }
  0x10   : > { %429 = vmatpush3.bf16.msra.mxu0 %v472_v3  ;;  %s164_s4 = scalar_lea.vmem %s589_s0, %s403_s27  ;;  %s175_s7 = scalar_lea.vmem %s591_s2, %s403_s27 }
  0x11   : > { %430 = vmatprep.subr.bf16.mxu0 %v504_v1  ;;  %v177_v9 = vld [vmem:[%s164_s4] sm:$0x3] }
  0x14   : > { %431 = vmatpush3.bf16.msra.mxu0 %v473_v4 }
  0x15   : > { %432 = vmatprep.subr.bf16.mxu0 %v504_v1 }
  0x18   : > { %433 = vmatpush3.bf16.msra.mxu0 %v474_v5 }
  0x19   : > { %434 = vmatprep.subr.bf16.mxu0 %v504_v1 }
  0x1c   : > { %435 = vmatpush3.bf16.msra.mxu0 %v475_v6 }
  0x1d   : > { %436 = vmatprep.subr.bf16.mxu0 %v504_v1 }
  0x20   : > { %437 = vmatpush3.bf16.msra.mxu0 %v476_v7 }
  0x21   : > { %438 = vmatprep.subr.bf16.mxu0 %v504_v1 }
  0x24   : > { %439 = vmatpush3.bf16.msra.mxu0 %v477_v8 }
  0x27   : > { %441 = vmatmul.mubr.bf16.vlgmr.msra.gmra.mrb[0].mxu0 %v177_v9 }
  0xfa   : > { %v276_v10 = vpop.f32.mrb[0].mxu0 }
  0xfb   : > { %v283_v11 = vsel %vm282_vm1, %v276_v10, 0.0  ;;  %v292_v12 = vmul.f32 %v276_v10, %v276_v10  ;;  %v442_v13 = vpop.f32.mrb[1].mxu0 }
  0xfc   : > { %v284_v14 = vrot.slane %v283_v11, 4  ;;  %v279_v15 = vpop.f32.mrb[2].mxu0 }
  0xfd   : > { %v293_v16 = vsel %vm282_vm1, %v292_v12, 0.0  ;;  %v443_v17 = vpop.f32.mrb[3].mxu0 }
  0xfe   : > { %v285_v18 = vadd.f32 %v284_v14, %v283_v11  ;;  %v294_v19 = vrot.slane %v293_v16, 4 }
 0x100   : > { %v286_v20 = vrot.slane %v285_v18, 2  ;;  %v295_v21 = vadd.f32 %v294_v19, %v293_v16 }
 0x102   : > { %v287_v22 = vadd.f32 %v286_v20, %v285_v18  ;;  %v296_v23 = vrot.slane %v295_v21, 2 }
 0x104   : > { %v288_v24 = vrot.slane %v287_v22, 1  ;;  %v297_v25 = vadd.f32 %v296_v23, %v295_v21 }
 0x106   : > { %v289_v26 = vadd.f32 %v288_v24, %v287_v22  ;;  %v298_v27 = vrot.slane %v297_v25, 1 }
 0x108   : > { %v291_v28 = vmul.f32 0.25, %v289_v26  ;;  %v299_v29 = vadd.f32 %v298_v27, %v297_v25 }
 0x10a   : > { %v300_v30 = vmul.f32 0.25, %v299_v29  ;;  %v301_v31 = vmul.f32 %v291_v28, %v291_v28  ;;  %v304_v35 = vsub.f32 %v276_v10, %v291_v28 }
 0x10c   : > { %v302_v32 = vsub.f32 %v300_v30, %v301_v31 }
 0x10e   : > { %v303_v33 = vmax.f32 %v302_v32, 0.0 }
 0x110   : > { %v305_v34 = vadd.f32 1e-05, %v303_v33 }
 0x112   : > { %478 = vrsqrt.f32 %v305_v34 }
 0x11c   : > { %v479_v36 = vpop.eup %478 }
 0x11d   : > { %v307_v37 = vmul.f32 %v479_v36, %v304_v35 }
 0x11f   : > { %v308_v38 = vpack.c.bf16 %v307_v37, %v307_v37 }
 0x121   : > { %309 = vst [vmem:[%s175_s7] sm:$0x3] %v308_v38 }
 0x122 PF: > { %s12_s11 = sadd.s32 1, %s502_s11   ;;  %s592_s9 = smov %s498_s10 }
 0x123   : > { %p9_p5 = scmp.ge.s32.totalorder %s12_s11, 4   ;;  %s593_s10 = smov %s595_s12 }
 0x125   :  { %11 = sbr.rel (!%p9_p5) target bundleno = 2 (0x2), region = 61 }

// kernel: forward.41
= control target key start
LH: loop header
LB: loop body
LE: loop exit
PB: predicated region body
PF: predicated region fallthrough
CT: control target
= control target key end

     0   :  { %s771_s9 = smov 0   ;;  %s773_s10 = smov 0   ;;  %s893_s0 = inlined_call_operand.vmem [shape: bf16[2,4,384], index: 0, kind: input, shape index: {}]   ;;  %s894_s1 = inlined_call_operand.vmem [shape: bf16[384,128], index: 1, kind: input, shape index: {}]   ;;  %s895_s2 = inlined_call_operand.vmem [shape: bf16[2,4,128], index: 2, kind: output, shape index: {}]  }
   0x1   :  { %s775_s11 = smov 0  }
   0x2 LB: > { %s24_s12 = sadd.s32 1, %s747_s10  ;;  %p594_p0 = scmp.ge.s32.totalorder %s751_s11, 1  ;;  %s751_s11 = sphi %s775_s11, %s12_s11   ;;  %s747_s10 = sphi %s773_s10, %s897_s10   ;;  %s743_s9 = sphi %s771_s9, %s896_s9  }
   0x3   : > { %p26_p1 = scmp.ge.s32.totalorder %s24_s12, 2  ;;  %p135_p2 = scmp.lt.s32.totalorder %s751_s11, 3 }
   0x5   : > { %s899_s12 = smov (%p26_p1, %s24_s12), 0  ;;  %p136_p3 = pnand %p594_p0, %p135_p2 }
   0x6   : > { %v702_v0 = vld [vmem:[%s894_s1 + $0x40] sm:$0xff] (!%p136_p3)   ;;  %v753_v1 = vmov (!%p136_p3), 0.0   ;;  %v705_v4 = vld [vmem:[%s894_s1 + $0x48] sm:$0xff] (!%p136_p3)   ;;  %v708_v7 = vld [vmem:[%s894_s1 + $0x50] sm:$0xff] (!%p136_p3)   ;;  %vm754_vm0 = vmmov (!%p136_p3), 0   ;;  %p163_p4 = scmp.lt.s32.totalorder (!%p136_p3), %s743_s9, 1  ;;  %v234_v20 = vlaneseq (!%p136_p3) }
   0x7   : > { %139 = sbr.rel (%p136_p3) target bundleno = 297 (0x129), region = 28  ;;  %654 = vmatprep.subr.bf16.mxu1 (!%p136_p3), %v753_v1  ;;  %v703_v2 = vld [vmem:[%s894_s1] sm:$0xff] (!%p136_p3)   ;;  %623 = vmatprep.subr.bf16.mxu0 (!%p136_p3), %v702_v0  ;;  %v706_v5 = vld [vmem:[%s894_s1 + $0x8] sm:$0xff] (!%p136_p3)   ;;  %v709_v8 = vld [vmem:[%s894_s1 + $0x10] sm:$0xff] (!%p136_p3)   ;;  %v755_v25 = vmov (!%p136_p3), 1983009808  }
   0x8   : > { %v704_v3 = vld [vmem:[%s894_s1 + $0x80] sm:$0xff] (!%p136_p3)   ;;  %624 = vmatpush3.bf16.msra.mxu0 (!%p136_p3), %v703_v2  ;;  %v707_v6 = vld [vmem:[%s894_s1 + $0x88] sm:$0xff] (!%p136_p3)   ;;  %670 = vmatprep.mubr.msk.bf16.mxu1 (!%p136_p3), %vm754_vm0, %v753_v1  ;;  %v710_v9 = vld [vmem:[%s894_s1 + $0x90] sm:$0xff] (!%p136_p3)   ;;  %v232_v26 = vunpack.c.l.s4 (!%p136_p3), %v755_v25  ;;  %v235_v27 = vshrl.u32 (!%p136_p3), %v234_v20, 7  ;;  %vm473_vm1 = vcmask (!%p136_p3), 1043456  }
   0x9   : > { %655 = vmatpush3.bf16.msra.mxu1 (!%p136_p3), %v704_v3  ;;  %625 = vmatprep.subr.bf16.mxu0 (!%p136_p3), %v705_v4  ;;  %v711_v10 = vld [vmem:[%s894_s1 + $0x58] sm:$0xff] (!%p136_p3)   ;;  %v714_v13 = vld [vmem:[%s894_s1 + $0x60] sm:$0xff] (!%p136_p3)   ;;  %v717_v16 = vld [vmem:[%s894_s1 + $0x68] sm:$0xff] (!%p136_p3)  }
   0xa   : > { %656 = vmatprep.subr.bf16.mxu1 (!%p136_p3), %v753_v1  ;;  %v712_v11 = vld [vmem:[%s894_s1 + $0x18] sm:$0xff] (!%p136_p3)   ;;  %v715_v14 = vld [vmem:[%s894_s1 + $0x20] sm:$0xff] (!%p136_p3)   ;;  %v718_v17 = vld [vmem:[%s894_s1 + $0x28] sm:$0xff] (!%p136_p3)   ;;  %v233_v30 = vunpack.c.0.s8 (!%p136_p3), %v232_v26 }
   0xb   : > { %v713_v12 = vld [vmem:[%s894_s1 + $0x98] sm:$0xff] (!%p136_p3)   ;;  %v716_v15 = vld [vmem:[%s894_s1 + $0xa0] sm:$0xff] (!%p136_p3)   ;;  %v719_v18 = vld [vmem:[%s894_s1 + $0xa8] sm:$0xff] (!%p136_p3)  }
   0xc   : > { %626 = vmatpush3.bf16.msra.mxu0 (!%p136_p3), %v706_v5  ;;  %v720_v19 = vld [vmem:[%s894_s1 + $0x70] sm:$0xff] (!%p136_p3)   ;;  %v723_v23 = vld [vmem:[%s894_s1 + $0x78] sm:$0xff] (!%p136_p3)   ;;  %v236_v32 = vsub.s32 (!%p136_p3), %v233_v30, %v235_v27 }
   0xd   : > { %657 = vmatpush3.bf16.msra.mxu1 (!%p136_p3), %v707_v6  ;;  %627 = vmatprep.subr.bf16.mxu0 (!%p136_p3), %v708_v7  ;;  %v721_v21 = vld [vmem:[%s894_s1 + $0x30] sm:$0xff] (!%p136_p3)   ;;  %v724_v28 = vld [vmem:[%s894_s1 + $0x38] sm:$0xff] (!%p136_p3)  }
   0xe   : > { %658 = vmatprep.subr.bf16.mxu1 %v753_v1  ;;  %s901_s9 = smov (!%p163_p4, %s743_s9), 1  ;;  %v722_v22 = vld [vmem:[%s894_s1 + $0xb0] sm:$0xff]   ;;  %v725_v31 = vld [vmem:[%s894_s1 + $0xb8] sm:$0xff]  }
   0xf   : > { %s674_s21 = smul.u32 6, %s901_s9  ;;  %s596_s17 = sshll.u32 %s901_s9, 1 }
  0x10   : > { %628 = vmatpush3.bf16.msra.mxu0 %v709_v8  ;;  %s178_s20 = scalar_lea.vmem %s895_s2, %s596_s17 }
  0x11   : > { %659 = vmatpush3.bf16.msra.mxu1 %v710_v9  ;;  %629 = vmatprep.subr.bf16.mxu0 %v711_v10  ;;  %s167_s30 = scalar_lea.vmem %s893_s0, %s674_s21 }
  0x12   : > { %660 = vmatprep.subr.bf16.mxu1 %v753_v1  ;;  %v180_v24 = vld [vmem:[%s167_s30] sm:$0x3f] }
  0x13   : > { %v230_v29 = vcombine.high %v180_v24, %v180_v24  ;;  %v237_v33 = vrot.slane %v180_v24, %v236_v32 }
  0x14   : > { %630 = vmatpush3.bf16.msra.mxu0 %v712_v11 }
  0x15   : > { %661 = vmatpush3.bf16.msra.mxu1 %v713_v12  ;;  %631 = vmatprep.subr.bf16.mxu0 %v714_v13  ;;  %v244_v34 = vrot.slane %v230_v29, %v236_v32  ;;  %v245_v35 = vcombine.high %v237_v33, %v237_v33 }
  0x16   : > { %662 = vmatprep.subr.bf16.mxu1 %v753_v1 }
  0x17   : > { %425 = vmatprep.mubr.bf16.mxu0 %v245_v35 }
  0x18   : > { %632 = vmatpush3.bf16.msra.mxu0 %v715_v14 }
  0x19   : > { %663 = vmatpush3.bf16.msra.mxu1 %v716_v15  ;;  %633 = vmatprep.subr.bf16.mxu0 %v717_v16 }
  0x1a   : > { %664 = vmatprep.subr.bf16.mxu1 %v753_v1 }
  0x1c   : > { %634 = vmatpush3.bf16.msra.mxu0 %v718_v17 }
  0x1d   : > { %665 = vmatpush3.bf16.msra.mxu1 %v719_v18  ;;  %635 = vmatprep.subr.bf16.mxu0 %v720_v19 }
  0x1e   : > { %666 = vmatprep.subr.bf16.mxu1 %v753_v1 }
  0x20   : > { %636 = vmatpush3.bf16.msra.mxu0 %v721_v21 }
  0x21   : > { %667 = vmatpush3.bf16.msra.mxu1 %v722_v22  ;;  %637 = vmatprep.subr.bf16.mxu0 %v723_v23 }
  0x22   : > { %668 = vmatprep.subr.bf16.mxu1 %v753_v1 }
  0x24   : > { %638 = vmatpush3.bf16.msra.mxu0 %v724_v28 }
  0x25   : > { %669 = vmatpush3.bf16.msra.mxu1 %v725_v31 }
  0x27   : > { %426 = vmatmul.mubr.bf16.vlgmr.msra.gmra.mrb[0].mxu0 %v237_v33 }
  0x28   : > { %671 = vmatmul.mubr.bf16.vlgmr.msra.gmra.mrb[0].mxu1 %v244_v34 }
  0xfa   : > { %v639_v37 = vpop.f32.mrb[0].mxu0 }
  0xfb   : > { %v467_v36 = vpop.f32.mrb[0].mxu1  ;;  %v640_v39 = vpop.f32.mrb[1].mxu0 }
  0xfc   : > { %v672_v38 = vpop.f32.mrb[1].mxu1  ;;  %v641_v41 = vadd.f32 %v640_v39, %v639_v37  ;;  %v642_v42 = vpop.f32.mrb[2].mxu0 }
  0xfd   : > { %v470_v40 = vpop.f32.mrb[2].mxu1  ;;  %v643_v44 = vpop.f32.mrb[3].mxu0 }
  0xfe   : > { %v673_v43 = vpop.f32.mrb[3].mxu1  ;;  %v468_v45 = vadd.f32 %v641_v41, %v467_v36 }
 0x100   : > { %v474_v46 = vsel %vm473_vm1, %v468_v45, 0.0  ;;  %v483_v47 = vmul.f32 %v468_v45, %v468_v45 }
 0x101   : > { %v475_v48 = vrot.slane %v474_v46, 4 }
 0x102   : > { %v484_v49 = vsel %vm473_vm1, %v483_v47, 0.0 }
 0x103   : > { %v476_v50 = vadd.f32 %v475_v48, %v474_v46  ;;  %v485_v51 = vrot.slane %v484_v49, 4 }
 0x105   : > { %v477_v52 = vrot.slane %v476_v50, 2  ;;  %v486_v53 = vadd.f32 %v485_v51, %v484_v49 }
 0x107   : > { %v478_v54 = vadd.f32 %v477_v52, %v476_v50  ;;  %v487_v55 = vrot.slane %v486_v53, 2 }
 0x109   : > { %v479_v56 = vrot.slane %v478_v54, 1  ;;  %v488_v57 = vadd.f32 %v487_v55, %v486_v53 }
 0x10b   : > { %v480_v58 = vadd.f32 %v479_v56, %v478_v54  ;;  %v489_v59 = vrot.slane %v488_v57, 1 }
 0x10d   : > { %v482_v60 = vmul.f32 0.25, %v480_v58  ;;  %v490_v61 = vadd.f32 %v489_v59, %v488_v57 }
 0x10f   : > { %v491_v62 = vmul.f32 0.25, %v490_v61  ;;  %v492_v63 = vmul.f32 %v482_v60, %v482_v60  ;;  %v495_v3 = vsub.f32 %v468_v45, %v482_v60 }
 0x111   : > { %v493_v0 = vsub.f32 %v491_v62, %v492_v63 }
 0x113   : > { %v494_v1 = vmax.f32 %v493_v0, 0.0 }
 0x115   : > { %v496_v2 = vadd.f32 1e-05, %v494_v1 }
 0x117   : > { %727 = vrsqrt.f32 %v496_v2 }
 0x121   : > { %v728_v4 = vpop.eup %727 }
 0x122   : > { %v498_v5 = vmul.f32 %v728_v4, %v495_v3 }
 0x124   : > { %v499_v6 = vmax.f32 %v498_v5, 0.0 }
 0x126   : > { %v500_v7 = vpack.c.bf16 %v499_v6, %v499_v6 }
 0x128   : > { %501 = vst [vmem:[%s178_s20] sm:$0x3] %v500_v7 }
 0x129 PF: > { %s12_s11 = sadd.s32 1, %s751_s11   ;;  %s896_s9 = smov %s747_s10 }
 0x12a   : > { %p9_p5 = scmp.ge.s32.totalorder %s12_s11, 4   ;;  %s897_s10 = smov %s899_s12 }
 0x12c   :  { %11 = sbr.rel (!%p9_p5) target bundleno = 2 (0x2), region = 61 }

// kernel: forward.38
= control target key start
LH: loop header
LB: loop body
LE: loop exit
PB: predicated region body
PF: predicated region fallthrough
CT: control target
= control target key end

     0   :  { %s608_s9 = smov 0   ;;  %s610_s10 = smov 0   ;;  %s693_s0 = inlined_call_operand.vmem [shape: bf16[2,4,256], index: 0, kind: input, shape index: {}]   ;;  %s694_s1 = inlined_call_operand.vmem [shape: bf16[256,128], index: 1, kind: input, shape index: {}]   ;;  %s695_s2 = inlined_call_operand.vmem [shape: bf16[2,4,128], index: 2, kind: output, shape index: {}]  }
   0x1   :  { %s612_s11 = smov 0  }
   0x2 LB: > { %s24_s12 = sadd.s32 1, %s587_s10  ;;  %p481_p0 = scmp.ge.s32.totalorder %s591_s11, 1  ;;  %s591_s11 = sphi %s612_s11, %s12_s11   ;;  %s587_s10 = sphi %s610_s10, %s697_s10   ;;  %s583_s9 = sphi %s608_s9, %s696_s9  }
   0x3   : > { %p26_p1 = scmp.ge.s32.totalorder %s24_s12, 2  ;;  %p135_p2 = scmp.lt.s32.totalorder %s591_s11, 3 }
   0x5   : > { %s699_s12 = smov (%p26_p1, %s24_s12), 0  ;;  %p136_p3 = pnand %p481_p0, %p135_p2 }
   0x6   : > { %v551_v0 = vld [vmem:[%s694_s1 + $0x40] sm:$0xff] (!%p136_p3)   ;;  %v553_v2 = vld [vmem:[%s694_s1 + $0x48] sm:$0xff] (!%p136_p3)   ;;  %p163_p4 = scmp.lt.s32.totalorder (!%p136_p3), %s583_s9, 1  ;;  %v555_v4 = vld [vmem:[%s694_s1 + $0x50] sm:$0xff] (!%p136_p3)   ;;  %vm360_vm0 = vcmask (!%p136_p3), 1043456  }
   0x7   : > { %139 = sbr.rel (%p136_p3) target bundleno = 295 (0x127), region = 28  ;;  %v552_v1 = vld [vmem:[%s694_s1] sm:$0xff] (!%p136_p3)   ;;  %505 = vmatprep.subr.bf16.mxu0 (!%p136_p3), %v551_v0  ;;  %v554_v3 = vld [vmem:[%s694_s1 + $0x8] sm:$0xff] (!%p136_p3)   ;;  %v556_v5 = vld [vmem:[%s694_s1 + $0x10] sm:$0xff] (!%p136_p3)  }
   0x8   : > { %506 = vmatpush3.bf16.msra.mxu0 (!%p136_p3), %v552_v1  ;;  %v557_v6 = vld [vmem:[%s694_s1 + $0x58] sm:$0xff] (!%p136_p3)   ;;  %v559_v8 = vld [vmem:[%s694_s1 + $0x60] sm:$0xff] (!%p136_p3)   ;;  %v561_v10 = vld [vmem:[%s694_s1 + $0x68] sm:$0xff] (!%p136_p3)  }
   0x9   : > { %507 = vmatprep.subr.bf16.mxu0 (!%p136_p3), %v553_v2  ;;  %v558_v7 = vld [vmem:[%s694_s1 + $0x18] sm:$0xff] (!%p136_p3)   ;;  %v560_v9 = vld [vmem:[%s694_s1 + $0x20] sm:$0xff] (!%p136_p3)   ;;  %v562_v13 = vld [vmem:[%s694_s1 + $0x28] sm:$0xff] (!%p136_p3)  }
   0xa   : > { %v563_v14 = vld [vmem:[%s694_s1 + $0x70] sm:$0xff] (!%p136_p3)   ;;  %v565_v16 = vld [vmem:[%s694_s1 + $0x78] sm:$0xff] (!%p136_p3)  }
   0xb   : > { %v564_v15 = vld [vmem:[%s694_s1 + $0x30] sm:$0xff] (!%p136_p3)   ;;  %v566_v17 = vld [vmem:[%s694_s1 + $0x38] sm:$0xff] (!%p136_p3)  }
   0xc   : > { %508 = vmatpush3.bf16.msra.mxu0 (!%p136_p3), %v554_v3 }
   0xd   : > { %509 = vmatprep.subr.bf16.mxu0 (!%p136_p3), %v555_v4 }
   0xe   : > { %s701_s9 = smov (!%p163_p4, %s583_s9), 1 }
   0xf   : > { %s504_s27 = sshll.u32 %s701_s9, 2  ;;  %s484_s25 = sshll.u32 %s701_s9, 1 }
  0x10   : > { %510 = vmatpush3.bf16.msra.mxu0 %v556_v5  ;;  %s167_s6 = scalar_lea.vmem %s693_s0, %s504_s27  ;;  %s178_s28 = scalar_lea.vmem %s695_s2, %s484_s25 }
  0x11   : > { %511 = vmatprep.subr.bf16.mxu0 %v557_v6  ;;  %v485_v11 = vld.sshfl [vmem:[%s167_s6] sm:$0x33 pattern:$0x76325410] }
  0x12   : > { %v221_v12 = vcombine.high %v485_v11, %v485_v11 }
  0x14   : > { %512 = vmatpush3.bf16.msra.mxu0 %v558_v7  ;;  %352 = vmatprep.mubr.bf16.mxu0 %v221_v12 }
  0x15   : > { %513 = vmatprep.subr.bf16.mxu0 %v559_v8 }
  0x18   : > { %514 = vmatpush3.bf16.msra.mxu0 %v560_v9 }
  0x19   : > { %515 = vmatprep.subr.bf16.mxu0 %v561_v10 }
  0x1c   : > { %516 = vmatpush3.bf16.msra.mxu0 %v562_v13 }
  0x1d   : > { %517 = vmatprep.subr.bf16.mxu0 %v563_v14 }
  0x20   : > { %518 = vmatpush3.bf16.msra.mxu0 %v564_v15 }
  0x21   : > { %519 = vmatprep.subr.bf16.mxu0 %v565_v16 }
  0x24   : > { %520 = vmatpush3.bf16.msra.mxu0 %v566_v17 }
  0x27   : > { %353 = vmatmul.mubr.bf16.vlgmr.msra.gmra.mrb[0].mxu0 %v485_v11 }
  0xfa   : > { %v521_v18 = vpop.f32.mrb[0].mxu0 }
  0xfb   : > { %v522_v19 = vpop.f32.mrb[1].mxu0 }
  0xfc   : > { %v523_v20 = vadd.f32 %v522_v19, %v521_v18  ;;  %v524_v21 = vpop.f32.mrb[2].mxu0 }
  0xfd   : > { %v525_v22 = vpop.f32.mrb[3].mxu0 }
  0xfe   : > { %v361_v23 = vsel %vm360_vm0, %v523_v20, 0.0  ;;  %v370_v24 = vmul.f32 %v523_v20, %v523_v20 }
  0xff   : > { %v362_v25 = vrot.slane %v361_v23, 4 }
 0x100   : > { %v371_v26 = vsel %vm360_vm0, %v370_v24, 0.0 }
 0x101   : > { %v363_v27 = vadd.f32 %v362_v25, %v361_v23  ;;  %v372_v28 = vrot.slane %v371_v26, 4 }
 0x103   : > { %v364_v29 = vrot.slane %v363_v27, 2  ;;  %v373_v30 = vadd.f32 %v372_v28, %v371_v26 }
 0x105   : > { %v365_v31 = vadd.f32 %v364_v29, %v363_v27  ;;  %v374_v32 = vrot.slane %v373_v30, 2 }
 0x107   : > { %v366_v33 = vrot.slane %v365_v31, 1  ;;  %v375_v34 = vadd.f32 %v374_v32, %v373_v30 }
 0x109   : > { %v367_v35 = vadd.f32 %v366_v33, %v365_v31  ;;  %v376_v36 = vrot.slane %v375_v34, 1 }
 0x10b   : > { %v369_v37 = vmul.f32 0.25, %v367_v35  ;;  %v377_v38 = vadd.f32 %v376_v36, %v375_v34 }
 0x10d   : > { %v378_v39 = vmul.f32 0.25, %v377_v38  ;;  %v379_v40 = vmul.f32 %v369_v37, %v369_v37  ;;  %v382_v44 = vsub.f32 %v523_v20, %v369_v37 }
 0x10f   : > { %v380_v41 = vsub.f32 %v378_v39, %v379_v40 }
 0x111   : > { %v381_v42 = vmax.f32 %v380_v41, 0.0 }
 0x113   : > { %v383_v43 = vadd.f32 1e-05, %v381_v42 }
 0x115   : > { %567 = vrsqrt.f32 %v383_v43 }
 0x11f   : > { %v568_v45 = vpop.eup %567 }
 0x120   : > { %v385_v46 = vmul.f32 %v568_v45, %v382_v44 }
 0x122   : > { %v386_v47 = vmax.f32 %v385_v46, 0.0 }
 0x124   : > { %v387_v48 = vpack.c.bf16 %v386_v47, %v386_v47 }
 0x126   : > { %388 = vst [vmem:[%s178_s28] sm:$0x3] %v387_v48 }
 0x127 PF: > { %s12_s11 = sadd.s32 1, %s591_s11   ;;  %s696_s9 = smov %s587_s10 }
 0x128   : > { %p9_p5 = scmp.ge.s32.totalorder %s12_s11, 4   ;;  %s697_s10 = smov %s699_s12 }
 0x12a   :  { %11 = sbr.rel (!%p9_p5) target bundleno = 2 (0x2), region = 61 }

// kernel: forward.40
= control target key start
LH: loop header
LB: loop body
LE: loop exit
PB: predicated region body
PF: predicated region fallthrough
CT: control target
= control target key end

     0   :  { %s850_s12 = smov 0   ;;  %s852_s13 = smov 0   ;;  %s975_s0 = inlined_call_operand.vmem [shape: bf16[2,4,384], index: 0, kind: input, shape index: {}]   ;;  %s976_s1 = inlined_call_operand.vmem [shape: bf16[384,128], index: 1, kind: input, shape index: {}]   ;;  %s977_s2 = inlined_call_operand.vmem [shape: bf16[2,4,128], index: 2, kind: input, shape index: {}]   ;;  %s978_s3 = inlined_call_operand.vmem [shape: bf16[2,4,128], index: 3, kind: output, shape index: {}]  }
   0x1   :  { %s854_s14 = smov 0  }
   0x2 LB: > { %s25_s15 = sadd.s32 1, %s821_s13  ;;  %p667_p0 = scmp.ge.s32.totalorder %s825_s14, 1  ;;  %s825_s14 = sphi %s854_s14, %s13_s14   ;;  %s821_s13 = sphi %s852_s13, %s980_s13   ;;  %s817_s12 = sphi %s850_s12, %s979_s12  }
   0x3   : > { %p27_p1 = scmp.ge.s32.totalorder %s25_s15, 2  ;;  %p174_p2 = scmp.lt.s32.totalorder %s825_s14, 3 }
   0x5   : > { %s982_s15 = smov (%p27_p1, %s25_s15), 0  ;;  %p175_p3 = pnand %p667_p0, %p174_p2 }
   0x6   : > { %v776_v0 = vld [vmem:[%s976_s1 + $0x40] sm:$0xff] (!%p175_p3)   ;;  %v827_v1 = vmov (!%p175_p3), 0.0   ;;  %v779_v4 = vld [vmem:[%s976_s1 + $0x48] sm:$0xff] (!%p175_p3)   ;;  %v782_v7 = vld [vmem:[%s976_s1 + $0x50] sm:$0xff] (!%p175_p3)   ;;  %vm828_vm0 = vmmov (!%p175_p3), 0   ;;  %p211_p4 = scmp.lt.s32.totalorder (!%p175_p3), %s817_s12, 1  ;;  %v289_v20 = vlaneseq (!%p175_p3) }
   0x7   : > { %178 = sbr.rel (%p175_p3) target bundleno = 299 (0x12b), region = 32  ;;  %728 = vmatprep.subr.bf16.mxu1 (!%p175_p3), %v827_v1  ;;  %v777_v2 = vld [vmem:[%s976_s1] sm:$0xff] (!%p175_p3)   ;;  %697 = vmatprep.subr.bf16.mxu0 (!%p175_p3), %v776_v0  ;;  %v780_v5 = vld [vmem:[%s976_s1 + $0x8] sm:$0xff] (!%p175_p3)   ;;  %v783_v8 = vld [vmem:[%s976_s1 + $0x10] sm:$0xff] (!%p175_p3)   ;;  %v829_v25 = vmov (!%p175_p3), 1983009808  }
   0x8   : > { %v778_v3 = vld [vmem:[%s976_s1 + $0x80] sm:$0xff] (!%p175_p3)   ;;  %698 = vmatpush3.bf16.msra.mxu0 (!%p175_p3), %v777_v2  ;;  %v781_v6 = vld [vmem:[%s976_s1 + $0x88] sm:$0xff] (!%p175_p3)   ;;  %744 = vmatprep.mubr.msk.bf16.mxu1 (!%p175_p3), %vm828_vm0, %v827_v1  ;;  %v784_v9 = vld [vmem:[%s976_s1 + $0x90] sm:$0xff] (!%p175_p3)   ;;  %v287_v26 = vunpack.c.l.s4 (!%p175_p3), %v829_v25  ;;  %v290_v27 = vshrl.u32 (!%p175_p3), %v289_v20, 7  ;;  %vm528_vm1 = vcmask (!%p175_p3), 1043456  }
   0x9   : > { %729 = vmatpush3.bf16.msra.mxu1 (!%p175_p3), %v778_v3  ;;  %699 = vmatprep.subr.bf16.mxu0 (!%p175_p3), %v779_v4  ;;  %v785_v10 = vld [vmem:[%s976_s1 + $0x58] sm:$0xff] (!%p175_p3)   ;;  %v788_v13 = vld [vmem:[%s976_s1 + $0x60] sm:$0xff] (!%p175_p3)   ;;  %v791_v16 = vld [vmem:[%s976_s1 + $0x68] sm:$0xff] (!%p175_p3)  }
   0xa   : > { %730 = vmatprep.subr.bf16.mxu1 (!%p175_p3), %v827_v1  ;;  %v786_v11 = vld [vmem:[%s976_s1 + $0x18] sm:$0xff] (!%p175_p3)   ;;  %v789_v14 = vld [vmem:[%s976_s1 + $0x20] sm:$0xff] (!%p175_p3)   ;;  %v792_v17 = vld [vmem:[%s976_s1 + $0x28] sm:$0xff] (!%p175_p3)   ;;  %v288_v30 = vunpack.c.0.s8 (!%p175_p3), %v287_v26 }
   0xb   : > { %v787_v12 = vld [vmem:[%s976_s1 + $0x98] sm:$0xff] (!%p175_p3)   ;;  %v790_v15 = vld [vmem:[%s976_s1 + $0xa0] sm:$0xff] (!%p175_p3)   ;;  %v793_v18 = vld [vmem:[%s976_s1 + $0xa8] sm:$0xff] (!%p175_p3)  }
   0xc   : > { %700 = vmatpush3.bf16.msra.mxu0 (!%p175_p3), %v780_v5  ;;  %v794_v19 = vld [vmem:[%s976_s1 + $0x70] sm:$0xff] (!%p175_p3)   ;;  %v797_v23 = vld [vmem:[%s976_s1 + $0x78] sm:$0xff] (!%p175_p3)   ;;  %v291_v32 = vsub.s32 (!%p175_p3), %v288_v30, %v290_v27 }
   0xd   : > { %731 = vmatpush3.bf16.msra.mxu1 (!%p175_p3), %v781_v6  ;;  %701 = vmatprep.subr.bf16.mxu0 (!%p175_p3), %v782_v7  ;;  %v795_v21 = vld [vmem:[%s976_s1 + $0x30] sm:$0xff] (!%p175_p3)   ;;  %v798_v28 = vld [vmem:[%s976_s1 + $0x38] sm:$0xff] (!%p175_p3)  }
   0xe   : > { %732 = vmatprep.subr.bf16.mxu1 %v827_v1  ;;  %s984_s12 = smov (!%p211_p4, %s817_s12), 1  ;;  %v796_v22 = vld [vmem:[%s976_s1 + $0xb0] sm:$0xff]   ;;  %v799_v31 = vld [vmem:[%s976_s1 + $0xb8] sm:$0xff]  }
   0xf   : > { %s748_s25 = smul.u32 6, %s984_s12  ;;  %s669_s22 = sshll.u32 %s984_s12, 1 }
  0x10   : > { %702 = vmatpush3.bf16.msra.mxu0 %v783_v8  ;;  %s233_s28 = scalar_lea.vmem %s978_s3, %s669_s22 }
  0x11   : > { %733 = vmatpush3.bf16.msra.mxu1 %v784_v9  ;;  %703 = vmatprep.subr.bf16.mxu0 %v785_v10  ;;  %s215_s7 = scalar_lea.vmem %s975_s0, %s748_s25  ;;  %s226_s25 = scalar_lea.vmem %s977_s2, %s669_s22 }
  0x12   : > { %734 = vmatprep.subr.bf16.mxu1 %v827_v1  ;;  %v235_v24 = vld [vmem:[%s215_s7] sm:$0x3f] }
  0x13   : > { %v285_v29 = vcombine.high %v235_v24, %v235_v24  ;;  %v292_v33 = vrot.slane %v235_v24, %v291_v32  ;;  %v554_v3 = vld [vmem:[%s226_s25] sm:$0x3] }
  0x14   : > { %704 = vmatpush3.bf16.msra.mxu0 %v786_v11  ;;  %v555_v4 = vunpack.c.l.bf16 %v554_v3 }
  0x15   : > { %735 = vmatpush3.bf16.msra.mxu1 %v787_v12  ;;  %705 = vmatprep.subr.bf16.mxu0 %v788_v13  ;;  %v299_v34 = vrot.slane %v285_v29, %v291_v32  ;;  %v300_v35 = vcombine.high %v292_v33, %v292_v33 }
  0x16   : > { %736 = vmatprep.subr.bf16.mxu1 %v827_v1 }
  0x17   : > { %480 = vmatprep.mubr.bf16.mxu0 %v300_v35 }
  0x18   : > { %706 = vmatpush3.bf16.msra.mxu0 %v789_v14 }
  0x19   : > { %737 = vmatpush3.bf16.msra.mxu1 %v790_v15  ;;  %707 = vmatprep.subr.bf16.mxu0 %v791_v16 }
  0x1a   : > { %738 = vmatprep.subr.bf16.mxu1 %v827_v1 }
  0x1c   : > { %708 = vmatpush3.bf16.msra.mxu0 %v792_v17 }
  0x1d   : > { %739 = vmatpush3.bf16.msra.mxu1 %v793_v18  ;;  %709 = vmatprep.subr.bf16.mxu0 %v794_v19 }
  0x1e   : > { %740 = vmatprep.subr.bf16.mxu1 %v827_v1 }
  0x20   : > { %710 = vmatpush3.bf16.msra.mxu0 %v795_v21 }
  0x21   : > { %741 = vmatpush3.bf16.msra.mxu1 %v796_v22  ;;  %711 = vmatprep.subr.bf16.mxu0 %v797_v23 }
  0x22   : > { %742 = vmatprep.subr.bf16.mxu1 %v827_v1 }
  0x24   : > { %712 = vmatpush3.bf16.msra.mxu0 %v798_v28 }
  0x25   : > { %743 = vmatpush3.bf16.msra.mxu1 %v799_v31 }
  0x27   : > { %481 = vmatmul.mubr.bf16.vlgmr.msra.gmra.mrb[0].mxu0 %v292_v33 }
  0x28   : > { %745 = vmatmul.mubr.bf16.vlgmr.msra.gmra.mrb[0].mxu1 %v299_v34 }
  0xfa   : > { %v713_v37 = vpop.f32.mrb[0].mxu0 }
  0xfb   : > { %v522_v36 = vpop.f32.mrb[0].mxu1  ;;  %v714_v39 = vpop.f32.mrb[1].mxu0 }
  0xfc   : > { %v746_v38 = vpop.f32.mrb[1].mxu1  ;;  %v715_v41 = vadd.f32 %v714_v39, %v713_v37  ;;  %v716_v42 = vpop.f32.mrb[2].mxu0 }
  0xfd   : > { %v525_v40 = vpop.f32.mrb[2].mxu1  ;;  %v717_v44 = vpop.f32.mrb[3].mxu0 }
  0xfe   : > { %v747_v43 = vpop.f32.mrb[3].mxu1  ;;  %v523_v45 = vadd.f32 %v715_v41, %v522_v36 }
 0x100   : > { %v529_v46 = vsel %vm528_vm1, %v523_v45, 0.0  ;;  %v538_v47 = vmul.f32 %v523_v45, %v523_v45 }
 0x101   : > { %v530_v48 = vrot.slane %v529_v46, 4 }
 0x102   : > { %v539_v49 = vsel %vm528_vm1, %v538_v47, 0.0 }
 0x103   : > { %v531_v50 = vadd.f32 %v530_v48, %v529_v46  ;;  %v540_v51 = vrot.slane %v539_v49, 4 }
 0x105   : > { %v532_v52 = vrot.slane %v531_v50, 2  ;;  %v541_v53 = vadd.f32 %v540_v51, %v539_v49 }
 0x107   : > { %v533_v54 = vadd.f32 %v532_v52, %v531_v50  ;;  %v542_v55 = vrot.slane %v541_v53, 2 }
 0x109   : > { %v534_v56 = vrot.slane %v533_v54, 1  ;;  %v543_v57 = vadd.f32 %v542_v55, %v541_v53 }
 0x10b   : > { %v535_v58 = vadd.f32 %v534_v56, %v533_v54  ;;  %v544_v59 = vrot.slane %v543_v57, 1 }
 0x10d   : > { %v537_v60 = vmul.f32 0.25, %v535_v58  ;;  %v545_v61 = vadd.f32 %v544_v59, %v543_v57 }
 0x10f   : > { %v546_v62 = vmul.f32 0.25, %v545_v61  ;;  %v547_v63 = vmul.f32 %v537_v60, %v537_v60  ;;  %v550_v5 = vsub.f32 %v523_v45, %v537_v60 }
 0x111   : > { %v548_v0 = vsub.f32 %v546_v62, %v547_v63 }
 0x113   : > { %v549_v1 = vmax.f32 %v548_v0, 0.0 }
 0x115   : > { %v551_v2 = vadd.f32 1e-05, %v549_v1 }
 0x117   : > { %801 = vrsqrt.f32 %v551_v2 }
 0x121   : > { %v802_v6 = vpop.eup %801 }
 0x122   : > { %v553_v7 = vmul.f32 %v802_v6, %v550_v5 }
 0x124   : > { %v556_v8 = vadd.f32 %v555_v4, %v553_v7 }
 0x126   : > { %v557_v9 = vmax.f32 %v556_v8, 0.0 }
 0x128   : > { %v558_v10 = vpack.c.bf16 %v557_v9, %v557_v9 }
 0x12a   : > { %559 = vst [vmem:[%s233_s28] sm:$0x3] %v558_v10 }
 0x12b PF: > { %s13_s14 = sadd.s32 1, %s825_s14   ;;  %s979_s12 = smov %s821_s13 }
 0x12c   : > { %p10_p5 = scmp.ge.s32.totalorder %s13_s14, 4   ;;  %s980_s13 = smov %s982_s15 }
 0x12e   :  { %12 = sbr.rel (!%p10_p5) target bundleno = 2 (0x2), region = 68 }

// kernel: forward.43
= control target key start
LH: loop header
LB: loop body
LE: loop exit
PB: predicated region body
PF: predicated region fallthrough
CT: control target
= control target key end

     0   :  { %10 = vsyncpa [#allocation3], 0  ;;  %v294_v1 = vmov 0.0   ;;  %vm295_vm0 = vmmov 0   ;;  %vm23_vm1 = vcmask 1043456   ;;  %s380_s0 = inlined_call_operand.vmem [shape: bf16[2,4,128], index: 0, kind: input, shape index: {}]   ;;  %s381_s1 = inlined_call_operand.vmem [shape: bf16[128,128], index: 1, kind: input, shape index: {}]   ;;  %s382_s2 = inlined_call_operand.vmem [shape: f32[1,128], index: 2, kind: input, shape index: {}]   ;;  %s383_s3 = inlined_call_operand.hbm [shape: f32[2,128], index: 3, kind: output, shape index: {0}]   ;;  %s384_s4 = inlined_call_operand.hbm [shape: f32[2,128], index: 4, kind: output, shape index: {1}]  }
   0x1   :  { %v238_v0 = vld [vmem:[%s381_s1] sm:$0xff]   ;;  %214 = vmatprep.subr.bf16.mxu0 %v294_v1  ;;  %v239_v2 = vld [vmem:[%s381_s1 + $0x8] sm:$0xff]   ;;  %230 = vmatprep.mubr.msk.bf16.mxu0 %vm295_vm0, %v294_v1  ;;  %v240_v3 = vld [vmem:[%s381_s1 + $0x10] sm:$0xff]  }
   0x2   :  { %215 = vmatpush3.bf16.msra.mxu0 %v238_v0  ;;  %v19_v4 = vld [vmem:[%s380_s0] sm:$0x3]  ;;  %v20_v5 = vld [vmem:[%s380_s0 + $0x2] sm:$0x3] }
   0x3   :  { %216 = vmatprep.subr.bf16.mxu0 %v294_v1  ;;  %v21_v6 = vunpack.c.l.bf16 %v19_v4  ;;  %v22_v7 = vunpack.c.l.bf16 %v20_v5 }
   0x6   :  { %217 = vmatpush3.bf16.msra.mxu0 %v239_v2 }
   0x7   :  { %218 = vmatprep.subr.bf16.mxu0 %v294_v1 }
   0x8   :  { %11 = vsyncpa [#allocation5], 0  ;;  %v241_v8 = vld [vmem:[%s381_s1 + $0x18] sm:$0xff]   ;;  %v24_v9 = vsel %vm23_vm1, %v21_v6, 0.0  ;;  %v31_v10 = vsel %vm23_vm1, %v22_v7, 0.0  ;;  %v242_v13 = vld [vmem:[%s381_s1 + $0x20] sm:$0xff]  }
   0x9   :  { %v25_v11 = vrot.slane %v24_v9, 4  ;;  %v32_v12 = vrot.slane %v31_v10, 4  ;;  %v243_v18 = vld [vmem:[%s381_s1 + $0x28] sm:$0xff]   ;;  %v244_v23 = vld [vmem:[%s381_s1 + $0x30] sm:$0xff]   ;;  %v245_v28 = vld [vmem:[%s381_s1 + $0x38] sm:$0xff]   ;;  %vm43_vm2 = vcmask 1041409  }
   0xa   :  { %219 = vmatpush3.bf16.msra.mxu0 %v240_v3  ;;  %s296_s8 = smov [#allocation2]  }
   0xb   :  { %220 = vmatprep.subr.bf16.mxu0 %v294_v1  ;;  %v26_v14 = vadd.f32 %v25_v11, %v24_v9  ;;  %v33_v15 = vadd.f32 %v32_v12, %v31_v10  ;;  %s174_s9 = sshll.u32 %s296_s8, 4  ;;  %s175_s9 = int_to_ptr.vmem [resolvable:$true] %s174_s9 }
   0xc   :  { %s246_s10 = scalar_lea.vmem %s175_s9, 32  ;;  %p251_p1 = scmp.lt.s32.totalorder %s175_s9, %s175_s9 }
   0xd   :  { %v27_v16 = vrot.slane %v26_v14, 2  ;;  %v34_v17 = vrot.slane %v33_v15, 2  ;;  %p247_p0 = scmp.ne.s32.totalorder %s175_s9, %s246_s10  ;;  %p252_p2 = scmp.lt.s32.totalorder %s246_s10, %s246_s10 }
   0xe   :  { %221 = vmatpush3.bf16.msra.mxu0 %v241_v8 }
   0xf   :  { %222 = vmatprep.subr.bf16.mxu0 %v294_v1  ;;  %v28_v19 = vadd.f32 %v27_v16, %v26_v14  ;;  %v35_v20 = vadd.f32 %v34_v17, %v33_v15  ;;  %p253_p3 = por %p252_p2, %p251_p1 }
  0x11   :  { %v29_v21 = vrot.slane %v28_v19, 1  ;;  %v36_v22 = vrot.slane %v35_v20, 1  ;;  %p254_p4 = pnand %p253_p3, %p247_p0 }
  0x12   :  { %223 = vmatpush3.bf16.msra.mxu0 %v242_v13 }
  0x13   :  { %224 = vmatprep.subr.bf16.mxu0 %v294_v1  ;;  %v30_v24 = vadd.f32 %v29_v21, %v28_v19  ;;  %v37_v25 = vadd.f32 %v36_v22, %v35_v20 }
  0x15   :  { %v39_v26 = vmul.f32 0.25, %v30_v24  ;;  %v40_v27 = vmul.f32 0.25, %v37_v25 }
  0x16   :  { %225 = vmatpush3.bf16.msra.mxu0 %v243_v18 }
  0x17   :  { %226 = vmatprep.subr.bf16.mxu0 %v294_v1  ;;  %v47_v29 = vpack.c.bf16 %v39_v26, %v39_v26  ;;  %v48_v30 = vpack.c.bf16 %v40_v27, %v40_v27  ;;  %v44_v35 = vsel %vm43_vm2, %v40_v27, %v39_v26 }
  0x18   :  { %46 = vst [vmem:[#allocation2] sm:$0x3] %v44_v35 }
  0x19   :  { %v74_v31 = vunpack.c.l.b16 %v47_v29  ;;  %v75_v32 = vunpack.c.l.b16 %v48_v30 }
  0x1a   :  { %227 = vmatpush3.bf16.msra.mxu0 %v244_v23 }
  0x1b   :  { %228 = vmatprep.subr.bf16.mxu0 %v294_v1  ;;  %v76_v33 = vsel %vm43_vm2, %v75_v32, %v74_v31 }
  0x1c   :  { %v77_v34 = vpack.c.b16 %v76_v33, %v76_v33 }
  0x1e   :  { %229 = vmatpush3.bf16.msra.mxu0 %v245_v28 }
  0x21   :  { %231 = vmatmul.mubr.bf16.vlgmr.msra.gmra.mrb[0].mxu0 %v77_v34 }
  0x22   :  { %257 = shalt.err (!%p254_p4)
}
  0x23   :  { %s258_s12 = scalar_lea.hbm %s383_s3, 32 }
  0x24   :  { %p259_p5 = scmp.ne.s32.totalorder %s383_s3, %s258_s12  ;;  %p262_p6 = scmp.lt.u32.totalorder %s258_s12, %s383_s3 }
  0x26   :  { %p264_p7 = pnand %p262_p6, %p259_p5 }
  0x28   :  { %267 = shalt.err (!%p264_p7)
}
  0x29   :  { %177 = dma.vmem_to_hbm [thread:$0]  %s175_s9, 32, %s383_s3, [#allocation3]   ;;  %v196_v36 = vld [vmem:[%s382_s2] ss:$0 sm:$0xff] }
  0x2a   :  { %s297_s21 = smov [#allocation4]  }
  0x2b   :  { %s184_s22 = sshll.u32 %s297_s21, 4  ;;  %s185_s22 = int_to_ptr.vmem [resolvable:$true] %s184_s22 }
  0x2c   :  { %s268_s23 = scalar_lea.vmem %s185_s22, 32  ;;  %p273_p9 = scmp.lt.s32.totalorder %s185_s22, %s185_s22 }
  0x2d   :  { %p269_p8 = scmp.ne.s32.totalorder %s185_s22, %s268_s23  ;;  %p274_p10 = scmp.lt.s32.totalorder %s268_s23, %s268_s23 }
  0x2f   :  { %p275_p11 = por %p274_p10, %p273_p9 }
  0x31   :  { %p276_p12 = pnand %p275_p11, %p269_p8 }
  0xf4   :  { %v161_v37 = vpop.f32.mrb[0].mxu0 }
  0xf5   :  { %v162_v38 = vadd.f32 %v196_v36, %v161_v37  ;;  %v232_v39 = vpop.f32.mrb[1].mxu0 }
  0xf6   :  { %v164_v40 = vpop.f32.mrb[2].mxu0 }
  0xf7   :  { %167 = vst [vmem:[#allocation4] sm:$0x3] %v162_v38  ;;  %v233_v41 = vpop.f32.mrb[3].mxu0 }
  0xf8   :  { %279 = shalt.err (!%p276_p12)
}
  0xf9   :  { %s280_s2 = scalar_lea.hbm %s384_s4, 32 }
  0xfa   :  { %p281_p13 = scmp.ne.s32.totalorder %s384_s4, %s280_s2  ;;  %p284_p0 = scmp.lt.u32.totalorder %s280_s2, %s384_s4 }
  0xfc   :  { %p286_p1 = pnand %p284_p0, %p281_p13 }
  0xfe   :  { %289 = shalt.err (!%p286_p1)
}
  0xff   :  { %187 = dma.vmem_to_hbm [thread:$0]  %s185_s22, 32, %s384_s4, [#allocation5]  }
 0x100   :  { %290 = dma.done.wait [#allocation3], 32  }
 0x101   :  { %291 = vsyncadd [#allocation3], 4294967264 }
 0x102   :  { %292 = dma.done.wait [#allocation5], 32  }
 0x103   :  { %293 = vsyncadd [#allocation5], 4294967264 }
 0x104   :  { %194 = vsyncpa [#allocation3], 1 }
 0x105   :  { %195 = vsyncpa [#allocation5], 1 }

</bundles_post_ra>
